<compile_context>
chip_gen: v6e
topology: v6e:2x2x1
jax: 0.10.0
libtpu: 0.0.40
codegen_flags: <defaults>
</compile_context>

<pallas_src>
import functools

import jax
import jax.numpy as jnp
from jax import lax
from jax.experimental import pallas as pl
from jax.experimental.pallas import tpu as pltpu

BN_EPS = 1e-5


# ----------------------------- Pallas kernels ------------------------------

def _global_head_kernel(feats_ref, wg_ref, b_ref, o_ref):
    """relu + 7x7 mean pool (sublane reduce, channels on lanes) + gout @ Wg + bias."""
    x = jnp.maximum(feats_ref[...], 0.0)                  # (B, 49, 2208)
    g = jnp.sum(x, axis=1) * (1.0 / x.shape[1])           # (B, 2208)
    o_ref[...] = (jnp.dot(g, wg_ref[...], preferred_element_type=jnp.float32)
                  + b_ref[...])                           # (B, 2K)


def _local_pipeline_kernel(col1_ref, w1_ref, s1_ref, sh1_ref,
                           w2_ref, s2_ref, sh2_ref,
                           wl1_ref, s3_ref, sh3_ref,
                           wl2_ref, bl2_ref, wpre_ref,
                           o_ref,
                           c1_scr, m1_scr, p1_scr, col2_scr, c2_scr, n2_scr,
                           *, B):
    """Whole localCNN[i] + local half of premodels[i] for one keypoint, VMEM-resident."""
    f32 = jnp.float32

    # ---- conv1 (3->16, k=6, s=2) as matmul + BN1 + ReLU, written row-wise into a
    #      (14,14)-padded scratch; the pad row/col stay -inf for the ceil-mode maxpool.
    c1_scr[...] = jnp.full(c1_scr.shape, -jnp.inf, dtype=c1_scr.dtype)
    w1 = w1_ref[...]                                      # (108, 16)
    s1 = s1_ref[...]                                      # (1, 16)
    sh1 = sh1_ref[...]
    for b in range(B):
        for oh in range(13):
            col = col1_ref[b, oh]                         # (13, 108)
            y = jnp.dot(col, w1, preferred_element_type=f32)   # (13, 16)
            y = jnp.maximum(y * s1 + sh1, 0.0)
            c1_scr[b, oh, 0:13, :] = y

    # ---- MaxPool2d(k=2, s=2, ceil_mode=True): 13x13 -> 7x7 (edge windows see -inf pads)
    for i in range(7):
        m1_scr[:, i, :, :] = jnp.maximum(c1_scr[:, 2 * i, :, :],
                                         c1_scr[:, 2 * i + 1, :, :])       # (B,14,16)
    for j in range(7):
        p1_scr[:, :, j, :] = jnp.maximum(m1_scr[:, :, 2 * j, :],
                                         m1_scr[:, :, 2 * j + 1, :])       # (B,7,16)

    # ---- conv2 (16->16, k=3, s=1): im2col built inside VMEM (9 window copies)
    for kh in range(3):
        for kw in range(3):
            t = kh * 3 + kw
            col2_scr[:, :, :, t * 16:(t + 1) * 16] = p1_scr[:, kh:kh + 5, kw:kw + 5, :]

    c2_scr[...] = jnp.zeros(c2_scr.shape, dtype=c2_scr.dtype)   # zero pads for avg-sum
    w2 = w2_ref[...]                                      # (144, 16)
    s2 = s2_ref[...]
    sh2 = sh2_ref[...]
    for b in range(B):
        for orow in range(5):
            col = col2_scr[b, orow]                       # (5, 144)
            y = jnp.dot(col, w2, preferred_element_type=f32)   # (5, 16)
            y = jnp.maximum(y * s2 + sh2, 0.0)
            c2_scr[b, orow, 0:5, :] = y

    # ---- AvgPool2d(k=2, s=2, ceil_mode=True) folded into linear1: the per-window
    #      divisors [4,4,2;4,4,2;2,2,1] are pre-divided into wl1, so only SUMS are needed.
    for i in range(3):
        n2_scr[:, i, :, :] = c2_scr[:, 2 * i, :, :] + c2_scr[:, 2 * i + 1, :, :]  # (B,6,16)

    acc = jnp.zeros((B, 128), dtype=f32)
    for i in range(3):
        for j in range(3):
            win = n2_scr[:, i, 2 * j, :] + n2_scr[:, i, 2 * j + 1, :]       # (B, 16)
            acc = acc + jnp.dot(win, wl1_ref[i * 3 + j],
                                preferred_element_type=f32)                 # (B, 128)
    l1 = jnp.maximum(acc * s3_ref[...] + sh3_ref[...], 0.0)                 # (B, 128)

    # ---- linear2 (128 -> 136) and the local half of premodels[i]
    lf = jnp.dot(l1, wl2_ref[...], preferred_element_type=f32) + bl2_ref[...]   # (B, 136)
    o_ref[...] = jnp.dot(lf, wpre_ref[...], preferred_element_type=f32)         # (B, 2)


# ------------------------------ JAX glue ----------------------------------

def bn_fold(gamma, beta, mean, var, bias):
    """Fold (conv/linear bias) + inference BatchNorm into per-channel scale/shift."""
    scale = gamma / jnp.sqrt(var + BN_EPS)
    shift = beta + (bias - mean) * scale
    return scale, shift


def extract_patches(x, points, K):
    """Per-keypoint 31x31 crop (incl. boundary clamps), vmapped over (K, B)."""
    B, C, H, _ = x.shape

    def crop_one(img, px, py):
        # Note: .astype(int32) truncates toward zero, matching Python int() for
        # the non-negative coordinates produced by (points + 0.5) * H.
        loc_x = ((px + 0.5) * H).astype(jnp.int32)
        loc_y = ((py + 0.5) * H).astype(jnp.int32)
        sx = jnp.where(loc_x - 15 < 0, 0,
                       jnp.where(loc_x + 16 > H, H - 31, loc_x - 15))
        sy = jnp.where(loc_y - 15 < 0, 0,
                       jnp.where(loc_y + 16 > H, H - 31, loc_y - 15))
        return lax.dynamic_slice(img, (jnp.int32(0), sx, sy), (C, 31, 31))

    crop_b = jax.vmap(crop_one, in_axes=(0, 0, 0))        # over batch
    crop_kb = jax.vmap(crop_b, in_axes=(None, 1, 1))      # over keypoints
    px = points[:, 0::2]                                  # (B, K)
    py = points[:, 1::2]
    return crop_kb(x, px, py)                             # (K, B, C, 31, 31)


def forward(params, backbone_feats, x, points, *, K):
    B, C, H, _ = x.shape
    CF = backbone_feats.shape[1]          # 2208
    f32 = jnp.float32

    # ---- global head: relu + 7x7 mean + (gout @ Wg + bias), done ONCE (no K-fold copies)
    featsT = jnp.transpose(backbone_feats.reshape(B, CF, 49), (0, 2, 1))     # (B,49,2208)
    wg = jnp.transpose(params["pre_w"][:, :, :CF], (2, 0, 1)).reshape(CF, 2 * K)
    b_all = params["pre_b"].reshape(1, 2 * K)
    pre_global = pl.pallas_call(
        _global_head_kernel,
        out_shape=jax.ShapeDtypeStruct((B, 2 * K), f32),
    )(featsT, wg, b_all)

    # ---- 31x31 patches + conv1 im2col (cheap XLA prep feeding the fused kernel)
    patches = extract_patches(x, points, K)                                  # (K,B,3,31,31)
    sl = [patches[:, :, :, kh:kh + 25:2, kw:kw + 25:2]
          for kh in range(6) for kw in range(6)]                             # each (K,B,3,13,13)
    col1 = jnp.stack(sl, axis=3).reshape(K, B, C * 36, 13, 13)               # col = c*36+kh*6+kw
    col1 = jnp.transpose(col1, (0, 1, 3, 4, 2))                              # (K,B,13,13,108)

    # ---- per-keypoint weights (BN folded, pool divisors folded into linear1)
    w1 = jnp.transpose(params["conv1_w"], (0, 2, 3, 4, 1)).reshape(K, C * 36, 16)
    s1, sh1 = bn_fold(params["bn1_gamma"], params["bn1_beta"],
                      params["bn1_mean"], params["bn1_var"], params["conv1_b"])
    w2 = jnp.transpose(params["conv2_w"], (0, 3, 4, 2, 1)).reshape(K, 144, 16)
    s2, sh2 = bn_fold(params["bn2_gamma"], params["bn2_beta"],
                      params["bn2_mean"], params["bn2_var"], params["conv2_b"])
    counts = jnp.array([[4., 4., 2.], [4., 4., 2.], [2., 2., 1.]], f32)      # ceil-mode divisors
    wl1 = jnp.transpose(params["lin1_w"].reshape(K, 128, 16, 3, 3), (0, 3, 4, 2, 1))
    wl1 = (wl1 / counts[None, :, :, None, None]).reshape(K, 9, 16, 128)
    s3, sh3 = bn_fold(params["bn3_gamma"], params["bn3_beta"],
                      params["bn3_mean"], params["bn3_var"], params["lin1_b"])
    wl2 = jnp.transpose(params["lin2_w"], (0, 2, 1))                         # (K,128,136)
    bl2 = params["lin2_b"].reshape(K, 1, 136)
    wpre = jnp.transpose(params["pre_w"][:, :, CF:], (0, 2, 1))              # (K,136,2)

    # ---- single fused per-keypoint kernel (grid over keypoints; all intermediates in VMEM)
    pre_local = pl.pallas_call(
        functools.partial(_local_pipeline_kernel, B=B),
        grid=(K,),
        in_specs=[
            pl.BlockSpec((None, B, 13, 13, C * 36), lambda k: (k, 0, 0, 0, 0)),
            pl.BlockSpec((None, C * 36, 16), lambda k: (k, 0, 0)),
            pl.BlockSpec((None, 1, 16), lambda k: (k, 0, 0)),
            pl.BlockSpec((None, 1, 16), lambda k: (k, 0, 0)),
            pl.BlockSpec((None, 144, 16), lambda k: (k, 0, 0)),
            pl.BlockSpec((None, 1, 16), lambda k: (k, 0, 0)),
            pl.BlockSpec((None, 1, 16), lambda k: (k, 0, 0)),
            pl.BlockSpec((None, 9, 16, 128), lambda k: (k, 0, 0, 0)),
            pl.BlockSpec((None, 1, 128), lambda k: (k, 0, 0)),
            pl.BlockSpec((None, 1, 128), lambda k: (k, 0, 0)),
            pl.BlockSpec((None, 128, 136), lambda k: (k, 0, 0)),
            pl.BlockSpec((None, 1, 136), lambda k: (k, 0, 0)),
            pl.BlockSpec((None, 136, 2), lambda k: (k, 0, 0)),
        ],
        out_specs=pl.BlockSpec((None, B, 2), lambda k: (k, 0, 0)),
        out_shape=jax.ShapeDtypeStruct((K, B, 2), f32),
        scratch_shapes=[
            pltpu.VMEM((B, 14, 14, 16), f32),   # conv1 output, padded for ceil maxpool
            pltpu.VMEM((B, 7, 14, 16), f32),    # row-pooled intermediate
            pltpu.VMEM((B, 7, 7, 16), f32),     # maxpool output
            pltpu.VMEM((B, 5, 5, 144), f32),    # conv2 im2col
            pltpu.VMEM((B, 6, 6, 16), f32),     # conv2 output, zero-padded for avgpool
            pltpu.VMEM((B, 3, 6, 16), f32),     # avgpool row sums
        ],
        # TODO(synk): with K not a multiple of 2 the v7x megacore split is uneven (2/1);
        #             K*B-wide grids would balance it but break the full-block out_spec.
        compiler_params=pltpu.CompilerParams(dimension_semantics=("parallel",)),
    )(col1, w1, s1.reshape(K, 1, 16), sh1.reshape(K, 1, 16),
      w2, s2.reshape(K, 1, 16), sh2.reshape(K, 1, 16),
      wl1, s3.reshape(K, 1, 128), sh3.reshape(K, 1, 128),
      wl2, bl2, wpre)

    # predicts[b, 2k+o] = (gout @ Wg + b)[b, 2k+o] + (localfea_k @ Wl_k)[b, o]
    return pre_global + jnp.transpose(pre_local, (1, 0, 2)).reshape(B, 2 * K)


def init_params(key, K, feat_dim):
    keys = iter(jax.random.split(key, 32))

    def rnd(shape, scale=0.1):
        return scale * jax.random.normal(next(keys), shape, dtype=jnp.float32)

    p = {}
    # K independent localCNN copies (PyTorch parameter shapes, stacked over keypoints).
    p["conv1_w"] = rnd((K, 16, 3, 6, 6)); p["conv1_b"] = rnd((K, 16))
    p["bn1_gamma"] = 1.0 + rnd((K, 16));  p["bn1_beta"] = rnd((K, 16))
    p["bn1_mean"] = rnd((K, 16));         p["bn1_var"] = 0.5 + jnp.abs(rnd((K, 16)))
    p["conv2_w"] = rnd((K, 16, 16, 3, 3)); p["conv2_b"] = rnd((K, 16))
    p["bn2_gamma"] = 1.0 + rnd((K, 16));  p["bn2_beta"] = rnd((K, 16))
    p["bn2_mean"] = rnd((K, 16));         p["bn2_var"] = 0.5 + jnp.abs(rnd((K, 16)))
    p["lin1_w"] = rnd((K, 128, 144));     p["lin1_b"] = rnd((K, 128))
    p["bn3_gamma"] = 1.0 + rnd((K, 128)); p["bn3_beta"] = rnd((K, 128))
    p["bn3_mean"] = rnd((K, 128));        p["bn3_var"] = 0.5 + jnp.abs(rnd((K, 128)))
    p["lin2_w"] = rnd((K, 136, 128));     p["lin2_b"] = rnd((K, 136))
    # K independent premodels: Linear(2208+136, 2).
    p["pre_w"] = rnd((K, 2, feat_dim + 136)); p["pre_b"] = rnd((K, 2))
    return p


if __name__ == "__main__":
    B, K, H, CF = 2, 3, 48, 2208
    key = jax.random.PRNGKey(0)
    kx, kp, kf, kw = jax.random.split(key, 4)

    x = jax.random.normal(kx, (B, 3, H, H), dtype=jnp.float32)
    points = jax.random.uniform(kp, (B, 2 * K), dtype=jnp.float32, minval=-0.5, maxval=0.5)
    # Stand-in for densenet161.features(x) output (see TODO above).
    backbone_feats = jax.random.normal(kf, (B, CF, 7, 7), dtype=jnp.float32)
    params = init_params(kw, K, CF)

    fwd = jax.jit(functools.partial(forward, K=K))
    predicts = fwd(params, backbone_feats, x, points)
    jax.block_until_ready(predicts)
    assert predicts.shape == (B, 2 * K) and predicts.dtype == jnp.float32
    print("KERNEL_OK")
</pallas_src>

<mosaic_0001>
module attributes {stable_mosaic.version = 11 : i64} {
  func.func @_local_pipeline_kernel(%arg0: i32, %arg1: memref<1x2x13x13x108xf32, #tpu.memory_space<vmem>>, %arg2: memref<1x108x16xf32, #tpu.memory_space<vmem>>, %arg3: memref<1x1x16xf32, #tpu.memory_space<vmem>>, %arg4: memref<1x1x16xf32, #tpu.memory_space<vmem>>, %arg5: memref<1x144x16xf32, #tpu.memory_space<vmem>>, %arg6: memref<1x1x16xf32, #tpu.memory_space<vmem>>, %arg7: memref<1x1x16xf32, #tpu.memory_space<vmem>>, %arg8: memref<1x9x16x128xf32, #tpu.memory_space<vmem>>, %arg9: memref<1x1x128xf32, #tpu.memory_space<vmem>>, %arg10: memref<1x1x128xf32, #tpu.memory_space<vmem>>, %arg11: memref<1x128x136xf32, #tpu.memory_space<vmem>>, %arg12: memref<1x1x136xf32, #tpu.memory_space<vmem>>, %arg13: memref<1x136x2xf32, #tpu.memory_space<vmem>>, %arg14: memref<1x2x2xf32, #tpu.memory_space<vmem>>, %arg15: memref<2x14x14x16xf32, #tpu.memory_space<vmem>>, %arg16: memref<2x7x14x16xf32, #tpu.memory_space<vmem>>, %arg17: memref<2x7x7x16xf32, #tpu.memory_space<vmem>>, %arg18: memref<2x5x5x144xf32, #tpu.memory_space<vmem>>, %arg19: memref<2x6x6x16xf32, #tpu.memory_space<vmem>>, %arg20: memref<2x3x6x16xf32, #tpu.memory_space<vmem>>) attributes {dimension_semantics = [#tpu.dimension_semantics<parallel>], iteration_bounds = array<i64: 3>, scalar_prefetch = 0 : i64, scratch_operands = 6 : i64, tpu.core_type = #tpu.core_type<tc>, window_params = [{transform_indices = @transform_0, window_bounds = array<i64: 1, 2, 13, 13, 108>}, {transform_indices = @transform_1, window_bounds = array<i64: 1, 108, 16>}, {transform_indices = @transform_2, window_bounds = array<i64: 1, 1, 16>}, {transform_indices = @transform_3, window_bounds = array<i64: 1, 1, 16>}, {transform_indices = @transform_4, window_bounds = array<i64: 1, 144, 16>}, {transform_indices = @transform_5, window_bounds = array<i64: 1, 1, 16>}, {transform_indices = @transform_6, window_bounds = array<i64: 1, 1, 16>}, {transform_indices = @transform_7, window_bounds = array<i64: 1, 9, 16, 128>}, {transform_indices = @transform_8, window_bounds = array<i64: 1, 1, 128>}, {transform_indices = @transform_9, window_bounds = array<i64: 1, 1, 128>}, {transform_indices = @transform_10, window_bounds = array<i64: 1, 128, 136>}, {transform_indices = @transform_11, window_bounds = array<i64: 1, 1, 136>}, {transform_indices = @transform_12, window_bounds = array<i64: 1, 136, 2>}, {transform_indices = @transform_13, window_bounds = array<i64: 1, 2, 2>}]} {
    %cst = arith.constant 0xFF800000 : f32
    %0 = vector.broadcast %cst : f32 to vector<2x14x14x16xf32>
    %c0 = arith.constant 0 : index
    %c0_0 = arith.constant 0 : index
    %c0_1 = arith.constant 0 : index
    %c0_2 = arith.constant 0 : index
    %1 = vector.load %arg15[%c0, %c0_0, %c0_1, %c0_2] : memref<2x14x14x16xf32, #tpu.memory_space<vmem>>, vector<2x14x14x16xf32>
    tpu.vector_store %arg15[%c0, %c0_0, %c0_1, %c0_2], %0 {strides = array<i32>} : memref<2x14x14x16xf32, #tpu.memory_space<vmem>>, vector<2x14x14x16xf32>,
    %c0_3 = arith.constant 0 : index
    %c0_4 = arith.constant 0 : index
    %c0_5 = arith.constant 0 : index
    %2 = vector.load %arg2[%c0_3, %c0_4, %c0_5] : memref<1x108x16xf32, #tpu.memory_space<vmem>>, vector<1x108x16xf32>
    %3 = vector.shape_cast %2 : vector<1x108x16xf32> to vector<108x16xf32>
    %c0_6 = arith.constant 0 : index
    %c0_7 = arith.constant 0 : index
    %c0_8 = arith.constant 0 : index
    %4 = vector.load %arg3[%c0_6, %c0_7, %c0_8] : memref<1x1x16xf32, #tpu.memory_space<vmem>>, vector<1x1x16xf32>
    %5 = vector.shape_cast %4 : vector<1x1x16xf32> to vector<1x16xf32>
    %c0_9 = arith.constant 0 : index
    %c0_10 = arith.constant 0 : index
    %c0_11 = arith.constant 0 : index
    %6 = vector.load %arg4[%c0_9, %c0_10, %c0_11] : memref<1x1x16xf32, #tpu.memory_space<vmem>>, vector<1x1x16xf32>
    %7 = vector.shape_cast %6 : vector<1x1x16xf32> to vector<1x16xf32>
    %c0_12 = arith.constant 0 : index
    %c0_13 = arith.constant 0 : index
    %c0_14 = arith.constant 0 : index
    %c0_15 = arith.constant 0 : index
    %c0_16 = arith.constant 0 : index
    %8 = vector.load %arg1[%c0_12, %c0_13, %c0_14, %c0_15, %c0_16] : memref<1x2x13x13x108xf32, #tpu.memory_space<vmem>>, vector<1x1x1x13x108xf32>
    %9 = vector.shape_cast %8 : vector<1x1x1x13x108xf32> to vector<13x108xf32>
    %cst_17 = arith.constant dense<0.000000e+00> : vector<13x16xf32>
    %10 = tpu.matmul %9, %3, %cst_17 {dimension_numbers = #tpu.dot_dimension_numbers<[1], [0], [0], [1], [0, 0, 1, 1], [], []>} : vector<13x108xf32>, vector<108x16xf32>, vector<13x16xf32> -> vector<13x16xf32>
    %11 = vector.broadcast %5 : vector<1x16xf32> to vector<13x16xf32>
    %12 = arith.mulf %10, %11 : vector<13x16xf32>
    %13 = vector.broadcast %7 : vector<1x16xf32> to vector<13x16xf32>
    %14 = arith.addf %12, %13 : vector<13x16xf32>
    %cst_18 = arith.constant 0.000000e+00 : f32
    %15 = vector.broadcast %cst_18 : f32 to vector<13x16xf32>
    %16 = arith.maximumf %14, %15 : vector<13x16xf32>
    %c0_19 = arith.constant 0 : index
    %c0_20 = arith.constant 0 : index
    %c0_21 = arith.constant 0 : index
    %c0_22 = arith.constant 0 : index
    %17 = vector.load %arg15[%c0_19, %c0_20, %c0_21, %c0_22] : memref<2x14x14x16xf32, #tpu.memory_space<vmem>>, vector<1x1x13x16xf32>
    %18 = vector.shape_cast %17 : vector<1x1x13x16xf32> to vector<13x16xf32>
    %19 = vector.shape_cast %16 : vector<13x16xf32> to vector<1x1x13x16xf32>
    tpu.vector_store %arg15[%c0_19, %c0_20, %c0_21, %c0_22], %19 {strides = array<i32>} : memref<2x14x14x16xf32, #tpu.memory_space<vmem>>, vector<1x1x13x16xf32>,
    %c0_23 = arith.constant 0 : index
    %c0_24 = arith.constant 0 : index
    %c1 = arith.constant 1 : index
    %c0_25 = arith.constant 0 : index
    %c0_26 = arith.constant 0 : index
    %20 = vector.load %arg1[%c0_23, %c0_24, %c1, %c0_25, %c0_26] : memref<1x2x13x13x108xf32, #tpu.memory_space<vmem>>, vector<1x1x1x13x108xf32>
    %21 = vector.shape_cast %20 : vector<1x1x1x13x108xf32> to vector<13x108xf32>
    %cst_27 = arith.constant dense<0.000000e+00> : vector<13x16xf32>
    %22 = tpu.matmul %21, %3, %cst_27 {dimension_numbers = #tpu.dot_dimension_numbers<[1], [0], [0], [1], [0, 0, 1, 1], [], []>} : vector<13x108xf32>, vector<108x16xf32>, vector<13x16xf32> -> vector<13x16xf32>
    %23 = vector.broadcast %5 : vector<1x16xf32> to vector<13x16xf32>
    %24 = arith.mulf %22, %23 : vector<13x16xf32>
    %25 = vector.broadcast %7 : vector<1x16xf32> to vector<13x16xf32>
    %26 = arith.addf %24, %25 : vector<13x16xf32>
    %cst_28 = arith.constant 0.000000e+00 : f32
    %27 = vector.broadcast %cst_28 : f32 to vector<13x16xf32>
    %28 = arith.maximumf %26, %27 : vector<13x16xf32>
    %c0_29 = arith.constant 0 : index
    %c1_30 = arith.constant 1 : index
    %c0_31 = arith.constant 0 : index
    %c0_32 = arith.constant 0 : index
    %29 = vector.load %arg15[%c0_29, %c1_30, %c0_31, %c0_32] : memref<2x14x14x16xf32, #tpu.memory_space<vmem>>, vector<1x1x13x16xf32>
    %30 = vector.shape_cast %29 : vector<1x1x13x16xf32> to vector<13x16xf32>
    %31 = vector.shape_cast %28 : vector<13x16xf32> to vector<1x1x13x16xf32>
    tpu.vector_store %arg15[%c0_29, %c1_30, %c0_31, %c0_32], %31 {strides = array<i32>} : memref<2x14x14x16xf32, #tpu.memory_space<vmem>>, vector<1x1x13x16xf32>,
    %c0_33 = arith.constant 0 : index
    %c0_34 = arith.constant 0 : index
    %c2 = arith.constant 2 : index
    %c0_35 = arith.constant 0 : index
    %c0_36 = arith.constant 0 : index
    %32 = vector.load %arg1[%c0_33, %c0_34, %c2, %c0_35, %c0_36] : memref<1x2x13x13x108xf32, #tpu.memory_space<vmem>>, vector<1x1x1x13x108xf32>
    %33 = vector.shape_cast %32 : vector<1x1x1x13x108xf32> to vector<13x108xf32>
    %cst_37 = arith.constant dense<0.000000e+00> : vector<13x16xf32>
    %34 = tpu.matmul %33, %3, %cst_37 {dimension_numbers = #tpu.dot_dimension_numbers<[1], [0], [0], [1], [0, 0, 1, 1], [], []>} : vector<13x108xf32>, vector<108x16xf32>, vector<13x16xf32> -> vector<13x16xf32>
    %35 = vector.broadcast %5 : vector<1x16xf32> to vector<13x16xf32>
    %36 = arith.mulf %34, %35 : vector<13x16xf32>
    %37 = vector.broadcast %7 : vector<1x16xf32> to vector<13x16xf32>
    %38 = arith.addf %36, %37 : vector<13x16xf32>
    %cst_38 = arith.constant 0.000000e+00 : f32
    %39 = vector.broadcast %cst_38 : f32 to vector<13x16xf32>
    %40 = arith.maximumf %38, %39 : vector<13x16xf32>
    %c0_39 = arith.constant 0 : index
    %c2_40 = arith.constant 2 : index
    %c0_41 = arith.constant 0 : index
    %c0_42 = arith.constant 0 : index
    %41 = vector.load %arg15[%c0_39, %c2_40, %c0_41, %c0_42] : memref<2x14x14x16xf32, #tpu.memory_space<vmem>>, vector<1x1x13x16xf32>
    %42 = vector.shape_cast %41 : vector<1x1x13x16xf32> to vector<13x16xf32>
    %43 = vector.shape_cast %40 : vector<13x16xf32> to vector<1x1x13x16xf32>
    tpu.vector_store %arg15[%c0_39, %c2_40, %c0_41, %c0_42], %43 {strides = array<i32>} : memref<2x14x14x16xf32, #tpu.memory_space<vmem>>, vector<1x1x13x16xf32>,
    %c0_43 = arith.constant 0 : index
    %c0_44 = arith.constant 0 : index
    %c3 = arith.constant 3 : index
    %c0_45 = arith.constant 0 : index
    %c0_46 = arith.constant 0 : index
    %44 = vector.load %arg1[%c0_43, %c0_44, %c3, %c0_45, %c0_46] : memref<1x2x13x13x108xf32, #tpu.memory_space<vmem>>, vector<1x1x1x13x108xf32>
    %45 = vector.shape_cast %44 : vector<1x1x1x13x108xf32> to vector<13x108xf32>
    %cst_47 = arith.constant dense<0.000000e+00> : vector<13x16xf32>
    %46 = tpu.matmul %45, %3, %cst_47 {dimension_numbers = #tpu.dot_dimension_numbers<[1], [0], [0], [1], [0, 0, 1, 1], [], []>} : vector<13x108xf32>, vector<108x16xf32>, vector<13x16xf32> -> vector<13x16xf32>
    %47 = vector.broadcast %5 : vector<1x16xf32> to vector<13x16xf32>
    %48 = arith.mulf %46, %47 : vector<13x16xf32>
    %49 = vector.broadcast %7 : vector<1x16xf32> to vector<13x16xf32>
    %50 = arith.addf %48, %49 : vector<13x16xf32>
    %cst_48 = arith.constant 0.000000e+00 : f32
    %51 = vector.broadcast %cst_48 : f32 to vector<13x16xf32>
    %52 = arith.maximumf %50, %51 : vector<13x16xf32>
    %c0_49 = arith.constant 0 : index
    %c3_50 = arith.constant 3 : index
    %c0_51 = arith.constant 0 : index
    %c0_52 = arith.constant 0 : index
    %53 = vector.load %arg15[%c0_49, %c3_50, %c0_51, %c0_52] : memref<2x14x14x16xf32, #tpu.memory_space<vmem>>, vector<1x1x13x16xf32>
    %54 = vector.shape_cast %53 : vector<1x1x13x16xf32> to vector<13x16xf32>
    %55 = vector.shape_cast %52 : vector<13x16xf32> to vector<1x1x13x16xf32>
    tpu.vector_store %arg15[%c0_49, %c3_50, %c0_51, %c0_52], %55 {strides = array<i32>} : memref<2x14x14x16xf32, #tpu.memory_space<vmem>>, vector<1x1x13x16xf32>,
    %c0_53 = arith.constant 0 : index
    %c0_54 = arith.constant 0 : index
    %c4 = arith.constant 4 : index
    %c0_55 = arith.constant 0 : index
    %c0_56 = arith.constant 0 : index
    %56 = vector.load %arg1[%c0_53, %c0_54, %c4, %c0_55, %c0_56] : memref<1x2x13x13x108xf32, #tpu.memory_space<vmem>>, vector<1x1x1x13x108xf32>
    %57 = vector.shape_cast %56 : vector<1x1x1x13x108xf32> to vector<13x108xf32>
    %cst_57 = arith.constant dense<0.000000e+00> : vector<13x16xf32>
    %58 = tpu.matmul %57, %3, %cst_57 {dimension_numbers = #tpu.dot_dimension_numbers<[1], [0], [0], [1], [0, 0, 1, 1], [], []>} : vector<13x108xf32>, vector<108x16xf32>, vector<13x16xf32> -> vector<13x16xf32>
    %59 = vector.broadcast %5 : vector<1x16xf32> to vector<13x16xf32>
    %60 = arith.mulf %58, %59 : vector<13x16xf32>
    %61 = vector.broadcast %7 : vector<1x16xf32> to vector<13x16xf32>
    %62 = arith.addf %60, %61 : vector<13x16xf32>
    %cst_58 = arith.constant 0.000000e+00 : f32
    %63 = vector.broadcast %cst_58 : f32 to vector<13x16xf32>
    %64 = arith.maximumf %62, %63 : vector<13x16xf32>
    %c0_59 = arith.constant 0 : index
    %c4_60 = arith.constant 4 : index
    %c0_61 = arith.constant 0 : index
    %c0_62 = arith.constant 0 : index
    %65 = vector.load %arg15[%c0_59, %c4_60, %c0_61, %c0_62] : memref<2x14x14x16xf32, #tpu.memory_space<vmem>>, vector<1x1x13x16xf32>
    %66 = vector.shape_cast %65 : vector<1x1x13x16xf32> to vector<13x16xf32>
    %67 = vector.shape_cast %64 : vector<13x16xf32> to vector<1x1x13x16xf32>
    tpu.vector_store %arg15[%c0_59, %c4_60, %c0_61, %c0_62], %67 {strides = array<i32>} : memref<2x14x14x16xf32, #tpu.memory_space<vmem>>, vector<1x1x13x16xf32>,
    %c0_63 = arith.constant 0 : index
    %c0_64 = arith.constant 0 : index
    %c5 = arith.constant 5 : index
    %c0_65 = arith.constant 0 : index
    %c0_66 = arith.constant 0 : index
    %68 = vector.load %arg1[%c0_63, %c0_64, %c5, %c0_65, %c0_66] : memref<1x2x13x13x108xf32, #tpu.memory_space<vmem>>, vector<1x1x1x13x108xf32>
    %69 = vector.shape_cast %68 : vector<1x1x1x13x108xf32> to vector<13x108xf32>
    %cst_67 = arith.constant dense<0.000000e+00> : vector<13x16xf32>
    %70 = tpu.matmul %69, %3, %cst_67 {dimension_numbers = #tpu.dot_dimension_numbers<[1], [0], [0], [1], [0, 0, 1, 1], [], []>} : vector<13x108xf32>, vector<108x16xf32>, vector<13x16xf32> -> vector<13x16xf32>
    %71 = vector.broadcast %5 : vector<1x16xf32> to vector<13x16xf32>
    %72 = arith.mulf %70, %71 : vector<13x16xf32>
    %73 = vector.broadcast %7 : vector<1x16xf32> to vector<13x16xf32>
    %74 = arith.addf %72, %73 : vector<13x16xf32>
    %cst_68 = arith.constant 0.000000e+00 : f32
    %75 = vector.broadcast %cst_68 : f32 to vector<13x16xf32>
    %76 = arith.maximumf %74, %75 : vector<13x16xf32>
    %c0_69 = arith.constant 0 : index
    %c5_70 = arith.constant 5 : index
    %c0_71 = arith.constant 0 : index
    %c0_72 = arith.constant 0 : index
    %77 = vector.load %arg15[%c0_69, %c5_70, %c0_71, %c0_72] : memref<2x14x14x16xf32, #tpu.memory_space<vmem>>, vector<1x1x13x16xf32>
    %78 = vector.shape_cast %77 : vector<1x1x13x16xf32> to vector<13x16xf32>
    %79 = vector.shape_cast %76 : vector<13x16xf32> to vector<1x1x13x16xf32>
    tpu.vector_store %arg15[%c0_69, %c5_70, %c0_71, %c0_72], %79 {strides = array<i32>} : memref<2x14x14x16xf32, #tpu.memory_space<vmem>>, vector<1x1x13x16xf32>,
    %c0_73 = arith.constant 0 : index
    %c0_74 = arith.constant 0 : index
    %c6 = arith.constant 6 : index
    %c0_75 = arith.constant 0 : index
    %c0_76 = arith.constant 0 : index
    %80 = vector.load %arg1[%c0_73, %c0_74, %c6, %c0_75, %c0_76] : memref<1x2x13x13x108xf32, #tpu.memory_space<vmem>>, vector<1x1x1x13x108xf32>
    %81 = vector.shape_cast %80 : vector<1x1x1x13x108xf32> to vector<13x108xf32>
    %cst_77 = arith.constant dense<0.000000e+00> : vector<13x16xf32>
    %82 = tpu.matmul %81, %3, %cst_77 {dimension_numbers = #tpu.dot_dimension_numbers<[1], [0], [0], [1], [0, 0, 1, 1], [], []>} : vector<13x108xf32>, vector<108x16xf32>, vector<13x16xf32> -> vector<13x16xf32>
    %83 = vector.broadcast %5 : vector<1x16xf32> to vector<13x16xf32>
    %84 = arith.mulf %82, %83 : vector<13x16xf32>
    %85 = vector.broadcast %7 : vector<1x16xf32> to vector<13x16xf32>
    %86 = arith.addf %84, %85 : vector<13x16xf32>
    %cst_78 = arith.constant 0.000000e+00 : f32
    %87 = vector.broadcast %cst_78 : f32 to vector<13x16xf32>
    %88 = arith.maximumf %86, %87 : vector<13x16xf32>
    %c0_79 = arith.constant 0 : index
    %c6_80 = arith.constant 6 : index
    %c0_81 = arith.constant 0 : index
    %c0_82 = arith.constant 0 : index
    %89 = vector.load %arg15[%c0_79, %c6_80, %c0_81, %c0_82] : memref<2x14x14x16xf32, #tpu.memory_space<vmem>>, vector<1x1x13x16xf32>
    %90 = vector.shape_cast %89 : vector<1x1x13x16xf32> to vector<13x16xf32>
    %91 = vector.shape_cast %88 : vector<13x16xf32> to vector<1x1x13x16xf32>
    tpu.vector_store %arg15[%c0_79, %c6_80, %c0_81, %c0_82], %91 {strides = array<i32>} : memref<2x14x14x16xf32, #tpu.memory_space<vmem>>, vector<1x1x13x16xf32>,
    %c0_83 = arith.constant 0 : index
    %c0_84 = arith.constant 0 : index
    %c7 = arith.constant 7 : index
    %c0_85 = arith.constant 0 : index
    %c0_86 = arith.constant 0 : index
    %92 = vector.load %arg1[%c0_83, %c0_84, %c7, %c0_85, %c0_86] : memref<1x2x13x13x108xf32, #tpu.memory_space<vmem>>, vector<1x1x1x13x108xf32>
    %93 = vector.shape_cast %92 : vector<1x1x1x13x108xf32> to vector<13x108xf32>
    %cst_87 = arith.constant dense<0.000000e+00> : vector<13x16xf32>
    %94 = tpu.matmul %93, %3, %cst_87 {dimension_numbers = #tpu.dot_dimension_numbers<[1], [0], [0], [1], [0, 0, 1, 1], [], []>} : vector<13x108xf32>, vector<108x16xf32>, vector<13x16xf32> -> vector<13x16xf32>
    %95 = vector.broadcast %5 : vector<1x16xf32> to vector<13x16xf32>
    %96 = arith.mulf %94, %95 : vector<13x16xf32>
    %97 = vector.broadcast %7 : vector<1x16xf32> to vector<13x16xf32>
    %98 = arith.addf %96, %97 : vector<13x16xf32>
    %cst_88 = arith.constant 0.000000e+00 : f32
    %99 = vector.broadcast %cst_88 : f32 to vector<13x16xf32>
    %100 = arith.maximumf %98, %99 : vector<13x16xf32>
    %c0_89 = arith.constant 0 : index
    %c7_90 = arith.constant 7 : index
    %c0_91 = arith.constant 0 : index
    %c0_92 = arith.constant 0 : index
    %101 = vector.load %arg15[%c0_89, %c7_90, %c0_91, %c0_92] : memref<2x14x14x16xf32, #tpu.memory_space<vmem>>, vector<1x1x13x16xf32>
    %102 = vector.shape_cast %101 : vector<1x1x13x16xf32> to vector<13x16xf32>
    %103 = vector.shape_cast %100 : vector<13x16xf32> to vector<1x1x13x16xf32>
    tpu.vector_store %arg15[%c0_89, %c7_90, %c0_91, %c0_92], %103 {strides = array<i32>} : memref<2x14x14x16xf32, #tpu.memory_space<vmem>>, vector<1x1x13x16xf32>,
    %c0_93 = arith.constant 0 : index
    %c0_94 = arith.constant 0 : index
    %c8 = arith.constant 8 : index
    %c0_95 = arith.constant 0 : index
    %c0_96 = arith.constant 0 : index
    %104 = vector.load %arg1[%c0_93, %c0_94, %c8, %c0_95, %c0_96] : memref<1x2x13x13x108xf32, #tpu.memory_space<vmem>>, vector<1x1x1x13x108xf32>
    %105 = vector.shape_cast %104 : vector<1x1x1x13x108xf32> to vector<13x108xf32>
    %cst_97 = arith.constant dense<0.000000e+00> : vector<13x16xf32>
    %106 = tpu.matmul %105, %3, %cst_97 {dimension_numbers = #tpu.dot_dimension_numbers<[1], [0], [0], [1], [0, 0, 1, 1], [], []>} : vector<13x108xf32>, vector<108x16xf32>, vector<13x16xf32> -> vector<13x16xf32>
    %107 = vector.broadcast %5 : vector<1x16xf32> to vector<13x16xf32>
    %108 = arith.mulf %106, %107 : vector<13x16xf32>
    %109 = vector.broadcast %7 : vector<1x16xf32> to vector<13x16xf32>
    %110 = arith.addf %108, %109 : vector<13x16xf32>
    %cst_98 = arith.constant 0.000000e+00 : f32
    %111 = vector.broadcast %cst_98 : f32 to vector<13x16xf32>
    %112 = arith.maximumf %110, %111 : vector<13x16xf32>
    %c0_99 = arith.constant 0 : index
    %c8_100 = arith.constant 8 : index
    %c0_101 = arith.constant 0 : index
    %c0_102 = arith.constant 0 : index
    %113 = vector.load %arg15[%c0_99, %c8_100, %c0_101, %c0_102] : memref<2x14x14x16xf32, #tpu.memory_space<vmem>>, vector<1x1x13x16xf32>
    %114 = vector.shape_cast %113 : vector<1x1x13x16xf32> to vector<13x16xf32>
    %115 = vector.shape_cast %112 : vector<13x16xf32> to vector<1x1x13x16xf32>
    tpu.vector_store %arg15[%c0_99, %c8_100, %c0_101, %c0_102], %115 {strides = array<i32>} : memref<2x14x14x16xf32, #tpu.memory_space<vmem>>, vector<1x1x13x16xf32>,
    %c0_103 = arith.constant 0 : index
    %c0_104 = arith.constant 0 : index
    %c9 = arith.constant 9 : index
    %c0_105 = arith.constant 0 : index
    %c0_106 = arith.constant 0 : index
    %116 = vector.load %arg1[%c0_103, %c0_104, %c9, %c0_105, %c0_106] : memref<1x2x13x13x108xf32, #tpu.memory_space<vmem>>, vector<1x1x1x13x108xf32>
    %117 = vector.shape_cast %116 : vector<1x1x1x13x108xf32> to vector<13x108xf32>
    %cst_107 = arith.constant dense<0.000000e+00> : vector<13x16xf32>
    %118 = tpu.matmul %117, %3, %cst_107 {dimension_numbers = #tpu.dot_dimension_numbers<[1], [0], [0], [1], [0, 0, 1, 1], [], []>} : vector<13x108xf32>, vector<108x16xf32>, vector<13x16xf32> -> vector<13x16xf32>
    %119 = vector.broadcast %5 : vector<1x16xf32> to vector<13x16xf32>
    %120 = arith.mulf %118, %119 : vector<13x16xf32>
    %121 = vector.broadcast %7 : vector<1x16xf32> to vector<13x16xf32>
    %122 = arith.addf %120, %121 : vector<13x16xf32>
    %cst_108 = arith.constant 0.000000e+00 : f32
    %123 = vector.broadcast %cst_108 : f32 to vector<13x16xf32>
    %124 = arith.maximumf %122, %123 : vector<13x16xf32>
    %c0_109 = arith.constant 0 : index
    %c9_110 = arith.constant 9 : index
    %c0_111 = arith.constant 0 : index
    %c0_112 = arith.constant 0 : index
    %125 = vector.load %arg15[%c0_109, %c9_110, %c0_111, %c0_112] : memref<2x14x14x16xf32, #tpu.memory_space<vmem>>, vector<1x1x13x16xf32>
    %126 = vector.shape_cast %125 : vector<1x1x13x16xf32> to vector<13x16xf32>
    %127 = vector.shape_cast %124 : vector<13x16xf32> to vector<1x1x13x16xf32>
    tpu.vector_store %arg15[%c0_109, %c9_110, %c0_111, %c0_112], %127 {strides = array<i32>} : memref<2x14x14x16xf32, #tpu.memory_space<vmem>>, vector<1x1x13x16xf32>,
    %c0_113 = arith.constant 0 : index
    %c0_114 = arith.constant 0 : index
    %c10 = arith.constant 10 : index
    %c0_115 = arith.constant 0 : index
    %c0_116 = arith.constant 0 : index
    %128 = vector.load %arg1[%c0_113, %c0_114, %c10, %c0_115, %c0_116] : memref<1x2x13x13x108xf32, #tpu.memory_space<vmem>>, vector<1x1x1x13x108xf32>
    %129 = vector.shape_cast %128 : vector<1x1x1x13x108xf32> to vector<13x108xf32>
    %cst_117 = arith.constant dense<0.000000e+00> : vector<13x16xf32>
    %130 = tpu.matmul %129, %3, %cst_117 {dimension_numbers = #tpu.dot_dimension_numbers<[1], [0], [0], [1], [0, 0, 1, 1], [], []>} : vector<13x108xf32>, vector<108x16xf32>, vector<13x16xf32> -> vector<13x16xf32>
    %131 = vector.broadcast %5 : vector<1x16xf32> to vector<13x16xf32>
    %132 = arith.mulf %130, %131 : vector<13x16xf32>
    %133 = vector.broadcast %7 : vector<1x16xf32> to vector<13x16xf32>
    %134 = arith.addf %132, %133 : vector<13x16xf32>
    %cst_118 = arith.constant 0.000000e+00 : f32
    %135 = vector.broadcast %cst_118 : f32 to vector<13x16xf32>
    %136 = arith.maximumf %134, %135 : vector<13x16xf32>
    %c0_119 = arith.constant 0 : index
    %c10_120 = arith.constant 10 : index
    %c0_121 = arith.constant 0 : index
    %c0_122 = arith.constant 0 : index
    %137 = vector.load %arg15[%c0_119, %c10_120, %c0_121, %c0_122] : memref<2x14x14x16xf32, #tpu.memory_space<vmem>>, vector<1x1x13x16xf32>
    %138 = vector.shape_cast %137 : vector<1x1x13x16xf32> to vector<13x16xf32>
    %139 = vector.shape_cast %136 : vector<13x16xf32> to vector<1x1x13x16xf32>
    tpu.vector_store %arg15[%c0_119, %c10_120, %c0_121, %c0_122], %139 {strides = array<i32>} : memref<2x14x14x16xf32, #tpu.memory_space<vmem>>, vector<1x1x13x16xf32>,
    %c0_123 = arith.constant 0 : index
    %c0_124 = arith.constant 0 : index
    %c11 = arith.constant 11 : index
    %c0_125 = arith.constant 0 : index
    %c0_126 = arith.constant 0 : index
    %140 = vector.load %arg1[%c0_123, %c0_124, %c11, %c0_125, %c0_126] : memref<1x2x13x13x108xf32, #tpu.memory_space<vmem>>, vector<1x1x1x13x108xf32>
    %141 = vector.shape_cast %140 : vector<1x1x1x13x108xf32> to vector<13x108xf32>
    %cst_127 = arith.constant dense<0.000000e+00> : vector<13x16xf32>
    %142 = tpu.matmul %141, %3, %cst_127 {dimension_numbers = #tpu.dot_dimension_numbers<[1], [0], [0], [1], [0, 0, 1, 1], [], []>} : vector<13x108xf32>, vector<108x16xf32>, vector<13x16xf32> -> vector<13x16xf32>
    %143 = vector.broadcast %5 : vector<1x16xf32> to vector<13x16xf32>
    %144 = arith.mulf %142, %143 : vector<13x16xf32>
    %145 = vector.broadcast %7 : vector<1x16xf32> to vector<13x16xf32>
    %146 = arith.addf %144, %145 : vector<13x16xf32>
    %cst_128 = arith.constant 0.000000e+00 : f32
    %147 = vector.broadcast %cst_128 : f32 to vector<13x16xf32>
    %148 = arith.maximumf %146, %147 : vector<13x16xf32>
    %c0_129 = arith.constant 0 : index
    %c11_130 = arith.constant 11 : index
    %c0_131 = arith.constant 0 : index
    %c0_132 = arith.constant 0 : index
    %149 = vector.load %arg15[%c0_129, %c11_130, %c0_131, %c0_132] : memref<2x14x14x16xf32, #tpu.memory_space<vmem>>, vector<1x1x13x16xf32>
    %150 = vector.shape_cast %149 : vector<1x1x13x16xf32> to vector<13x16xf32>
    %151 = vector.shape_cast %148 : vector<13x16xf32> to vector<1x1x13x16xf32>
    tpu.vector_store %arg15[%c0_129, %c11_130, %c0_131, %c0_132], %151 {strides = array<i32>} : memref<2x14x14x16xf32, #tpu.memory_space<vmem>>, vector<1x1x13x16xf32>,
    %c0_133 = arith.constant 0 : index
    %c0_134 = arith.constant 0 : index
    %c12 = arith.constant 12 : index
    %c0_135 = arith.constant 0 : index
    %c0_136 = arith.constant 0 : index
    %152 = vector.load %arg1[%c0_133, %c0_134, %c12, %c0_135, %c0_136] : memref<1x2x13x13x108xf32, #tpu.memory_space<vmem>>, vector<1x1x1x13x108xf32>
    %153 = vector.shape_cast %152 : vector<1x1x1x13x108xf32> to vector<13x108xf32>
    %cst_137 = arith.constant dense<0.000000e+00> : vector<13x16xf32>
    %154 = tpu.matmul %153, %3, %cst_137 {dimension_numbers = #tpu.dot_dimension_numbers<[1], [0], [0], [1], [0, 0, 1, 1], [], []>} : vector<13x108xf32>, vector<108x16xf32>, vector<13x16xf32> -> vector<13x16xf32>
    %155 = vector.broadcast %5 : vector<1x16xf32> to vector<13x16xf32>
    %156 = arith.mulf %154, %155 : vector<13x16xf32>
    %157 = vector.broadcast %7 : vector<1x16xf32> to vector<13x16xf32>
    %158 = arith.addf %156, %157 : vector<13x16xf32>
    %cst_138 = arith.constant 0.000000e+00 : f32
    %159 = vector.broadcast %cst_138 : f32 to vector<13x16xf32>
    %160 = arith.maximumf %158, %159 : vector<13x16xf32>
    %c0_139 = arith.constant 0 : index
    %c12_140 = arith.constant 12 : index
    %c0_141 = arith.constant 0 : index
    %c0_142 = arith.constant 0 : index
    %161 = vector.load %arg15[%c0_139, %c12_140, %c0_141, %c0_142] : memref<2x14x14x16xf32, #tpu.memory_space<vmem>>, vector<1x1x13x16xf32>
    %162 = vector.shape_cast %161 : vector<1x1x13x16xf32> to vector<13x16xf32>
    %163 = vector.shape_cast %160 : vector<13x16xf32> to vector<1x1x13x16xf32>
    tpu.vector_store %arg15[%c0_139, %c12_140, %c0_141, %c0_142], %163 {strides = array<i32>} : memref<2x14x14x16xf32, #tpu.memory_space<vmem>>, vector<1x1x13x16xf32>,
    %c0_143 = arith.constant 0 : index
    %c1_144 = arith.constant 1 : index
    %c0_145 = arith.constant 0 : index
    %c0_146 = arith.constant 0 : index
    %c0_147 = arith.constant 0 : index
    %164 = vector.load %arg1[%c0_143, %c1_144, %c0_145, %c0_146, %c0_147] : memref<1x2x13x13x108xf32, #tpu.memory_space<vmem>>, vector<1x1x1x13x108xf32>
    %165 = vector.shape_cast %164 : vector<1x1x1x13x108xf32> to vector<13x108xf32>
    %cst_148 = arith.constant dense<0.000000e+00> : vector<13x16xf32>
    %166 = tpu.matmul %165, %3, %cst_148 {dimension_numbers = #tpu.dot_dimension_numbers<[1], [0], [0], [1], [0, 0, 1, 1], [], []>} : vector<13x108xf32>, vector<108x16xf32>, vector<13x16xf32> -> vector<13x16xf32>
    %167 = vector.broadcast %5 : vector<1x16xf32> to vector<13x16xf32>
    %168 = arith.mulf %166, %167 : vector<13x16xf32>
    %169 = vector.broadcast %7 : vector<1x16xf32> to vector<13x16xf32>
    %170 = arith.addf %168, %169 : vector<13x16xf32>
    %cst_149 = arith.constant 0.000000e+00 : f32
    %171 = vector.broadcast %cst_149 : f32 to vector<13x16xf32>
    %172 = arith.maximumf %170, %171 : vector<13x16xf32>
    %c1_150 = arith.constant 1 : index
    %c0_151 = arith.constant 0 : index
    %c0_152 = arith.constant 0 : index
    %c0_153 = arith.constant 0 : index
    %173 = vector.load %arg15[%c1_150, %c0_151, %c0_152, %c0_153] : memref<2x14x14x16xf32, #tpu.memory_space<vmem>>, vector<1x1x13x16xf32>
    %174 = vector.shape_cast %173 : vector<1x1x13x16xf32> to vector<13x16xf32>
    %175 = vector.shape_cast %172 : vector<13x16xf32> to vector<1x1x13x16xf32>
    tpu.vector_store %arg15[%c1_150, %c0_151, %c0_152, %c0_153], %175 {strides = array<i32>} : memref<2x14x14x16xf32, #tpu.memory_space<vmem>>, vector<1x1x13x16xf32>,
    %c0_154 = arith.constant 0 : index
    %c1_155 = arith.constant 1 : index
    %c1_156 = arith.constant 1 : index
    %c0_157 = arith.constant 0 : index
    %c0_158 = arith.constant 0 : index
    %176 = vector.load %arg1[%c0_154, %c1_155, %c1_156, %c0_157, %c0_158] : memref<1x2x13x13x108xf32, #tpu.memory_space<vmem>>, vector<1x1x1x13x108xf32>
    %177 = vector.shape_cast %176 : vector<1x1x1x13x108xf32> to vector<13x108xf32>
    %cst_159 = arith.constant dense<0.000000e+00> : vector<13x16xf32>
    %178 = tpu.matmul %177, %3, %cst_159 {dimension_numbers = #tpu.dot_dimension_numbers<[1], [0], [0], [1], [0, 0, 1, 1], [], []>} : vector<13x108xf32>, vector<108x16xf32>, vector<13x16xf32> -> vector<13x16xf32>
    %179 = vector.broadcast %5 : vector<1x16xf32> to vector<13x16xf32>
    %180 = arith.mulf %178, %179 : vector<13x16xf32>
    %181 = vector.broadcast %7 : vector<1x16xf32> to vector<13x16xf32>
    %182 = arith.addf %180, %181 : vector<13x16xf32>
    %cst_160 = arith.constant 0.000000e+00 : f32
    %183 = vector.broadcast %cst_160 : f32 to vector<13x16xf32>
    %184 = arith.maximumf %182, %183 : vector<13x16xf32>
    %c1_161 = arith.constant 1 : index
    %c1_162 = arith.constant 1 : index
    %c0_163 = arith.constant 0 : index
    %c0_164 = arith.constant 0 : index
    %185 = vector.load %arg15[%c1_161, %c1_162, %c0_163, %c0_164] : memref<2x14x14x16xf32, #tpu.memory_space<vmem>>, vector<1x1x13x16xf32>
    %186 = vector.shape_cast %185 : vector<1x1x13x16xf32> to vector<13x16xf32>
    %187 = vector.shape_cast %184 : vector<13x16xf32> to vector<1x1x13x16xf32>
    tpu.vector_store %arg15[%c1_161, %c1_162, %c0_163, %c0_164], %187 {strides = array<i32>} : memref<2x14x14x16xf32, #tpu.memory_space<vmem>>, vector<1x1x13x16xf32>,
    %c0_165 = arith.constant 0 : index
    %c1_166 = arith.constant 1 : index
    %c2_167 = arith.constant 2 : index
    %c0_168 = arith.constant 0 : index
    %c0_169 = arith.constant 0 : index
    %188 = vector.load %arg1[%c0_165, %c1_166, %c2_167, %c0_168, %c0_169] : memref<1x2x13x13x108xf32, #tpu.memory_space<vmem>>, vector<1x1x1x13x108xf32>
    %189 = vector.shape_cast %188 : vector<1x1x1x13x108xf32> to vector<13x108xf32>
    %cst_170 = arith.constant dense<0.000000e+00> : vector<13x16xf32>
    %190 = tpu.matmul %189, %3, %cst_170 {dimension_numbers = #tpu.dot_dimension_numbers<[1], [0], [0], [1], [0, 0, 1, 1], [], []>} : vector<13x108xf32>, vector<108x16xf32>, vector<13x16xf32> -> vector<13x16xf32>
    %191 = vector.broadcast %5 : vector<1x16xf32> to vector<13x16xf32>
    %192 = arith.mulf %190, %191 : vector<13x16xf32>
    %193 = vector.broadcast %7 : vector<1x16xf32> to vector<13x16xf32>
    %194 = arith.addf %192, %193 : vector<13x16xf32>
    %cst_171 = arith.constant 0.000000e+00 : f32
    %195 = vector.broadcast %cst_171 : f32 to vector<13x16xf32>
    %196 = arith.maximumf %194, %195 : vector<13x16xf32>
    %c1_172 = arith.constant 1 : index
    %c2_173 = arith.constant 2 : index
    %c0_174 = arith.constant 0 : index
    %c0_175 = arith.constant 0 : index
    %197 = vector.load %arg15[%c1_172, %c2_173, %c0_174, %c0_175] : memref<2x14x14x16xf32, #tpu.memory_space<vmem>>, vector<1x1x13x16xf32>
    %198 = vector.shape_cast %197 : vector<1x1x13x16xf32> to vector<13x16xf32>
    %199 = vector.shape_cast %196 : vector<13x16xf32> to vector<1x1x13x16xf32>
    tpu.vector_store %arg15[%c1_172, %c2_173, %c0_174, %c0_175], %199 {strides = array<i32>} : memref<2x14x14x16xf32, #tpu.memory_space<vmem>>, vector<1x1x13x16xf32>,
    %c0_176 = arith.constant 0 : index
    %c1_177 = arith.constant 1 : index
    %c3_178 = arith.constant 3 : index
    %c0_179 = arith.constant 0 : index
    %c0_180 = arith.constant 0 : index
    %200 = vector.load %arg1[%c0_176, %c1_177, %c3_178, %c0_179, %c0_180] : memref<1x2x13x13x108xf32, #tpu.memory_space<vmem>>, vector<1x1x1x13x108xf32>
    %201 = vector.shape_cast %200 : vector<1x1x1x13x108xf32> to vector<13x108xf32>
    %cst_181 = arith.constant dense<0.000000e+00> : vector<13x16xf32>
    %202 = tpu.matmul %201, %3, %cst_181 {dimension_numbers = #tpu.dot_dimension_numbers<[1], [0], [0], [1], [0, 0, 1, 1], [], []>} : vector<13x108xf32>, vector<108x16xf32>, vector<13x16xf32> -> vector<13x16xf32>
    %203 = vector.broadcast %5 : vector<1x16xf32> to vector<13x16xf32>
    %204 = arith.mulf %202, %203 : vector<13x16xf32>
    %205 = vector.broadcast %7 : vector<1x16xf32> to vector<13x16xf32>
    %206 = arith.addf %204, %205 : vector<13x16xf32>
    %cst_182 = arith.constant 0.000000e+00 : f32
    %207 = vector.broadcast %cst_182 : f32 to vector<13x16xf32>
    %208 = arith.maximumf %206, %207 : vector<13x16xf32>
    %c1_183 = arith.constant 1 : index
    %c3_184 = arith.constant 3 : index
    %c0_185 = arith.constant 0 : index
    %c0_186 = arith.constant 0 : index
    %209 = vector.load %arg15[%c1_183, %c3_184, %c0_185, %c0_186] : memref<2x14x14x16xf32, #tpu.memory_space<vmem>>, vector<1x1x13x16xf32>
    %210 = vector.shape_cast %209 : vector<1x1x13x16xf32> to vector<13x16xf32>
    %211 = vector.shape_cast %208 : vector<13x16xf32> to vector<1x1x13x16xf32>
    tpu.vector_store %arg15[%c1_183, %c3_184, %c0_185, %c0_186], %211 {strides = array<i32>} : memref<2x14x14x16xf32, #tpu.memory_space<vmem>>, vector<1x1x13x16xf32>,
    %c0_187 = arith.constant 0 : index
    %c1_188 = arith.constant 1 : index
    %c4_189 = arith.constant 4 : index
    %c0_190 = arith.constant 0 : index
    %c0_191 = arith.constant 0 : index
    %212 = vector.load %arg1[%c0_187, %c1_188, %c4_189, %c0_190, %c0_191] : memref<1x2x13x13x108xf32, #tpu.memory_space<vmem>>, vector<1x1x1x13x108xf32>
    %213 = vector.shape_cast %212 : vector<1x1x1x13x108xf32> to vector<13x108xf32>
    %cst_192 = arith.constant dense<0.000000e+00> : vector<13x16xf32>
    %214 = tpu.matmul %213, %3, %cst_192 {dimension_numbers = #tpu.dot_dimension_numbers<[1], [0], [0], [1], [0, 0, 1, 1], [], []>} : vector<13x108xf32>, vector<108x16xf32>, vector<13x16xf32> -> vector<13x16xf32>
    %215 = vector.broadcast %5 : vector<1x16xf32> to vector<13x16xf32>
    %216 = arith.mulf %214, %215 : vector<13x16xf32>
    %217 = vector.broadcast %7 : vector<1x16xf32> to vector<13x16xf32>
    %218 = arith.addf %216, %217 : vector<13x16xf32>
    %cst_193 = arith.constant 0.000000e+00 : f32
    %219 = vector.broadcast %cst_193 : f32 to vector<13x16xf32>
    %220 = arith.maximumf %218, %219 : vector<13x16xf32>
    %c1_194 = arith.constant 1 : index
    %c4_195 = arith.constant 4 : index
    %c0_196 = arith.constant 0 : index
    %c0_197 = arith.constant 0 : index
    %221 = vector.load %arg15[%c1_194, %c4_195, %c0_196, %c0_197] : memref<2x14x14x16xf32, #tpu.memory_space<vmem>>, vector<1x1x13x16xf32>
    %222 = vector.shape_cast %221 : vector<1x1x13x16xf32> to vector<13x16xf32>
    %223 = vector.shape_cast %220 : vector<13x16xf32> to vector<1x1x13x16xf32>
    tpu.vector_store %arg15[%c1_194, %c4_195, %c0_196, %c0_197], %223 {strides = array<i32>} : memref<2x14x14x16xf32, #tpu.memory_space<vmem>>, vector<1x1x13x16xf32>,
    %c0_198 = arith.constant 0 : index
    %c1_199 = arith.constant 1 : index
    %c5_200 = arith.constant 5 : index
    %c0_201 = arith.constant 0 : index
    %c0_202 = arith.constant 0 : index
    %224 = vector.load %arg1[%c0_198, %c1_199, %c5_200, %c0_201, %c0_202] : memref<1x2x13x13x108xf32, #tpu.memory_space<vmem>>, vector<1x1x1x13x108xf32>
    %225 = vector.shape_cast %224 : vector<1x1x1x13x108xf32> to vector<13x108xf32>
    %cst_203 = arith.constant dense<0.000000e+00> : vector<13x16xf32>
    %226 = tpu.matmul %225, %3, %cst_203 {dimension_numbers = #tpu.dot_dimension_numbers<[1], [0], [0], [1], [0, 0, 1, 1], [], []>} : vector<13x108xf32>, vector<108x16xf32>, vector<13x16xf32> -> vector<13x16xf32>
    %227 = vector.broadcast %5 : vector<1x16xf32> to vector<13x16xf32>
    %228 = arith.mulf %226, %227 : vector<13x16xf32>
    %229 = vector.broadcast %7 : vector<1x16xf32> to vector<13x16xf32>
    %230 = arith.addf %228, %229 : vector<13x16xf32>
    %cst_204 = arith.constant 0.000000e+00 : f32
    %231 = vector.broadcast %cst_204 : f32 to vector<13x16xf32>
    %232 = arith.maximumf %230, %231 : vector<13x16xf32>
    %c1_205 = arith.constant 1 : index
    %c5_206 = arith.constant 5 : index
    %c0_207 = arith.constant 0 : index
    %c0_208 = arith.constant 0 : index
    %233 = vector.load %arg15[%c1_205, %c5_206, %c0_207, %c0_208] : memref<2x14x14x16xf32, #tpu.memory_space<vmem>>, vector<1x1x13x16xf32>
    %234 = vector.shape_cast %233 : vector<1x1x13x16xf32> to vector<13x16xf32>
    %235 = vector.shape_cast %232 : vector<13x16xf32> to vector<1x1x13x16xf32>
    tpu.vector_store %arg15[%c1_205, %c5_206, %c0_207, %c0_208], %235 {strides = array<i32>} : memref<2x14x14x16xf32, #tpu.memory_space<vmem>>, vector<1x1x13x16xf32>,
    %c0_209 = arith.constant 0 : index
    %c1_210 = arith.constant 1 : index
    %c6_211 = arith.constant 6 : index
    %c0_212 = arith.constant 0 : index
    %c0_213 = arith.constant 0 : index
    %236 = vector.load %arg1[%c0_209, %c1_210, %c6_211, %c0_212, %c0_213] : memref<1x2x13x13x108xf32, #tpu.memory_space<vmem>>, vector<1x1x1x13x108xf32>
    %237 = vector.shape_cast %236 : vector<1x1x1x13x108xf32> to vector<13x108xf32>
    %cst_214 = arith.constant dense<0.000000e+00> : vector<13x16xf32>
    %238 = tpu.matmul %237, %3, %cst_214 {dimension_numbers = #tpu.dot_dimension_numbers<[1], [0], [0], [1], [0, 0, 1, 1], [], []>} : vector<13x108xf32>, vector<108x16xf32>, vector<13x16xf32> -> vector<13x16xf32>
    %239 = vector.broadcast %5 : vector<1x16xf32> to vector<13x16xf32>
    %240 = arith.mulf %238, %239 : vector<13x16xf32>
    %241 = vector.broadcast %7 : vector<1x16xf32> to vector<13x16xf32>
    %242 = arith.addf %240, %241 : vector<13x16xf32>
    %cst_215 = arith.constant 0.000000e+00 : f32
    %243 = vector.broadcast %cst_215 : f32 to vector<13x16xf32>
    %244 = arith.maximumf %242, %243 : vector<13x16xf32>
    %c1_216 = arith.constant 1 : index
    %c6_217 = arith.constant 6 : index
    %c0_218 = arith.constant 0 : index
    %c0_219 = arith.constant 0 : index
    %245 = vector.load %arg15[%c1_216, %c6_217, %c0_218, %c0_219] : memref<2x14x14x16xf32, #tpu.memory_space<vmem>>, vector<1x1x13x16xf32>
    %246 = vector.shape_cast %245 : vector<1x1x13x16xf32> to vector<13x16xf32>
    %247 = vector.shape_cast %244 : vector<13x16xf32> to vector<1x1x13x16xf32>
    tpu.vector_store %arg15[%c1_216, %c6_217, %c0_218, %c0_219], %247 {strides = array<i32>} : memref<2x14x14x16xf32, #tpu.memory_space<vmem>>, vector<1x1x13x16xf32>,
    %c0_220 = arith.constant 0 : index
    %c1_221 = arith.constant 1 : index
    %c7_222 = arith.constant 7 : index
    %c0_223 = arith.constant 0 : index
    %c0_224 = arith.constant 0 : index
    %248 = vector.load %arg1[%c0_220, %c1_221, %c7_222, %c0_223, %c0_224] : memref<1x2x13x13x108xf32, #tpu.memory_space<vmem>>, vector<1x1x1x13x108xf32>
    %249 = vector.shape_cast %248 : vector<1x1x1x13x108xf32> to vector<13x108xf32>
    %cst_225 = arith.constant dense<0.000000e+00> : vector<13x16xf32>
    %250 = tpu.matmul %249, %3, %cst_225 {dimension_numbers = #tpu.dot_dimension_numbers<[1], [0], [0], [1], [0, 0, 1, 1], [], []>} : vector<13x108xf32>, vector<108x16xf32>, vector<13x16xf32> -> vector<13x16xf32>
    %251 = vector.broadcast %5 : vector<1x16xf32> to vector<13x16xf32>
    %252 = arith.mulf %250, %251 : vector<13x16xf32>
    %253 = vector.broadcast %7 : vector<1x16xf32> to vector<13x16xf32>
    %254 = arith.addf %252, %253 : vector<13x16xf32>
    %cst_226 = arith.constant 0.000000e+00 : f32
    %255 = vector.broadcast %cst_226 : f32 to vector<13x16xf32>
    %256 = arith.maximumf %254, %255 : vector<13x16xf32>
    %c1_227 = arith.constant 1 : index
    %c7_228 = arith.constant 7 : index
    %c0_229 = arith.constant 0 : index
    %c0_230 = arith.constant 0 : index
    %257 = vector.load %arg15[%c1_227, %c7_228, %c0_229, %c0_230] : memref<2x14x14x16xf32, #tpu.memory_space<vmem>>, vector<1x1x13x16xf32>
    %258 = vector.shape_cast %257 : vector<1x1x13x16xf32> to vector<13x16xf32>
    %259 = vector.shape_cast %256 : vector<13x16xf32> to vector<1x1x13x16xf32>
    tpu.vector_store %arg15[%c1_227, %c7_228, %c0_229, %c0_230], %259 {strides = array<i32>} : memref<2x14x14x16xf32, #tpu.memory_space<vmem>>, vector<1x1x13x16xf32>,
    %c0_231 = arith.constant 0 : index
    %c1_232 = arith.constant 1 : index
    %c8_233 = arith.constant 8 : index
    %c0_234 = arith.constant 0 : index
    %c0_235 = arith.constant 0 : index
    %260 = vector.load %arg1[%c0_231, %c1_232, %c8_233, %c0_234, %c0_235] : memref<1x2x13x13x108xf32, #tpu.memory_space<vmem>>, vector<1x1x1x13x108xf32>
    %261 = vector.shape_cast %260 : vector<1x1x1x13x108xf32> to vector<13x108xf32>
    %cst_236 = arith.constant dense<0.000000e+00> : vector<13x16xf32>
    %262 = tpu.matmul %261, %3, %cst_236 {dimension_numbers = #tpu.dot_dimension_numbers<[1], [0], [0], [1], [0, 0, 1, 1], [], []>} : vector<13x108xf32>, vector<108x16xf32>, vector<13x16xf32> -> vector<13x16xf32>
    %263 = vector.broadcast %5 : vector<1x16xf32> to vector<13x16xf32>
    %264 = arith.mulf %262, %263 : vector<13x16xf32>
    %265 = vector.broadcast %7 : vector<1x16xf32> to vector<13x16xf32>
    %266 = arith.addf %264, %265 : vector<13x16xf32>
    %cst_237 = arith.constant 0.000000e+00 : f32
    %267 = vector.broadcast %cst_237 : f32 to vector<13x16xf32>
    %268 = arith.maximumf %266, %267 : vector<13x16xf32>
    %c1_238 = arith.constant 1 : index
    %c8_239 = arith.constant 8 : index
    %c0_240 = arith.constant 0 : index
    %c0_241 = arith.constant 0 : index
    %269 = vector.load %arg15[%c1_238, %c8_239, %c0_240, %c0_241] : memref<2x14x14x16xf32, #tpu.memory_space<vmem>>, vector<1x1x13x16xf32>
    %270 = vector.shape_cast %269 : vector<1x1x13x16xf32> to vector<13x16xf32>
    %271 = vector.shape_cast %268 : vector<13x16xf32> to vector<1x1x13x16xf32>
    tpu.vector_store %arg15[%c1_238, %c8_239, %c0_240, %c0_241], %271 {strides = array<i32>} : memref<2x14x14x16xf32, #tpu.memory_space<vmem>>, vector<1x1x13x16xf32>,
    %c0_242 = arith.constant 0 : index
    %c1_243 = arith.constant 1 : index
    %c9_244 = arith.constant 9 : index
    %c0_245 = arith.constant 0 : index
    %c0_246 = arith.constant 0 : index
    %272 = vector.load %arg1[%c0_242, %c1_243, %c9_244, %c0_245, %c0_246] : memref<1x2x13x13x108xf32, #tpu.memory_space<vmem>>, vector<1x1x1x13x108xf32>
    %273 = vector.shape_cast %272 : vector<1x1x1x13x108xf32> to vector<13x108xf32>
    %cst_247 = arith.constant dense<0.000000e+00> : vector<13x16xf32>
    %274 = tpu.matmul %273, %3, %cst_247 {dimension_numbers = #tpu.dot_dimension_numbers<[1], [0], [0], [1], [0, 0, 1, 1], [], []>} : vector<13x108xf32>, vector<108x16xf32>, vector<13x16xf32> -> vector<13x16xf32>
    %275 = vector.broadcast %5 : vector<1x16xf32> to vector<13x16xf32>
    %276 = arith.mulf %274, %275 : vector<13x16xf32>
    %277 = vector.broadcast %7 : vector<1x16xf32> to vector<13x16xf32>
    %278 = arith.addf %276, %277 : vector<13x16xf32>
    %cst_248 = arith.constant 0.000000e+00 : f32
    %279 = vector.broadcast %cst_248 : f32 to vector<13x16xf32>
    %280 = arith.maximumf %278, %279 : vector<13x16xf32>
    %c1_249 = arith.constant 1 : index
    %c9_250 = arith.constant 9 : index
    %c0_251 = arith.constant 0 : index
    %c0_252 = arith.constant 0 : index
    %281 = vector.load %arg15[%c1_249, %c9_250, %c0_251, %c0_252] : memref<2x14x14x16xf32, #tpu.memory_space<vmem>>, vector<1x1x13x16xf32>
    %282 = vector.shape_cast %281 : vector<1x1x13x16xf32> to vector<13x16xf32>
    %283 = vector.shape_cast %280 : vector<13x16xf32> to vector<1x1x13x16xf32>
    tpu.vector_store %arg15[%c1_249, %c9_250, %c0_251, %c0_252], %283 {strides = array<i32>} : memref<2x14x14x16xf32, #tpu.memory_space<vmem>>, vector<1x1x13x16xf32>,
    %c0_253 = arith.constant 0 : index
    %c1_254 = arith.constant 1 : index
    %c10_255 = arith.constant 10 : index
    %c0_256 = arith.constant 0 : index
    %c0_257 = arith.constant 0 : index
    %284 = vector.load %arg1[%c0_253, %c1_254, %c10_255, %c0_256, %c0_257] : memref<1x2x13x13x108xf32, #tpu.memory_space<vmem>>, vector<1x1x1x13x108xf32>
    %285 = vector.shape_cast %284 : vector<1x1x1x13x108xf32> to vector<13x108xf32>
    %cst_258 = arith.constant dense<0.000000e+00> : vector<13x16xf32>
    %286 = tpu.matmul %285, %3, %cst_258 {dimension_numbers = #tpu.dot_dimension_numbers<[1], [0], [0], [1], [0, 0, 1, 1], [], []>} : vector<13x108xf32>, vector<108x16xf32>, vector<13x16xf32> -> vector<13x16xf32>
    %287 = vector.broadcast %5 : vector<1x16xf32> to vector<13x16xf32>
    %288 = arith.mulf %286, %287 : vector<13x16xf32>
    %289 = vector.broadcast %7 : vector<1x16xf32> to vector<13x16xf32>
    %290 = arith.addf %288, %289 : vector<13x16xf32>
    %cst_259 = arith.constant 0.000000e+00 : f32
    %291 = vector.broadcast %cst_259 : f32 to vector<13x16xf32>
    %292 = arith.maximumf %290, %291 : vector<13x16xf32>
    %c1_260 = arith.constant 1 : index
    %c10_261 = arith.constant 10 : index
    %c0_262 = arith.constant 0 : index
    %c0_263 = arith.constant 0 : index
    %293 = vector.load %arg15[%c1_260, %c10_261, %c0_262, %c0_263] : memref<2x14x14x16xf32, #tpu.memory_space<vmem>>, vector<1x1x13x16xf32>
    %294 = vector.shape_cast %293 : vector<1x1x13x16xf32> to vector<13x16xf32>
    %295 = vector.shape_cast %292 : vector<13x16xf32> to vector<1x1x13x16xf32>
    tpu.vector_store %arg15[%c1_260, %c10_261, %c0_262, %c0_263], %295 {strides = array<i32>} : memref<2x14x14x16xf32, #tpu.memory_space<vmem>>, vector<1x1x13x16xf32>,
    %c0_264 = arith.constant 0 : index
    %c1_265 = arith.constant 1 : index
    %c11_266 = arith.constant 11 : index
    %c0_267 = arith.constant 0 : index
    %c0_268 = arith.constant 0 : index
    %296 = vector.load %arg1[%c0_264, %c1_265, %c11_266, %c0_267, %c0_268] : memref<1x2x13x13x108xf32, #tpu.memory_space<vmem>>, vector<1x1x1x13x108xf32>
    %297 = vector.shape_cast %296 : vector<1x1x1x13x108xf32> to vector<13x108xf32>
    %cst_269 = arith.constant dense<0.000000e+00> : vector<13x16xf32>
    %298 = tpu.matmul %297, %3, %cst_269 {dimension_numbers = #tpu.dot_dimension_numbers<[1], [0], [0], [1], [0, 0, 1, 1], [], []>} : vector<13x108xf32>, vector<108x16xf32>, vector<13x16xf32> -> vector<13x16xf32>
    %299 = vector.broadcast %5 : vector<1x16xf32> to vector<13x16xf32>
    %300 = arith.mulf %298, %299 : vector<13x16xf32>
    %301 = vector.broadcast %7 : vector<1x16xf32> to vector<13x16xf32>
    %302 = arith.addf %300, %301 : vector<13x16xf32>
    %cst_270 = arith.constant 0.000000e+00 : f32
    %303 = vector.broadcast %cst_270 : f32 to vector<13x16xf32>
    %304 = arith.maximumf %302, %303 : vector<13x16xf32>
    %c1_271 = arith.constant 1 : index
    %c11_272 = arith.constant 11 : index
    %c0_273 = arith.constant 0 : index
    %c0_274 = arith.constant 0 : index
    %305 = vector.load %arg15[%c1_271, %c11_272, %c0_273, %c0_274] : memref<2x14x14x16xf32, #tpu.memory_space<vmem>>, vector<1x1x13x16xf32>
    %306 = vector.shape_cast %305 : vector<1x1x13x16xf32> to vector<13x16xf32>
    %307 = vector.shape_cast %304 : vector<13x16xf32> to vector<1x1x13x16xf32>
    tpu.vector_store %arg15[%c1_271, %c11_272, %c0_273, %c0_274], %307 {strides = array<i32>} : memref<2x14x14x16xf32, #tpu.memory_space<vmem>>, vector<1x1x13x16xf32>,
    %c0_275 = arith.constant 0 : index
    %c1_276 = arith.constant 1 : index
    %c12_277 = arith.constant 12 : index
    %c0_278 = arith.constant 0 : index
    %c0_279 = arith.constant 0 : index
    %308 = vector.load %arg1[%c0_275, %c1_276, %c12_277, %c0_278, %c0_279] : memref<1x2x13x13x108xf32, #tpu.memory_space<vmem>>, vector<1x1x1x13x108xf32>
    %309 = vector.shape_cast %308 : vector<1x1x1x13x108xf32> to vector<13x108xf32>
    %cst_280 = arith.constant dense<0.000000e+00> : vector<13x16xf32>
    %310 = tpu.matmul %309, %3, %cst_280 {dimension_numbers = #tpu.dot_dimension_numbers<[1], [0], [0], [1], [0, 0, 1, 1], [], []>} : vector<13x108xf32>, vector<108x16xf32>, vector<13x16xf32> -> vector<13x16xf32>
    %311 = vector.broadcast %5 : vector<1x16xf32> to vector<13x16xf32>
    %312 = arith.mulf %310, %311 : vector<13x16xf32>
    %313 = vector.broadcast %7 : vector<1x16xf32> to vector<13x16xf32>
    %314 = arith.addf %312, %313 : vector<13x16xf32>
    %cst_281 = arith.constant 0.000000e+00 : f32
    %315 = vector.broadcast %cst_281 : f32 to vector<13x16xf32>
    %316 = arith.maximumf %314, %315 : vector<13x16xf32>
    %c1_282 = arith.constant 1 : index
    %c12_283 = arith.constant 12 : index
    %c0_284 = arith.constant 0 : index
    %c0_285 = arith.constant 0 : index
    %317 = vector.load %arg15[%c1_282, %c12_283, %c0_284, %c0_285] : memref<2x14x14x16xf32, #tpu.memory_space<vmem>>, vector<1x1x13x16xf32>
    %318 = vector.shape_cast %317 : vector<1x1x13x16xf32> to vector<13x16xf32>
    %319 = vector.shape_cast %316 : vector<13x16xf32> to vector<1x1x13x16xf32>
    tpu.vector_store %arg15[%c1_282, %c12_283, %c0_284, %c0_285], %319 {strides = array<i32>} : memref<2x14x14x16xf32, #tpu.memory_space<vmem>>, vector<1x1x13x16xf32>,
    %c0_286 = arith.constant 0 : index
    %c0_287 = arith.constant 0 : index
    %c0_288 = arith.constant 0 : index
    %c0_289 = arith.constant 0 : index
    %320 = vector.load %arg15[%c0_286, %c0_287, %c0_288, %c0_289] : memref<2x14x14x16xf32, #tpu.memory_space<vmem>>, vector<2x1x14x16xf32>
    %321 = vector.shape_cast %320 : vector<2x1x14x16xf32> to vector<2x14x16xf32>
    %c0_290 = arith.constant 0 : index
    %c1_291 = arith.constant 1 : index
    %c0_292 = arith.constant 0 : index
    %c0_293 = arith.constant 0 : index
    %322 = vector.load %arg15[%c0_290, %c1_291, %c0_292, %c0_293] : memref<2x14x14x16xf32, #tpu.memory_space<vmem>>, vector<2x1x14x16xf32>
    %323 = vector.shape_cast %322 : vector<2x1x14x16xf32> to vector<2x14x16xf32>
    %324 = arith.maximumf %321, %323 : vector<2x14x16xf32>
    %c0_294 = arith.constant 0 : index
    %c0_295 = arith.constant 0 : index
    %c0_296 = arith.constant 0 : index
    %c0_297 = arith.constant 0 : index
    %325 = vector.load %arg16[%c0_294, %c0_295, %c0_296, %c0_297] : memref<2x7x14x16xf32, #tpu.memory_space<vmem>>, vector<2x1x14x16xf32>
    %326 = vector.shape_cast %325 : vector<2x1x14x16xf32> to vector<2x14x16xf32>
    %327 = vector.shape_cast %324 : vector<2x14x16xf32> to vector<2x1x14x16xf32>
    tpu.vector_store %arg16[%c0_294, %c0_295, %c0_296, %c0_297], %327 {strides = array<i32>} : memref<2x7x14x16xf32, #tpu.memory_space<vmem>>, vector<2x1x14x16xf32>,
    %c0_298 = arith.constant 0 : index
    %c2_299 = arith.constant 2 : index
    %c0_300 = arith.constant 0 : index
    %c0_301 = arith.constant 0 : index
    %328 = vector.load %arg15[%c0_298, %c2_299, %c0_300, %c0_301] : memref<2x14x14x16xf32, #tpu.memory_space<vmem>>, vector<2x1x14x16xf32>
    %329 = vector.shape_cast %328 : vector<2x1x14x16xf32> to vector<2x14x16xf32>
    %c0_302 = arith.constant 0 : index
    %c3_303 = arith.constant 3 : index
    %c0_304 = arith.constant 0 : index
    %c0_305 = arith.constant 0 : index
    %330 = vector.load %arg15[%c0_302, %c3_303, %c0_304, %c0_305] : memref<2x14x14x16xf32, #tpu.memory_space<vmem>>, vector<2x1x14x16xf32>
    %331 = vector.shape_cast %330 : vector<2x1x14x16xf32> to vector<2x14x16xf32>
    %332 = arith.maximumf %329, %331 : vector<2x14x16xf32>
    %c0_306 = arith.constant 0 : index
    %c1_307 = arith.constant 1 : index
    %c0_308 = arith.constant 0 : index
    %c0_309 = arith.constant 0 : index
    %333 = vector.load %arg16[%c0_306, %c1_307, %c0_308, %c0_309] : memref<2x7x14x16xf32, #tpu.memory_space<vmem>>, vector<2x1x14x16xf32>
    %334 = vector.shape_cast %333 : vector<2x1x14x16xf32> to vector<2x14x16xf32>
    %335 = vector.shape_cast %332 : vector<2x14x16xf32> to vector<2x1x14x16xf32>
    tpu.vector_store %arg16[%c0_306, %c1_307, %c0_308, %c0_309], %335 {strides = array<i32>} : memref<2x7x14x16xf32, #tpu.memory_space<vmem>>, vector<2x1x14x16xf32>,
    %c0_310 = arith.constant 0 : index
    %c4_311 = arith.constant 4 : index
    %c0_312 = arith.constant 0 : index
    %c0_313 = arith.constant 0 : index
    %336 = vector.load %arg15[%c0_310, %c4_311, %c0_312, %c0_313] : memref<2x14x14x16xf32, #tpu.memory_space<vmem>>, vector<2x1x14x16xf32>
    %337 = vector.shape_cast %336 : vector<2x1x14x16xf32> to vector<2x14x16xf32>
    %c0_314 = arith.constant 0 : index
    %c5_315 = arith.constant 5 : index
    %c0_316 = arith.constant 0 : index
    %c0_317 = arith.constant 0 : index
    %338 = vector.load %arg15[%c0_314, %c5_315, %c0_316, %c0_317] : memref<2x14x14x16xf32, #tpu.memory_space<vmem>>, vector<2x1x14x16xf32>
    %339 = vector.shape_cast %338 : vector<2x1x14x16xf32> to vector<2x14x16xf32>
    %340 = arith.maximumf %337, %339 : vector<2x14x16xf32>
    %c0_318 = arith.constant 0 : index
    %c2_319 = arith.constant 2 : index
    %c0_320 = arith.constant 0 : index
    %c0_321 = arith.constant 0 : index
    %341 = vector.load %arg16[%c0_318, %c2_319, %c0_320, %c0_321] : memref<2x7x14x16xf32, #tpu.memory_space<vmem>>, vector<2x1x14x16xf32>
    %342 = vector.shape_cast %341 : vector<2x1x14x16xf32> to vector<2x14x16xf32>
    %343 = vector.shape_cast %340 : vector<2x14x16xf32> to vector<2x1x14x16xf32>
    tpu.vector_store %arg16[%c0_318, %c2_319, %c0_320, %c0_321], %343 {strides = array<i32>} : memref<2x7x14x16xf32, #tpu.memory_space<vmem>>, vector<2x1x14x16xf32>,
    %c0_322 = arith.constant 0 : index
    %c6_323 = arith.constant 6 : index
    %c0_324 = arith.constant 0 : index
    %c0_325 = arith.constant 0 : index
    %344 = vector.load %arg15[%c0_322, %c6_323, %c0_324, %c0_325] : memref<2x14x14x16xf32, #tpu.memory_space<vmem>>, vector<2x1x14x16xf32>
    %345 = vector.shape_cast %344 : vector<2x1x14x16xf32> to vector<2x14x16xf32>
    %c0_326 = arith.constant 0 : index
    %c7_327 = arith.constant 7 : index
    %c0_328 = arith.constant 0 : index
    %c0_329 = arith.constant 0 : index
    %346 = vector.load %arg15[%c0_326, %c7_327, %c0_328, %c0_329] : memref<2x14x14x16xf32, #tpu.memory_space<vmem>>, vector<2x1x14x16xf32>
    %347 = vector.shape_cast %346 : vector<2x1x14x16xf32> to vector<2x14x16xf32>
    %348 = arith.maximumf %345, %347 : vector<2x14x16xf32>
    %c0_330 = arith.constant 0 : index
    %c3_331 = arith.constant 3 : index
    %c0_332 = arith.constant 0 : index
    %c0_333 = arith.constant 0 : index
    %349 = vector.load %arg16[%c0_330, %c3_331, %c0_332, %c0_333] : memref<2x7x14x16xf32, #tpu.memory_space<vmem>>, vector<2x1x14x16xf32>
    %350 = vector.shape_cast %349 : vector<2x1x14x16xf32> to vector<2x14x16xf32>
    %351 = vector.shape_cast %348 : vector<2x14x16xf32> to vector<2x1x14x16xf32>
    tpu.vector_store %arg16[%c0_330, %c3_331, %c0_332, %c0_333], %351 {strides = array<i32>} : memref<2x7x14x16xf32, #tpu.memory_space<vmem>>, vector<2x1x14x16xf32>,
    %c0_334 = arith.constant 0 : index
    %c8_335 = arith.constant 8 : index
    %c0_336 = arith.constant 0 : index
    %c0_337 = arith.constant 0 : index
    %352 = vector.load %arg15[%c0_334, %c8_335, %c0_336, %c0_337] : memref<2x14x14x16xf32, #tpu.memory_space<vmem>>, vector<2x1x14x16xf32>
    %353 = vector.shape_cast %352 : vector<2x1x14x16xf32> to vector<2x14x16xf32>
    %c0_338 = arith.constant 0 : index
    %c9_339 = arith.constant 9 : index
    %c0_340 = arith.constant 0 : index
    %c0_341 = arith.constant 0 : index
    %354 = vector.load %arg15[%c0_338, %c9_339, %c0_340, %c0_341] : memref<2x14x14x16xf32, #tpu.memory_space<vmem>>, vector<2x1x14x16xf32>
    %355 = vector.shape_cast %354 : vector<2x1x14x16xf32> to vector<2x14x16xf32>
    %356 = arith.maximumf %353, %355 : vector<2x14x16xf32>
    %c0_342 = arith.constant 0 : index
    %c4_343 = arith.constant 4 : index
    %c0_344 = arith.constant 0 : index
    %c0_345 = arith.constant 0 : index
    %357 = vector.load %arg16[%c0_342, %c4_343, %c0_344, %c0_345] : memref<2x7x14x16xf32, #tpu.memory_space<vmem>>, vector<2x1x14x16xf32>
    %358 = vector.shape_cast %357 : vector<2x1x14x16xf32> to vector<2x14x16xf32>
    %359 = vector.shape_cast %356 : vector<2x14x16xf32> to vector<2x1x14x16xf32>
    tpu.vector_store %arg16[%c0_342, %c4_343, %c0_344, %c0_345], %359 {strides = array<i32>} : memref<2x7x14x16xf32, #tpu.memory_space<vmem>>, vector<2x1x14x16xf32>,
    %c0_346 = arith.constant 0 : index
    %c10_347 = arith.constant 10 : index
    %c0_348 = arith.constant 0 : index
    %c0_349 = arith.constant 0 : index
    %360 = vector.load %arg15[%c0_346, %c10_347, %c0_348, %c0_349] : memref<2x14x14x16xf32, #tpu.memory_space<vmem>>, vector<2x1x14x16xf32>
    %361 = vector.shape_cast %360 : vector<2x1x14x16xf32> to vector<2x14x16xf32>
    %c0_350 = arith.constant 0 : index
    %c11_351 = arith.constant 11 : index
    %c0_352 = arith.constant 0 : index
    %c0_353 = arith.constant 0 : index
    %362 = vector.load %arg15[%c0_350, %c11_351, %c0_352, %c0_353] : memref<2x14x14x16xf32, #tpu.memory_space<vmem>>, vector<2x1x14x16xf32>
    %363 = vector.shape_cast %362 : vector<2x1x14x16xf32> to vector<2x14x16xf32>
    %364 = arith.maximumf %361, %363 : vector<2x14x16xf32>
    %c0_354 = arith.constant 0 : index
    %c5_355 = arith.constant 5 : index
    %c0_356 = arith.constant 0 : index
    %c0_357 = arith.constant 0 : index
    %365 = vector.load %arg16[%c0_354, %c5_355, %c0_356, %c0_357] : memref<2x7x14x16xf32, #tpu.memory_space<vmem>>, vector<2x1x14x16xf32>
    %366 = vector.shape_cast %365 : vector<2x1x14x16xf32> to vector<2x14x16xf32>
    %367 = vector.shape_cast %364 : vector<2x14x16xf32> to vector<2x1x14x16xf32>
    tpu.vector_store %arg16[%c0_354, %c5_355, %c0_356, %c0_357], %367 {strides = array<i32>} : memref<2x7x14x16xf32, #tpu.memory_space<vmem>>, vector<2x1x14x16xf32>,
    %c0_358 = arith.constant 0 : index
    %c12_359 = arith.constant 12 : index
    %c0_360 = arith.constant 0 : index
    %c0_361 = arith.constant 0 : index
    %368 = vector.load %arg15[%c0_358, %c12_359, %c0_360, %c0_361] : memref<2x14x14x16xf32, #tpu.memory_space<vmem>>, vector<2x1x14x16xf32>
    %369 = vector.shape_cast %368 : vector<2x1x14x16xf32> to vector<2x14x16xf32>
    %c0_362 = arith.constant 0 : index
    %c13 = arith.constant 13 : index
    %c0_363 = arith.constant 0 : index
    %c0_364 = arith.constant 0 : index
    %370 = vector.load %arg15[%c0_362, %c13, %c0_363, %c0_364] : memref<2x14x14x16xf32, #tpu.memory_space<vmem>>, vector<2x1x14x16xf32>
    %371 = vector.shape_cast %370 : vector<2x1x14x16xf32> to vector<2x14x16xf32>
    %372 = arith.maximumf %369, %371 : vector<2x14x16xf32>
    %c0_365 = arith.constant 0 : index
    %c6_366 = arith.constant 6 : index
    %c0_367 = arith.constant 0 : index
    %c0_368 = arith.constant 0 : index
    %373 = vector.load %arg16[%c0_365, %c6_366, %c0_367, %c0_368] : memref<2x7x14x16xf32, #tpu.memory_space<vmem>>, vector<2x1x14x16xf32>
    %374 = vector.shape_cast %373 : vector<2x1x14x16xf32> to vector<2x14x16xf32>
    %375 = vector.shape_cast %372 : vector<2x14x16xf32> to vector<2x1x14x16xf32>
    tpu.vector_store %arg16[%c0_365, %c6_366, %c0_367, %c0_368], %375 {strides = array<i32>} : memref<2x7x14x16xf32, #tpu.memory_space<vmem>>, vector<2x1x14x16xf32>,
    %c0_369 = arith.constant 0 : index
    %c0_370 = arith.constant 0 : index
    %c0_371 = arith.constant 0 : index
    %c0_372 = arith.constant 0 : index
    %376 = vector.load %arg16[%c0_369, %c0_370, %c0_371, %c0_372] : memref<2x7x14x16xf32, #tpu.memory_space<vmem>>, vector<2x7x1x16xf32>
    %377 = vector.shape_cast %376 : vector<2x7x1x16xf32> to vector<2x7x16xf32>
    %c0_373 = arith.constant 0 : index
    %c0_374 = arith.constant 0 : index
    %c1_375 = arith.constant 1 : index
    %c0_376 = arith.constant 0 : index
    %378 = vector.load %arg16[%c0_373, %c0_374, %c1_375, %c0_376] : memref<2x7x14x16xf32, #tpu.memory_space<vmem>>, vector<2x7x1x16xf32>
    %379 = vector.shape_cast %378 : vector<2x7x1x16xf32> to vector<2x7x16xf32>
    %380 = arith.maximumf %377, %379 : vector<2x7x16xf32>
    %c0_377 = arith.constant 0 : index
    %c0_378 = arith.constant 0 : index
    %c0_379 = arith.constant 0 : index
    %c0_380 = arith.constant 0 : index
    %381 = vector.load %arg17[%c0_377, %c0_378, %c0_379, %c0_380] : memref<2x7x7x16xf32, #tpu.memory_space<vmem>>, vector<2x7x1x16xf32>
    %382 = vector.shape_cast %381 : vector<2x7x1x16xf32> to vector<2x7x16xf32>
    %383 = vector.shape_cast %380 : vector<2x7x16xf32> to vector<2x7x1x16xf32>
    tpu.vector_store %arg17[%c0_377, %c0_378, %c0_379, %c0_380], %383 {strides = array<i32>} : memref<2x7x7x16xf32, #tpu.memory_space<vmem>>, vector<2x7x1x16xf32>,
    %c0_381 = arith.constant 0 : index
    %c0_382 = arith.constant 0 : index
    %c2_383 = arith.constant 2 : index
    %c0_384 = arith.constant 0 : index
    %384 = vector.load %arg16[%c0_381, %c0_382, %c2_383, %c0_384] : memref<2x7x14x16xf32, #tpu.memory_space<vmem>>, vector<2x7x1x16xf32>
    %385 = vector.shape_cast %384 : vector<2x7x1x16xf32> to vector<2x7x16xf32>
    %c0_385 = arith.constant 0 : index
    %c0_386 = arith.constant 0 : index
    %c3_387 = arith.constant 3 : index
    %c0_388 = arith.constant 0 : index
    %386 = vector.load %arg16[%c0_385, %c0_386, %c3_387, %c0_388] : memref<2x7x14x16xf32, #tpu.memory_space<vmem>>, vector<2x7x1x16xf32>
    %387 = vector.shape_cast %386 : vector<2x7x1x16xf32> to vector<2x7x16xf32>
    %388 = arith.maximumf %385, %387 : vector<2x7x16xf32>
    %c0_389 = arith.constant 0 : index
    %c0_390 = arith.constant 0 : index
    %c1_391 = arith.constant 1 : index
    %c0_392 = arith.constant 0 : index
    %389 = vector.load %arg17[%c0_389, %c0_390, %c1_391, %c0_392] : memref<2x7x7x16xf32, #tpu.memory_space<vmem>>, vector<2x7x1x16xf32>
    %390 = vector.shape_cast %389 : vector<2x7x1x16xf32> to vector<2x7x16xf32>
    %391 = vector.shape_cast %388 : vector<2x7x16xf32> to vector<2x7x1x16xf32>
    tpu.vector_store %arg17[%c0_389, %c0_390, %c1_391, %c0_392], %391 {strides = array<i32>} : memref<2x7x7x16xf32, #tpu.memory_space<vmem>>, vector<2x7x1x16xf32>,
    %c0_393 = arith.constant 0 : index
    %c0_394 = arith.constant 0 : index
    %c4_395 = arith.constant 4 : index
    %c0_396 = arith.constant 0 : index
    %392 = vector.load %arg16[%c0_393, %c0_394, %c4_395, %c0_396] : memref<2x7x14x16xf32, #tpu.memory_space<vmem>>, vector<2x7x1x16xf32>
    %393 = vector.shape_cast %392 : vector<2x7x1x16xf32> to vector<2x7x16xf32>
    %c0_397 = arith.constant 0 : index
    %c0_398 = arith.constant 0 : index
    %c5_399 = arith.constant 5 : index
    %c0_400 = arith.constant 0 : index
    %394 = vector.load %arg16[%c0_397, %c0_398, %c5_399, %c0_400] : memref<2x7x14x16xf32, #tpu.memory_space<vmem>>, vector<2x7x1x16xf32>
    %395 = vector.shape_cast %394 : vector<2x7x1x16xf32> to vector<2x7x16xf32>
    %396 = arith.maximumf %393, %395 : vector<2x7x16xf32>
    %c0_401 = arith.constant 0 : index
    %c0_402 = arith.constant 0 : index
    %c2_403 = arith.constant 2 : index
    %c0_404 = arith.constant 0 : index
    %397 = vector.load %arg17[%c0_401, %c0_402, %c2_403, %c0_404] : memref<2x7x7x16xf32, #tpu.memory_space<vmem>>, vector<2x7x1x16xf32>
    %398 = vector.shape_cast %397 : vector<2x7x1x16xf32> to vector<2x7x16xf32>
    %399 = vector.shape_cast %396 : vector<2x7x16xf32> to vector<2x7x1x16xf32>
    tpu.vector_store %arg17[%c0_401, %c0_402, %c2_403, %c0_404], %399 {strides = array<i32>} : memref<2x7x7x16xf32, #tpu.memory_space<vmem>>, vector<2x7x1x16xf32>,
    %c0_405 = arith.constant 0 : index
    %c0_406 = arith.constant 0 : index
    %c6_407 = arith.constant 6 : index
    %c0_408 = arith.constant 0 : index
    %400 = vector.load %arg16[%c0_405, %c0_406, %c6_407, %c0_408] : memref<2x7x14x16xf32, #tpu.memory_space<vmem>>, vector<2x7x1x16xf32>
    %401 = vector.shape_cast %400 : vector<2x7x1x16xf32> to vector<2x7x16xf32>
    %c0_409 = arith.constant 0 : index
    %c0_410 = arith.constant 0 : index
    %c7_411 = arith.constant 7 : index
    %c0_412 = arith.constant 0 : index
    %402 = vector.load %arg16[%c0_409, %c0_410, %c7_411, %c0_412] : memref<2x7x14x16xf32, #tpu.memory_space<vmem>>, vector<2x7x1x16xf32>
    %403 = vector.shape_cast %402 : vector<2x7x1x16xf32> to vector<2x7x16xf32>
    %404 = arith.maximumf %401, %403 : vector<2x7x16xf32>
    %c0_413 = arith.constant 0 : index
    %c0_414 = arith.constant 0 : index
    %c3_415 = arith.constant 3 : index
    %c0_416 = arith.constant 0 : index
    %405 = vector.load %arg17[%c0_413, %c0_414, %c3_415, %c0_416] : memref<2x7x7x16xf32, #tpu.memory_space<vmem>>, vector<2x7x1x16xf32>
    %406 = vector.shape_cast %405 : vector<2x7x1x16xf32> to vector<2x7x16xf32>
    %407 = vector.shape_cast %404 : vector<2x7x16xf32> to vector<2x7x1x16xf32>
    tpu.vector_store %arg17[%c0_413, %c0_414, %c3_415, %c0_416], %407 {strides = array<i32>} : memref<2x7x7x16xf32, #tpu.memory_space<vmem>>, vector<2x7x1x16xf32>,
    %c0_417 = arith.constant 0 : index
    %c0_418 = arith.constant 0 : index
    %c8_419 = arith.constant 8 : index
    %c0_420 = arith.constant 0 : index
    %408 = vector.load %arg16[%c0_417, %c0_418, %c8_419, %c0_420] : memref<2x7x14x16xf32, #tpu.memory_space<vmem>>, vector<2x7x1x16xf32>
    %409 = vector.shape_cast %408 : vector<2x7x1x16xf32> to vector<2x7x16xf32>
    %c0_421 = arith.constant 0 : index
    %c0_422 = arith.constant 0 : index
    %c9_423 = arith.constant 9 : index
    %c0_424 = arith.constant 0 : index
    %410 = vector.load %arg16[%c0_421, %c0_422, %c9_423, %c0_424] : memref<2x7x14x16xf32, #tpu.memory_space<vmem>>, vector<2x7x1x16xf32>
    %411 = vector.shape_cast %410 : vector<2x7x1x16xf32> to vector<2x7x16xf32>
    %412 = arith.maximumf %409, %411 : vector<2x7x16xf32>
    %c0_425 = arith.constant 0 : index
    %c0_426 = arith.constant 0 : index
    %c4_427 = arith.constant 4 : index
    %c0_428 = arith.constant 0 : index
    %413 = vector.load %arg17[%c0_425, %c0_426, %c4_427, %c0_428] : memref<2x7x7x16xf32, #tpu.memory_space<vmem>>, vector<2x7x1x16xf32>
    %414 = vector.shape_cast %413 : vector<2x7x1x16xf32> to vector<2x7x16xf32>
    %415 = vector.shape_cast %412 : vector<2x7x16xf32> to vector<2x7x1x16xf32>
    tpu.vector_store %arg17[%c0_425, %c0_426, %c4_427, %c0_428], %415 {strides = array<i32>} : memref<2x7x7x16xf32, #tpu.memory_space<vmem>>, vector<2x7x1x16xf32>,
    %c0_429 = arith.constant 0 : index
    %c0_430 = arith.constant 0 : index
    %c10_431 = arith.constant 10 : index
    %c0_432 = arith.constant 0 : index
    %416 = vector.load %arg16[%c0_429, %c0_430, %c10_431, %c0_432] : memref<2x7x14x16xf32, #tpu.memory_space<vmem>>, vector<2x7x1x16xf32>
    %417 = vector.shape_cast %416 : vector<2x7x1x16xf32> to vector<2x7x16xf32>
    %c0_433 = arith.constant 0 : index
    %c0_434 = arith.constant 0 : index
    %c11_435 = arith.constant 11 : index
    %c0_436 = arith.constant 0 : index
    %418 = vector.load %arg16[%c0_433, %c0_434, %c11_435, %c0_436] : memref<2x7x14x16xf32, #tpu.memory_space<vmem>>, vector<2x7x1x16xf32>
    %419 = vector.shape_cast %418 : vector<2x7x1x16xf32> to vector<2x7x16xf32>
    %420 = arith.maximumf %417, %419 : vector<2x7x16xf32>
    %c0_437 = arith.constant 0 : index
    %c0_438 = arith.constant 0 : index
    %c5_439 = arith.constant 5 : index
    %c0_440 = arith.constant 0 : index
    %421 = vector.load %arg17[%c0_437, %c0_438, %c5_439, %c0_440] : memref<2x7x7x16xf32, #tpu.memory_space<vmem>>, vector<2x7x1x16xf32>
    %422 = vector.shape_cast %421 : vector<2x7x1x16xf32> to vector<2x7x16xf32>
    %423 = vector.shape_cast %420 : vector<2x7x16xf32> to vector<2x7x1x16xf32>
    tpu.vector_store %arg17[%c0_437, %c0_438, %c5_439, %c0_440], %423 {strides = array<i32>} : memref<2x7x7x16xf32, #tpu.memory_space<vmem>>, vector<2x7x1x16xf32>,
    %c0_441 = arith.constant 0 : index
    %c0_442 = arith.constant 0 : index
    %c12_443 = arith.constant 12 : index
    %c0_444 = arith.constant 0 : index
    %424 = vector.load %arg16[%c0_441, %c0_442, %c12_443, %c0_444] : memref<2x7x14x16xf32, #tpu.memory_space<vmem>>, vector<2x7x1x16xf32>
    %425 = vector.shape_cast %424 : vector<2x7x1x16xf32> to vector<2x7x16xf32>
    %c0_445 = arith.constant 0 : index
    %c0_446 = arith.constant 0 : index
    %c13_447 = arith.constant 13 : index
    %c0_448 = arith.constant 0 : index
    %426 = vector.load %arg16[%c0_445, %c0_446, %c13_447, %c0_448] : memref<2x7x14x16xf32, #tpu.memory_space<vmem>>, vector<2x7x1x16xf32>
    %427 = vector.shape_cast %426 : vector<2x7x1x16xf32> to vector<2x7x16xf32>
    %428 = arith.maximumf %425, %427 : vector<2x7x16xf32>
    %c0_449 = arith.constant 0 : index
    %c0_450 = arith.constant 0 : index
    %c6_451 = arith.constant 6 : index
    %c0_452 = arith.constant 0 : index
    %429 = vector.load %arg17[%c0_449, %c0_450, %c6_451, %c0_452] : memref<2x7x7x16xf32, #tpu.memory_space<vmem>>, vector<2x7x1x16xf32>
    %430 = vector.shape_cast %429 : vector<2x7x1x16xf32> to vector<2x7x16xf32>
    %431 = vector.shape_cast %428 : vector<2x7x16xf32> to vector<2x7x1x16xf32>
    tpu.vector_store %arg17[%c0_449, %c0_450, %c6_451, %c0_452], %431 {strides = array<i32>} : memref<2x7x7x16xf32, #tpu.memory_space<vmem>>, vector<2x7x1x16xf32>,
    %c0_453 = arith.constant 0 : index
    %c0_454 = arith.constant 0 : index
    %c0_455 = arith.constant 0 : index
    %c0_456 = arith.constant 0 : index
    %432 = vector.load %arg17[%c0_453, %c0_454, %c0_455, %c0_456] : memref<2x7x7x16xf32, #tpu.memory_space<vmem>>, vector<2x5x5x16xf32>
    %c0_457 = arith.constant 0 : index
    %c0_458 = arith.constant 0 : index
    %c0_459 = arith.constant 0 : index
    %c0_460 = arith.constant 0 : index
    %433 = vector.load %arg18[%c0_457, %c0_458, %c0_459, %c0_460] : memref<2x5x5x144xf32, #tpu.memory_space<vmem>>, vector<2x5x5x16xf32>
    tpu.vector_store %arg18[%c0_457, %c0_458, %c0_459, %c0_460], %432 {strides = array<i32>} : memref<2x5x5x144xf32, #tpu.memory_space<vmem>>, vector<2x5x5x16xf32>,
    %c0_461 = arith.constant 0 : index
    %c0_462 = arith.constant 0 : index
    %c1_463 = arith.constant 1 : index
    %c0_464 = arith.constant 0 : index
    %434 = vector.load %arg17[%c0_461, %c0_462, %c1_463, %c0_464] : memref<2x7x7x16xf32, #tpu.memory_space<vmem>>, vector<2x5x5x16xf32>
    %c0_465 = arith.constant 0 : index
    %c0_466 = arith.constant 0 : index
    %c0_467 = arith.constant 0 : index
    %c16 = arith.constant 16 : index
    %435 = vector.load %arg18[%c0_465, %c0_466, %c0_467, %c16] : memref<2x5x5x144xf32, #tpu.memory_space<vmem>>, vector<2x5x5x16xf32>
    tpu.vector_store %arg18[%c0_465, %c0_466, %c0_467, %c16], %434 {strides = array<i32>} : memref<2x5x5x144xf32, #tpu.memory_space<vmem>>, vector<2x5x5x16xf32>,
    %c0_468 = arith.constant 0 : index
    %c0_469 = arith.constant 0 : index
    %c2_470 = arith.constant 2 : index
    %c0_471 = arith.constant 0 : index
    %436 = vector.load %arg17[%c0_468, %c0_469, %c2_470, %c0_471] : memref<2x7x7x16xf32, #tpu.memory_space<vmem>>, vector<2x5x5x16xf32>
    %c0_472 = arith.constant 0 : index
    %c0_473 = arith.constant 0 : index
    %c0_474 = arith.constant 0 : index
    %c32 = arith.constant 32 : index
    %437 = vector.load %arg18[%c0_472, %c0_473, %c0_474, %c32] : memref<2x5x5x144xf32, #tpu.memory_space<vmem>>, vector<2x5x5x16xf32>
    tpu.vector_store %arg18[%c0_472, %c0_473, %c0_474, %c32], %436 {strides = array<i32>} : memref<2x5x5x144xf32, #tpu.memory_space<vmem>>, vector<2x5x5x16xf32>,
    %c0_475 = arith.constant 0 : index
    %c1_476 = arith.constant 1 : index
    %c0_477 = arith.constant 0 : index
    %c0_478 = arith.constant 0 : index
    %438 = vector.load %arg17[%c0_475, %c1_476, %c0_477, %c0_478] : memref<2x7x7x16xf32, #tpu.memory_space<vmem>>, vector<2x5x5x16xf32>
    %c0_479 = arith.constant 0 : index
    %c0_480 = arith.constant 0 : index
    %c0_481 = arith.constant 0 : index
    %c48 = arith.constant 48 : index
    %439 = vector.load %arg18[%c0_479, %c0_480, %c0_481, %c48] : memref<2x5x5x144xf32, #tpu.memory_space<vmem>>, vector<2x5x5x16xf32>
    tpu.vector_store %arg18[%c0_479, %c0_480, %c0_481, %c48], %438 {strides = array<i32>} : memref<2x5x5x144xf32, #tpu.memory_space<vmem>>, vector<2x5x5x16xf32>,
    %c0_482 = arith.constant 0 : index
    %c1_483 = arith.constant 1 : index
    %c1_484 = arith.constant 1 : index
    %c0_485 = arith.constant 0 : index
    %440 = vector.load %arg17[%c0_482, %c1_483, %c1_484, %c0_485] : memref<2x7x7x16xf32, #tpu.memory_space<vmem>>, vector<2x5x5x16xf32>
    %c0_486 = arith.constant 0 : index
    %c0_487 = arith.constant 0 : index
    %c0_488 = arith.constant 0 : index
    %c64 = arith.constant 64 : index
    %441 = vector.load %arg18[%c0_486, %c0_487, %c0_488, %c64] : memref<2x5x5x144xf32, #tpu.memory_space<vmem>>, vector<2x5x5x16xf32>
    tpu.vector_store %arg18[%c0_486, %c0_487, %c0_488, %c64], %440 {strides = array<i32>} : memref<2x5x5x144xf32, #tpu.memory_space<vmem>>, vector<2x5x5x16xf32>,
    %c0_489 = arith.constant 0 : index
    %c1_490 = arith.constant 1 : index
    %c2_491 = arith.constant 2 : index
    %c0_492 = arith.constant 0 : index
    %442 = vector.load %arg17[%c0_489, %c1_490, %c2_491, %c0_492] : memref<2x7x7x16xf32, #tpu.memory_space<vmem>>, vector<2x5x5x16xf32>
    %c0_493 = arith.constant 0 : index
    %c0_494 = arith.constant 0 : index
    %c0_495 = arith.constant 0 : index
    %c80 = arith.constant 80 : index
    %443 = vector.load %arg18[%c0_493, %c0_494, %c0_495, %c80] : memref<2x5x5x144xf32, #tpu.memory_space<vmem>>, vector<2x5x5x16xf32>
    tpu.vector_store %arg18[%c0_493, %c0_494, %c0_495, %c80], %442 {strides = array<i32>} : memref<2x5x5x144xf32, #tpu.memory_space<vmem>>, vector<2x5x5x16xf32>,
    %c0_496 = arith.constant 0 : index
    %c2_497 = arith.constant 2 : index
    %c0_498 = arith.constant 0 : index
    %c0_499 = arith.constant 0 : index
    %444 = vector.load %arg17[%c0_496, %c2_497, %c0_498, %c0_499] : memref<2x7x7x16xf32, #tpu.memory_space<vmem>>, vector<2x5x5x16xf32>
    %c0_500 = arith.constant 0 : index
    %c0_501 = arith.constant 0 : index
    %c0_502 = arith.constant 0 : index
    %c96 = arith.constant 96 : index
    %445 = vector.load %arg18[%c0_500, %c0_501, %c0_502, %c96] : memref<2x5x5x144xf32, #tpu.memory_space<vmem>>, vector<2x5x5x16xf32>
    tpu.vector_store %arg18[%c0_500, %c0_501, %c0_502, %c96], %444 {strides = array<i32>} : memref<2x5x5x144xf32, #tpu.memory_space<vmem>>, vector<2x5x5x16xf32>,
    %c0_503 = arith.constant 0 : index
    %c2_504 = arith.constant 2 : index
    %c1_505 = arith.constant 1 : index
    %c0_506 = arith.constant 0 : index
    %446 = vector.load %arg17[%c0_503, %c2_504, %c1_505, %c0_506] : memref<2x7x7x16xf32, #tpu.memory_space<vmem>>, vector<2x5x5x16xf32>
    %c0_507 = arith.constant 0 : index
    %c0_508 = arith.constant 0 : index
    %c0_509 = arith.constant 0 : index
    %c112 = arith.constant 112 : index
    %447 = vector.load %arg18[%c0_507, %c0_508, %c0_509, %c112] : memref<2x5x5x144xf32, #tpu.memory_space<vmem>>, vector<2x5x5x16xf32>
    tpu.vector_store %arg18[%c0_507, %c0_508, %c0_509, %c112], %446 {strides = array<i32>} : memref<2x5x5x144xf32, #tpu.memory_space<vmem>>, vector<2x5x5x16xf32>,
    %c0_510 = arith.constant 0 : index
    %c2_511 = arith.constant 2 : index
    %c2_512 = arith.constant 2 : index
    %c0_513 = arith.constant 0 : index
    %448 = vector.load %arg17[%c0_510, %c2_511, %c2_512, %c0_513] : memref<2x7x7x16xf32, #tpu.memory_space<vmem>>, vector<2x5x5x16xf32>
    %c0_514 = arith.constant 0 : index
    %c0_515 = arith.constant 0 : index
    %c0_516 = arith.constant 0 : index
    %c128 = arith.constant 128 : index
    %449 = vector.load %arg18[%c0_514, %c0_515, %c0_516, %c128] : memref<2x5x5x144xf32, #tpu.memory_space<vmem>>, vector<2x5x5x16xf32>
    tpu.vector_store %arg18[%c0_514, %c0_515, %c0_516, %c128], %448 {strides = array<i32>} : memref<2x5x5x144xf32, #tpu.memory_space<vmem>>, vector<2x5x5x16xf32>,
    %cst_517 = arith.constant 0.000000e+00 : f32
    %450 = vector.broadcast %cst_517 : f32 to vector<2x6x6x16xf32>
    %c0_518 = arith.constant 0 : index
    %c0_519 = arith.constant 0 : index
    %c0_520 = arith.constant 0 : index
    %c0_521 = arith.constant 0 : index
    %451 = vector.load %arg19[%c0_518, %c0_519, %c0_520, %c0_521] : memref<2x6x6x16xf32, #tpu.memory_space<vmem>>, vector<2x6x6x16xf32>
    tpu.vector_store %arg19[%c0_518, %c0_519, %c0_520, %c0_521], %450 {strides = array<i32>} : memref<2x6x6x16xf32, #tpu.memory_space<vmem>>, vector<2x6x6x16xf32>,
    %c0_522 = arith.constant 0 : index
    %c0_523 = arith.constant 0 : index
    %c0_524 = arith.constant 0 : index
    %452 = vector.load %arg5[%c0_522, %c0_523, %c0_524] : memref<1x144x16xf32, #tpu.memory_space<vmem>>, vector<1x144x16xf32>
    %453 = vector.shape_cast %452 : vector<1x144x16xf32> to vector<144x16xf32>
    %c0_525 = arith.constant 0 : index
    %c0_526 = arith.constant 0 : index
    %c0_527 = arith.constant 0 : index
    %454 = vector.load %arg6[%c0_525, %c0_526, %c0_527] : memref<1x1x16xf32, #tpu.memory_space<vmem>>, vector<1x1x16xf32>
    %455 = vector.shape_cast %454 : vector<1x1x16xf32> to vector<1x16xf32>
    %c0_528 = arith.constant 0 : index
    %c0_529 = arith.constant 0 : index
    %c0_530 = arith.constant 0 : index
    %456 = vector.load %arg7[%c0_528, %c0_529, %c0_530] : memref<1x1x16xf32, #tpu.memory_space<vmem>>, vector<1x1x16xf32>
    %457 = vector.shape_cast %456 : vector<1x1x16xf32> to vector<1x16xf32>
    %c0_531 = arith.constant 0 : index
    %c0_532 = arith.constant 0 : index
    %c0_533 = arith.constant 0 : index
    %c0_534 = arith.constant 0 : index
    %458 = vector.load %arg18[%c0_531, %c0_532, %c0_533, %c0_534] : memref<2x5x5x144xf32, #tpu.memory_space<vmem>>, vector<1x1x5x144xf32>
    %459 = vector.shape_cast %458 : vector<1x1x5x144xf32> to vector<5x144xf32>
    %cst_535 = arith.constant dense<0.000000e+00> : vector<5x16xf32>
    %460 = tpu.matmul %459, %453, %cst_535 {dimension_numbers = #tpu.dot_dimension_numbers<[1], [0], [0], [1], [0, 0, 1, 1], [], []>} : vector<5x144xf32>, vector<144x16xf32>, vector<5x16xf32> -> vector<5x16xf32>
    %461 = vector.broadcast %455 : vector<1x16xf32> to vector<5x16xf32>
    %462 = arith.mulf %460, %461 : vector<5x16xf32>
    %463 = vector.broadcast %457 : vector<1x16xf32> to vector<5x16xf32>
    %464 = arith.addf %462, %463 : vector<5x16xf32>
    %cst_536 = arith.constant 0.000000e+00 : f32
    %465 = vector.broadcast %cst_536 : f32 to vector<5x16xf32>
    %466 = arith.maximumf %464, %465 : vector<5x16xf32>
    %c0_537 = arith.constant 0 : index
    %c0_538 = arith.constant 0 : index
    %c0_539 = arith.constant 0 : index
    %c0_540 = arith.constant 0 : index
    %467 = vector.load %arg19[%c0_537, %c0_538, %c0_539, %c0_540] : memref<2x6x6x16xf32, #tpu.memory_space<vmem>>, vector<1x1x5x16xf32>
    %468 = vector.shape_cast %467 : vector<1x1x5x16xf32> to vector<5x16xf32>
    %469 = vector.shape_cast %466 : vector<5x16xf32> to vector<1x1x5x16xf32>
    tpu.vector_store %arg19[%c0_537, %c0_538, %c0_539, %c0_540], %469 {strides = array<i32>} : memref<2x6x6x16xf32, #tpu.memory_space<vmem>>, vector<1x1x5x16xf32>,
    %c0_541 = arith.constant 0 : index
    %c1_542 = arith.constant 1 : index
    %c0_543 = arith.constant 0 : index
    %c0_544 = arith.constant 0 : index
    %470 = vector.load %arg18[%c0_541, %c1_542, %c0_543, %c0_544] : memref<2x5x5x144xf32, #tpu.memory_space<vmem>>, vector<1x1x5x144xf32>
    %471 = vector.shape_cast %470 : vector<1x1x5x144xf32> to vector<5x144xf32>
    %cst_545 = arith.constant dense<0.000000e+00> : vector<5x16xf32>
    %472 = tpu.matmul %471, %453, %cst_545 {dimension_numbers = #tpu.dot_dimension_numbers<[1], [0], [0], [1], [0, 0, 1, 1], [], []>} : vector<5x144xf32>, vector<144x16xf32>, vector<5x16xf32> -> vector<5x16xf32>
    %473 = vector.broadcast %455 : vector<1x16xf32> to vector<5x16xf32>
    %474 = arith.mulf %472, %473 : vector<5x16xf32>
    %475 = vector.broadcast %457 : vector<1x16xf32> to vector<5x16xf32>
    %476 = arith.addf %474, %475 : vector<5x16xf32>
    %cst_546 = arith.constant 0.000000e+00 : f32
    %477 = vector.broadcast %cst_546 : f32 to vector<5x16xf32>
    %478 = arith.maximumf %476, %477 : vector<5x16xf32>
    %c0_547 = arith.constant 0 : index
    %c1_548 = arith.constant 1 : index
    %c0_549 = arith.constant 0 : index
    %c0_550 = arith.constant 0 : index
    %479 = vector.load %arg19[%c0_547, %c1_548, %c0_549, %c0_550] : memref<2x6x6x16xf32, #tpu.memory_space<vmem>>, vector<1x1x5x16xf32>
    %480 = vector.shape_cast %479 : vector<1x1x5x16xf32> to vector<5x16xf32>
    %481 = vector.shape_cast %478 : vector<5x16xf32> to vector<1x1x5x16xf32>
    tpu.vector_store %arg19[%c0_547, %c1_548, %c0_549, %c0_550], %481 {strides = array<i32>} : memref<2x6x6x16xf32, #tpu.memory_space<vmem>>, vector<1x1x5x16xf32>,
    %c0_551 = arith.constant 0 : index
    %c2_552 = arith.constant 2 : index
    %c0_553 = arith.constant 0 : index
    %c0_554 = arith.constant 0 : index
    %482 = vector.load %arg18[%c0_551, %c2_552, %c0_553, %c0_554] : memref<2x5x5x144xf32, #tpu.memory_space<vmem>>, vector<1x1x5x144xf32>
    %483 = vector.shape_cast %482 : vector<1x1x5x144xf32> to vector<5x144xf32>
    %cst_555 = arith.constant dense<0.000000e+00> : vector<5x16xf32>
    %484 = tpu.matmul %483, %453, %cst_555 {dimension_numbers = #tpu.dot_dimension_numbers<[1], [0], [0], [1], [0, 0, 1, 1], [], []>} : vector<5x144xf32>, vector<144x16xf32>, vector<5x16xf32> -> vector<5x16xf32>
    %485 = vector.broadcast %455 : vector<1x16xf32> to vector<5x16xf32>
    %486 = arith.mulf %484, %485 : vector<5x16xf32>
    %487 = vector.broadcast %457 : vector<1x16xf32> to vector<5x16xf32>
    %488 = arith.addf %486, %487 : vector<5x16xf32>
    %cst_556 = arith.constant 0.000000e+00 : f32
    %489 = vector.broadcast %cst_556 : f32 to vector<5x16xf32>
    %490 = arith.maximumf %488, %489 : vector<5x16xf32>
    %c0_557 = arith.constant 0 : index
    %c2_558 = arith.constant 2 : index
    %c0_559 = arith.constant 0 : index
    %c0_560 = arith.constant 0 : index
    %491 = vector.load %arg19[%c0_557, %c2_558, %c0_559, %c0_560] : memref<2x6x6x16xf32, #tpu.memory_space<vmem>>, vector<1x1x5x16xf32>
    %492 = vector.shape_cast %491 : vector<1x1x5x16xf32> to vector<5x16xf32>
    %493 = vector.shape_cast %490 : vector<5x16xf32> to vector<1x1x5x16xf32>
    tpu.vector_store %arg19[%c0_557, %c2_558, %c0_559, %c0_560], %493 {strides = array<i32>} : memref<2x6x6x16xf32, #tpu.memory_space<vmem>>, vector<1x1x5x16xf32>,
    %c0_561 = arith.constant 0 : index
    %c3_562 = arith.constant 3 : index
    %c0_563 = arith.constant 0 : index
    %c0_564 = arith.constant 0 : index
    %494 = vector.load %arg18[%c0_561, %c3_562, %c0_563, %c0_564] : memref<2x5x5x144xf32, #tpu.memory_space<vmem>>, vector<1x1x5x144xf32>
    %495 = vector.shape_cast %494 : vector<1x1x5x144xf32> to vector<5x144xf32>
    %cst_565 = arith.constant dense<0.000000e+00> : vector<5x16xf32>
    %496 = tpu.matmul %495, %453, %cst_565 {dimension_numbers = #tpu.dot_dimension_numbers<[1], [0], [0], [1], [0, 0, 1, 1], [], []>} : vector<5x144xf32>, vector<144x16xf32>, vector<5x16xf32> -> vector<5x16xf32>
    %497 = vector.broadcast %455 : vector<1x16xf32> to vector<5x16xf32>
    %498 = arith.mulf %496, %497 : vector<5x16xf32>
    %499 = vector.broadcast %457 : vector<1x16xf32> to vector<5x16xf32>
    %500 = arith.addf %498, %499 : vector<5x16xf32>
    %cst_566 = arith.constant 0.000000e+00 : f32
    %501 = vector.broadcast %cst_566 : f32 to vector<5x16xf32>
    %502 = arith.maximumf %500, %501 : vector<5x16xf32>
    %c0_567 = arith.constant 0 : index
    %c3_568 = arith.constant 3 : index
    %c0_569 = arith.constant 0 : index
    %c0_570 = arith.constant 0 : index
    %503 = vector.load %arg19[%c0_567, %c3_568, %c0_569, %c0_570] : memref<2x6x6x16xf32, #tpu.memory_space<vmem>>, vector<1x1x5x16xf32>
    %504 = vector.shape_cast %503 : vector<1x1x5x16xf32> to vector<5x16xf32>
    %505 = vector.shape_cast %502 : vector<5x16xf32> to vector<1x1x5x16xf32>
    tpu.vector_store %arg19[%c0_567, %c3_568, %c0_569, %c0_570], %505 {strides = array<i32>} : memref<2x6x6x16xf32, #tpu.memory_space<vmem>>, vector<1x1x5x16xf32>,
    %c0_571 = arith.constant 0 : index
    %c4_572 = arith.constant 4 : index
    %c0_573 = arith.constant 0 : index
    %c0_574 = arith.constant 0 : index
    %506 = vector.load %arg18[%c0_571, %c4_572, %c0_573, %c0_574] : memref<2x5x5x144xf32, #tpu.memory_space<vmem>>, vector<1x1x5x144xf32>
    %507 = vector.shape_cast %506 : vector<1x1x5x144xf32> to vector<5x144xf32>
    %cst_575 = arith.constant dense<0.000000e+00> : vector<5x16xf32>
    %508 = tpu.matmul %507, %453, %cst_575 {dimension_numbers = #tpu.dot_dimension_numbers<[1], [0], [0], [1], [0, 0, 1, 1], [], []>} : vector<5x144xf32>, vector<144x16xf32>, vector<5x16xf32> -> vector<5x16xf32>
    %509 = vector.broadcast %455 : vector<1x16xf32> to vector<5x16xf32>
    %510 = arith.mulf %508, %509 : vector<5x16xf32>
    %511 = vector.broadcast %457 : vector<1x16xf32> to vector<5x16xf32>
    %512 = arith.addf %510, %511 : vector<5x16xf32>
    %cst_576 = arith.constant 0.000000e+00 : f32
    %513 = vector.broadcast %cst_576 : f32 to vector<5x16xf32>
    %514 = arith.maximumf %512, %513 : vector<5x16xf32>
    %c0_577 = arith.constant 0 : index
    %c4_578 = arith.constant 4 : index
    %c0_579 = arith.constant 0 : index
    %c0_580 = arith.constant 0 : index
    %515 = vector.load %arg19[%c0_577, %c4_578, %c0_579, %c0_580] : memref<2x6x6x16xf32, #tpu.memory_space<vmem>>, vector<1x1x5x16xf32>
    %516 = vector.shape_cast %515 : vector<1x1x5x16xf32> to vector<5x16xf32>
    %517 = vector.shape_cast %514 : vector<5x16xf32> to vector<1x1x5x16xf32>
    tpu.vector_store %arg19[%c0_577, %c4_578, %c0_579, %c0_580], %517 {strides = array<i32>} : memref<2x6x6x16xf32, #tpu.memory_space<vmem>>, vector<1x1x5x16xf32>,
    %c1_581 = arith.constant 1 : index
    %c0_582 = arith.constant 0 : index
    %c0_583 = arith.constant 0 : index
    %c0_584 = arith.constant 0 : index
    %518 = vector.load %arg18[%c1_581, %c0_582, %c0_583, %c0_584] : memref<2x5x5x144xf32, #tpu.memory_space<vmem>>, vector<1x1x5x144xf32>
    %519 = vector.shape_cast %518 : vector<1x1x5x144xf32> to vector<5x144xf32>
    %cst_585 = arith.constant dense<0.000000e+00> : vector<5x16xf32>
    %520 = tpu.matmul %519, %453, %cst_585 {dimension_numbers = #tpu.dot_dimension_numbers<[1], [0], [0], [1], [0, 0, 1, 1], [], []>} : vector<5x144xf32>, vector<144x16xf32>, vector<5x16xf32> -> vector<5x16xf32>
    %521 = vector.broadcast %455 : vector<1x16xf32> to vector<5x16xf32>
    %522 = arith.mulf %520, %521 : vector<5x16xf32>
    %523 = vector.broadcast %457 : vector<1x16xf32> to vector<5x16xf32>
    %524 = arith.addf %522, %523 : vector<5x16xf32>
    %cst_586 = arith.constant 0.000000e+00 : f32
    %525 = vector.broadcast %cst_586 : f32 to vector<5x16xf32>
    %526 = arith.maximumf %524, %525 : vector<5x16xf32>
    %c1_587 = arith.constant 1 : index
    %c0_588 = arith.constant 0 : index
    %c0_589 = arith.constant 0 : index
    %c0_590 = arith.constant 0 : index
    %527 = vector.load %arg19[%c1_587, %c0_588, %c0_589, %c0_590] : memref<2x6x6x16xf32, #tpu.memory_space<vmem>>, vector<1x1x5x16xf32>
    %528 = vector.shape_cast %527 : vector<1x1x5x16xf32> to vector<5x16xf32>
    %529 = vector.shape_cast %526 : vector<5x16xf32> to vector<1x1x5x16xf32>
    tpu.vector_store %arg19[%c1_587, %c0_588, %c0_589, %c0_590], %529 {strides = array<i32>} : memref<2x6x6x16xf32, #tpu.memory_space<vmem>>, vector<1x1x5x16xf32>,
    %c1_591 = arith.constant 1 : index
    %c1_592 = arith.constant 1 : index
    %c0_593 = arith.constant 0 : index
    %c0_594 = arith.constant 0 : index
    %530 = vector.load %arg18[%c1_591, %c1_592, %c0_593, %c0_594] : memref<2x5x5x144xf32, #tpu.memory_space<vmem>>, vector<1x1x5x144xf32>
    %531 = vector.shape_cast %530 : vector<1x1x5x144xf32> to vector<5x144xf32>
    %cst_595 = arith.constant dense<0.000000e+00> : vector<5x16xf32>
    %532 = tpu.matmul %531, %453, %cst_595 {dimension_numbers = #tpu.dot_dimension_numbers<[1], [0], [0], [1], [0, 0, 1, 1], [], []>} : vector<5x144xf32>, vector<144x16xf32>, vector<5x16xf32> -> vector<5x16xf32>
    %533 = vector.broadcast %455 : vector<1x16xf32> to vector<5x16xf32>
    %534 = arith.mulf %532, %533 : vector<5x16xf32>
    %535 = vector.broadcast %457 : vector<1x16xf32> to vector<5x16xf32>
    %536 = arith.addf %534, %535 : vector<5x16xf32>
    %cst_596 = arith.constant 0.000000e+00 : f32
    %537 = vector.broadcast %cst_596 : f32 to vector<5x16xf32>
    %538 = arith.maximumf %536, %537 : vector<5x16xf32>
    %c1_597 = arith.constant 1 : index
    %c1_598 = arith.constant 1 : index
    %c0_599 = arith.constant 0 : index
    %c0_600 = arith.constant 0 : index
    %539 = vector.load %arg19[%c1_597, %c1_598, %c0_599, %c0_600] : memref<2x6x6x16xf32, #tpu.memory_space<vmem>>, vector<1x1x5x16xf32>
    %540 = vector.shape_cast %539 : vector<1x1x5x16xf32> to vector<5x16xf32>
    %541 = vector.shape_cast %538 : vector<5x16xf32> to vector<1x1x5x16xf32>
    tpu.vector_store %arg19[%c1_597, %c1_598, %c0_599, %c0_600], %541 {strides = array<i32>} : memref<2x6x6x16xf32, #tpu.memory_space<vmem>>, vector<1x1x5x16xf32>,
    %c1_601 = arith.constant 1 : index
    %c2_602 = arith.constant 2 : index
    %c0_603 = arith.constant 0 : index
    %c0_604 = arith.constant 0 : index
    %542 = vector.load %arg18[%c1_601, %c2_602, %c0_603, %c0_604] : memref<2x5x5x144xf32, #tpu.memory_space<vmem>>, vector<1x1x5x144xf32>
    %543 = vector.shape_cast %542 : vector<1x1x5x144xf32> to vector<5x144xf32>
    %cst_605 = arith.constant dense<0.000000e+00> : vector<5x16xf32>
    %544 = tpu.matmul %543, %453, %cst_605 {dimension_numbers = #tpu.dot_dimension_numbers<[1], [0], [0], [1], [0, 0, 1, 1], [], []>} : vector<5x144xf32>, vector<144x16xf32>, vector<5x16xf32> -> vector<5x16xf32>
    %545 = vector.broadcast %455 : vector<1x16xf32> to vector<5x16xf32>
    %546 = arith.mulf %544, %545 : vector<5x16xf32>
    %547 = vector.broadcast %457 : vector<1x16xf32> to vector<5x16xf32>
    %548 = arith.addf %546, %547 : vector<5x16xf32>
    %cst_606 = arith.constant 0.000000e+00 : f32
    %549 = vector.broadcast %cst_606 : f32 to vector<5x16xf32>
    %550 = arith.maximumf %548, %549 : vector<5x16xf32>
    %c1_607 = arith.constant 1 : index
    %c2_608 = arith.constant 2 : index
    %c0_609 = arith.constant 0 : index
    %c0_610 = arith.constant 0 : index
    %551 = vector.load %arg19[%c1_607, %c2_608, %c0_609, %c0_610] : memref<2x6x6x16xf32, #tpu.memory_space<vmem>>, vector<1x1x5x16xf32>
    %552 = vector.shape_cast %551 : vector<1x1x5x16xf32> to vector<5x16xf32>
    %553 = vector.shape_cast %550 : vector<5x16xf32> to vector<1x1x5x16xf32>
    tpu.vector_store %arg19[%c1_607, %c2_608, %c0_609, %c0_610], %553 {strides = array<i32>} : memref<2x6x6x16xf32, #tpu.memory_space<vmem>>, vector<1x1x5x16xf32>,
    %c1_611 = arith.constant 1 : index
    %c3_612 = arith.constant 3 : index
    %c0_613 = arith.constant 0 : index
    %c0_614 = arith.constant 0 : index
    %554 = vector.load %arg18[%c1_611, %c3_612, %c0_613, %c0_614] : memref<2x5x5x144xf32, #tpu.memory_space<vmem>>, vector<1x1x5x144xf32>
    %555 = vector.shape_cast %554 : vector<1x1x5x144xf32> to vector<5x144xf32>
    %cst_615 = arith.constant dense<0.000000e+00> : vector<5x16xf32>
    %556 = tpu.matmul %555, %453, %cst_615 {dimension_numbers = #tpu.dot_dimension_numbers<[1], [0], [0], [1], [0, 0, 1, 1], [], []>} : vector<5x144xf32>, vector<144x16xf32>, vector<5x16xf32> -> vector<5x16xf32>
    %557 = vector.broadcast %455 : vector<1x16xf32> to vector<5x16xf32>
    %558 = arith.mulf %556, %557 : vector<5x16xf32>
    %559 = vector.broadcast %457 : vector<1x16xf32> to vector<5x16xf32>
    %560 = arith.addf %558, %559 : vector<5x16xf32>
    %cst_616 = arith.constant 0.000000e+00 : f32
    %561 = vector.broadcast %cst_616 : f32 to vector<5x16xf32>
    %562 = arith.maximumf %560, %561 : vector<5x16xf32>
    %c1_617 = arith.constant 1 : index
    %c3_618 = arith.constant 3 : index
    %c0_619 = arith.constant 0 : index
    %c0_620 = arith.constant 0 : index
    %563 = vector.load %arg19[%c1_617, %c3_618, %c0_619, %c0_620] : memref<2x6x6x16xf32, #tpu.memory_space<vmem>>, vector<1x1x5x16xf32>
    %564 = vector.shape_cast %563 : vector<1x1x5x16xf32> to vector<5x16xf32>
    %565 = vector.shape_cast %562 : vector<5x16xf32> to vector<1x1x5x16xf32>
    tpu.vector_store %arg19[%c1_617, %c3_618, %c0_619, %c0_620], %565 {strides = array<i32>} : memref<2x6x6x16xf32, #tpu.memory_space<vmem>>, vector<1x1x5x16xf32>,
    %c1_621 = arith.constant 1 : index
    %c4_622 = arith.constant 4 : index
    %c0_623 = arith.constant 0 : index
    %c0_624 = arith.constant 0 : index
    %566 = vector.load %arg18[%c1_621, %c4_622, %c0_623, %c0_624] : memref<2x5x5x144xf32, #tpu.memory_space<vmem>>, vector<1x1x5x144xf32>
    %567 = vector.shape_cast %566 : vector<1x1x5x144xf32> to vector<5x144xf32>
    %cst_625 = arith.constant dense<0.000000e+00> : vector<5x16xf32>
    %568 = tpu.matmul %567, %453, %cst_625 {dimension_numbers = #tpu.dot_dimension_numbers<[1], [0], [0], [1], [0, 0, 1, 1], [], []>} : vector<5x144xf32>, vector<144x16xf32>, vector<5x16xf32> -> vector<5x16xf32>
    %569 = vector.broadcast %455 : vector<1x16xf32> to vector<5x16xf32>
    %570 = arith.mulf %568, %569 : vector<5x16xf32>
    %571 = vector.broadcast %457 : vector<1x16xf32> to vector<5x16xf32>
    %572 = arith.addf %570, %571 : vector<5x16xf32>
    %cst_626 = arith.constant 0.000000e+00 : f32
    %573 = vector.broadcast %cst_626 : f32 to vector<5x16xf32>
    %574 = arith.maximumf %572, %573 : vector<5x16xf32>
    %c1_627 = arith.constant 1 : index
    %c4_628 = arith.constant 4 : index
    %c0_629 = arith.constant 0 : index
    %c0_630 = arith.constant 0 : index
    %575 = vector.load %arg19[%c1_627, %c4_628, %c0_629, %c0_630] : memref<2x6x6x16xf32, #tpu.memory_space<vmem>>, vector<1x1x5x16xf32>
    %576 = vector.shape_cast %575 : vector<1x1x5x16xf32> to vector<5x16xf32>
    %577 = vector.shape_cast %574 : vector<5x16xf32> to vector<1x1x5x16xf32>
    tpu.vector_store %arg19[%c1_627, %c4_628, %c0_629, %c0_630], %577 {strides = array<i32>} : memref<2x6x6x16xf32, #tpu.memory_space<vmem>>, vector<1x1x5x16xf32>,
    %c0_631 = arith.constant 0 : index
    %c0_632 = arith.constant 0 : index
    %c0_633 = arith.constant 0 : index
    %c0_634 = arith.constant 0 : index
    %578 = vector.load %arg19[%c0_631, %c0_632, %c0_633, %c0_634] : memref<2x6x6x16xf32, #tpu.memory_space<vmem>>, vector<2x1x6x16xf32>
    %579 = vector.shape_cast %578 : vector<2x1x6x16xf32> to vector<2x6x16xf32>
    %c0_635 = arith.constant 0 : index
    %c1_636 = arith.constant 1 : index
    %c0_637 = arith.constant 0 : index
    %c0_638 = arith.constant 0 : index
    %580 = vector.load %arg19[%c0_635, %c1_636, %c0_637, %c0_638] : memref<2x6x6x16xf32, #tpu.memory_space<vmem>>, vector<2x1x6x16xf32>
    %581 = vector.shape_cast %580 : vector<2x1x6x16xf32> to vector<2x6x16xf32>
    %582 = arith.addf %579, %581 : vector<2x6x16xf32>
    %c0_639 = arith.constant 0 : index
    %c0_640 = arith.constant 0 : index
    %c0_641 = arith.constant 0 : index
    %c0_642 = arith.constant 0 : index
    %583 = vector.load %arg20[%c0_639, %c0_640, %c0_641, %c0_642] : memref<2x3x6x16xf32, #tpu.memory_space<vmem>>, vector<2x1x6x16xf32>
    %584 = vector.shape_cast %583 : vector<2x1x6x16xf32> to vector<2x6x16xf32>
    %585 = vector.shape_cast %582 : vector<2x6x16xf32> to vector<2x1x6x16xf32>
    tpu.vector_store %arg20[%c0_639, %c0_640, %c0_641, %c0_642], %585 {strides = array<i32>} : memref<2x3x6x16xf32, #tpu.memory_space<vmem>>, vector<2x1x6x16xf32>,
    %c0_643 = arith.constant 0 : index
    %c2_644 = arith.constant 2 : index
    %c0_645 = arith.constant 0 : index
    %c0_646 = arith.constant 0 : index
    %586 = vector.load %arg19[%c0_643, %c2_644, %c0_645, %c0_646] : memref<2x6x6x16xf32, #tpu.memory_space<vmem>>, vector<2x1x6x16xf32>
    %587 = vector.shape_cast %586 : vector<2x1x6x16xf32> to vector<2x6x16xf32>
    %c0_647 = arith.constant 0 : index
    %c3_648 = arith.constant 3 : index
    %c0_649 = arith.constant 0 : index
    %c0_650 = arith.constant 0 : index
    %588 = vector.load %arg19[%c0_647, %c3_648, %c0_649, %c0_650] : memref<2x6x6x16xf32, #tpu.memory_space<vmem>>, vector<2x1x6x16xf32>
    %589 = vector.shape_cast %588 : vector<2x1x6x16xf32> to vector<2x6x16xf32>
    %590 = arith.addf %587, %589 : vector<2x6x16xf32>
    %c0_651 = arith.constant 0 : index
    %c1_652 = arith.constant 1 : index
    %c0_653 = arith.constant 0 : index
    %c0_654 = arith.constant 0 : index
    %591 = vector.load %arg20[%c0_651, %c1_652, %c0_653, %c0_654] : memref<2x3x6x16xf32, #tpu.memory_space<vmem>>, vector<2x1x6x16xf32>
    %592 = vector.shape_cast %591 : vector<2x1x6x16xf32> to vector<2x6x16xf32>
    %593 = vector.shape_cast %590 : vector<2x6x16xf32> to vector<2x1x6x16xf32>
    tpu.vector_store %arg20[%c0_651, %c1_652, %c0_653, %c0_654], %593 {strides = array<i32>} : memref<2x3x6x16xf32, #tpu.memory_space<vmem>>, vector<2x1x6x16xf32>,
    %c0_655 = arith.constant 0 : index
    %c4_656 = arith.constant 4 : index
    %c0_657 = arith.constant 0 : index
    %c0_658 = arith.constant 0 : index
    %594 = vector.load %arg19[%c0_655, %c4_656, %c0_657, %c0_658] : memref<2x6x6x16xf32, #tpu.memory_space<vmem>>, vector<2x1x6x16xf32>
    %595 = vector.shape_cast %594 : vector<2x1x6x16xf32> to vector<2x6x16xf32>
    %c0_659 = arith.constant 0 : index
    %c5_660 = arith.constant 5 : index
    %c0_661 = arith.constant 0 : index
    %c0_662 = arith.constant 0 : index
    %596 = vector.load %arg19[%c0_659, %c5_660, %c0_661, %c0_662] : memref<2x6x6x16xf32, #tpu.memory_space<vmem>>, vector<2x1x6x16xf32>
    %597 = vector.shape_cast %596 : vector<2x1x6x16xf32> to vector<2x6x16xf32>
    %598 = arith.addf %595, %597 : vector<2x6x16xf32>
    %c0_663 = arith.constant 0 : index
    %c2_664 = arith.constant 2 : index
    %c0_665 = arith.constant 0 : index
    %c0_666 = arith.constant 0 : index
    %599 = vector.load %arg20[%c0_663, %c2_664, %c0_665, %c0_666] : memref<2x3x6x16xf32, #tpu.memory_space<vmem>>, vector<2x1x6x16xf32>
    %600 = vector.shape_cast %599 : vector<2x1x6x16xf32> to vector<2x6x16xf32>
    %601 = vector.shape_cast %598 : vector<2x6x16xf32> to vector<2x1x6x16xf32>
    tpu.vector_store %arg20[%c0_663, %c2_664, %c0_665, %c0_666], %601 {strides = array<i32>} : memref<2x3x6x16xf32, #tpu.memory_space<vmem>>, vector<2x1x6x16xf32>,
    %cst_667 = arith.constant 0.000000e+00 : f32
    %602 = vector.broadcast %cst_667 : f32 to vector<2x128xf32>
    %c0_668 = arith.constant 0 : index
    %c0_669 = arith.constant 0 : index
    %c0_670 = arith.constant 0 : index
    %c0_671 = arith.constant 0 : index
    %603 = vector.load %arg20[%c0_668, %c0_669, %c0_670, %c0_671] : memref<2x3x6x16xf32, #tpu.memory_space<vmem>>, vector<2x1x1x16xf32>
    %604 = vector.shape_cast %603 : vector<2x1x1x16xf32> to vector<2x16xf32>
    %c0_672 = arith.constant 0 : index
    %c0_673 = arith.constant 0 : index
    %c1_674 = arith.constant 1 : index
    %c0_675 = arith.constant 0 : index
    %605 = vector.load %arg20[%c0_672, %c0_673, %c1_674, %c0_675] : memref<2x3x6x16xf32, #tpu.memory_space<vmem>>, vector<2x1x1x16xf32>
    %606 = vector.shape_cast %605 : vector<2x1x1x16xf32> to vector<2x16xf32>
    %607 = arith.addf %604, %606 : vector<2x16xf32>
    %c0_676 = arith.constant 0 : index
    %c0_677 = arith.constant 0 : index
    %c0_678 = arith.constant 0 : index
    %c0_679 = arith.constant 0 : index
    %608 = vector.load %arg8[%c0_676, %c0_677, %c0_678, %c0_679] : memref<1x9x16x128xf32, #tpu.memory_space<vmem>>, vector<1x1x16x128xf32>
    %609 = vector.shape_cast %608 : vector<1x1x16x128xf32> to vector<16x128xf32>
    %cst_680 = arith.constant dense<0.000000e+00> : vector<2x128xf32>
    %610 = tpu.matmul %607, %609, %cst_680 {dimension_numbers = #tpu.dot_dimension_numbers<[1], [0], [0], [1], [0, 0, 1, 1], [], []>} : vector<2x16xf32>, vector<16x128xf32>, vector<2x128xf32> -> vector<2x128xf32>
    %611 = arith.addf %602, %610 : vector<2x128xf32>
    %c0_681 = arith.constant 0 : index
    %c0_682 = arith.constant 0 : index
    %c2_683 = arith.constant 2 : index
    %c0_684 = arith.constant 0 : index
    %612 = vector.load %arg20[%c0_681, %c0_682, %c2_683, %c0_684] : memref<2x3x6x16xf32, #tpu.memory_space<vmem>>, vector<2x1x1x16xf32>
    %613 = vector.shape_cast %612 : vector<2x1x1x16xf32> to vector<2x16xf32>
    %c0_685 = arith.constant 0 : index
    %c0_686 = arith.constant 0 : index
    %c3_687 = arith.constant 3 : index
    %c0_688 = arith.constant 0 : index
    %614 = vector.load %arg20[%c0_685, %c0_686, %c3_687, %c0_688] : memref<2x3x6x16xf32, #tpu.memory_space<vmem>>, vector<2x1x1x16xf32>
    %615 = vector.shape_cast %614 : vector<2x1x1x16xf32> to vector<2x16xf32>
    %616 = arith.addf %613, %615 : vector<2x16xf32>
    %c0_689 = arith.constant 0 : index
    %c1_690 = arith.constant 1 : index
    %c0_691 = arith.constant 0 : index
    %c0_692 = arith.constant 0 : index
    %617 = vector.load %arg8[%c0_689, %c1_690, %c0_691, %c0_692] : memref<1x9x16x128xf32, #tpu.memory_space<vmem>>, vector<1x1x16x128xf32>
    %618 = vector.shape_cast %617 : vector<1x1x16x128xf32> to vector<16x128xf32>
    %cst_693 = arith.constant dense<0.000000e+00> : vector<2x128xf32>
    %619 = tpu.matmul %616, %618, %cst_693 {dimension_numbers = #tpu.dot_dimension_numbers<[1], [0], [0], [1], [0, 0, 1, 1], [], []>} : vector<2x16xf32>, vector<16x128xf32>, vector<2x128xf32> -> vector<2x128xf32>
    %620 = arith.addf %611, %619 : vector<2x128xf32>
    %c0_694 = arith.constant 0 : index
    %c0_695 = arith.constant 0 : index
    %c4_696 = arith.constant 4 : index
    %c0_697 = arith.constant 0 : index
    %621 = vector.load %arg20[%c0_694, %c0_695, %c4_696, %c0_697] : memref<2x3x6x16xf32, #tpu.memory_space<vmem>>, vector<2x1x1x16xf32>
    %622 = vector.shape_cast %621 : vector<2x1x1x16xf32> to vector<2x16xf32>
    %c0_698 = arith.constant 0 : index
    %c0_699 = arith.constant 0 : index
    %c5_700 = arith.constant 5 : index
    %c0_701 = arith.constant 0 : index
    %623 = vector.load %arg20[%c0_698, %c0_699, %c5_700, %c0_701] : memref<2x3x6x16xf32, #tpu.memory_space<vmem>>, vector<2x1x1x16xf32>
    %624 = vector.shape_cast %623 : vector<2x1x1x16xf32> to vector<2x16xf32>
    %625 = arith.addf %622, %624 : vector<2x16xf32>
    %c0_702 = arith.constant 0 : index
    %c2_703 = arith.constant 2 : index
    %c0_704 = arith.constant 0 : index
    %c0_705 = arith.constant 0 : index
    %626 = vector.load %arg8[%c0_702, %c2_703, %c0_704, %c0_705] : memref<1x9x16x128xf32, #tpu.memory_space<vmem>>, vector<1x1x16x128xf32>
    %627 = vector.shape_cast %626 : vector<1x1x16x128xf32> to vector<16x128xf32>
    %cst_706 = arith.constant dense<0.000000e+00> : vector<2x128xf32>
    %628 = tpu.matmul %625, %627, %cst_706 {dimension_numbers = #tpu.dot_dimension_numbers<[1], [0], [0], [1], [0, 0, 1, 1], [], []>} : vector<2x16xf32>, vector<16x128xf32>, vector<2x128xf32> -> vector<2x128xf32>
    %629 = arith.addf %620, %628 : vector<2x128xf32>
    %c0_707 = arith.constant 0 : index
    %c1_708 = arith.constant 1 : index
    %c0_709 = arith.constant 0 : index
    %c0_710 = arith.constant 0 : index
    %630 = vector.load %arg20[%c0_707, %c1_708, %c0_709, %c0_710] : memref<2x3x6x16xf32, #tpu.memory_space<vmem>>, vector<2x1x1x16xf32>
    %631 = vector.shape_cast %630 : vector<2x1x1x16xf32> to vector<2x16xf32>
    %c0_711 = arith.constant 0 : index
    %c1_712 = arith.constant 1 : index
    %c1_713 = arith.constant 1 : index
    %c0_714 = arith.constant 0 : index
    %632 = vector.load %arg20[%c0_711, %c1_712, %c1_713, %c0_714] : memref<2x3x6x16xf32, #tpu.memory_space<vmem>>, vector<2x1x1x16xf32>
    %633 = vector.shape_cast %632 : vector<2x1x1x16xf32> to vector<2x16xf32>
    %634 = arith.addf %631, %633 : vector<2x16xf32>
    %c0_715 = arith.constant 0 : index
    %c3_716 = arith.constant 3 : index
    %c0_717 = arith.constant 0 : index
    %c0_718 = arith.constant 0 : index
    %635 = vector.load %arg8[%c0_715, %c3_716, %c0_717, %c0_718] : memref<1x9x16x128xf32, #tpu.memory_space<vmem>>, vector<1x1x16x128xf32>
    %636 = vector.shape_cast %635 : vector<1x1x16x128xf32> to vector<16x128xf32>
    %cst_719 = arith.constant dense<0.000000e+00> : vector<2x128xf32>
    %637 = tpu.matmul %634, %636, %cst_719 {dimension_numbers = #tpu.dot_dimension_numbers<[1], [0], [0], [1], [0, 0, 1, 1], [], []>} : vector<2x16xf32>, vector<16x128xf32>, vector<2x128xf32> -> vector<2x128xf32>
    %638 = arith.addf %629, %637 : vector<2x128xf32>
    %c0_720 = arith.constant 0 : index
    %c1_721 = arith.constant 1 : index
    %c2_722 = arith.constant 2 : index
    %c0_723 = arith.constant 0 : index
    %639 = vector.load %arg20[%c0_720, %c1_721, %c2_722, %c0_723] : memref<2x3x6x16xf32, #tpu.memory_space<vmem>>, vector<2x1x1x16xf32>
    %640 = vector.shape_cast %639 : vector<2x1x1x16xf32> to vector<2x16xf32>
    %c0_724 = arith.constant 0 : index
    %c1_725 = arith.constant 1 : index
    %c3_726 = arith.constant 3 : index
    %c0_727 = arith.constant 0 : index
    %641 = vector.load %arg20[%c0_724, %c1_725, %c3_726, %c0_727] : memref<2x3x6x16xf32, #tpu.memory_space<vmem>>, vector<2x1x1x16xf32>
    %642 = vector.shape_cast %641 : vector<2x1x1x16xf32> to vector<2x16xf32>
    %643 = arith.addf %640, %642 : vector<2x16xf32>
    %c0_728 = arith.constant 0 : index
    %c4_729 = arith.constant 4 : index
    %c0_730 = arith.constant 0 : index
    %c0_731 = arith.constant 0 : index
    %644 = vector.load %arg8[%c0_728, %c4_729, %c0_730, %c0_731] : memref<1x9x16x128xf32, #tpu.memory_space<vmem>>, vector<1x1x16x128xf32>
    %645 = vector.shape_cast %644 : vector<1x1x16x128xf32> to vector<16x128xf32>
    %cst_732 = arith.constant dense<0.000000e+00> : vector<2x128xf32>
    %646 = tpu.matmul %643, %645, %cst_732 {dimension_numbers = #tpu.dot_dimension_numbers<[1], [0], [0], [1], [0, 0, 1, 1], [], []>} : vector<2x16xf32>, vector<16x128xf32>, vector<2x128xf32> -> vector<2x128xf32>
    %647 = arith.addf %638, %646 : vector<2x128xf32>
    %c0_733 = arith.constant 0 : index
    %c1_734 = arith.constant 1 : index
    %c4_735 = arith.constant 4 : index
    %c0_736 = arith.constant 0 : index
    %648 = vector.load %arg20[%c0_733, %c1_734, %c4_735, %c0_736] : memref<2x3x6x16xf32, #tpu.memory_space<vmem>>, vector<2x1x1x16xf32>
    %649 = vector.shape_cast %648 : vector<2x1x1x16xf32> to vector<2x16xf32>
    %c0_737 = arith.constant 0 : index
    %c1_738 = arith.constant 1 : index
    %c5_739 = arith.constant 5 : index
    %c0_740 = arith.constant 0 : index
    %650 = vector.load %arg20[%c0_737, %c1_738, %c5_739, %c0_740] : memref<2x3x6x16xf32, #tpu.memory_space<vmem>>, vector<2x1x1x16xf32>
    %651 = vector.shape_cast %650 : vector<2x1x1x16xf32> to vector<2x16xf32>
    %652 = arith.addf %649, %651 : vector<2x16xf32>
    %c0_741 = arith.constant 0 : index
    %c5_742 = arith.constant 5 : index
    %c0_743 = arith.constant 0 : index
    %c0_744 = arith.constant 0 : index
    %653 = vector.load %arg8[%c0_741, %c5_742, %c0_743, %c0_744] : memref<1x9x16x128xf32, #tpu.memory_space<vmem>>, vector<1x1x16x128xf32>
    %654 = vector.shape_cast %653 : vector<1x1x16x128xf32> to vector<16x128xf32>
    %cst_745 = arith.constant dense<0.000000e+00> : vector<2x128xf32>
    %655 = tpu.matmul %652, %654, %cst_745 {dimension_numbers = #tpu.dot_dimension_numbers<[1], [0], [0], [1], [0, 0, 1, 1], [], []>} : vector<2x16xf32>, vector<16x128xf32>, vector<2x128xf32> -> vector<2x128xf32>
    %656 = arith.addf %647, %655 : vector<2x128xf32>
    %c0_746 = arith.constant 0 : index
    %c2_747 = arith.constant 2 : index
    %c0_748 = arith.constant 0 : index
    %c0_749 = arith.constant 0 : index
    %657 = vector.load %arg20[%c0_746, %c2_747, %c0_748, %c0_749] : memref<2x3x6x16xf32, #tpu.memory_space<vmem>>, vector<2x1x1x16xf32>
    %658 = vector.shape_cast %657 : vector<2x1x1x16xf32> to vector<2x16xf32>
    %c0_750 = arith.constant 0 : index
    %c2_751 = arith.constant 2 : index
    %c1_752 = arith.constant 1 : index
    %c0_753 = arith.constant 0 : index
    %659 = vector.load %arg20[%c0_750, %c2_751, %c1_752, %c0_753] : memref<2x3x6x16xf32, #tpu.memory_space<vmem>>, vector<2x1x1x16xf32>
    %660 = vector.shape_cast %659 : vector<2x1x1x16xf32> to vector<2x16xf32>
    %661 = arith.addf %658, %660 : vector<2x16xf32>
    %c0_754 = arith.constant 0 : index
    %c6_755 = arith.constant 6 : index
    %c0_756 = arith.constant 0 : index
    %c0_757 = arith.constant 0 : index
    %662 = vector.load %arg8[%c0_754, %c6_755, %c0_756, %c0_757] : memref<1x9x16x128xf32, #tpu.memory_space<vmem>>, vector<1x1x16x128xf32>
    %663 = vector.shape_cast %662 : vector<1x1x16x128xf32> to vector<16x128xf32>
    %cst_758 = arith.constant dense<0.000000e+00> : vector<2x128xf32>
    %664 = tpu.matmul %661, %663, %cst_758 {dimension_numbers = #tpu.dot_dimension_numbers<[1], [0], [0], [1], [0, 0, 1, 1], [], []>} : vector<2x16xf32>, vector<16x128xf32>, vector<2x128xf32> -> vector<2x128xf32>
    %665 = arith.addf %656, %664 : vector<2x128xf32>
    %c0_759 = arith.constant 0 : index
    %c2_760 = arith.constant 2 : index
    %c2_761 = arith.constant 2 : index
    %c0_762 = arith.constant 0 : index
    %666 = vector.load %arg20[%c0_759, %c2_760, %c2_761, %c0_762] : memref<2x3x6x16xf32, #tpu.memory_space<vmem>>, vector<2x1x1x16xf32>
    %667 = vector.shape_cast %666 : vector<2x1x1x16xf32> to vector<2x16xf32>
    %c0_763 = arith.constant 0 : index
    %c2_764 = arith.constant 2 : index
    %c3_765 = arith.constant 3 : index
    %c0_766 = arith.constant 0 : index
    %668 = vector.load %arg20[%c0_763, %c2_764, %c3_765, %c0_766] : memref<2x3x6x16xf32, #tpu.memory_space<vmem>>, vector<2x1x1x16xf32>
    %669 = vector.shape_cast %668 : vector<2x1x1x16xf32> to vector<2x16xf32>
    %670 = arith.addf %667, %669 : vector<2x16xf32>
    %c0_767 = arith.constant 0 : index
    %c7_768 = arith.constant 7 : index
    %c0_769 = arith.constant 0 : index
    %c0_770 = arith.constant 0 : index
    %671 = vector.load %arg8[%c0_767, %c7_768, %c0_769, %c0_770] : memref<1x9x16x128xf32, #tpu.memory_space<vmem>>, vector<1x1x16x128xf32>
    %672 = vector.shape_cast %671 : vector<1x1x16x128xf32> to vector<16x128xf32>
    %cst_771 = arith.constant dense<0.000000e+00> : vector<2x128xf32>
    %673 = tpu.matmul %670, %672, %cst_771 {dimension_numbers = #tpu.dot_dimension_numbers<[1], [0], [0], [1], [0, 0, 1, 1], [], []>} : vector<2x16xf32>, vector<16x128xf32>, vector<2x128xf32> -> vector<2x128xf32>
    %674 = arith.addf %665, %673 : vector<2x128xf32>
    %c0_772 = arith.constant 0 : index
    %c2_773 = arith.constant 2 : index
    %c4_774 = arith.constant 4 : index
    %c0_775 = arith.constant 0 : index
    %675 = vector.load %arg20[%c0_772, %c2_773, %c4_774, %c0_775] : memref<2x3x6x16xf32, #tpu.memory_space<vmem>>, vector<2x1x1x16xf32>
    %676 = vector.shape_cast %675 : vector<2x1x1x16xf32> to vector<2x16xf32>
    %c0_776 = arith.constant 0 : index
    %c2_777 = arith.constant 2 : index
    %c5_778 = arith.constant 5 : index
    %c0_779 = arith.constant 0 : index
    %677 = vector.load %arg20[%c0_776, %c2_777, %c5_778, %c0_779] : memref<2x3x6x16xf32, #tpu.memory_space<vmem>>, vector<2x1x1x16xf32>
    %678 = vector.shape_cast %677 : vector<2x1x1x16xf32> to vector<2x16xf32>
    %679 = arith.addf %676, %678 : vector<2x16xf32>
    %c0_780 = arith.constant 0 : index
    %c8_781 = arith.constant 8 : index
    %c0_782 = arith.constant 0 : index
    %c0_783 = arith.constant 0 : index
    %680 = vector.load %arg8[%c0_780, %c8_781, %c0_782, %c0_783] : memref<1x9x16x128xf32, #tpu.memory_space<vmem>>, vector<1x1x16x128xf32>
    %681 = vector.shape_cast %680 : vector<1x1x16x128xf32> to vector<16x128xf32>
    %cst_784 = arith.constant dense<0.000000e+00> : vector<2x128xf32>
    %682 = tpu.matmul %679, %681, %cst_784 {dimension_numbers = #tpu.dot_dimension_numbers<[1], [0], [0], [1], [0, 0, 1, 1], [], []>} : vector<2x16xf32>, vector<16x128xf32>, vector<2x128xf32> -> vector<2x128xf32>
    %683 = arith.addf %674, %682 : vector<2x128xf32>
    %c0_785 = arith.constant 0 : index
    %c0_786 = arith.constant 0 : index
    %c0_787 = arith.constant 0 : index
    %684 = vector.load %arg9[%c0_785, %c0_786, %c0_787] : memref<1x1x128xf32, #tpu.memory_space<vmem>>, vector<1x1x128xf32>
    %685 = vector.shape_cast %684 : vector<1x1x128xf32> to vector<1x128xf32>
    %686 = vector.broadcast %685 : vector<1x128xf32> to vector<2x128xf32>
    %687 = arith.mulf %683, %686 : vector<2x128xf32>
    %c0_788 = arith.constant 0 : index
    %c0_789 = arith.constant 0 : index
    %c0_790 = arith.constant 0 : index
    %688 = vector.load %arg10[%c0_788, %c0_789, %c0_790] : memref<1x1x128xf32, #tpu.memory_space<vmem>>, vector<1x1x128xf32>
    %689 = vector.shape_cast %688 : vector<1x1x128xf32> to vector<1x128xf32>
    %690 = vector.broadcast %689 : vector<1x128xf32> to vector<2x128xf32>
    %691 = arith.addf %687, %690 : vector<2x128xf32>
    %cst_791 = arith.constant 0.000000e+00 : f32
    %692 = vector.broadcast %cst_791 : f32 to vector<2x128xf32>
    %693 = arith.maximumf %691, %692 : vector<2x128xf32>
    %c0_792 = arith.constant 0 : index
    %c0_793 = arith.constant 0 : index
    %c0_794 = arith.constant 0 : index
    %694 = vector.load %arg11[%c0_792, %c0_793, %c0_794] : memref<1x128x136xf32, #tpu.memory_space<vmem>>, vector<1x128x136xf32>
    %695 = vector.shape_cast %694 : vector<1x128x136xf32> to vector<128x136xf32>
    %cst_795 = arith.constant dense<0.000000e+00> : vector<2x136xf32>
    %696 = tpu.matmul %693, %695, %cst_795 {dimension_numbers = #tpu.dot_dimension_numbers<[1], [0], [0], [1], [0, 0, 1, 1], [], []>} : vector<2x128xf32>, vector<128x136xf32>, vector<2x136xf32> -> vector<2x136xf32>
    %c0_796 = arith.constant 0 : index
    %c0_797 = arith.constant 0 : index
    %c0_798 = arith.constant 0 : index
    %697 = vector.load %arg12[%c0_796, %c0_797, %c0_798] : memref<1x1x136xf32, #tpu.memory_space<vmem>>, vector<1x1x136xf32>
    %698 = vector.shape_cast %697 : vector<1x1x136xf32> to vector<1x136xf32>
    %699 = vector.broadcast %698 : vector<1x136xf32> to vector<2x136xf32>
    %700 = arith.addf %696, %699 : vector<2x136xf32>
    %c0_799 = arith.constant 0 : index
    %c0_800 = arith.constant 0 : index
    %c0_801 = arith.constant 0 : index
    %701 = vector.load %arg13[%c0_799, %c0_800, %c0_801] : memref<1x136x2xf32, #tpu.memory_space<vmem>>, vector<1x136x2xf32>
    %702 = vector.shape_cast %701 : vector<1x136x2xf32> to vector<136x2xf32>
    %cst_802 = arith.constant dense<0.000000e+00> : vector<2x2xf32>
    %703 = tpu.matmul %700, %702, %cst_802 {dimension_numbers = #tpu.dot_dimension_numbers<[1], [0], [0], [1], [0, 0, 1, 1], [], []>} : vector<2x136xf32>, vector<136x2xf32>, vector<2x2xf32> -> vector<2x2xf32>
    %c0_803 = arith.constant 0 : index
    %c0_804 = arith.constant 0 : index
    %c0_805 = arith.constant 0 : index
    %704 = vector.load %arg14[%c0_803, %c0_804, %c0_805] : memref<1x2x2xf32, #tpu.memory_space<vmem>>, vector<1x2x2xf32>
    %705 = vector.shape_cast %704 : vector<1x2x2xf32> to vector<2x2xf32>
    %706 = vector.shape_cast %703 : vector<2x2xf32> to vector<1x2x2xf32>
    tpu.vector_store %arg14[%c0_803, %c0_804, %c0_805], %706 {strides = array<i32>} : memref<1x2x2xf32, #tpu.memory_space<vmem>>, vector<1x2x2xf32>,
    return
  }
  func.func @transform_0(%arg0: i32) -> (i32, i32, i32, i32, i32) {
    %c0_i32 = arith.constant 0 : i32
    %c0_i32_0 = arith.constant 0 : i32
    %c0_i32_1 = arith.constant 0 : i32
    %c0_i32_2 = arith.constant 0 : i32
    %c0_i32_3 = arith.constant 0 : i32
    return %arg0, %c0_i32, %c0_i32_0, %c0_i32_1, %c0_i32_2 : i32, i32, i32, i32, i32
  }
  func.func @transform_1(%arg0: i32) -> (i32, i32, i32) {
    %c0_i32 = arith.constant 0 : i32
    %c0_i32_0 = arith.constant 0 : i32
    %c0_i32_1 = arith.constant 0 : i32
    return %arg0, %c0_i32, %c0_i32_0 : i32, i32, i32
  }
  func.func @transform_2(%arg0: i32) -> (i32, i32, i32) {
    %c0_i32 = arith.constant 0 : i32
    %c0_i32_0 = arith.constant 0 : i32
    %c0_i32_1 = arith.constant 0 : i32
    return %arg0, %c0_i32, %c0_i32_0 : i32, i32, i32
  }
  func.func @transform_3(%arg0: i32) -> (i32, i32, i32) {
    %c0_i32 = arith.constant 0 : i32
    %c0_i32_0 = arith.constant 0 : i32
    %c0_i32_1 = arith.constant 0 : i32
    return %arg0, %c0_i32, %c0_i32_0 : i32, i32, i32
  }
  func.func @transform_4(%arg0: i32) -> (i32, i32, i32) {
    %c0_i32 = arith.constant 0 : i32
    %c0_i32_0 = arith.constant 0 : i32
    %c0_i32_1 = arith.constant 0 : i32
    return %arg0, %c0_i32, %c0_i32_0 : i32, i32, i32
  }
  func.func @transform_5(%arg0: i32) -> (i32, i32, i32) {
    %c0_i32 = arith.constant 0 : i32
    %c0_i32_0 = arith.constant 0 : i32
    %c0_i32_1 = arith.constant 0 : i32
    return %arg0, %c0_i32, %c0_i32_0 : i32, i32, i32
  }
  func.func @transform_6(%arg0: i32) -> (i32, i32, i32) {
    %c0_i32 = arith.constant 0 : i32
    %c0_i32_0 = arith.constant 0 : i32
    %c0_i32_1 = arith.constant 0 : i32
    return %arg0, %c0_i32, %c0_i32_0 : i32, i32, i32
  }
  func.func @transform_7(%arg0: i32) -> (i32, i32, i32, i32) {
    %c0_i32 = arith.constant 0 : i32
    %c0_i32_0 = arith.constant 0 : i32
    %c0_i32_1 = arith.constant 0 : i32
    %c0_i32_2 = arith.constant 0 : i32
    return %arg0, %c0_i32, %c0_i32_0, %c0_i32_1 : i32, i32, i32, i32
  }
  func.func @transform_8(%arg0: i32) -> (i32, i32, i32) {
    %c0_i32 = arith.constant 0 : i32
    %c0_i32_0 = arith.constant 0 : i32
    %c0_i32_1 = arith.constant 0 : i32
    return %arg0, %c0_i32, %c0_i32_0 : i32, i32, i32
  }
  func.func @transform_9(%arg0: i32) -> (i32, i32, i32) {
    %c0_i32 = arith.constant 0 : i32
    %c0_i32_0 = arith.constant 0 : i32
    %c0_i32_1 = arith.constant 0 : i32
    return %arg0, %c0_i32, %c0_i32_0 : i32, i32, i32
  }
  func.func @transform_10(%arg0: i32) -> (i32, i32, i32) {
    %c0_i32 = arith.constant 0 : i32
    %c0_i32_0 = arith.constant 0 : i32
    %c0_i32_1 = arith.constant 0 : i32
    return %arg0, %c0_i32, %c0_i32_0 : i32, i32, i32
  }
  func.func @transform_11(%arg0: i32) -> (i32, i32, i32) {
    %c0_i32 = arith.constant 0 : i32
    %c0_i32_0 = arith.constant 0 : i32
    %c0_i32_1 = arith.constant 0 : i32
    return %arg0, %c0_i32, %c0_i32_0 : i32, i32, i32
  }
  func.func @transform_12(%arg0: i32) -> (i32, i32, i32) {
    %c0_i32 = arith.constant 0 : i32
    %c0_i32_0 = arith.constant 0 : i32
    %c0_i32_1 = arith.constant 0 : i32
    return %arg0, %c0_i32, %c0_i32_0 : i32, i32, i32
  }
  func.func @transform_13(%arg0: i32) -> (i32, i32, i32) {
    %c0_i32 = arith.constant 0 : i32
    %c0_i32_0 = arith.constant 0 : i32
    %c0_i32_1 = arith.constant 0 : i32
    return %arg0, %c0_i32, %c0_i32_0 : i32, i32, i32
  }
}

module attributes {stable_mosaic.version = 11 : i64} {
  func.func @_global_head_kernel(%arg0: memref<2x49x2208xf32, #tpu.memory_space<vmem>>, %arg1: memref<2208x6xf32, #tpu.memory_space<vmem>>, %arg2: memref<1x6xf32, #tpu.memory_space<vmem>>, %arg3: memref<2x6xf32, #tpu.memory_space<vmem>>) attributes {dimension_semantics = [], scalar_prefetch = 0 : i64, scratch_operands = 0 : i64, tpu.core_type = #tpu.core_type<tc>} {
    %c0 = arith.constant 0 : index
    %c0_0 = arith.constant 0 : index
    %c0_1 = arith.constant 0 : index
    %0 = vector.load %arg0[%c0, %c0_0, %c0_1] : memref<2x49x2208xf32, #tpu.memory_space<vmem>>, vector<2x49x2208xf32>
    %cst = arith.constant 0.000000e+00 : f32
    %1 = vector.broadcast %cst : f32 to vector<2x49x2208xf32>
    %2 = arith.maximumf %0, %1 : vector<2x49x2208xf32>
    %cst_2 = arith.constant dense<0.000000e+00> : vector<2x2208xf32>
    %3 = vector.multi_reduction <add>, %2, %cst_2 [1] : vector<2x49x2208xf32> to vector<2x2208xf32>
    %cst_3 = arith.constant 0.0204081628 : f32
    %4 = vector.broadcast %cst_3 : f32 to vector<2x2208xf32>
    %5 = arith.mulf %3, %4 : vector<2x2208xf32>
    %c0_4 = arith.constant 0 : index
    %c0_5 = arith.constant 0 : index
    %6 = vector.load %arg1[%c0_4, %c0_5] : memref<2208x6xf32, #tpu.memory_space<vmem>>, vector<2208x6xf32>
    %cst_6 = arith.constant dense<0.000000e+00> : vector<2x6xf32>
    %7 = tpu.matmul %5, %6, %cst_6 {dimension_numbers = #tpu.dot_dimension_numbers<[1], [0], [0], [1], [0, 0, 1, 1], [], []>} : vector<2x2208xf32>, vector<2208x6xf32>, vector<2x6xf32> -> vector<2x6xf32>
    %c0_7 = arith.constant 0 : index
    %c0_8 = arith.constant 0 : index
    %8 = vector.load %arg2[%c0_7, %c0_8] : memref<1x6xf32, #tpu.memory_space<vmem>>, vector<1x6xf32>
    %9 = vector.broadcast %8 : vector<1x6xf32> to vector<2x6xf32>
    %10 = arith.addf %7, %9 : vector<2x6xf32>
    %c0_9 = arith.constant 0 : index
    %c0_10 = arith.constant 0 : index
    %11 = vector.load %arg3[%c0_9, %c0_10] : memref<2x6xf32, #tpu.memory_space<vmem>>, vector<2x6xf32>
    tpu.vector_store %arg3[%c0_9, %c0_10], %10 {strides = array<i32>} : memref<2x6xf32, #tpu.memory_space<vmem>>, vector<2x6xf32>,
    return
  }
}

</mosaic_0001>

<bundles_post_ra>
// kernel: custom-call.1
= control target key start
LH: loop header
LB: loop body
LE: loop exit
PB: predicated region body
PF: predicated region fallthrough
CT: control target
= control target key end

     0   :  { %s6_s0 = inlined_call_operand.vmem [shape: f32[6,3,31,31], index: 0, kind: output, shape index: {}]  }

// kernel: forward.2
= control target key start
LH: loop header
LB: loop body
LE: loop exit
PB: predicated region body
PF: predicated region fallthrough
CT: control target
= control target key end

     0   :  { %vm523_vm0 = vcmask 1040384   ;;  %vm1356_vm1 = vcmask 1041409   ;;  %vm740_vm2 = vcmask 261120   ;;  %vm752_vm3 = vcmask 253952   ;;  %s4292_s1 = inlined_call_operand.vmem [shape: f32[2208,6], index: 1, kind: input, shape index: {}]   ;;  %s4293_s0 = inlined_call_operand.vmem [shape: f32[2,49,2208], index: 0, kind: input, shape index: {}]   ;;  %s4294_s2 = inlined_call_operand.vmem [shape: f32[1,6], index: 2, kind: input, shape index: {}]   ;;  %s4295_s3 = inlined_call_operand.vmem [shape: f32[2,6], index: 3, kind: output, shape index: {}]  }
   0x1   :  { %v1068_v0 = vld [vmem:[%s4292_s1 + $0xf8] sm:$0xff]  ;;  %v1067_v2 = vld [vmem:[%s4292_s1 + $0xf0] sm:$0xff]  ;;  %v1066_v4 = vld [vmem:[%s4292_s1 + $0xe8] sm:$0xff]  ;;  %vm2024_vm4 = vcmask 41984  }
   0x2   :  { %v1052_v1 = vld [vmem:[%s4292_s1 + $0x78] sm:$0xff]  ;;  %2032 = vmatprep.subr.mxu1 %v1068_v0  ;;  %v1051_v3 = vld [vmem:[%s4292_s1 + $0x70] sm:$0xff]  ;;  %v1050_v5 = vld [vmem:[%s4292_s1 + $0x68] sm:$0xff] }
   0x3   :  { %2033 = vmatpush3.msra.mxu1 %v1052_v1  ;;  %v1065_v6 = vld [vmem:[%s4292_s1 + $0xe0] sm:$0xff]  ;;  %v1064_v8 = vld [vmem:[%s4292_s1 + $0xd8] sm:$0xff]  ;;  %v1063_v10 = vld [vmem:[%s4292_s1 + $0xd0] sm:$0xff] }
   0x4   :  { %2034 = vmatprep.subr.mxu1 %v1067_v2  ;;  %v1049_v7 = vld [vmem:[%s4292_s1 + $0x60] sm:$0xff]  ;;  %v1048_v9 = vld [vmem:[%s4292_s1 + $0x58] sm:$0xff]  ;;  %v1047_v11 = vld [vmem:[%s4292_s1 + $0x50] sm:$0xff] }
   0x5   :  { %2035 = vmatpush3.msra.mxu1 %v1051_v3  ;;  %v1062_v12 = vld [vmem:[%s4292_s1 + $0xc8] sm:$0xff]  ;;  %v1132_v13 = vld [vmem:[%s4292_s1 + $0x2f8] sm:$0xff]  ;;  %v1061_v15 = vld [vmem:[%s4292_s1 + $0xc0] sm:$0xff] }
   0x6   :  { %2036 = vmatprep.subr.mxu1 %v1066_v4  ;;  %v1046_v14 = vld [vmem:[%s4292_s1 + $0x48] sm:$0xff]  ;;  %2102 = vmatprep.subr.mxu0 %v1132_v13  ;;  %v1116_v16 = vld [vmem:[%s4292_s1 + $0x278] sm:$0xff]  ;;  %v1045_v17 = vld [vmem:[%s4292_s1 + $0x40] sm:$0xff] }
   0x7   :  { %2037 = vmatpush3.msra.mxu1 %v1050_v5  ;;  %2103 = vmatpush3.msra.mxu0 %v1116_v16  ;;  %v1131_v18 = vld [vmem:[%s4292_s1 + $0x2f0] sm:$0xff]  ;;  %v15_v19 = vld [vmem:[%s4293_s0 + $0x8] sm:$0xff]  ;;  %v1060_v20 = vld [vmem:[%s4292_s1 + $0xb8] sm:$0xff] }
   0x8   :  { %2038 = vmatprep.subr.mxu1 %v1065_v6  ;;  %2104 = vmatprep.subr.mxu0 %v1131_v18  ;;  %v33_v21 = vld [vmem:[%s4293_s0 + $0x98] sm:$0xff]  ;;  %v51_v22 = vld [vmem:[%s4293_s0 + $0x128] sm:$0xff]  ;;  %v267_v24 = vmax.f32 %v15_v19, 0.0  ;;  %v1059_v30 = vld [vmem:[%s4292_s1 + $0xb0] sm:$0xff] }
   0x9   :  { %2039 = vmatpush3.msra.mxu1 %v1049_v7  ;;  %v69_v23 = vld [vmem:[%s4293_s0 + $0x1b8] sm:$0xff]  ;;  %v87_v26 = vld [vmem:[%s4293_s0 + $0x248] sm:$0xff]  ;;  %v285_v28 = vmax.f32 %v33_v21, 0.0  ;;  %v303_v29 = vmax.f32 %v51_v22, 0.0  ;;  %v1043_v34 = vld [vmem:[%s4292_s1 + $0x30] sm:$0xff] }
   0xa   :  { %2040 = vmatprep.subr.mxu1 %v1064_v8  ;;  %v1044_v25 = vld [vmem:[%s4292_s1 + $0x38] sm:$0xff]  ;;  %v123_v27 = vld [vmem:[%s4293_s0 + $0x368] sm:$0x1]  ;;  %v321_v37 = vmax.f32 %v69_v23, 0.0  ;;  %v339_v45 = vmax.f32 %v87_v26, 0.0  ;;  %v1115_v51 = vld [vmem:[%s4292_s1 + $0x270] sm:$0xff] }
   0xb   :  { %2041 = vmatpush3.msra.mxu1 %v1048_v9  ;;  %v141_v31 = vld [vmem:[%s4293_s0 + $0x3f8] sm:$0xff]  ;;  %v159_v32 = vld [vmem:[%s4293_s0 + $0x488] sm:$0xff]  ;;  %v532_v40 = vadd.f32 %v285_v28, %v267_v24  ;;  %v375_v47 = vmax.f32 %v123_v27, 0.0  ;;  %v14_v52 = vld [vmem:[%s4293_s0] sm:$0xff]  ;;  %2105 = vmatpush3.msra.mxu0 %v1115_v51 }
   0xc   :  { %2042 = vmatprep.subr.mxu1 %v1063_v10  ;;  %v177_v33 = vld [vmem:[%s4293_s0 + $0x518] sm:$0xff]  ;;  %v195_v36 = vld [vmem:[%s4293_s0 + $0x5a8] sm:$0xff]  ;;  %v393_v38 = vmax.f32 %v141_v31, 0.0  ;;  %v411_v39 = vmax.f32 %v159_v32, 0.0  ;;  %v32_v53 = vld [vmem:[%s4293_s0 + $0x90] sm:$0xff]  ;;  %v266_v58 = vmax.f32 %v14_v52, 0.0 }
   0xd   :  { %2043 = vmatpush3.msra.mxu1 %v1047_v11  ;;  %v105_v35 = vld [vmem:[%s4293_s0 + $0x2d8] sm:$0xff]  ;;  %v1058_v41 = vld [vmem:[%s4292_s1 + $0xa8] sm:$0xff]  ;;  %v429_v46 = vmax.f32 %v177_v33, 0.0  ;;  %v447_v48 = vmax.f32 %v195_v36, 0.0  ;;  %v533_v49 = vadd.f32 %v532_v40, %v303_v29  ;;  %v1057_v55 = vld [vmem:[%s4292_s1 + $0xa0] sm:$0xff]  ;;  %v284_v59 = vmax.f32 %v32_v53, 0.0 }
   0xe   :  { %2044 = vmatprep.subr.mxu1 %v1062_v12  ;;  %v213_v42 = vld [vmem:[%s4293_s0 + $0x638] sm:$0xff]  ;;  %v2445_v43 = vld [vmem:[%s4293_s0 + $0x6c8] sm:$0xff]  ;;  %v774_v50 = vadd.f32 %v411_v39, %v393_v38  ;;  %v357_v56 = vmax.f32 %v105_v35, 0.0  ;;  %v50_v57 = vld [vmem:[%s4293_s0 + $0x120] sm:$0xff]  ;;  %v537_v11 = vsel %vm523_vm0, %v375_v47, 0.0 }
   0xf   :  { %2045 = vmatpush3.msra.mxu1 %v1046_v14  ;;  %v249_v44 = vld [vmem:[%s4293_s0 + $0x758] sm:$0x1]  ;;  %v1042_v54 = vld [vmem:[%s4292_s1 + $0x28] sm:$0xff]  ;;  %v1041_v60 = vld [vmem:[%s4292_s1 + $0x20] sm:$0xff]  ;;  %v465_v61 = vmax.f32 %v213_v42, 0.0  ;;  %v534_v63 = vadd.f32 %v533_v49, %v321_v37  ;;  %v483_v4 = vmax.f32 %v2445_v43, 0.0  ;;  %v518_v8 = vadd.f32 %v284_v59, %v266_v58 }
  0x10   :  { %2046 = vmatprep.subr.mxu1 %v1061_v15  ;;  %v501_v62 = vmax.f32 %v249_v44, 0.0  ;;  %v775_v0 = vadd.f32 %v774_v50, %v429_v46  ;;  %v68_v1 = vld [vmem:[%s4293_s0 + $0x1b0] sm:$0xff]  ;;  %v1056_v3 = vld [vmem:[%s4292_s1 + $0x98] sm:$0xff]  ;;  %v158_v5 = vld [vmem:[%s4293_s0 + $0x480] sm:$0xff]  ;;  %v302_v7 = vmax.f32 %v50_v57, 0.0 }
  0x11   :  { %2047 = vmatpush3.msra.mxu1 %v1045_v17  ;;  %v140_v2 = vld [vmem:[%s4293_s0 + $0x3f0] sm:$0xff]  ;;  %v1040_v9 = vld [vmem:[%s4292_s1 + $0x18] sm:$0xff]  ;;  %v535_v10 = vadd.f32 %v534_v63, %v339_v45  ;;  %v86_v13 = vld [vmem:[%s4293_s0 + $0x240] sm:$0xff]  ;;  %v320_v18 = vmax.f32 %v68_v1, 0.0  ;;  %v410_v19 = vmax.f32 %v158_v5, 0.0 }
  0x12   :  { %2048 = vmatprep.subr.mxu1 %v1060_v20  ;;  %v176_v6 = vld [vmem:[%s4293_s0 + $0x510] sm:$0xff]  ;;  %v776_v12 = vadd.f32 %v775_v0, %v447_v48  ;;  %v194_v14 = vld [vmem:[%s4293_s0 + $0x5a0] sm:$0xff]  ;;  %v392_v15 = vmax.f32 %v140_v2, 0.0  ;;  %v1130_v21 = vld [vmem:[%s4292_s1 + $0x2e8] sm:$0xff]  ;;  %v779_v24 = vsel %vm523_vm0, %v501_v62, 0.0  ;;  %v338_v29 = vmax.f32 %v86_v13, 0.0 }
  0x13   :  { %2049 = vmatpush3.msra.mxu1 %v1044_v25  ;;  %v1055_v16 = vld [vmem:[%s4292_s1 + $0x90] sm:$0xff]  ;;  %v122_v17 = vld [vmem:[%s4293_s0 + $0x360] sm:$0x1]  ;;  %v428_v20 = vmax.f32 %v176_v6, 0.0  ;;  %v536_v22 = vadd.f32 %v535_v10, %v357_v56  ;;  %2106 = vmatprep.subr.mxu0 %v1130_v21  ;;  %v1114_v27 = vld [vmem:[%s4292_s1 + $0x268] sm:$0xff]  ;;  %v519_v31 = vadd.f32 %v518_v8, %v302_v7 }
  0x14   :  { %2050 = vmatprep.subr.mxu1 %v1059_v30  ;;  %v777_v23 = vadd.f32 %v776_v12, %v465_v61  ;;  %v104_v25 = vld [vmem:[%s4293_s0 + $0x2d0] sm:$0xff]  ;;  %v446_v30 = vmax.f32 %v194_v14, 0.0  ;;  %v761_v32 = vadd.f32 %v410_v19, %v392_v15  ;;  %2107 = vmatpush3.msra.mxu0 %v1114_v27  ;;  %v1129_v33 = vld [vmem:[%s4292_s1 + $0x2e0] sm:$0xff]  ;;  %v374_v39 = vmax.f32 %v122_v17, 0.0  ;;  %v1128_v40 = vld [vmem:[%s4292_s1 + $0x2d8] sm:$0xff] }
  0x15   :  { %2051 = vmatpush3.msra.mxu1 %v1043_v34  ;;  %v212_v26 = vld [vmem:[%s4293_s0 + $0x630] sm:$0xff]  ;;  %v1113_v34 = vld [vmem:[%s4292_s1 + $0x260] sm:$0xff]  ;;  %v538_v36 = vadd.f32 %v537_v11, %v536_v22  ;;  %2108 = vmatprep.subr.mxu0 %v1129_v33  ;;  %v356_v42 = vmax.f32 %v104_v25, 0.0  ;;  %v520_v44 = vadd.f32 %v519_v31, %v320_v18  ;;  %v1112_v46 = vld [vmem:[%s4292_s1 + $0x258] sm:$0xff] }
  0x16   :  { %2052 = vmatprep.subr.mxu1 %v1058_v41  ;;  %v248_v28 = vld [vmem:[%s4293_s0 + $0x750] sm:$0x1]  ;;  %v778_v37 = vadd.f32 %v777_v23, %v483_v4  ;;  %v230_v38 = vld [vmem:[%s4293_s0 + $0x6c0] sm:$0xff]  ;;  %v1054_v41 = vld [vmem:[%s4292_s1 + $0x88] sm:$0xff]  ;;  %v464_v43 = vmax.f32 %v212_v26, 0.0  ;;  %v762_v45 = vadd.f32 %v761_v32, %v428_v20  ;;  %2109 = vmatpush3.msra.mxu0 %v1113_v34  ;;  %v524_v61 = vsel %vm523_vm0, %v374_v39, 0.0 }
  0x17   :  { %2053 = vmatpush3.msra.mxu1 %v1042_v54  ;;  %v1039_v35 = vld [vmem:[%s4292_s1 + $0x10] sm:$0xff]  ;;  %v1038_v48 = vld [vmem:[%s4292_s1 + $0x8] sm:$0xff]  ;;  %v539_v49 = vrot.slane %v538_v36, 4  ;;  %v500_v51 = vmax.f32 %v248_v28, 0.0  ;;  %2110 = vmatprep.subr.mxu0 %v1128_v40  ;;  %v1053_v53 = vld [vmem:[%s4292_s1 + $0x80] sm:$0xff]  ;;  %v482_v54 = vmax.f32 %v230_v38, 0.0 }
  0x18   :  { %2054 = vmatprep.subr.mxu1 %v1057_v55  ;;  %v1127_v47 = vld [vmem:[%s4292_s1 + $0x2d0] sm:$0xff]  ;;  %v780_v50 = vadd.f32 %v779_v24, %v778_v37  ;;  %v521_v55 = vadd.f32 %v520_v44, %v338_v29  ;;  %v763_v56 = vadd.f32 %v762_v45, %v446_v30  ;;  %2111 = vmatpush3.msra.mxu0 %v1112_v46  ;;  %v1126_v57 = vld [vmem:[%s4292_s1 + $0x2c8] sm:$0xff]  ;;  %v1037_v58 = vld [vmem:[%s4292_s1] sm:$0xff] }
  0x19   :  { %2055 = vmatpush3.msra.mxu1 %v1041_v60  ;;  %v1111_v52 = vld [vmem:[%s4292_s1 + $0x250] sm:$0xff]  ;;  %v540_v59 = vadd.f32 %v539_v49, %v538_v36  ;;  %2112 = vmatprep.subr.mxu0 %v1127_v47  ;;  %v1110_v62 = vld [vmem:[%s4292_s1 + $0x248] sm:$0xff]  ;;  %v1100_v1 = vld [vmem:[%s4292_s1 + $0x1f8] sm:$0xff]  ;;  %v766_v5 = vsel %vm523_vm0, %v500_v51, 0.0 }
  0x1a   :  { %2056 = vmatprep.subr.mxu1 %v1056_v3  ;;  %v781_v60 = vrot.slane %v780_v50, 4  ;;  %v522_v63 = vadd.f32 %v521_v55, %v356_v42  ;;  %v764_v0 = vadd.f32 %v763_v56, %v464_v43  ;;  %2113 = vmatpush3.msra.mxu0 %v1111_v52  ;;  %v1125_v2 = vld [vmem:[%s4292_s1 + $0x2c0] sm:$0xff]  ;;  %v1108_v12 = vld [vmem:[%s4292_s1 + $0x238] sm:$0xff]  ;;  %v1123_v15 = vld [vmem:[%s4292_s1 + $0x2b0] sm:$0xff] }
  0x1b   :  { %2057 = vmatpush3.msra.mxu1 %v1040_v9  ;;  %v541_v3 = vrot.slane %v540_v59, 2  ;;  %2114 = vmatprep.subr.mxu0 %v1126_v57  ;;  %v1109_v6 = vld [vmem:[%s4292_s1 + $0x240] sm:$0xff]  ;;  %v1124_v9 = vld [vmem:[%s4292_s1 + $0x2b8] sm:$0xff]  ;;  %v1107_v18 = vld [vmem:[%s4292_s1 + $0x230] sm:$0xff] }
  0x1c   :  { %2058 = vmatprep.subr.mxu1 %v1055_v16  ;;  %v782_v4 = vadd.f32 %v781_v60, %v780_v50  ;;  %v525_v7 = vadd.f32 %v524_v61, %v522_v63  ;;  %v765_v8 = vadd.f32 %v764_v0, %v482_v54  ;;  %2115 = vmatpush3.msra.mxu0 %v1110_v62  ;;  %v1122_v21 = vld [vmem:[%s4292_s1 + $0x2a8] sm:$0xff]  ;;  %v1121_v27 = vld [vmem:[%s4292_s1 + $0x2a0] sm:$0xff]  ;;  %v1120_v33 = vld [vmem:[%s4292_s1 + $0x298] sm:$0xff] }
  0x1d   :  { %2059 = vmatpush3.msra.mxu1 %v1039_v35  ;;  %v542_v10 = vadd.f32 %v541_v3, %v540_v59  ;;  %2116 = vmatprep.subr.mxu0 %v1125_v2  ;;  %v1106_v24 = vld [vmem:[%s4292_s1 + $0x228] sm:$0xff]  ;;  %v1105_v30 = vld [vmem:[%s4292_s1 + $0x220] sm:$0xff]  ;;  %v1104_v34 = vld [vmem:[%s4292_s1 + $0x218] sm:$0xff] }
  0x1e   :  { %2060 = vmatprep.subr.mxu1 %v1054_v41  ;;  %v783_v11 = vrot.slane %v782_v4, 2  ;;  %v526_v13 = vrot.slane %v525_v7, 4  ;;  %v767_v14 = vadd.f32 %v766_v5, %v765_v8  ;;  %2117 = vmatpush3.msra.mxu0 %v1109_v6  ;;  %v1119_v35 = vld [vmem:[%s4292_s1 + $0x290] sm:$0xff]  ;;  %v19_v38 = vld [vmem:[%s4293_s0 + $0x28] sm:$0xff]  ;;  %v37_v39 = vld [vmem:[%s4293_s0 + $0xb8] sm:$0xff] }
  0x1f   :  { %2061 = vmatpush3.msra.mxu1 %v1038_v48  ;;  %v543_v16 = vrot.slane %v542_v10, 1  ;;  %2118 = vmatprep.subr.mxu0 %v1124_v9  ;;  %v1103_v37 = vld [vmem:[%s4292_s1 + $0x210] sm:$0xff]  ;;  %v1118_v42 = vld [vmem:[%s4292_s1 + $0x288] sm:$0xff]  ;;  %v73_v44 = vld [vmem:[%s4293_s0 + $0x1d8] sm:$0xff]  ;;  %v271_v45 = vmax.f32 %v19_v38, 0.0  ;;  %v289_v46 = vmax.f32 %v37_v39, 0.0 }
  0x20   :  { %2062 = vmatprep.subr.mxu1 %v1053_v53  ;;  %v784_v17 = vadd.f32 %v783_v11, %v782_v4  ;;  %v527_v19 = vadd.f32 %v526_v13, %v525_v7  ;;  %v768_v20 = vrot.slane %v767_v14, 4  ;;  %2119 = vmatpush3.msra.mxu0 %v1108_v12  ;;  %v55_v43 = vld [vmem:[%s4293_s0 + $0x148] sm:$0xff]  ;;  %v145_v50 = vld [vmem:[%s4293_s0 + $0x418] sm:$0xff]  ;;  %v1117_v57 = vld [vmem:[%s4292_s1 + $0x280] sm:$0xff]  ;;  %v325_v60 = vmax.f32 %v73_v44, 0.0 }
  0x21   :  { %2063 = vmatpush3.msra.mxu1 %v1037_v58  ;;  %v544_v22 = vadd.f32 %v543_v16, %v542_v10  ;;  %2120 = vmatprep.subr.mxu0 %v1123_v15  ;;  %v1102_v48 = vld [vmem:[%s4292_s1 + $0x208] sm:$0xff]  ;;  %v181_v55 = vld [vmem:[%s4293_s0 + $0x538] sm:$0xff]  ;;  %v307_v56 = vmax.f32 %v55_v43, 0.0  ;;  %v397_v61 = vmax.f32 %v145_v50, 0.0  ;;  %v584_v62 = vadd.f32 %v289_v46, %v271_v45  ;;  %v1101_v5 = vld [vmem:[%s4292_s1 + $0x200] sm:$0xff] }
  0x22   :  { %2067 = vmatprep.subr.mxu1 %v1100_v1  ;;  %v785_v23 = vrot.slane %v784_v17, 1  ;;  %v528_v25 = vrot.slane %v527_v19, 2  ;;  %v769_v26 = vadd.f32 %v768_v20, %v767_v14  ;;  %2121 = vmatpush3.msra.mxu0 %v1107_v18  ;;  %v91_v49 = vld [vmem:[%s4293_s0 + $0x268] sm:$0xff]  ;;  %v2648_v58 = vld [vmem:[%s4293_s0 + $0x2f8] sm:$0xff]  ;;  %v433_v3 = vmax.f32 %v181_v55, 0.0  ;;  %v18_v14 = vld [vmem:[%s4293_s0 + $0x20] sm:$0xff] }
  0x23   :  { %v1002_v29 = vmul.f32 0.020408163, %v544_v22  ;;  %2122 = vmatprep.subr.mxu0 %v1122_v21  ;;  %v127_v53 = vld [vmem:[%s4293_s0 + $0x388] sm:$0x1]  ;;  %v253_v1 = vld [vmem:[%s4293_s0 + $0x778] sm:$0x1]  ;;  %v585_v11 = vadd.f32 %v584_v62, %v307_v56 }
  0x24   :  { %v786_v28 = vadd.f32 %v785_v23, %v784_v17  ;;  %v529_v31 = vadd.f32 %v528_v25, %v527_v19  ;;  %v770_v32 = vrot.slane %v769_v26, 2  ;;  %2123 = vmatpush3.msra.mxu0 %v1106_v24  ;;  %v163_v54 = vld [vmem:[%s4293_s0 + $0x4a8] sm:$0xff]  ;;  %v1084_v4 = vld [vmem:[%s4292_s1 + $0x178] sm:$0xff]  ;;  %v343_v7 = vmax.f32 %v91_v49, 0.0  ;;  %v36_v15 = vld [vmem:[%s4293_s0 + $0xb0] sm:$0xff] }
  0x25   :  { %2124 = vmatprep.subr.mxu0 %v1121_v27  ;;  %v199_v59 = vld [vmem:[%s4293_s0 + $0x5c8] sm:$0xff]  ;;  %v415_v2 = vmax.f32 %v163_v54, 0.0  ;;  %v217_v6 = vld [vmem:[%s4293_s0 + $0x658] sm:$0xff]  ;;  %v379_v8 = vmax.f32 %v127_v53, 0.0  ;;  %v1099_v16 = vld [vmem:[%s4292_s1 + $0x1f0] sm:$0xff]  ;;  %v361_v19 = vmax.f32 %v2648_v58, 0.0  ;;  %v586_v24 = vadd.f32 %v585_v11, %v325_v60 }
  0x26   :  { %v1020_v36 = vmul.f32 0.020408163, %v786_v28  ;;  %v530_v40 = vrot.slane %v529_v31, 1  ;;  %v771_v41 = vadd.f32 %v770_v32, %v769_v26  ;;  %2125 = vmatpush3.msra.mxu0 %v1105_v30  ;;  %v451_v10 = vmax.f32 %v199_v59, 0.0  ;;  %v1196_v13 = vld [vmem:[%s4292_s1 + $0x4f8] sm:$0xff]  ;;  %v1083_v17 = vld [vmem:[%s4292_s1 + $0x170] sm:$0xff] }
  0x27   :  { %2126 = vmatprep.subr.mxu0 %v1120_v33  ;;  %v826_v12 = vadd.f32 %v415_v2, %v397_v61  ;;  %v235_v18 = vld [vmem:[%s4293_s0 + $0x6e8] sm:$0xff]  ;;  %v505_v20 = vmax.f32 %v253_v1, 0.0  ;;  %v469_v23 = vmax.f32 %v217_v6, 0.0  ;;  %v54_v26 = vld [vmem:[%s4293_s0 + $0x140] sm:$0xff]  ;;  %v144_v27 = vld [vmem:[%s4293_s0 + $0x410] sm:$0xff]  ;;  %v270_v32 = vmax.f32 %v18_v14, 0.0 }
  0x28   :  { %v1358_v47 = vsel %vm1356_vm1, %v1020_v36, %v1002_v29  ;;  %v531_v51 = vadd.f32 %v530_v40, %v529_v31  ;;  %v772_v52 = vrot.slane %v771_v41, 1  ;;  %2127 = vmatpush3.msra.mxu0 %v1104_v34  ;;  %v1098_v22 = vld [vmem:[%s4292_s1 + $0x1e8] sm:$0xff]  ;;  %v162_v28 = vld [vmem:[%s4293_s0 + $0x4a0] sm:$0xff]  ;;  %v180_v31 = vld [vmem:[%s4293_s0 + $0x530] sm:$0xff]  ;;  %v288_v33 = vmax.f32 %v36_v15, 0.0 }
  0x29   :  { %1458 = vmatprep.mubr.f32.mxu1 %v1358_v47  ;;  %2128 = vmatprep.subr.mxu0 %v1119_v35  ;;  %v827_v25 = vadd.f32 %v826_v12, %v433_v3  ;;  %v1082_v29 = vld [vmem:[%s4292_s1 + $0x168] sm:$0xff]  ;;  %v126_v30 = vld [vmem:[%s4293_s0 + $0x380] sm:$0x1]  ;;  %v487_v34 = vmax.f32 %v235_v18, 0.0  ;;  %v587_v35 = vadd.f32 %v586_v24, %v343_v7  ;;  %v589_v36 = vsel %vm523_vm0, %v379_v8, 0.0  ;;  %v72_v38 = vld [vmem:[%s4293_s0 + $0x1d0] sm:$0xff] }
  0x2a   :  { %v773_v63 = vadd.f32 %v772_v52, %v771_v41  ;;  %v1001_v0 = vmul.f32 0.020408163, %v531_v51  ;;  %2129 = vmatpush3.msra.mxu0 %v1103_v37  ;;  %v2713_v39 = vld [vmem:[%s4293_s0 + $0x260] sm:$0xff]  ;;  %v252_v40 = vld [vmem:[%s4293_s0 + $0x770] sm:$0x1]  ;;  %v306_v44 = vmax.f32 %v54_v26, 0.0  ;;  %v571_v58 = vadd.f32 %v288_v33, %v270_v32 }
  0x2b   :  { %2130 = vmatprep.subr.mxu0 %v1118_v42  ;;  %v828_v37 = vadd.f32 %v827_v25, %v451_v10  ;;  %v1097_v41 = vld [vmem:[%s4292_s1 + $0x1e0] sm:$0xff]  ;;  %v831_v42 = vsel %vm523_vm0, %v505_v20, 0.0  ;;  %v396_v45 = vmax.f32 %v144_v27, 0.0  ;;  %v414_v46 = vmax.f32 %v162_v28, 0.0  ;;  %v2728_v49 = vld [vmem:[%s4293_s0 + $0x2f0] sm:$0xff]  ;;  %v1096_v59 = vld [vmem:[%s4292_s1 + $0x1d8] sm:$0xff] }
  0x2c   :  { %v1019_v9 = vmul.f32 0.020408163, %v773_v63  ;;  %2131 = vmatpush3.msra.mxu0 %v1102_v48  ;;  %v198_v43 = vld [vmem:[%s4293_s0 + $0x5c0] sm:$0xff]  ;;  %v588_v47 = vadd.f32 %v587_v35, %v361_v19  ;;  %v216_v50 = vld [vmem:[%s4293_s0 + $0x650] sm:$0xff]  ;;  %v378_v52 = vmax.f32 %v126_v30, 0.0  ;;  %v432_v53 = vmax.f32 %v180_v31, 0.0 }
  0x2d   :  { %2132 = vmatprep.subr.mxu0 %v1117_v57  ;;  %v829_v48 = vadd.f32 %v828_v37, %v469_v23  ;;  %v2736_v51 = vld [vmem:[%s4293_s0 + $0x6e0] sm:$0xff]  ;;  %v324_v55 = vmax.f32 %v72_v38, 0.0  ;;  %v342_v56 = vmax.f32 %v2713_v39, 0.0  ;;  %v504_v57 = vmax.f32 %v252_v40, 0.0  ;;  %v35_v1 = vld [vmem:[%s4293_s0 + $0xa8] sm:$0xff]  ;;  %v1080_v2 = vld [vmem:[%s4292_s1 + $0x158] sm:$0xff] }
  0x2e   :  { %v1357_v21 = vsel %vm1356_vm1, %v1019_v9, %v1001_v0  ;;  %2133 = vmatpush3.msra.mxu0 %v1101_v5  ;;  %v1081_v54 = vld [vmem:[%s4292_s1 + $0x160] sm:$0xff]  ;;  %v590_v60 = vadd.f32 %v589_v36, %v588_v47  ;;  %v450_v62 = vmax.f32 %v198_v43, 0.0  ;;  %v813_v63 = vadd.f32 %v414_v46, %v396_v45  ;;  %v17_v0 = vld [vmem:[%s4293_s0 + $0x18] sm:$0xff]  ;;  %v1095_v3 = vld [vmem:[%s4292_s1 + $0x1d0] sm:$0xff] }
  0x2f   :  { %1459 = vmatmul.mubr.f32.vlgmr.msra.gmra.mxu1 %v1357_v21  ;;  %2172 = vmatprep.subr.mxu0 %v1196_v13  ;;  %v830_v61 = vadd.f32 %v829_v48, %v487_v34  ;;  %v468_v5 = vmax.f32 %v216_v50, 0.0  ;;  %v486_v6 = vmax.f32 %v2736_v51, 0.0  ;;  %v572_v7 = vadd.f32 %v571_v58, %v306_v44  ;;  %v53_v8 = vld [vmem:[%s4293_s0 + $0x138] sm:$0xff]  ;;  %v2766_v13 = vld [vmem:[%s4293_s0 + $0x1c8] sm:$0xff]  ;;  %v1093_v35 = vld [vmem:[%s4292_s1 + $0x1c0] sm:$0xff] }
  0x30   :  { %2068 = vmatpush3.msra.mxu1 %v1084_v4  ;;  %v360_v4 = vmax.f32 %v2728_v49, 0.0  ;;  %v591_v9 = vrot.slane %v590_v60, 4  ;;  %v576_v11 = vsel %vm523_vm0, %v378_v52, 0.0  ;;  %v814_v12 = vadd.f32 %v813_v63, %v432_v53  ;;  %v143_v14 = vld [vmem:[%s4293_s0 + $0x408] sm:$0xff]  ;;  %v161_v15 = vld [vmem:[%s4293_s0 + $0x498] sm:$0xff]  ;;  %v1091_v58 = vld [vmem:[%s4292_s1 + $0x1b0] sm:$0xff] }
  0x31   :  { %2069 = vmatprep.subr.mxu1 %v1099_v16  ;;  %v832_v10 = vadd.f32 %v831_v42, %v830_v61  ;;  %v1079_v16 = vld [vmem:[%s4292_s1 + $0x150] sm:$0xff]  ;;  %v818_v18 = vsel %vm523_vm0, %v504_v57, 0.0  ;;  %v2781_v19 = vld [vmem:[%s4293_s0 + $0x258] sm:$0xff]  ;;  %v269_v20 = vmax.f32 %v17_v0, 0.0  ;;  %v287_v21 = vmax.f32 %v35_v1, 0.0  ;;  %v2789_v26 = vld [vmem:[%s4293_s0 + $0x2e8] sm:$0xff] }
  0x32   :  { %2070 = vmatpush3.msra.mxu1 %v1083_v17  ;;  %v573_v17 = vadd.f32 %v572_v7, %v324_v55  ;;  %v592_v23 = vadd.f32 %v591_v9, %v590_v60  ;;  %v815_v25 = vadd.f32 %v814_v12, %v450_v62  ;;  %v179_v27 = vld [vmem:[%s4293_s0 + $0x528] sm:$0xff]  ;;  %v305_v28 = vmax.f32 %v53_v8, 0.0  ;;  %v2800_v31 = vld [vmem:[%s4293_s0 + $0x378] sm:$0x1]  ;;  %v1075_v0 = vld [vmem:[%s4292_s1 + $0x130] sm:$0xff] }
  0x33   :  { %2071 = vmatprep.subr.mxu1 %v1098_v22  ;;  %v1094_v22 = vld [vmem:[%s4292_s1 + $0x1c8] sm:$0xff]  ;;  %v833_v24 = vrot.slane %v832_v10, 4  ;;  %v323_v32 = vmax.f32 %v2766_v13, 0.0  ;;  %v395_v33 = vmax.f32 %v143_v14, 0.0  ;;  %v413_v34 = vmax.f32 %v161_v15, 0.0  ;;  %v197_v39 = vld [vmem:[%s4293_s0 + $0x5b8] sm:$0xff] }
  0x34   :  { %2072 = vmatpush3.msra.mxu1 %v1082_v29  ;;  %v1078_v29 = vld [vmem:[%s4292_s1 + $0x148] sm:$0xff]  ;;  %v574_v30 = vadd.f32 %v573_v17, %v342_v56  ;;  %v593_v36 = vrot.slane %v592_v23, 2  ;;  %v816_v38 = vadd.f32 %v815_v25, %v468_v5  ;;  %v341_v40 = vmax.f32 %v2781_v19, 0.0  ;;  %v1092_v47 = vld [vmem:[%s4292_s1 + $0x1b8] sm:$0xff]  ;;  %v16_v14 = vld [vmem:[%s4293_s0 + $0x10] sm:$0xff] }
  0x35   :  { %2073 = vmatprep.subr.mxu1 %v1097_v41  ;;  %v834_v37 = vadd.f32 %v833_v24, %v832_v10  ;;  %v1077_v41 = vld [vmem:[%s4292_s1 + $0x140] sm:$0xff]  ;;  %v215_v43 = vld [vmem:[%s4293_s0 + $0x648] sm:$0xff]  ;;  %v359_v44 = vmax.f32 %v2789_v26, 0.0  ;;  %v431_v45 = vmax.f32 %v179_v27, 0.0  ;;  %v558_v46 = vadd.f32 %v287_v21, %v269_v20  ;;  %v1076_v53 = vld [vmem:[%s4292_s1 + $0x138] sm:$0xff] }
  0x36   :  { %2074 = vmatpush3.msra.mxu1 %v1081_v54  ;;  %v575_v42 = vadd.f32 %v574_v30, %v360_v4  ;;  %v594_v48 = vadd.f32 %v593_v36, %v592_v23  ;;  %v817_v50 = vadd.f32 %v816_v38, %v486_v6  ;;  %v251_v51 = vld [vmem:[%s4293_s0 + $0x768] sm:$0x1]  ;;  %v377_v52 = vmax.f32 %v2800_v31, 0.0  ;;  %v233_v62 = vld [vmem:[%s4293_s0 + $0x6d8] sm:$0xff]  ;;  %v34_v15 = vld [vmem:[%s4293_s0 + $0xa0] sm:$0xff] }
  0x37   :  { %2075 = vmatprep.subr.mxu1 %v1096_v59  ;;  %v835_v49 = vrot.slane %v834_v37, 2  ;;  %v449_v55 = vmax.f32 %v197_v39, 0.0  ;;  %v559_v56 = vadd.f32 %v558_v46, %v305_v28  ;;  %v800_v57 = vadd.f32 %v413_v34, %v395_v33  ;;  %v1090_v5 = vld [vmem:[%s4292_s1 + $0x1a8] sm:$0xff]  ;;  %v1073_v17 = vld [vmem:[%s4292_s1 + $0x120] sm:$0xff]  ;;  %v1088_v23 = vld [vmem:[%s4292_s1 + $0x198] sm:$0xff] }
  0x38   :  { %2076 = vmatpush3.msra.mxu1 %v1080_v2  ;;  %v577_v54 = vadd.f32 %v576_v11, %v575_v42  ;;  %v595_v59 = vrot.slane %v594_v48, 1  ;;  %v819_v61 = vadd.f32 %v818_v18, %v817_v50  ;;  %v467_v63 = vmax.f32 %v215_v43, 0.0  ;;  %v1074_v9 = vld [vmem:[%s4292_s1 + $0x128] sm:$0xff]  ;;  %v142_v28 = vld [vmem:[%s4293_s0 + $0x400] sm:$0xff]  ;;  %v88_v39 = vld [vmem:[%s4293_s0 + $0x250] sm:$0xff] }
  0x39   :  { %2077 = vmatprep.subr.mxu1 %v1095_v3  ;;  %v836_v60 = vadd.f32 %v835_v49, %v834_v37  ;;  %v503_v2 = vmax.f32 %v251_v51, 0.0  ;;  %v560_v3 = vadd.f32 %v559_v56, %v323_v32  ;;  %v801_v4 = vadd.f32 %v800_v57, %v431_v45  ;;  %v70_v32 = vld [vmem:[%s4293_s0 + $0x1c0] sm:$0xff]  ;;  %v1087_v42 = vld [vmem:[%s4292_s1 + $0x190] sm:$0xff] }
  0x3a   :  { %2078 = vmatpush3.msra.mxu1 %v1079_v16  ;;  %v578_v1 = vrot.slane %v577_v54, 4  ;;  %v596_v6 = vadd.f32 %v595_v59, %v594_v48  ;;  %v820_v8 = vrot.slane %v819_v61, 4  ;;  %v485_v11 = vmax.f32 %v233_v62, 0.0  ;;  %v1089_v16 = vld [vmem:[%s4292_s1 + $0x1a0] sm:$0xff]  ;;  %v1071_v48 = vld [vmem:[%s4292_s1 + $0x110] sm:$0xff] }
  0x3b   :  { %2079 = vmatprep.subr.mxu1 %v1094_v22  ;;  %v837_v7 = vrot.slane %v836_v60, 1  ;;  %v561_v12 = vadd.f32 %v560_v3, %v341_v40  ;;  %v802_v13 = vadd.f32 %v801_v4, %v449_v55  ;;  %v563_v21 = vsel %vm523_vm0, %v377_v52, 0.0  ;;  %v52_v22 = vld [vmem:[%s4293_s0 + $0x130] sm:$0xff]  ;;  %v178_v40 = vld [vmem:[%s4293_s0 + $0x520] sm:$0xff] }
  0x3c   :  { %2080 = vmatpush3.msra.mxu1 %v1078_v29  ;;  %v579_v10 = vadd.f32 %v578_v1, %v577_v54  ;;  %v1006_v19 = vmul.f32 0.020408163, %v596_v6  ;;  %v821_v20 = vadd.f32 %v820_v8, %v819_v61  ;;  %v805_v27 = vsel %vm523_vm0, %v503_v2, 0.0  ;;  %v160_v29 = vld [vmem:[%s4293_s0 + $0x490] sm:$0xff]  ;;  %v2887_v45 = vld [vmem:[%s4293_s0 + $0x2e0] sm:$0xff]  ;;  %v1086_v54 = vld [vmem:[%s4292_s1 + $0x188] sm:$0xff] }
  0x3d   :  { %2081 = vmatprep.subr.mxu1 %v1093_v35  ;;  %v838_v18 = vadd.f32 %v837_v7, %v836_v60  ;;  %v562_v25 = vadd.f32 %v561_v12, %v359_v44  ;;  %v803_v26 = vadd.f32 %v802_v13, %v467_v63  ;;  %v268_v33 = vmax.f32 %v16_v14, 0.0  ;;  %v1072_v35 = vld [vmem:[%s4292_s1 + $0x118] sm:$0xff]  ;;  %v196_v52 = vld [vmem:[%s4293_s0 + $0x5b0] sm:$0xff]  ;;  %v1070_v60 = vld [vmem:[%s4292_s1 + $0x108] sm:$0xff] }
  0x3e   :  { %2082 = vmatpush3.msra.mxu1 %v1077_v41  ;;  %v580_v24 = vrot.slane %v579_v10, 2  ;;  %v822_v31 = vrot.slane %v821_v20, 2  ;;  %v286_v34 = vmax.f32 %v34_v15, 0.0  ;;  %v304_v41 = vmax.f32 %v52_v22, 0.0  ;;  %v124_v56 = vld [vmem:[%s4293_s0 + $0x370] sm:$0x1] }
  0x3f   :  { %2083 = vmatprep.subr.mxu1 %v1092_v47  ;;  %v1024_v30 = vmul.f32 0.020408163, %v838_v18  ;;  %v564_v37 = vadd.f32 %v563_v21, %v562_v25  ;;  %v804_v38 = vadd.f32 %v803_v26, %v485_v11  ;;  %v394_v46 = vmax.f32 %v142_v28, 0.0  ;;  %v1085_v3 = vld [vmem:[%s4292_s1 + $0x180] sm:$0xff]  ;;  %v232_v12 = vld [vmem:[%s4293_s0 + $0x6d0] sm:$0xff]  ;;  %v1164_v18 = vld [vmem:[%s4292_s1 + $0x3f8] sm:$0xff] }
  0x40   :  { %2084 = vmatpush3.msra.mxu1 %v1076_v53  ;;  %v581_v36 = vadd.f32 %v580_v24, %v579_v10  ;;  %v823_v44 = vadd.f32 %v822_v31, %v821_v20  ;;  %v412_v47 = vmax.f32 %v160_v29, 0.0  ;;  %v322_v53 = vmax.f32 %v70_v32, 0.0  ;;  %v250_v4 = vld [vmem:[%s4293_s0 + $0x760] sm:$0x1]  ;;  %v1195_v24 = vld [vmem:[%s4292_s1 + $0x4f0] sm:$0xff]  ;;  %v23_v32 = vld [vmem:[%s4293_s0 + $0x48] sm:$0xff] }
  0x41   :  { %2085 = vmatprep.subr.mxu1 %v1091_v58  ;;  %v1362_v43 = vsel %vm1356_vm1, %v1024_v30, %v1006_v19  ;;  %v565_v50 = vrot.slane %v564_v37, 4  ;;  %v806_v51 = vadd.f32 %v805_v27, %v804_v38  ;;  %v340_v57 = vmax.f32 %v88_v39, 0.0  ;;  %v1180_v19 = vld [vmem:[%s4292_s1 + $0x478] sm:$0xff]  ;;  %v1179_v30 = vld [vmem:[%s4292_s1 + $0x470] sm:$0xff] }
  0x42   :  { %2086 = vmatpush3.msra.mxu1 %v1075_v0  ;;  %1598 = vmatprep.mubr.f32.mxu0 %v1362_v43  ;;  %v582_v49 = vrot.slane %v581_v36, 1  ;;  %v824_v55 = vrot.slane %v823_v44, 1  ;;  %v430_v58 = vmax.f32 %v178_v40, 0.0  ;;  %v545_v59 = vadd.f32 %v286_v34, %v268_v33  ;;  %v214_v0 = vld [vmem:[%s4293_s0 + $0x640] sm:$0xff]  ;;  %v41_v33 = vld [vmem:[%s4293_s0 + $0xd8] sm:$0xff]  ;;  %v1178_v43 = vld [vmem:[%s4292_s1 + $0x468] sm:$0xff] }
  0x43   :  { %2087 = vmatprep.subr.mxu1 %v1090_v5  ;;  %v566_v62 = vadd.f32 %v565_v50, %v564_v37  ;;  %v807_v63 = vrot.slane %v806_v51, 4  ;;  %v358_v1 = vmax.f32 %v2887_v45, 0.0  ;;  %v448_v5 = vmax.f32 %v196_v52, 0.0  ;;  %v59_v37 = vld [vmem:[%s4293_s0 + $0x168] sm:$0xff]  ;;  %v149_v45 = vld [vmem:[%s4293_s0 + $0x438] sm:$0xff] }
  0x44   :  { %2088 = vmatpush3.msra.mxu1 %v1074_v9  ;;  %v583_v61 = vadd.f32 %v582_v49, %v581_v36  ;;  %v825_v2 = vadd.f32 %v824_v55, %v823_v44  ;;  %v546_v6 = vadd.f32 %v545_v59, %v304_v41  ;;  %v787_v7 = vadd.f32 %v412_v47, %v394_v46  ;;  %v1069_v9 = vld [vmem:[%s4292_s1 + $0x100] sm:$0xff]  ;;  %v1194_v36 = vld [vmem:[%s4292_s1 + $0x4e8] sm:$0xff]  ;;  %v77_v49 = vld [vmem:[%s4293_s0 + $0x1f8] sm:$0xff] }
  0x45   :  { %2089 = vmatprep.subr.mxu1 %v1089_v16  ;;  %v567_v10 = vrot.slane %v566_v62, 2  ;;  %v808_v11 = vadd.f32 %v807_v63, %v806_v51  ;;  %v376_v13 = vmax.f32 %v124_v56, 0.0  ;;  %v466_v15 = vmax.f32 %v214_v0, 0.0  ;;  %v1193_v44 = vld [vmem:[%s4292_s1 + $0x4e0] sm:$0xff]  ;;  %v167_v50 = vld [vmem:[%s4293_s0 + $0x4c8] sm:$0xff]  ;;  %v185_v55 = vld [vmem:[%s4293_s0 + $0x558] sm:$0xff] }
  0x46   :  { %2090 = vmatpush3.msra.mxu1 %v1073_v17  ;;  %v1005_v8 = vmul.f32 0.020408163, %v583_v61  ;;  %v1023_v14 = vmul.f32 0.020408163, %v825_v2  ;;  %v547_v16 = vadd.f32 %v546_v6, %v322_v53  ;;  %v788_v17 = vadd.f32 %v787_v7, %v430_v58  ;;  %v1192_v53 = vld [vmem:[%s4292_s1 + $0x4d8] sm:$0xff]  ;;  %v1191_v6 = vld [vmem:[%s4292_s1 + $0x4d0] sm:$0xff] }
  0x47   :  { %2091 = vmatprep.subr.mxu1 %v1088_v23  ;;  %v568_v20 = vadd.f32 %v567_v10, %v566_v62  ;;  %v809_v21 = vrot.slane %v808_v11, 2  ;;  %v502_v22 = vmax.f32 %v250_v4, 0.0  ;;  %v484_v25 = vmax.f32 %v232_v12, 0.0  ;;  %v257_v61 = vld [vmem:[%s4293_s0 + $0x798] sm:$0x1]  ;;  %v1175_v12 = vld [vmem:[%s4292_s1 + $0x450] sm:$0xff] }
  0x48   :  { %2092 = vmatpush3.msra.mxu1 %v1072_v35  ;;  %v1361_v23 = vsel %vm1356_vm1, %v1023_v14, %v1005_v8  ;;  %v548_v26 = vadd.f32 %v547_v16, %v340_v57  ;;  %v789_v27 = vadd.f32 %v788_v17, %v448_v5  ;;  %v550_v31 = vsel %vm523_vm0, %v376_v13, 0.0  ;;  %v1176_v0 = vld [vmem:[%s4292_s1 + $0x458] sm:$0xff]  ;;  %v3002_v13 = vld [vmem:[%s4293_s0 + $0x708] sm:$0xff] }
  0x49   :  { %2093 = vmatprep.subr.mxu1 %v1087_v42  ;;  %1599 = vmatmul.mubr.f32.vlgmr.msra.gmra.mxu0 %v1361_v23  ;;  %v569_v28 = vrot.slane %v568_v20, 1  ;;  %v810_v29 = vadd.f32 %v809_v21, %v808_v11  ;;  %v275_v38 = vmax.f32 %v23_v32, 0.0  ;;  %v293_v39 = vmax.f32 %v41_v33, 0.0  ;;  %v113_v7 = vld [vmem:[%s4293_s0 + $0x318] sm:$0xff]  ;;  %v1174_v23 = vld [vmem:[%s4292_s1 + $0x448] sm:$0xff]  ;;  %v58_v33 = vld [vmem:[%s4293_s0 + $0x160] sm:$0xff] }
  0x4a   :  { %2094 = vmatpush3.msra.mxu1 %v1071_v48  ;;  %2173 = vmatpush3.msra.mxu0 %v1180_v19  ;;  %v549_v34 = vadd.f32 %v548_v26, %v358_v1  ;;  %v790_v35 = vadd.f32 %v789_v27, %v466_v15  ;;  %v792_v42 = vsel %vm523_vm0, %v502_v22, 0.0  ;;  %v1177_v48 = vld [vmem:[%s4292_s1 + $0x460] sm:$0xff]  ;;  %v311_v56 = vmax.f32 %v59_v37, 0.0  ;;  %v203_v1 = vld [vmem:[%s4293_s0 + $0x5e8] sm:$0xff]  ;;  %v221_v8 = vld [vmem:[%s4293_s0 + $0x678] sm:$0xff] }
  0x4b   :  { %2095 = vmatprep.subr.mxu1 %v1086_v54  ;;  %2174 = vmatprep.subr.mxu0 %v1195_v24  ;;  %v570_v40 = vadd.f32 %v569_v28, %v568_v20  ;;  %v811_v41 = vrot.slane %v810_v29, 1  ;;  %v95_v54 = vld [vmem:[%s4293_s0 + $0x288] sm:$0xff]  ;;  %v636_v57 = vadd.f32 %v293_v39, %v275_v38  ;;  %v401_v62 = vmax.f32 %v149_v45, 0.0  ;;  %v22_v22 = vld [vmem:[%s4293_s0 + $0x40] sm:$0xff]  ;;  %v40_v28 = vld [vmem:[%s4293_s0 + $0xd0] sm:$0xff] }
  0x4c   :  { %2096 = vmatpush3.msra.mxu1 %v1070_v60  ;;  %2175 = vmatpush3.msra.mxu0 %v1179_v30  ;;  %v551_v46 = vadd.f32 %v550_v31, %v549_v34  ;;  %v791_v47 = vadd.f32 %v790_v35, %v484_v25  ;;  %v131_v60 = vld [vmem:[%s4293_s0 + $0x3a8] sm:$0x1]  ;;  %v329_v2 = vmax.f32 %v77_v49, 0.0  ;;  %v437_v10 = vmax.f32 %v185_v55, 0.0  ;;  %v1189_v24 = vld [vmem:[%s4292_s1 + $0x4c0] sm:$0xff]  ;;  %v148_v34 = vld [vmem:[%s4293_s0 + $0x430] sm:$0xff] }
  0x4d   :  { %2097 = vmatprep.subr.mxu1 %v1085_v3  ;;  %v812_v51 = vadd.f32 %v811_v41, %v810_v29  ;;  %v1004_v52 = vmul.f32 0.020408163, %v570_v40  ;;  %2176 = vmatprep.subr.mxu0 %v1194_v36  ;;  %v419_v3 = vmax.f32 %v167_v50, 0.0  ;;  %v383_v14 = vmax.f32 %v131_v60, 0.0  ;;  %v1190_v19 = vld [vmem:[%s4292_s1 + $0x4c8] sm:$0xff]  ;;  %v166_v35 = vld [vmem:[%s4293_s0 + $0x4c0] sm:$0xff] }
  0x4e   :  { %2098 = vmatpush3.msra.mxu1 %v1069_v9  ;;  %v552_v58 = vrot.slane %v551_v46, 4  ;;  %v793_v59 = vadd.f32 %v792_v42, %v791_v47  ;;  %2177 = vmatpush3.msra.mxu0 %v1178_v43  ;;  %v347_v9 = vmax.f32 %v95_v54, 0.0  ;;  %v509_v15 = vmax.f32 %v257_v61, 0.0  ;;  %v1173_v36 = vld [vmem:[%s4292_s1 + $0x440] sm:$0xff]  ;;  %v1188_v37 = vld [vmem:[%s4292_s1 + $0x4b8] sm:$0xff]  ;;  %v3040_v41 = vld [vmem:[%s4293_s0 + $0x1f0] sm:$0xff] }
  0x4f   :  { %2137 = vmatprep.subr.mxu1 %v1164_v18  ;;  %v1022_v63 = vmul.f32 0.020408163, %v812_v51  ;;  %2178 = vmatprep.subr.mxu0 %v1193_v44  ;;  %v637_v16 = vadd.f32 %v636_v57, %v311_v56  ;;  %v455_v20 = vmax.f32 %v203_v1, 0.0  ;;  %v878_v21 = vadd.f32 %v419_v3, %v401_v62  ;;  %v3050_v47 = vld [vmem:[%s4293_s0 + $0x3a0] sm:$0x1]  ;;  %v1172_v50 = vld [vmem:[%s4292_s1 + $0x438] sm:$0xff] }
  0x50   :  { %v553_v4 = vadd.f32 %v552_v58, %v551_v46  ;;  %v794_v5 = vrot.slane %v793_v59, 4  ;;  %2179 = vmatpush3.msra.mxu0 %v1177_v48  ;;  %v365_v25 = vmax.f32 %v113_v7, 0.0  ;;  %v473_v26 = vmax.f32 %v221_v8, 0.0  ;;  %v3045_v46 = vld [vmem:[%s4293_s0 + $0x280] sm:$0xff]  ;;  %v184_v48 = vld [vmem:[%s4293_s0 + $0x550] sm:$0xff] }
  0x51   :  { %v1360_v11 = vsel %vm1356_vm1, %v1022_v63, %v1004_v52  ;;  %2180 = vmatprep.subr.mxu0 %v1192_v53  ;;  %v638_v27 = vadd.f32 %v637_v16, %v329_v2  ;;  %v491_v31 = vmax.f32 %v3002_v13, 0.0  ;;  %v879_v32 = vadd.f32 %v878_v21, %v437_v10  ;;  %v1187_v57 = vld [vmem:[%s4292_s1 + $0x4b0] sm:$0xff] }
  0x52   :  { %1528 = vmatprep.mubr.f32.mxu1 %v1360_v11  ;;  %v554_v17 = vrot.slane %v553_v4, 2  ;;  %v795_v18 = vadd.f32 %v794_v5, %v793_v59  ;;  %2181 = vmatpush3.msra.mxu0 %v1176_v0  ;;  %v641_v39 = vsel %vm523_vm0, %v383_v14, 0.0  ;;  %v883_v40 = vsel %vm523_vm0, %v509_v15, 0.0  ;;  %v202_v59 = vld [vmem:[%s4293_s0 + $0x5e0] sm:$0xff]  ;;  %v256_v60 = vld [vmem:[%s4293_s0 + $0x790] sm:$0x1] }
  0x53   :  { %2182 = vmatprep.subr.mxu0 %v1191_v6  ;;  %v639_v38 = vadd.f32 %v638_v27, %v347_v9  ;;  %v274_v42 = vmax.f32 %v22_v22, 0.0  ;;  %v880_v45 = vadd.f32 %v879_v32, %v455_v20  ;;  %v292_v49 = vmax.f32 %v40_v28, 0.0  ;;  %v1171_v62 = vld [vmem:[%s4292_s1 + $0x430] sm:$0xff]  ;;  %v1186_v6 = vld [vmem:[%s4292_s1 + $0x4a8] sm:$0xff]  ;;  %v3087_v9 = vld [vmem:[%s4293_s0 + $0x700] sm:$0xff] }
  0x54   :  { %v555_v29 = vadd.f32 %v554_v17, %v553_v4  ;;  %v796_v30 = vrot.slane %v795_v18, 2  ;;  %2183 = vmatpush3.msra.mxu0 %v1175_v12  ;;  %v310_v52 = vmax.f32 %v58_v33, 0.0  ;;  %v400_v53 = vmax.f32 %v148_v34, 0.0  ;;  %v3074_v0 = vld [vmem:[%s4293_s0 + $0x310] sm:$0xff]  ;;  %v1148_v11 = vld [vmem:[%s4292_s1 + $0x378] sm:$0xff]  ;;  %v1170_v12 = vld [vmem:[%s4292_s1 + $0x428] sm:$0xff] }
  0x55   :  { %2184 = vmatprep.subr.mxu0 %v1190_v19  ;;  %v640_v51 = vadd.f32 %v639_v38, %v365_v25  ;;  %v418_v54 = vmax.f32 %v166_v35, 0.0  ;;  %v881_v58 = vadd.f32 %v880_v45, %v473_v26  ;;  %v328_v61 = vmax.f32 %v3040_v41, 0.0  ;;  %v220_v8 = vld [vmem:[%s4293_s0 + $0x670] sm:$0xff]  ;;  %v1185_v19 = vld [vmem:[%s4292_s1 + $0x4a0] sm:$0xff]  ;;  %v1162_v33 = vld [vmem:[%s4292_s1 + $0x3e8] sm:$0xff] }
  0x56   :  { %v556_v43 = vrot.slane %v555_v29, 1  ;;  %v797_v44 = vadd.f32 %v796_v30, %v795_v18  ;;  %2185 = vmatpush3.msra.mxu0 %v1174_v23  ;;  %v346_v1 = vmax.f32 %v3045_v46, 0.0  ;;  %v382_v2 = vmax.f32 %v3050_v47, 0.0  ;;  %v1163_v18 = vld [vmem:[%s4292_s1 + $0x3f0] sm:$0xff]  ;;  %v3105_v23 = vld [vmem:[%s4293_s0 + $0x38] sm:$0xff]  ;;  %v1169_v25 = vld [vmem:[%s4292_s1 + $0x420] sm:$0xff] }
  0x57   :  { %2186 = vmatprep.subr.mxu0 %v1189_v24  ;;  %v642_v63 = vadd.f32 %v641_v39, %v640_v51  ;;  %v436_v3 = vmax.f32 %v184_v48, 0.0  ;;  %v882_v7 = vadd.f32 %v881_v58, %v491_v31  ;;  %v623_v10 = vadd.f32 %v292_v49, %v274_v42  ;;  %v1147_v24 = vld [vmem:[%s4292_s1 + $0x370] sm:$0xff]  ;;  %v3117_v30 = vld [vmem:[%s4293_s0 + $0xc8] sm:$0xff]  ;;  %v3122_v31 = vld [vmem:[%s4293_s0 + $0x158] sm:$0xff] }
  0x58   :  { %v557_v55 = vadd.f32 %v556_v43, %v555_v29  ;;  %v798_v56 = vrot.slane %v797_v44, 1  ;;  %2187 = vmatpush3.msra.mxu0 %v1173_v36  ;;  %v454_v14 = vmax.f32 %v202_v59, 0.0  ;;  %v508_v15 = vmax.f32 %v256_v60, 0.0  ;;  %v1184_v34 = vld [vmem:[%s4292_s1 + $0x498] sm:$0xff]  ;;  %v3135_v38 = vld [vmem:[%s4293_s0 + $0x428] sm:$0xff]  ;;  %v1161_v48 = vld [vmem:[%s4292_s1 + $0x3e0] sm:$0xff] }
  0x59   :  { %2188 = vmatprep.subr.mxu0 %v1188_v37  ;;  %v643_v13 = vrot.slane %v642_v63, 4  ;;  %v865_v16 = vadd.f32 %v418_v54, %v400_v53  ;;  %v884_v20 = vadd.f32 %v883_v40, %v882_v7  ;;  %v364_v21 = vmax.f32 %v3074_v0, 0.0  ;;  %v3140_v39 = vld [vmem:[%s4293_s0 + $0x4b8] sm:$0xff]  ;;  %v1146_v40 = vld [vmem:[%s4292_s1 + $0x368] sm:$0xff]  ;;  %v1183_v49 = vld [vmem:[%s4292_s1 + $0x490] sm:$0xff] }
  0x5a   :  { %v799_v4 = vadd.f32 %v798_v56, %v797_v44  ;;  %v1003_v5 = vmul.f32 0.020408163, %v557_v55  ;;  %2189 = vmatpush3.msra.mxu0 %v1172_v50  ;;  %v624_v22 = vadd.f32 %v623_v10, %v310_v52  ;;  %v472_v27 = vmax.f32 %v220_v8, 0.0  ;;  %v1168_v41 = vld [vmem:[%s4292_s1 + $0x418] sm:$0xff]  ;;  %v3152_v45 = vld [vmem:[%s4293_s0 + $0x1e8] sm:$0xff]  ;;  %v1145_v56 = vld [vmem:[%s4292_s1 + $0x360] sm:$0xff] }
  0x5b   :  { %2190 = vmatprep.subr.mxu0 %v1187_v57  ;;  %v644_v26 = vadd.f32 %v643_v13, %v642_v63  ;;  %v490_v28 = vmax.f32 %v3087_v9, 0.0  ;;  %v866_v29 = vadd.f32 %v865_v16, %v436_v3  ;;  %v885_v35 = vrot.slane %v884_v20, 4  ;;  %v3157_v46 = vld [vmem:[%s4293_s0 + $0x278] sm:$0xff]  ;;  %v183_v53 = vld [vmem:[%s4293_s0 + $0x548] sm:$0xff]  ;;  %v1167_v57 = vld [vmem:[%s4292_s1 + $0x410] sm:$0xff] }
  0x5c   :  { %v1021_v17 = vmul.f32 0.020408163, %v799_v4  ;;  %2191 = vmatpush3.msra.mxu0 %v1171_v62  ;;  %v625_v36 = vadd.f32 %v624_v22, %v328_v61  ;;  %v628_v37 = vsel %vm523_vm0, %v382_v2, 0.0  ;;  %v870_v44 = vsel %vm523_vm0, %v508_v15, 0.0  ;;  %v3169_v52 = vld [vmem:[%s4293_s0 + $0x398] sm:$0x1] }
  0x5d   :  { %2192 = vmatprep.subr.mxu0 %v1186_v6  ;;  %v645_v42 = vrot.slane %v644_v26, 2  ;;  %v867_v43 = vadd.f32 %v866_v29, %v454_v14  ;;  %v273_v47 = vmax.f32 %v3105_v23, 0.0  ;;  %v886_v50 = vadd.f32 %v885_v35, %v884_v20  ;;  %v3185_v60 = vld [vmem:[%s4293_s0 + $0x5d8] sm:$0xff]  ;;  %v1182_v63 = vld [vmem:[%s4292_s1 + $0x488] sm:$0xff]  ;;  %v1165_v20 = vld [vmem:[%s4292_s1 + $0x400] sm:$0xff] }
  0x5e   :  { %v1359_v32 = vsel %vm1356_vm1, %v1021_v17, %v1003_v5  ;;  %2193 = vmatpush3.msra.mxu0 %v1170_v12  ;;  %v626_v51 = vadd.f32 %v625_v36, %v346_v1  ;;  %v291_v54 = vmax.f32 %v3117_v30, 0.0  ;;  %v309_v55 = vmax.f32 %v3122_v31, 0.0  ;;  %v255_v2 = vld [vmem:[%s4293_s0 + $0x788] sm:$0x1]  ;;  %v1160_v5 = vld [vmem:[%s4292_s1 + $0x3d8] sm:$0xff]  ;;  %v1181_v12 = vld [vmem:[%s4292_s1 + $0x480] sm:$0xff] }
  0x5f   :  { %1529 = vmatmul.mubr.f32.vlgmr.msra.gmra.mxu1 %v1359_v32  ;;  %2194 = vmatprep.subr.mxu0 %v1185_v19  ;;  %v646_v58 = vadd.f32 %v645_v42, %v644_v26  ;;  %v868_v59 = vadd.f32 %v867_v43, %v472_v27  ;;  %v399_v61 = vmax.f32 %v3135_v38, 0.0  ;;  %v417_v62 = vmax.f32 %v3140_v39, 0.0  ;;  %v1166_v6 = vld [vmem:[%s4292_s1 + $0x408] sm:$0xff]  ;;  %v3218_v16 = vld [vmem:[%s4293_s0 + $0x6f8] sm:$0xff]  ;;  %v1143_v31 = vld [vmem:[%s4292_s1 + $0x350] sm:$0xff] }
  0x60   :  { %2138 = vmatpush3.msra.mxu1 %v1148_v11  ;;  %2195 = vmatpush3.msra.mxu0 %v1169_v25  ;;  %v887_v0 = vrot.slane %v886_v50, 2  ;;  %v627_v1 = vadd.f32 %v626_v51, %v364_v21  ;;  %v327_v3 = vmax.f32 %v3152_v45, 0.0  ;;  %v345_v4 = vmax.f32 %v3157_v46, 0.0  ;;  %v3206_v9 = vld [vmem:[%s4293_s0 + $0x308] sm:$0xff]  ;;  %v1144_v19 = vld [vmem:[%s4292_s1 + $0x358] sm:$0xff]  ;;  %v1159_v25 = vld [vmem:[%s4292_s1 + $0x3d0] sm:$0xff] }
  0x61   :  { %2139 = vmatprep.subr.mxu1 %v1163_v18  ;;  %2196 = vmatprep.subr.mxu0 %v1184_v34  ;;  %v647_v7 = vrot.slane %v646_v58, 1  ;;  %v869_v8 = vadd.f32 %v868_v59, %v490_v28  ;;  %v381_v10 = vmax.f32 %v3169_v52, 0.0  ;;  %v435_v11 = vmax.f32 %v183_v53, 0.0  ;;  %v219_v15 = vld [vmem:[%s4293_s0 + $0x668] sm:$0xff]  ;;  %v1260_v27 = vld [vmem:[%s4292_s1 + $0x6f8] sm:$0xff]  ;;  %v3241_v36 = vld [vmem:[%s4293_s0 + $0x30] sm:$0xff] }
  0x62   :  { %2140 = vmatpush3.msra.mxu1 %v1147_v24  ;;  %2197 = vmatpush3.msra.mxu0 %v1168_v41  ;;  %v888_v13 = vadd.f32 %v887_v0, %v886_v50  ;;  %v629_v14 = vadd.f32 %v628_v37, %v627_v1  ;;  %v453_v17 = vmax.f32 %v3185_v60, 0.0  ;;  %v610_v18 = vadd.f32 %v291_v54, %v273_v47  ;;  %v1158_v37 = vld [vmem:[%s4292_s1 + $0x3c8] sm:$0xff]  ;;  %v38_v42 = vld [vmem:[%s4293_s0 + $0xc0] sm:$0xff]  ;;  %v164_v51 = vld [vmem:[%s4293_s0 + $0x4b0] sm:$0xff] }
  0x63   :  { %2141 = vmatprep.subr.mxu1 %v1162_v33  ;;  %2198 = vmatprep.subr.mxu0 %v1183_v49  ;;  %v648_v21 = vadd.f32 %v647_v7, %v646_v58  ;;  %v871_v22 = vadd.f32 %v870_v44, %v869_v8  ;;  %v507_v23 = vmax.f32 %v255_v2, 0.0  ;;  %v852_v24 = vadd.f32 %v417_v62, %v399_v61  ;;  %v146_v43 = vld [vmem:[%s4293_s0 + $0x420] sm:$0xff]  ;;  %v1142_v44 = vld [vmem:[%s4292_s1 + $0x348] sm:$0xff]  ;;  %v3280_v46 = vld [vmem:[%s4293_s0 + $0x270] sm:$0xff] }
  0x64   :  { %2142 = vmatpush3.msra.mxu1 %v1146_v40  ;;  %2199 = vmatpush3.msra.mxu0 %v1167_v57  ;;  %v889_v26 = vrot.slane %v888_v13, 1  ;;  %v630_v28 = vrot.slane %v629_v14, 4  ;;  %v363_v29 = vmax.f32 %v3206_v9, 0.0  ;;  %v611_v30 = vadd.f32 %v610_v18, %v309_v55  ;;  %v1157_v45 = vld [vmem:[%s4292_s1 + $0x3c0] sm:$0xff]  ;;  %v56_v55 = vld [vmem:[%s4293_s0 + $0x150] sm:$0xff]  ;;  %v1156_v0 = vld [vmem:[%s4292_s1 + $0x3b8] sm:$0xff] }
  0x65   :  { %2143 = vmatprep.subr.mxu1 %v1161_v48  ;;  %2200 = vmatprep.subr.mxu0 %v1182_v63  ;;  %v872_v32 = vrot.slane %v871_v22, 4  ;;  %v471_v33 = vmax.f32 %v219_v15, 0.0  ;;  %v489_v34 = vmax.f32 %v3218_v16, 0.0  ;;  %v853_v35 = vadd.f32 %v852_v24, %v435_v11  ;;  %v1141_v58 = vld [vmem:[%s4292_s1 + $0x340] sm:$0xff]  ;;  %v200_v9 = vld [vmem:[%s4293_s0 + $0x5d0] sm:$0xff]  ;;  %v1154_v24 = vld [vmem:[%s4292_s1 + $0x3a8] sm:$0xff] }
  0x66   :  { %2144 = vmatpush3.msra.mxu1 %v1145_v56  ;;  %2201 = vmatpush3.msra.mxu0 %v1166_v6  ;;  %v890_v38 = vadd.f32 %v889_v26, %v888_v13  ;;  %v1010_v39 = vmul.f32 0.020408163, %v648_v21  ;;  %v631_v40 = vadd.f32 %v630_v28, %v629_v14  ;;  %v612_v41 = vadd.f32 %v611_v30, %v327_v3  ;;  %v3271_v56 = vld [vmem:[%s4293_s0 + $0x1e0] sm:$0xff]  ;;  %v1140_v6 = vld [vmem:[%s4292_s1 + $0x338] sm:$0xff]  ;;  %v1139_v18 = vld [vmem:[%s4292_s1 + $0x330] sm:$0xff] }
  0x67   :  { %2145 = vmatprep.subr.mxu1 %v1160_v5  ;;  %2202 = vmatprep.subr.mxu0 %v1181_v12  ;;  %v873_v47 = vadd.f32 %v872_v32, %v871_v22  ;;  %v615_v48 = vsel %vm523_vm0, %v381_v10, 0.0  ;;  %v854_v49 = vadd.f32 %v853_v35, %v453_v17  ;;  %v857_v50 = vsel %vm523_vm0, %v507_v23, 0.0  ;;  %v182_v61 = vld [vmem:[%s4293_s0 + $0x540] sm:$0xff]  ;;  %v1155_v12 = vld [vmem:[%s4292_s1 + $0x3b0] sm:$0xff]  ;;  %v1138_v30 = vld [vmem:[%s4292_s1 + $0x328] sm:$0xff] }
  0x68   :  { %2146 = vmatpush3.msra.mxu1 %v1144_v19  ;;  %2203 = vmatpush3.msra.mxu0 %v1165_v20  ;;  %v1028_v52 = vmul.f32 0.020408163, %v890_v38  ;;  %v632_v53 = vrot.slane %v631_v40, 2  ;;  %v613_v54 = vadd.f32 %v612_v41, %v345_v4  ;;  %v272_v57 = vmax.f32 %v3241_v36, 0.0  ;;  %v3292_v4 = vld [vmem:[%s4293_s0 + $0x390] sm:$0x1] }
  0x69   :  { %2147 = vmatprep.subr.mxu1 %v1159_v25  ;;  %2242 = vmatprep.subr.mxu0 %v1260_v27  ;;  %v874_v59 = vrot.slane %v873_v47, 2  ;;  %v855_v60 = vadd.f32 %v854_v49, %v471_v33  ;;  %v290_v62 = vmax.f32 %v38_v42, 0.0  ;;  %v398_v63 = vmax.f32 %v146_v43, 0.0  ;;  %v218_v15 = vld [vmem:[%s4293_s0 + $0x660] sm:$0xff]  ;;  %v236_v33 = vld [vmem:[%s4293_s0 + $0x6f0] sm:$0xff]  ;;  %v1152_v42 = vld [vmem:[%s4292_s1 + $0x398] sm:$0xff] }
  0x6a   :  { %2148 = vmatpush3.msra.mxu1 %v1143_v31  ;;  %v1366_v1 = vsel %vm1356_vm1, %v1028_v52, %v1010_v39  ;;  %v633_v2 = vadd.f32 %v632_v53, %v631_v40  ;;  %v614_v3 = vadd.f32 %v613_v54, %v363_v29  ;;  %v416_v5 = vmax.f32 %v164_v51, 0.0  ;;  %v254_v21 = vld [vmem:[%s4293_s0 + $0x780] sm:$0x1]  ;;  %v1136_v43 = vld [vmem:[%s4292_s1 + $0x318] sm:$0xff]  ;;  %v1151_v49 = vld [vmem:[%s4292_s1 + $0x390] sm:$0xff] }
  0x6b   :  { %2149 = vmatprep.subr.mxu1 %v1158_v37  ;;  %1738 = vmatprep.mubr.f32.mxu0 %v1366_v1  ;;  %v875_v7 = vadd.f32 %v874_v59, %v873_v47  ;;  %v856_v8 = vadd.f32 %v855_v60, %v489_v34  ;;  %v308_v10 = vmax.f32 %v56_v55, 0.0  ;;  %v326_v11 = vmax.f32 %v3271_v56, 0.0  ;;  %v110_v27 = vld [vmem:[%s4293_s0 + $0x300] sm:$0xff]  ;;  %v3348_v54 = vld [vmem:[%s4293_s0 + $0x68] sm:$0xff]  ;;  %v3353_v55 = vld [vmem:[%s4293_s0 + $0xf8] sm:$0xff] }
  0x6c   :  { %2150 = vmatpush3.msra.mxu1 %v1142_v44  ;;  %v634_v13 = vrot.slane %v633_v2, 1  ;;  %v616_v14 = vadd.f32 %v615_v48, %v614_v3  ;;  %v344_v16 = vmax.f32 %v3280_v46, 0.0  ;;  %v434_v17 = vmax.f32 %v182_v61, 0.0  ;;  %v1153_v36 = vld [vmem:[%s4292_s1 + $0x3a0] sm:$0xff]  ;;  %v1135_v56 = vld [vmem:[%s4292_s1 + $0x310] sm:$0xff]  ;;  %v3368_v61 = vld [vmem:[%s4293_s0 + $0x458] sm:$0xff] }
  0x6d   :  { %2151 = vmatprep.subr.mxu1 %v1157_v45  ;;  %v876_v19 = vrot.slane %v875_v7, 1  ;;  %v858_v20 = vadd.f32 %v857_v50, %v856_v8  ;;  %v380_v22 = vmax.f32 %v3292_v4, 0.0  ;;  %v597_v23 = vadd.f32 %v290_v62, %v272_v57  ;;  %v1137_v41 = vld [vmem:[%s4292_s1 + $0x320] sm:$0xff]  ;;  %v1244_v50 = vld [vmem:[%s4292_s1 + $0x678] sm:$0xff]  ;;  %v1243_v60 = vld [vmem:[%s4292_s1 + $0x670] sm:$0xff] }
  0x6e   :  { %2152 = vmatpush3.msra.mxu1 %v1141_v58  ;;  %v635_v25 = vadd.f32 %v634_v13, %v633_v2  ;;  %v617_v26 = vrot.slane %v616_v14, 4  ;;  %v452_v28 = vmax.f32 %v200_v9, 0.0  ;;  %v839_v29 = vadd.f32 %v416_v5, %v398_v63  ;;  %v1259_v58 = vld [vmem:[%s4292_s1 + $0x6f0] sm:$0xff]  ;;  %v1150_v62 = vld [vmem:[%s4292_s1 + $0x388] sm:$0xff]  ;;  %v3383_v4 = vld [vmem:[%s4293_s0 + $0x218] sm:$0xff] }
  0x6f   :  { %2153 = vmatprep.subr.mxu1 %v1156_v0  ;;  %v877_v31 = vadd.f32 %v876_v19, %v875_v7  ;;  %v859_v32 = vrot.slane %v858_v20, 4  ;;  %v470_v34 = vmax.f32 %v218_v15, 0.0  ;;  %v598_v35 = vadd.f32 %v597_v23, %v308_v10  ;;  %v3378_v3 = vld [vmem:[%s4293_s0 + $0x188] sm:$0xff] }
  0x70   :  { %2154 = vmatpush3.msra.mxu1 %v1140_v6  ;;  %v1009_v37 = vmul.f32 0.020408163, %v635_v25  ;;  %v618_v38 = vadd.f32 %v617_v26, %v616_v14  ;;  %v506_v39 = vmax.f32 %v254_v21, 0.0  ;;  %v840_v40 = vadd.f32 %v839_v29, %v434_v17  ;;  %v171_v5 = vld [vmem:[%s4293_s0 + $0x4e8] sm:$0xff]  ;;  %v1149_v14 = vld [vmem:[%s4292_s1 + $0x380] sm:$0xff] }
  0x71   :  { %2155 = vmatprep.subr.mxu1 %v1155_v12  ;;  %v1027_v44 = vmul.f32 0.020408163, %v877_v31  ;;  %v860_v45 = vadd.f32 %v859_v32, %v858_v20  ;;  %v362_v47 = vmax.f32 %v110_v27, 0.0  ;;  %v599_v48 = vadd.f32 %v598_v35, %v326_v11  ;;  %v1134_v6 = vld [vmem:[%s4292_s1 + $0x308] sm:$0xff]  ;;  %v189_v11 = vld [vmem:[%s4293_s0 + $0x578] sm:$0xff]  ;;  %v1133_v21 = vld [vmem:[%s4292_s1 + $0x300] sm:$0xff] }
  0x72   :  { %2156 = vmatpush3.msra.mxu1 %v1139_v18  ;;  %v619_v51 = vrot.slane %v618_v38, 2  ;;  %v488_v52 = vmax.f32 %v236_v33, 0.0  ;;  %v841_v53 = vadd.f32 %v840_v40, %v452_v28  ;;  %v602_v0 = vsel %vm523_vm0, %v380_v22, 0.0  ;;  %v1258_v9 = vld [vmem:[%s4292_s1 + $0x6e8] sm:$0xff]  ;;  %v261_v25 = vld [vmem:[%s4293_s0 + $0x7b8] sm:$0x1] }
  0x73   :  { %2157 = vmatprep.subr.mxu1 %v1154_v24  ;;  %v1365_v57 = vsel %vm1356_vm1, %v1027_v44, %v1009_v37  ;;  %v861_v59 = vrot.slane %v860_v45, 2  ;;  %v600_v46 = vadd.f32 %v599_v48, %v344_v16  ;;  %v844_v2 = vsel %vm523_vm0, %v506_v39, 0.0  ;;  %v3397_v10 = vld [vmem:[%s4293_s0 + $0x3c8] sm:$0x1]  ;;  %v1257_v24 = vld [vmem:[%s4292_s1 + $0x6e0] sm:$0xff]  ;;  %v1256_v37 = vld [vmem:[%s4292_s1 + $0x6d8] sm:$0xff] }
  0x74   :  { %2158 = vmatpush3.msra.mxu1 %v1138_v30  ;;  %1739 = vmatmul.mubr.f32.vlgmr.msra.gmra.mxu0 %v1365_v57  ;;  %v620_v63 = vadd.f32 %v619_v51, %v618_v38  ;;  %v842_v1 = vadd.f32 %v841_v53, %v470_v34  ;;  %v279_v12 = vmax.f32 %v3348_v54, 0.0  ;;  %v297_v13 = vmax.f32 %v3353_v55, 0.0  ;;  %v1242_v17 = vld [vmem:[%s4292_s1 + $0x668] sm:$0xff]  ;;  %v1228_v30 = vld [vmem:[%s4292_s1 + $0x5f8] sm:$0xff]  ;;  %v1241_v31 = vld [vmem:[%s4292_s1 + $0x660] sm:$0xff] }
  0x75   :  { %2159 = vmatprep.subr.mxu1 %v1153_v36  ;;  %2243 = vmatpush3.msra.mxu0 %v1244_v50  ;;  %v862_v7 = vadd.f32 %v861_v59, %v860_v45  ;;  %v601_v8 = vadd.f32 %v600_v46, %v362_v47  ;;  %v3413_v18 = vld [vmem:[%s4293_s0 + $0x608] sm:$0xff]  ;;  %v405_v19 = vmax.f32 %v3368_v61, 0.0  ;;  %v423_v20 = vmax.f32 %v171_v5, 0.0  ;;  %v3443_v38 = vld [vmem:[%s4293_s0 + $0x338] sm:$0xff]  ;;  %v1255_v51 = vld [vmem:[%s4292_s1 + $0x6d0] sm:$0xff] }
  0x76   :  { %2160 = vmatpush3.msra.mxu1 %v1137_v41  ;;  %2244 = vmatprep.subr.mxu0 %v1259_v58  ;;  %v621_v15 = vrot.slane %v620_v63, 1  ;;  %v843_v16 = vadd.f32 %v842_v1, %v488_v52  ;;  %v315_v26 = vmax.f32 %v3378_v3, 0.0  ;;  %v333_v27 = vmax.f32 %v3383_v4, 0.0  ;;  %v99_v32 = vld [vmem:[%s4293_s0 + $0x2a8] sm:$0xff]  ;;  %v225_v39 = vld [vmem:[%s4293_s0 + $0x698] sm:$0xff]  ;;  %v1239_v55 = vld [vmem:[%s4292_s1 + $0x650] sm:$0xff] }
  0x77   :  { %2161 = vmatprep.subr.mxu1 %v1152_v42  ;;  %v863_v22 = vrot.slane %v862_v7, 1  ;;  %2245 = vmatpush3.msra.mxu0 %v1243_v60  ;;  %v603_v23 = vadd.f32 %v602_v0, %v601_v8  ;;  %v387_v33 = vmax.f32 %v3397_v10, 0.0  ;;  %v441_v34 = vmax.f32 %v189_v11, 0.0  ;;  %v1240_v44 = vld [vmem:[%s4292_s1 + $0x658] sm:$0xff]  ;;  %v3455_v45 = vld [vmem:[%s4293_s0 + $0x728] sm:$0xff]  ;;  %v26_v59 = vld [vmem:[%s4293_s0 + $0x60] sm:$0xff] }
  0x78   :  { %2162 = vmatpush3.msra.mxu1 %v1136_v43  ;;  %v622_v28 = vadd.f32 %v621_v15, %v620_v63  ;;  %v845_v29 = vadd.f32 %v844_v2, %v843_v16  ;;  %2246 = vmatprep.subr.mxu0 %v1258_v9  ;;  %v459_v40 = vmax.f32 %v3413_v18, 0.0  ;;  %v688_v41 = vadd.f32 %v297_v13, %v279_v12  ;;  %v44_v60 = vld [vmem:[%s4293_s0 + $0xf0] sm:$0xff]  ;;  %v170_v2 = vld [vmem:[%s4293_s0 + $0x4e0] sm:$0xff]  ;;  %v1238_v4 = vld [vmem:[%s4292_s1 + $0x648] sm:$0xff] }
  0x79   :  { %2163 = vmatprep.subr.mxu1 %v1151_v49  ;;  %v864_v35 = vadd.f32 %v863_v22, %v862_v7  ;;  %v604_v36 = vrot.slane %v603_v23, 4  ;;  %2247 = vmatpush3.msra.mxu0 %v1242_v17  ;;  %v513_v47 = vmax.f32 %v261_v25, 0.0  ;;  %v930_v48 = vadd.f32 %v423_v20, %v405_v19  ;;  %v152_v1 = vld [vmem:[%s4293_s0 + $0x450] sm:$0xff]  ;;  %v62_v8 = vld [vmem:[%s4293_s0 + $0x180] sm:$0xff] }
  0x7a   :  { %2164 = vmatpush3.msra.mxu1 %v1135_v56  ;;  %v1008_v42 = vmul.f32 0.020408163, %v622_v28  ;;  %v846_v43 = vrot.slane %v845_v29, 4  ;;  %2248 = vmatprep.subr.mxu0 %v1257_v24  ;;  %v351_v52 = vmax.f32 %v99_v32, 0.0  ;;  %v689_v53 = vadd.f32 %v688_v41, %v315_v26  ;;  %v3492_v9 = vld [vmem:[%s4293_s0 + $0x210] sm:$0xff]  ;;  %v1253_v11 = vld [vmem:[%s4292_s1 + $0x6c0] sm:$0xff] }
  0x7b   :  { %2165 = vmatprep.subr.mxu1 %v1150_v62  ;;  %v1026_v49 = vmul.f32 0.020408163, %v864_v35  ;;  %v605_v50 = vadd.f32 %v604_v36, %v603_v23  ;;  %2249 = vmatpush3.msra.mxu0 %v1241_v31  ;;  %v369_v56 = vmax.f32 %v3443_v38, 0.0  ;;  %v477_v57 = vmax.f32 %v225_v39, 0.0  ;;  %v1254_v62 = vld [vmem:[%s4292_s1 + $0x6c8] sm:$0xff]  ;;  %v3500_v13 = vld [vmem:[%s4293_s0 + $0x2a0] sm:$0xff] }
  0x7c   :  { %2166 = vmatpush3.msra.mxu1 %v1134_v6  ;;  %v847_v54 = vadd.f32 %v846_v43, %v845_v29  ;;  %2250 = vmatprep.subr.mxu0 %v1256_v37  ;;  %v931_v58 = vadd.f32 %v930_v48, %v441_v34  ;;  %v495_v63 = vmax.f32 %v3455_v45, 0.0  ;;  %v690_v0 = vadd.f32 %v689_v53, %v333_v27  ;;  %v1237_v18 = vld [vmem:[%s4292_s1 + $0x640] sm:$0xff]  ;;  %v1252_v24 = vld [vmem:[%s4292_s1 + $0x6b8] sm:$0xff]  ;;  %v260_v32 = vld [vmem:[%s4293_s0 + $0x7b0] sm:$0x1] }
  0x7d   :  { %2167 = vmatprep.subr.mxu1 %v1149_v14  ;;  %v1364_v46 = vsel %vm1356_vm1, %v1026_v49, %v1008_v42  ;;  %v606_v61 = vrot.slane %v605_v50, 2  ;;  %2251 = vmatpush3.msra.mxu0 %v1240_v44  ;;  %v693_v5 = vsel %vm523_vm0, %v387_v33, 0.0  ;;  %v935_v7 = vsel %vm523_vm0, %v513_v47, 0.0  ;;  %v188_v14 = vld [vmem:[%s4293_s0 + $0x570] sm:$0xff]  ;;  %v3511_v20 = vld [vmem:[%s4293_s0 + $0x3c0] sm:$0x1] }
  0x7e   :  { %2168 = vmatpush3.msra.mxu1 %v1133_v21  ;;  %1668 = vmatprep.mubr.f32.mxu1 %v1364_v46  ;;  %v848_v3 = vrot.slane %v847_v54, 2  ;;  %v932_v6 = vadd.f32 %v931_v58, %v459_v40  ;;  %v691_v12 = vadd.f32 %v690_v0, %v351_v52  ;;  %v278_v15 = vmax.f32 %v26_v59, 0.0  ;;  %v206_v26 = vld [vmem:[%s4293_s0 + $0x600] sm:$0xff]  ;;  %v1251_v36 = vld [vmem:[%s4292_s1 + $0x6b0] sm:$0xff]  ;;  %v1234_v52 = vld [vmem:[%s4292_s1 + $0x628] sm:$0xff] }
  0x7f   :  { %2207 = vmatprep.subr.mxu1 %v1228_v30  ;;  %2252 = vmatprep.subr.mxu0 %v1255_v51  ;;  %v607_v10 = vadd.f32 %v606_v61, %v605_v50  ;;  %v296_v16 = vmax.f32 %v44_v60, 0.0  ;;  %v404_v21 = vmax.f32 %v152_v1, 0.0  ;;  %v422_v22 = vmax.f32 %v170_v2, 0.0  ;;  %v1236_v30 = vld [vmem:[%s4292_s1 + $0x638] sm:$0xff]  ;;  %v224_v38 = vld [vmem:[%s4293_s0 + $0x690] sm:$0xff]  ;;  %v3543_v45 = vld [vmem:[%s4293_s0 + $0x720] sm:$0xff] }
  0x80   :  { %2253 = vmatpush3.msra.mxu0 %v1239_v55  ;;  %v849_v17 = vadd.f32 %v848_v3, %v847_v54  ;;  %v933_v19 = vadd.f32 %v932_v6, %v477_v57  ;;  %v692_v25 = vadd.f32 %v691_v12, %v369_v56  ;;  %v314_v27 = vmax.f32 %v62_v8, 0.0  ;;  %v1235_v42 = vld [vmem:[%s4292_s1 + $0x630] sm:$0xff]  ;;  %v1212_v50 = vld [vmem:[%s4292_s1 + $0x578] sm:$0xff]  ;;  %v1250_v51 = vld [vmem:[%s4292_s1 + $0x6a8] sm:$0xff] }
  0x81   :  { %2254 = vmatprep.subr.mxu0 %v1254_v62  ;;  %v608_v23 = vrot.slane %v607_v10, 1  ;;  %v332_v28 = vmax.f32 %v3492_v9, 0.0  ;;  %v350_v33 = vmax.f32 %v3500_v13, 0.0  ;;  %v440_v34 = vmax.f32 %v188_v14, 0.0  ;;  %v116_v44 = vld [vmem:[%s4293_s0 + $0x330] sm:$0xff]  ;;  %v1249_v58 = vld [vmem:[%s4292_s1 + $0x6a0] sm:$0xff] }
  0x82   :  { %2255 = vmatpush3.msra.mxu0 %v1238_v4  ;;  %v850_v29 = vrot.slane %v849_v17, 1  ;;  %v934_v31 = vadd.f32 %v933_v19, %v495_v63  ;;  %v694_v37 = vadd.f32 %v693_v5, %v692_v25  ;;  %v386_v39 = vmax.f32 %v3511_v20, 0.0  ;;  %v1227_v57 = vld [vmem:[%s4292_s1 + $0x5f0] sm:$0xff]  ;;  %v3563_v61 = vld [vmem:[%s4293_s0 + $0x58] sm:$0xff]  ;;  %v1233_v63 = vld [vmem:[%s4292_s1 + $0x620] sm:$0xff] }
  0x83   :  { %2256 = vmatprep.subr.mxu0 %v1253_v11  ;;  %v609_v35 = vadd.f32 %v608_v23, %v607_v10  ;;  %v675_v40 = vadd.f32 %v296_v16, %v278_v15  ;;  %v458_v47 = vmax.f32 %v206_v26, 0.0  ;;  %v917_v48 = vadd.f32 %v422_v22, %v404_v21  ;;  %v1211_v62 = vld [vmem:[%s4292_s1 + $0x570] sm:$0xff]  ;;  %v3575_v4 = vld [vmem:[%s4293_s0 + $0xe8] sm:$0xff]  ;;  %v3580_v5 = vld [vmem:[%s4293_s0 + $0x178] sm:$0xff] }
  0x84   :  { %2257 = vmatpush3.msra.mxu0 %v1237_v18  ;;  %v851_v41 = vadd.f32 %v850_v29, %v849_v17  ;;  %v936_v43 = vadd.f32 %v935_v7, %v934_v31  ;;  %v695_v53 = vrot.slane %v694_v37, 4  ;;  %v512_v54 = vmax.f32 %v260_v32, 0.0  ;;  %v1226_v7 = vld [vmem:[%s4292_s1 + $0x5e8] sm:$0xff]  ;;  %v1248_v8 = vld [vmem:[%s4292_s1 + $0x698] sm:$0xff] }
  0x85   :  { %2258 = vmatprep.subr.mxu0 %v1252_v24  ;;  %v1007_v49 = vmul.f32 0.020408163, %v609_v35  ;;  %v676_v55 = vadd.f32 %v675_v40, %v314_v27  ;;  %v476_v60 = vmax.f32 %v224_v38, 0.0  ;;  %v918_v46 = vadd.f32 %v917_v48, %v440_v34  ;;  %v3593_v12 = vld [vmem:[%s4293_s0 + $0x448] sm:$0xff]  ;;  %v3598_v13 = vld [vmem:[%s4293_s0 + $0x4d8] sm:$0xff]  ;;  %v1225_v34 = vld [vmem:[%s4292_s1 + $0x5e0] sm:$0xff] }
  0x86   :  { %2259 = vmatpush3.msra.mxu0 %v1236_v30  ;;  %v1025_v56 = vmul.f32 0.020408163, %v851_v41  ;;  %v937_v59 = vrot.slane %v936_v43, 4  ;;  %v696_v0 = vadd.f32 %v695_v53, %v694_v37  ;;  %v368_v1 = vmax.f32 %v116_v44, 0.0  ;;  %v1232_v14 = vld [vmem:[%s4292_s1 + $0x618] sm:$0xff]  ;;  %v3607_v18 = vld [vmem:[%s4293_s0 + $0x208] sm:$0xff] }
  0x87   :  { %2260 = vmatprep.subr.mxu0 %v1251_v36  ;;  %v494_v2 = vmax.f32 %v3543_v45, 0.0  ;;  %v677_v3 = vadd.f32 %v676_v55, %v332_v28  ;;  %v680_v10 = vsel %vm523_vm0, %v386_v39, 0.0  ;;  %v919_v11 = vadd.f32 %v918_v46, %v458_v47  ;;  %v3612_v19 = vld [vmem:[%s4293_s0 + $0x298] sm:$0xff]  ;;  %v3623_v24 = vld [vmem:[%s4293_s0 + $0x568] sm:$0xff]  ;;  %v1247_v28 = vld [vmem:[%s4292_s1 + $0x690] sm:$0xff] }
  0x88   :  { %2261 = vmatpush3.msra.mxu0 %v1235_v42  ;;  %v1363_v6 = vsel %vm1356_vm1, %v1025_v56, %v1007_v49  ;;  %v938_v9 = vadd.f32 %v937_v59, %v936_v43  ;;  %v697_v15 = vrot.slane %v696_v0, 2  ;;  %v922_v17 = vsel %vm523_vm0, %v512_v54, 0.0  ;;  %v3618_v23 = vld [vmem:[%s4293_s0 + $0x3b8] sm:$0x1]  ;;  %v1210_v27 = vld [vmem:[%s4292_s1 + $0x568] sm:$0xff]  ;;  %v1231_v35 = vld [vmem:[%s4292_s1 + $0x610] sm:$0xff] }
  0x89   :  { %2262 = vmatprep.subr.mxu0 %v1250_v51  ;;  %1669 = vmatmul.mubr.f32.vlgmr.msra.gmra.mxu1 %v1363_v6  ;;  %v678_v16 = vadd.f32 %v677_v3, %v350_v33  ;;  %v277_v20 = vmax.f32 %v3563_v61, 0.0  ;;  %v920_v22 = vadd.f32 %v919_v11, %v476_v60  ;;  %v295_v25 = vmax.f32 %v3575_v4, 0.0  ;;  %v3636_v31 = vld [vmem:[%s4293_s0 + $0x5f8] sm:$0xff]  ;;  %v259_v38 = vld [vmem:[%s4293_s0 + $0x7a8] sm:$0x1]  ;;  %v1209_v41 = vld [vmem:[%s4292_s1 + $0x560] sm:$0xff] }
  0x8a   :  { %2263 = vmatpush3.msra.mxu0 %v1234_v52  ;;  %2208 = vmatpush3.msra.mxu1 %v1212_v50  ;;  %v939_v21 = vrot.slane %v938_v9, 2  ;;  %v313_v26 = vmax.f32 %v3580_v5, 0.0  ;;  %v698_v29 = vadd.f32 %v697_v15, %v696_v0  ;;  %v403_v32 = vmax.f32 %v3593_v12, 0.0  ;;  %v1246_v42 = vld [vmem:[%s4292_s1 + $0x688] sm:$0xff]  ;;  %v1224_v49 = vld [vmem:[%s4292_s1 + $0x5d8] sm:$0xff]  ;;  %v1207_v4 = vld [vmem:[%s4292_s1 + $0x550] sm:$0xff] }
  0x8b   :  { %2264 = vmatprep.subr.mxu0 %v1249_v58  ;;  %2209 = vmatprep.subr.mxu1 %v1227_v57  ;;  %v679_v30 = vadd.f32 %v678_v16, %v368_v1  ;;  %v421_v33 = vmax.f32 %v3598_v13, 0.0  ;;  %v921_v37 = vadd.f32 %v920_v22, %v494_v2  ;;  %v331_v39 = vmax.f32 %v3607_v18, 0.0  ;;  %v3660_v45 = vld [vmem:[%s4293_s0 + $0x328] sm:$0xff]  ;;  %v1208_v56 = vld [vmem:[%s4292_s1 + $0x558] sm:$0xff]  ;;  %v1245_v57 = vld [vmem:[%s4292_s1 + $0x680] sm:$0xff] }
  0x8c   :  { %2265 = vmatpush3.msra.mxu0 %v1233_v63  ;;  %2210 = vmatpush3.msra.mxu1 %v1211_v62  ;;  %v940_v36 = vadd.f32 %v939_v21, %v938_v9  ;;  %v349_v40 = vmax.f32 %v3612_v19, 0.0  ;;  %v699_v43 = vrot.slane %v698_v29, 1  ;;  %v385_v47 = vmax.f32 %v3618_v23, 0.0  ;;  %v1230_v50 = vld [vmem:[%s4292_s1 + $0x608] sm:$0xff]  ;;  %v3683_v60 = vld [vmem:[%s4293_s0 + $0x718] sm:$0xff]  ;;  %v1223_v62 = vld [vmem:[%s4292_s1 + $0x5d0] sm:$0xff] }
  0x8d   :  { %2266 = vmatprep.subr.mxu0 %v1248_v8  ;;  %2211 = vmatprep.subr.mxu1 %v1226_v7  ;;  %v681_v44 = vadd.f32 %v680_v10, %v679_v30  ;;  %v439_v48 = vmax.f32 %v3623_v24, 0.0  ;;  %v923_v52 = vadd.f32 %v922_v17, %v921_v37  ;;  %v223_v53 = vld [vmem:[%s4293_s0 + $0x688] sm:$0xff]  ;;  %v457_v54 = vmax.f32 %v3636_v31, 0.0  ;;  %v1229_v63 = vld [vmem:[%s4292_s1 + $0x600] sm:$0xff]  ;;  %v3698_v9 = vld [vmem:[%s4293_s0 + $0x50] sm:$0xff] }
  0x8e   :  { %2267 = vmatpush3.msra.mxu0 %v1232_v14  ;;  %2212 = vmatpush3.msra.mxu1 %v1210_v27  ;;  %v941_v51 = vrot.slane %v940_v36, 1  ;;  %v662_v55 = vadd.f32 %v295_v25, %v277_v20  ;;  %v700_v58 = vadd.f32 %v699_v43, %v698_v29  ;;  %v511_v46 = vmax.f32 %v259_v38, 0.0  ;;  %v1222_v10 = vld [vmem:[%s4292_s1 + $0x5c8] sm:$0xff]  ;;  %v42_v15 = vld [vmem:[%s4293_s0 + $0xe0] sm:$0xff]  ;;  %v3710_v16 = vld [vmem:[%s4293_s0 + $0x170] sm:$0xff] }
  0x8f   :  { %2268 = vmatprep.subr.mxu0 %v1247_v28  ;;  %2213 = vmatprep.subr.mxu1 %v1225_v34  ;;  %v682_v59 = vrot.slane %v681_v44, 4  ;;  %v904_v61 = vadd.f32 %v421_v33, %v403_v32  ;;  %v924_v1 = vrot.slane %v923_v52, 4  ;;  %v367_v2 = vmax.f32 %v3660_v45, 0.0  ;;  %v1206_v17 = vld [vmem:[%s4292_s1 + $0x548] sm:$0xff]  ;;  %v150_v23 = vld [vmem:[%s4293_s0 + $0x440] sm:$0xff]  ;;  %v168_v24 = vld [vmem:[%s4293_s0 + $0x4d0] sm:$0xff] }
  0x90   :  { %2269 = vmatpush3.msra.mxu0 %v1231_v35  ;;  %2214 = vmatpush3.msra.mxu1 %v1209_v41  ;;  %v942_v0 = vadd.f32 %v941_v51, %v940_v36  ;;  %v663_v3 = vadd.f32 %v662_v55, %v313_v26  ;;  %v1014_v5 = vmul.f32 0.020408163, %v700_v58  ;;  %v475_v7 = vmax.f32 %v223_v53, 0.0  ;;  %v1221_v25 = vld [vmem:[%s4292_s1 + $0x5c0] sm:$0xff]  ;;  %v3738_v31 = vld [vmem:[%s4293_s0 + $0x290] sm:$0xff]  ;;  %v1204_v45 = vld [vmem:[%s4292_s1 + $0x538] sm:$0xff] }
  0x91   :  { %2270 = vmatprep.subr.mxu0 %v1246_v42  ;;  %2215 = vmatprep.subr.mxu1 %v1224_v49  ;;  %v683_v6 = vadd.f32 %v682_v59, %v681_v44  ;;  %v905_v8 = vadd.f32 %v904_v61, %v439_v48  ;;  %v925_v12 = vadd.f32 %v924_v1, %v923_v52  ;;  %v493_v13 = vmax.f32 %v3683_v60, 0.0  ;;  %v3733_v30 = vld [vmem:[%s4293_s0 + $0x200] sm:$0xff]  ;;  %v132_v35 = vld [vmem:[%s4293_s0 + $0x3b0] sm:$0x1] }
  0x92   :  { %2271 = vmatpush3.msra.mxu0 %v1230_v50  ;;  %2216 = vmatpush3.msra.mxu1 %v1208_v56  ;;  %v1032_v11 = vmul.f32 0.020408163, %v942_v0  ;;  %v664_v14 = vadd.f32 %v663_v3, %v331_v39  ;;  %v667_v20 = vsel %vm523_vm0, %v385_v47, 0.0  ;;  %v909_v22 = vsel %vm523_vm0, %v511_v46, 0.0  ;;  %v1205_v33 = vld [vmem:[%s4292_s1 + $0x540] sm:$0xff]  ;;  %v1220_v39 = vld [vmem:[%s4292_s1 + $0x5b8] sm:$0xff] }
  0x93   :  { %2272 = vmatprep.subr.mxu0 %v1245_v57  ;;  %2217 = vmatprep.subr.mxu1 %v1223_v62  ;;  %v684_v18 = vrot.slane %v683_v6, 2  ;;  %v906_v21 = vadd.f32 %v905_v8, %v457_v54  ;;  %v2313_v27 = vmov 0.0   ;;  %v926_v28 = vrot.slane %v925_v12, 2  ;;  %v186_v36 = vld [vmem:[%s4293_s0 + $0x560] sm:$0xff]  ;;  %v204_v42 = vld [vmem:[%s4293_s0 + $0x5f0] sm:$0xff]  ;;  %v1202_v0 = vld [vmem:[%s4292_s1 + $0x528] sm:$0xff] }
  0x94   :  { %2273 = vmatpush3.msra.mxu0 %v1229_v63  ;;  %2218 = vmatpush3.msra.mxu1 %v1207_v4  ;;  %v1370_v26 = vsel %vm1356_vm1, %v1032_v11, %v1014_v5  ;;  %v665_v29 = vadd.f32 %v664_v14, %v349_v40  ;;  %v276_v32 = vmax.f32 %v3698_v9, 0.0  ;;  %v294_v37 = vmax.f32 %v42_v15, 0.0  ;;  %v258_v49 = vld [vmem:[%s4293_s0 + $0x7a0] sm:$0x1]  ;;  %v1219_v52 = vld [vmem:[%s4292_s1 + $0x5b0] sm:$0xff]  ;;  %v1218_v63 = vld [vmem:[%s4292_s1 + $0x5a8] sm:$0xff] }
  0x95   :  { %1954 = vmatprep.subr.mxu0 %v2313_v27  ;;  %2219 = vmatprep.subr.mxu1 %v1222_v10  ;;  %v685_v19 = vadd.f32 %v684_v18, %v683_v6  ;;  %v907_v34 = vadd.f32 %v906_v21, %v475_v7  ;;  %v312_v38 = vmax.f32 %v3710_v16, 0.0  ;;  %v927_v40 = vadd.f32 %v926_v28, %v925_v12  ;;  %v3771_v55 = vld [vmem:[%s4293_s0 + $0x320] sm:$0xff]  ;;  %v1203_v58 = vld [vmem:[%s4292_s1 + $0x530] sm:$0xff]  ;;  %v1216_v12 = vld [vmem:[%s4292_s1 + $0x598] sm:$0xff] }
  0x96   :  { %1878 = vmatprep.mubr.f32.mxu0 %v1370_v26  ;;  %2220 = vmatpush3.msra.mxu1 %v1206_v17  ;;  %v666_v41 = vadd.f32 %v665_v29, %v367_v2  ;;  %v402_v43 = vmax.f32 %v150_v23, 0.0  ;;  %v420_v44 = vmax.f32 %v168_v24, 0.0  ;;  %v330_v50 = vmax.f32 %v3733_v30, 0.0  ;;  %v222_v46 = vld [vmem:[%s4293_s0 + $0x680] sm:$0xff]  ;;  %v3788_v3 = vld [vmem:[%s4293_s0 + $0x710] sm:$0xff]  ;;  %v3803_v17 = vld [vmem:[%s4293_s0 + $0x78] sm:$0xff] }
  0x97   :  { %2221 = vmatprep.subr.mxu1 %v1221_v25  ;;  %v686_v47 = vrot.slane %v685_v19, 1  ;;  %v908_v48 = vadd.f32 %v907_v34, %v493_v13  ;;  %v348_v51 = vmax.f32 %v3738_v31, 0.0  ;;  %v928_v53 = vrot.slane %v927_v40, 1  ;;  %v1217_v6 = vld [vmem:[%s4292_s1 + $0x5a0] sm:$0xff]  ;;  %v3808_v18 = vld [vmem:[%s4293_s0 + $0x108] sm:$0xff]  ;;  %v3818_v25 = vld [vmem:[%s4293_s0 + $0x198] sm:$0xff] }
  0x98   :  { %2222 = vmatpush3.msra.mxu1 %v1205_v33  ;;  %v668_v54 = vadd.f32 %v667_v20, %v666_v41  ;;  %v384_v56 = vmax.f32 %v132_v35, 0.0  ;;  %v438_v57 = vmax.f32 %v186_v36, 0.0  ;;  %v456_v61 = vmax.f32 %v204_v42, 0.0  ;;  %v1201_v7 = vld [vmem:[%s4292_s1 + $0x520] sm:$0xff]  ;;  %v1308_v20 = vld [vmem:[%s4292_s1 + $0x878] sm:$0xff]  ;;  %v3823_v26 = vld [vmem:[%s4293_s0 + $0x228] sm:$0xff] }
  0x99   :  { %2223 = vmatprep.subr.mxu1 %v1220_v39  ;;  %v687_v59 = vadd.f32 %v686_v47, %v685_v19  ;;  %v910_v60 = vadd.f32 %v909_v22, %v908_v48  ;;  %v649_v62 = vadd.f32 %v294_v37, %v276_v32  ;;  %v929_v1 = vadd.f32 %v928_v53, %v927_v40  ;;  %v1200_v28 = vld [vmem:[%s4292_s1 + $0x518] sm:$0xff]  ;;  %v155_v33 = vld [vmem:[%s4293_s0 + $0x468] sm:$0xff]  ;;  %v1307_v35 = vld [vmem:[%s4292_s1 + $0x870] sm:$0xff] }
  0x9a   :  { %2224 = vmatpush3.msra.mxu1 %v1204_v45  ;;  %v669_v2 = vrot.slane %v668_v54, 4  ;;  %v510_v4 = vmax.f32 %v258_v49, 0.0  ;;  %v891_v5 = vadd.f32 %v420_v44, %v402_v43  ;;  %v366_v10 = vmax.f32 %v3771_v55, 0.0  ;;  %v173_v19 = vld [vmem:[%s4293_s0 + $0x4f8] sm:$0xff]  ;;  %v1215_v41 = vld [vmem:[%s4292_s1 + $0x590] sm:$0xff]  ;;  %v191_v45 = vld [vmem:[%s4293_s0 + $0x588] sm:$0xff] }
  0x9b   :  { %2225 = vmatprep.subr.mxu1 %v1219_v52  ;;  %v1013_v8 = vmul.f32 0.020408163, %v687_v59  ;;  %v911_v9 = vrot.slane %v910_v60, 4  ;;  %v650_v11 = vadd.f32 %v649_v62, %v312_v38  ;;  %v1031_v13 = vmul.f32 0.020408163, %v929_v1  ;;  %v3842_v37 = vld [vmem:[%s4293_s0 + $0x2b8] sm:$0xff] }
  0x9c   :  { %2226 = vmatpush3.msra.mxu1 %v1203_v58  ;;  %v670_v14 = vadd.f32 %v669_v2, %v668_v54  ;;  %v474_v15 = vmax.f32 %v222_v46, 0.0  ;;  %v892_v16 = vadd.f32 %v891_v5, %v438_v57  ;;  %v492_v22 = vmax.f32 %v3788_v3, 0.0  ;;  %v3847_v38 = vld [vmem:[%s4293_s0 + $0x348] sm:$0xff]  ;;  %v3857_v44 = vld [vmem:[%s4293_s0 + $0x3d8] sm:$0x1]  ;;  %v1199_v49 = vld [vmem:[%s4292_s1 + $0x510] sm:$0xff] }
  0x9d   :  { %2227 = vmatprep.subr.mxu1 %v1218_v63  ;;  %v912_v21 = vadd.f32 %v911_v9, %v910_v60  ;;  %v651_v23 = vadd.f32 %v650_v11, %v330_v50  ;;  %v654_v24 = vsel %vm523_vm0, %v384_v56, 0.0  ;;  %v1369_v29 = vsel %vm1356_vm1, %v1031_v13, %v1013_v8  ;;  %v1306_v52 = vld [vmem:[%s4292_s1 + $0x868] sm:$0xff]  ;;  %v209_v59 = vld [vmem:[%s4293_s0 + $0x618] sm:$0xff] }
  0x9e   :  { %2228 = vmatpush3.msra.mxu1 %v1202_v0  ;;  %v671_v30 = vrot.slane %v670_v14, 2  ;;  %v893_v31 = vadd.f32 %v892_v16, %v456_v61  ;;  %v896_v32 = vsel %vm523_vm0, %v510_v4, 0.0  ;;  %1879 = vmatmul.mubr.f32.vlgmr.msra.gmra.mxu0 %v1369_v29  ;;  %v281_v39 = vmax.f32 %v3803_v17, 0.0  ;;  %v263_v53 = vld [vmem:[%s4293_s0 + $0x7c8] sm:$0x1]  ;;  %v1305_v0 = vld [vmem:[%s4292_s1 + $0x860] sm:$0xff] }
  0x9f   :  { %2229 = vmatprep.subr.mxu1 %v1217_v6  ;;  %v913_v34 = vrot.slane %v912_v21, 2  ;;  %v652_v36 = vadd.f32 %v651_v23, %v348_v51  ;;  %v299_v40 = vmax.f32 %v3808_v18, 0.0  ;;  %1955 = vmatpush1.msra.mxu0 %v1308_v20  ;;  %v317_v47 = vmax.f32 %v3818_v25, 0.0  ;;  %v1214_v56 = vld [vmem:[%s4292_s1 + $0x588] sm:$0xff]  ;;  %v1213_v4 = vld [vmem:[%s4292_s1 + $0x580] sm:$0xff]  ;;  %v1304_v13 = vld [vmem:[%s4292_s1 + $0x858] sm:$0xff] }
  0xa0   :  { %2230 = vmatpush3.msra.mxu1 %v1201_v7  ;;  %v672_v42 = vadd.f32 %v671_v30, %v670_v14  ;;  %v894_v43 = vadd.f32 %v893_v31, %v474_v15  ;;  %v335_v48 = vmax.f32 %v3823_v26, 0.0  ;;  %1956 = vmatprep.subr.mxu0 %v2313_v27  ;;  %v407_v54 = vmax.f32 %v155_v33, 0.0  ;;  %v1198_v61 = vld [vmem:[%s4292_s1 + $0x508] sm:$0xff]  ;;  %v3901_v7 = vld [vmem:[%s4293_s0 + $0x738] sm:$0xff]  ;;  %v1303_v25 = vld [vmem:[%s4292_s1 + $0x850] sm:$0xff] }
  0xa1   :  { %2231 = vmatprep.subr.mxu1 %v1216_v12  ;;  %v914_v50 = vadd.f32 %v913_v34, %v912_v21  ;;  %v653_v51 = vadd.f32 %v652_v36, %v366_v10  ;;  %v425_v55 = vmax.f32 %v173_v19, 0.0  ;;  %1957 = vmatpush1.msra.mxu0 %v1307_v35  ;;  %v353_v60 = vmax.f32 %v3842_v37, 0.0  ;;  %v3892_v1 = vld [vmem:[%s4293_s0 + $0x6a8] sm:$0xff]  ;;  %v1197_v10 = vld [vmem:[%s4292_s1 + $0x500] sm:$0xff]  ;;  %v1292_v18 = vld [vmem:[%s4292_s1 + $0x7f8] sm:$0xff] }
  0xa2   :  { %2232 = vmatpush3.msra.mxu1 %v1200_v28  ;;  %v673_v57 = vrot.slane %v672_v42, 1  ;;  %v895_v58 = vadd.f32 %v894_v43, %v492_v22  ;;  %v371_v46 = vmax.f32 %v3847_v38, 0.0  ;;  %1958 = vmatprep.subr.mxu0 %v2313_v27  ;;  %v389_v2 = vmax.f32 %v3857_v44, 0.0  ;;  %v28_v22 = vld [vmem:[%s4293_s0 + $0x70] sm:$0xff]  ;;  %v46_v30 = vld [vmem:[%s4293_s0 + $0x100] sm:$0xff]  ;;  %v1302_v26 = vld [vmem:[%s4292_s1 + $0x848] sm:$0xff] }
  0xa3   :  { %2233 = vmatprep.subr.mxu1 %v1215_v41  ;;  %v915_v62 = vrot.slane %v914_v50, 1  ;;  %v655_v63 = vadd.f32 %v654_v24, %v653_v51  ;;  %v443_v3 = vmax.f32 %v191_v45, 0.0  ;;  %1959 = vmatpush1.msra.mxu0 %v1306_v52  ;;  %v515_v8 = vmax.f32 %v263_v53, 0.0  ;;  %v3928_v31 = vld [vmem:[%s4293_s0 + $0x190] sm:$0xff]  ;;  %v154_v35 = vld [vmem:[%s4293_s0 + $0x460] sm:$0xff] }
  0xa4   :  { %2234 = vmatpush3.msra.mxu1 %v1199_v49  ;;  %v674_v5 = vadd.f32 %v673_v57, %v672_v42  ;;  %v897_v6 = vadd.f32 %v896_v32, %v895_v58  ;;  %v714_v9 = vadd.f32 %v299_v40, %v281_v39  ;;  %1960 = vmatprep.subr.mxu0 %v2313_v27  ;;  %v461_v14 = vmax.f32 %v209_v59, 0.0  ;;  %v172_v36 = vld [vmem:[%s4293_s0 + $0x4f0] sm:$0xff]  ;;  %v3948_v42 = vld [vmem:[%s4293_s0 + $0x220] sm:$0xff] }
  0xa5   :  { %2235 = vmatprep.subr.mxu1 %v1214_v56  ;;  %v916_v11 = vadd.f32 %v915_v62, %v914_v50  ;;  %v656_v12 = vrot.slane %v655_v63, 4  ;;  %v956_v15 = vadd.f32 %v425_v55, %v407_v54  ;;  %1961 = vmatpush1.msra.mxu0 %v1305_v0  ;;  %v479_v20 = vmax.f32 %v3892_v1, 0.0  ;;  %v3953_v43 = vld [vmem:[%s4293_s0 + $0x2b0] sm:$0xff]  ;;  %v190_v49 = vld [vmem:[%s4293_s0 + $0x580] sm:$0xff] }
  0xa6   :  { %2236 = vmatpush3.msra.mxu1 %v1198_v61  ;;  %v1012_v16 = vmul.f32 0.020408163, %v674_v5  ;;  %v898_v17 = vrot.slane %v897_v6, 4  ;;  %v715_v21 = vadd.f32 %v714_v9, %v317_v47  ;;  %1962 = vmatprep.subr.mxu0 %v2313_v27  ;;  %v497_v28 = vmax.f32 %v3901_v7, 0.0  ;;  %v1301_v37 = vld [vmem:[%s4292_s1 + $0x840] sm:$0xff]  ;;  %v208_v54 = vld [vmem:[%s4293_s0 + $0x610] sm:$0xff] }
  0xa7   :  { %2237 = vmatprep.subr.mxu1 %v1213_v4  ;;  %v1030_v23 = vmul.f32 0.020408163, %v916_v11  ;;  %v657_v24 = vadd.f32 %v656_v12, %v655_v63  ;;  %v957_v29 = vadd.f32 %v956_v15, %v443_v3  ;;  %1963 = vmatpush1.msra.mxu0 %v1304_v13  ;;  %v719_v19 = vsel %vm523_vm0, %v389_v2, 0.0  ;;  %v262_v59 = vld [vmem:[%s4293_s0 + $0x7c0] sm:$0x1]  ;;  %v1300_v63 = vld [vmem:[%s4292_s1 + $0x838] sm:$0xff] }
  0xa8   :  { %2238 = vmatpush3.msra.mxu1 %v1197_v10  ;;  %v899_v32 = vadd.f32 %v898_v17, %v897_v6  ;;  %v716_v33 = vadd.f32 %v715_v21, %v335_v48  ;;  %v961_v34 = vsel %vm523_vm0, %v515_v8, 0.0  ;;  %1964 = vmatprep.subr.mxu0 %v2313_v27  ;;  %v280_v44 = vmax.f32 %v28_v22, 0.0  ;;  %v3960_v48 = vld [vmem:[%s4293_s0 + $0x3d0] sm:$0x1]  ;;  %v3987_v38 = vld [vmem:[%s4293_s0 + $0x340] sm:$0xff] }
  0xa9   :  { %v1368_v39 = vsel %vm1356_vm1, %v1030_v23, %v1012_v16  ;;  %v658_v40 = vrot.slane %v657_v24, 2  ;;  %2277 = vmatprep.subr.mxu1 %v1292_v18  ;;  %v958_v41 = vadd.f32 %v957_v29, %v461_v14  ;;  %1965 = vmatpush1.msra.mxu0 %v1303_v25  ;;  %v298_v50 = vmax.f32 %v46_v30, 0.0  ;;  %v226_v4 = vld [vmem:[%s4293_s0 + $0x6a0] sm:$0xff]  ;;  %v1299_v8 = vld [vmem:[%s4292_s1 + $0x830] sm:$0xff]  ;;  %v1276_v18 = vld [vmem:[%s4292_s1 + $0x778] sm:$0xff] }
  0xaa   :  { %1808 = vmatprep.mubr.f32.mxu1 %v1368_v39  ;;  %v900_v45 = vrot.slane %v899_v32, 2  ;;  %v717_v47 = vadd.f32 %v716_v33, %v353_v60  ;;  %v316_v51 = vmax.f32 %v3928_v31, 0.0  ;;  %1966 = vmatprep.subr.mxu0 %v2313_v27  ;;  %v406_v55 = vmax.f32 %v154_v35, 0.0  ;;  %v4000_v10 = vld [vmem:[%s4293_s0 + $0x730] sm:$0xff]  ;;  %v4027_v33 = vld [vmem:[%s4293_s0 + $0x1a8] sm:$0xff] }
  0xab   :  { %v659_v52 = vadd.f32 %v658_v40, %v657_v24  ;;  %v959_v53 = vadd.f32 %v958_v41, %v479_v20  ;;  %v424_v56 = vmax.f32 %v172_v36, 0.0  ;;  %1967 = vmatpush1.msra.mxu0 %v1302_v26  ;;  %v334_v60 = vmax.f32 %v3948_v42, 0.0  ;;  %v1298_v20 = vld [vmem:[%s4292_s1 + $0x828] sm:$0xff]  ;;  %v4038_v40 = vld [vmem:[%s4293_s0 + $0x238] sm:$0xff]  ;;  %v1275_v42 = vld [vmem:[%s4292_s1 + $0x770] sm:$0xff] }
  0xac   :  { %v901_v57 = vadd.f32 %v900_v45, %v899_v32  ;;  %v718_v58 = vadd.f32 %v717_v47, %v371_v46  ;;  %v352_v61 = vmax.f32 %v3953_v43, 0.0  ;;  %1968 = vmatprep.subr.mxu0 %v2313_v27  ;;  %v388_v46 = vmax.f32 %v3960_v48, 0.0  ;;  %v4013_v24 = vld [vmem:[%s4293_s0 + $0x88] sm:$0xff]  ;;  %v4022_v32 = vld [vmem:[%s4293_s0 + $0x118] sm:$0xff] }
  0xad   :  { %v660_v62 = vrot.slane %v659_v52, 1  ;;  %v960_v0 = vadd.f32 %v959_v53, %v497_v28  ;;  %v442_v1 = vmax.f32 %v190_v49, 0.0  ;;  %1969 = vmatpush1.msra.mxu0 %v1301_v37  ;;  %v460_v5 = vmax.f32 %v208_v54, 0.0  ;;  %v1291_v28 = vld [vmem:[%s4292_s1 + $0x7f0] sm:$0xff]  ;;  %v4043_v26 = vld [vmem:[%s4293_s0 + $0x2c8] sm:$0xff]  ;;  %v4052_v45 = vld [vmem:[%s4293_s0 + $0x358] sm:$0xff] }
  0xae   :  { %v902_v2 = vrot.slane %v901_v57, 1  ;;  %v720_v3 = vadd.f32 %v719_v19, %v718_v58  ;;  %v701_v6 = vadd.f32 %v298_v50, %v280_v44  ;;  %1970 = vmatprep.subr.mxu0 %v2313_v27  ;;  %v514_v11 = vmax.f32 %v262_v59, 0.0  ;;  %v1297_v19 = vld [vmem:[%s4292_s1 + $0x820] sm:$0xff]  ;;  %v4057_v47 = vld [vmem:[%s4293_s0 + $0x3e8] sm:$0x1]  ;;  %v1296_v49 = vld [vmem:[%s4292_s1 + $0x818] sm:$0xff] }
  0xaf   :  { %v661_v7 = vadd.f32 %v660_v62, %v659_v52  ;;  %v962_v9 = vadd.f32 %v961_v34, %v960_v0  ;;  %v943_v12 = vadd.f32 %v424_v56, %v406_v55  ;;  %1971 = vmatpush1.msra.mxu0 %v1300_v63  ;;  %v370_v15 = vmax.f32 %v3987_v38, 0.0  ;;  %v4067_v52 = vld [vmem:[%s4293_s0 + $0x478] sm:$0xff]  ;;  %v4072_v37 = vld [vmem:[%s4293_s0 + $0x508] sm:$0xff]  ;;  %v1295_v62 = vld [vmem:[%s4292_s1 + $0x810] sm:$0xff] }
  0xb0   :  { %v903_v13 = vadd.f32 %v902_v2, %v901_v57  ;;  %v721_v14 = vrot.slane %v720_v3, 4  ;;  %v702_v16 = vadd.f32 %v701_v6, %v316_v51  ;;  %1972 = vmatprep.subr.mxu0 %v2313_v27  ;;  %v478_v22 = vmax.f32 %v226_v4, 0.0  ;;  %v1290_v55 = vld [vmem:[%s4292_s1 + $0x7e8] sm:$0xff]  ;;  %v4082_v58 = vld [vmem:[%s4293_s0 + $0x598] sm:$0xff] }
  0xb1   :  { %v1011_v17 = vmul.f32 0.020408163, %v661_v7  ;;  %v963_v21 = vrot.slane %v962_v9, 4  ;;  %v944_v23 = vadd.f32 %v943_v12, %v442_v1  ;;  %1973 = vmatpush1.msra.mxu0 %v1299_v8  ;;  %v496_v30 = vmax.f32 %v4000_v10, 0.0  ;;  %v1289_v1 = vld [vmem:[%s4292_s1 + $0x7e0] sm:$0xff]  ;;  %v4101_v4 = vld [vmem:[%s4293_s0 + $0x628] sm:$0xff] }
  0xb2   :  { %v1029_v25 = vmul.f32 0.020408163, %v903_v13  ;;  %v722_v29 = vadd.f32 %v721_v14, %v720_v3  ;;  %v703_v31 = vadd.f32 %v702_v16, %v334_v60  ;;  %1974 = vmatprep.subr.mxu0 %v2313_v27  ;;  %v706_v35 = vsel %vm523_vm0, %v388_v46, 0.0  ;;  %v1273_v7 = vld [vmem:[%s4292_s1 + $0x760] sm:$0xff]  ;;  %v1294_v8 = vld [vmem:[%s4292_s1 + $0x808] sm:$0xff]  ;;  %v1288_v14 = vld [vmem:[%s4292_s1 + $0x7d8] sm:$0xff] }
  0xb3   :  { %v964_v34 = vadd.f32 %v963_v21, %v962_v9  ;;  %v945_v36 = vadd.f32 %v944_v23, %v460_v5  ;;  %v948_v39 = vsel %vm523_vm0, %v514_v11, 0.0  ;;  %1975 = vmatpush1.msra.mxu0 %v1298_v20  ;;  %v283_v48 = vmax.f32 %v4013_v24, 0.0  ;;  %v4115_v11 = vld [vmem:[%s4293_s0 + $0x6b8] sm:$0xff]  ;;  %v1293_v21 = vld [vmem:[%s4292_s1 + $0x800] sm:$0xff] }
  0xb4   :  { %v1367_v41 = vsel %vm1356_vm1, %v1029_v25, %v1011_v17  ;;  %v723_v43 = vrot.slane %v722_v29, 2  ;;  %v704_v44 = vadd.f32 %v703_v31, %v352_v61  ;;  %1976 = vmatprep.subr.mxu0 %v2313_v27  ;;  %v301_v53 = vmax.f32 %v4022_v32, 0.0  ;;  %v1274_v61 = vld [vmem:[%s4292_s1 + $0x768] sm:$0xff]  ;;  %v1272_v20 = vld [vmem:[%s4292_s1 + $0x758] sm:$0xff] }
  0xb5   :  { %1809 = vmatmul.mubr.f32.vlgmr.msra.gmra.mxu1 %v1367_v41  ;;  %v965_v50 = vrot.slane %v964_v34, 2  ;;  %v946_v51 = vadd.f32 %v945_v36, %v478_v22  ;;  %v319_v54 = vmax.f32 %v4027_v33, 0.0  ;;  %1977 = vmatpush1.msra.mxu0 %v1297_v19  ;;  %v337_v59 = vmax.f32 %v4038_v40, 0.0  ;;  %v1271_v33 = vld [vmem:[%s4292_s1 + $0x750] sm:$0xff]  ;;  %v1312_v19 = vld [vmem:[%s4292_s1 + $0x898] sm:$0xff]  ;;  %v247_v36 = vld [vmem:[%s4293_s0 + $0x748] sm:$0xff] }
  0xb6   :  { %2278 = vmatpush3.msra.mxu1 %v1276_v18  ;;  %v724_v56 = vadd.f32 %v723_v43, %v722_v29  ;;  %v705_v57 = vadd.f32 %v704_v44, %v370_v15  ;;  %v355_v60 = vmax.f32 %v4043_v26, 0.0  ;;  %1978 = vmatprep.subr.mxu0 %v2313_v27  ;;  %v373_v38 = vmax.f32 %v4052_v45, 0.0  ;;  %v1286_v26 = vld [vmem:[%s4292_s1 + $0x7c8] sm:$0xff]  ;;  %v48_v45 = vld [vmem:[%s4293_s0 + $0x110] sm:$0xff] }
  0xb7   :  { %2279 = vmatprep.subr.mxu1 %v1291_v28  ;;  %v966_v63 = vadd.f32 %v965_v50, %v964_v34  ;;  %v947_v0 = vadd.f32 %v946_v51, %v496_v30  ;;  %v391_v46 = vmax.f32 %v4057_v47, 0.0  ;;  %1979 = vmatpush1.msra.mxu0 %v1296_v49  ;;  %v409_v5 = vmax.f32 %v4067_v52, 0.0  ;;  %v1287_v28 = vld [vmem:[%s4292_s1 + $0x7d0] sm:$0xff]  ;;  %v265_v51 = vld [vmem:[%s4293_s0 + $0x7d8] sm:$0x1]  ;;  %v66_v47 = vld [vmem:[%s4293_s0 + $0x1a0] sm:$0xff] }
  0xb8   :  { %2280 = vmatpush3.msra.mxu1 %v1275_v42  ;;  %v725_v2 = vrot.slane %v724_v56, 1  ;;  %v707_v3 = vadd.f32 %v706_v35, %v705_v57  ;;  %v427_v6 = vmax.f32 %v4072_v37, 0.0  ;;  %1980 = vmatprep.subr.mxu0 %v2313_v27  ;;  %v445_v12 = vmax.f32 %v4082_v58, 0.0 }
  0xb9   :  { %2281 = vmatprep.subr.mxu1 %v1290_v55  ;;  %v967_v9 = vrot.slane %v966_v63, 1  ;;  %v949_v10 = vadd.f32 %v948_v39, %v947_v0  ;;  %v741_v13 = vsel %vm740_vm2, %v283_v48, 0.0  ;;  %1981 = vmatpush1.msra.mxu0 %v1295_v62  ;;  %v742_v17 = vsel %vm740_vm2, %v301_v53, 0.0  ;;  %v1270_v48 = vld [vmem:[%s4292_s1 + $0x748] sm:$0xff]  ;;  %v1285_v53 = vld [vmem:[%s4292_s1 + $0x7c0] sm:$0xff]  ;;  %v1311_v55 = vld [vmem:[%s4292_s1 + $0x890] sm:$0xff] }
  0xba   :  { %2282 = vmatpush3.msra.mxu1 %v1274_v61  ;;  %v726_v15 = vadd.f32 %v725_v2, %v724_v56  ;;  %v708_v16 = vrot.slane %v707_v3, 4  ;;  %v744_v18 = vsel %vm740_vm2, %v319_v54, 0.0  ;;  %1982 = vmatprep.subr.mxu0 %v2313_v27  ;;  %v463_v24 = vmax.f32 %v4101_v4, 0.0  ;;  %v1269_v54 = vld [vmem:[%s4292_s1 + $0x740] sm:$0xff]  ;;  %v1268_v0 = vld [vmem:[%s4292_s1 + $0x738] sm:$0xff] }
  0xbb   :  { %2283 = vmatprep.subr.mxu1 %v1289_v1  ;;  %v968_v22 = vadd.f32 %v967_v9, %v966_v63  ;;  %v950_v23 = vrot.slane %v949_v10, 4  ;;  %v743_v25 = vadd.f32 %v742_v17, %v741_v13  ;;  %1983 = vmatpush1.msra.mxu0 %v1294_v8  ;;  %v481_v31 = vmax.f32 %v4115_v11, 0.0  ;;  %v30_v63 = vld [vmem:[%s4293_s0 + $0x80] sm:$0xff]  ;;  %v1310_v1 = vld [vmem:[%s4292_s1 + $0x888] sm:$0xff] }
  0xbc   :  { %2284 = vmatpush3.msra.mxu1 %v1273_v7  ;;  %v1016_v29 = vmul.f32 0.020408163, %v726_v15  ;;  %v709_v30 = vadd.f32 %v708_v16, %v707_v3  ;;  %v746_v32 = vsel %vm740_vm2, %v337_v59, 0.0  ;;  %1984 = vmatprep.subr.mxu0 %v2313_v27  ;;  %v748_v40 = vsel %vm740_vm2, %v355_v60, 0.0  ;;  %v1284_v60 = vld [vmem:[%s4292_s1 + $0x7b8] sm:$0xff]  ;;  %v1267_v15 = vld [vmem:[%s4292_s1 + $0x730] sm:$0xff] }
  0xbd   :  { %2285 = vmatprep.subr.mxu1 %v1288_v14  ;;  %v1034_v34 = vmul.f32 0.020408163, %v968_v22  ;;  %v951_v35 = vadd.f32 %v950_v23, %v949_v10  ;;  %v745_v39 = vadd.f32 %v744_v18, %v743_v25  ;;  %1985 = vmatpush1.msra.mxu0 %v1293_v21  ;;  %v982_v42 = vsel %vm740_vm2, %v409_v5, 0.0  ;;  %v156_v5 = vld [vmem:[%s4293_s0 + $0x470] sm:$0xff]  ;;  %v1309_v10 = vld [vmem:[%s4292_s1 + $0x880] sm:$0xff]  ;;  %v1282_v21 = vld [vmem:[%s4292_s1 + $0x7a8] sm:$0xff] }
  0xbe   :  { %2286 = vmatpush3.msra.mxu1 %v1272_v20  ;;  %v710_v41 = vrot.slane %v709_v30, 2  ;;  %v983_v43 = vsel %vm740_vm2, %v427_v6, 0.0  ;;  %v985_v44 = vsel %vm740_vm2, %v445_v12, 0.0  ;;  %2010 = vmatprep.subr.mxu0 %v2313_v27  ;;  %v499_v57 = vmax.f32 %v247_v36, 0.0  ;;  %v1283_v6 = vld [vmem:[%s4292_s1 + $0x7b0] sm:$0xff] }
  0xbf   :  { %2287 = vmatprep.subr.mxu1 %v1287_v28  ;;  %v1372_v49 = vsel %vm1356_vm1, %v1034_v34, %v1016_v29  ;;  %v952_v50 = vrot.slane %v951_v35, 2  ;;  %v747_v52 = vadd.f32 %v746_v32, %v745_v39  ;;  %v984_v37 = vadd.f32 %v983_v43, %v982_v42  ;;  %2011 = vmatpush2.msra.mxu0 %v1312_v19  ;;  %v192_v12 = vld [vmem:[%s4293_s0 + $0x590] sm:$0xff]  ;;  %v1266_v29 = vld [vmem:[%s4292_s1 + $0x728] sm:$0xff]  ;;  %v138_v32 = vld [vmem:[%s4293_s0 + $0x3e0] sm:$0x1] }
  0xc0   :  { %2288 = vmatpush3.msra.mxu1 %v1271_v33  ;;  %v711_v56 = vadd.f32 %v710_v41, %v709_v30  ;;  %v750_v58 = vsel %vm740_vm2, %v373_v38, 0.0  ;;  %v987_v59 = vsel %vm740_vm2, %v463_v24, 0.0  ;;  %2012 = vmatprep.subr.mxu0 %v2313_v27  ;;  %v517_v2 = vmax.f32 %v265_v51, 0.0  ;;  %v84_v18 = vld [vmem:[%s4293_s0 + $0x230] sm:$0xff]  ;;  %v210_v24 = vld [vmem:[%s4293_s0 + $0x620] sm:$0xff] }
  0xc1   :  { %2289 = vmatprep.subr.mxu1 %v1286_v26  ;;  %v749_v61 = vadd.f32 %v748_v40, %v747_v52  ;;  %v986_v62 = vadd.f32 %v985_v44, %v984_v37  ;;  %1948 = vmatprep.mubr.f32.mxu1 %v1372_v49  ;;  %v953_v38 = vadd.f32 %v952_v50, %v951_v35  ;;  %v753_v3 = vsel %vm752_vm3, %v391_v46, 0.0  ;;  %v174_v46 = vld [vmem:[%s4293_s0 + $0x500] sm:$0xff]  ;;  %v228_v35 = vld [vmem:[%s4293_s0 + $0x6b0] sm:$0xff]  ;;  %v1280_v49 = vld [vmem:[%s4292_s1 + $0x798] sm:$0xff] }
  0xc2   :  { %2290 = vmatpush3.msra.mxu1 %v1270_v48  ;;  %v989_v4 = vsel %vm740_vm2, %v481_v31, 0.0  ;;  %2013 = vmatpush2.msra.mxu0 %v1311_v55  ;;  %v712_v9 = vrot.slane %v711_v56, 1  ;;  %v991_v11 = vsel %vm740_vm2, %v499_v57, 0.0  ;;  %v282_v13 = vmax.f32 %v30_v63, 0.0  ;;  %v1281_v19 = vld [vmem:[%s4292_s1 + $0x7a0] sm:$0xff]  ;;  %v120_v42 = vld [vmem:[%s4293_s0 + $0x350] sm:$0xff] }
  0xc3   :  { %2291 = vmatprep.subr.mxu1 %v1285_v53  ;;  %v751_v7 = vadd.f32 %v750_v58, %v749_v61  ;;  %v988_v8 = vadd.f32 %v987_v59, %v986_v62  ;;  %2014 = vmatprep.subr.mxu0 %v2313_v27  ;;  %v300_v14 = vmax.f32 %v48_v45, 0.0  ;;  %v408_v20 = vmax.f32 %v156_v5, 0.0  ;;  %v1265_v40 = vld [vmem:[%s4292_s1 + $0x720] sm:$0xff]  ;;  %v264_v43 = vld [vmem:[%s4293_s0 + $0x7d0] sm:$0x1] }
  0xc4   :  { %2292 = vmatpush3.msra.mxu1 %v1269_v54  ;;  %2015 = vmatpush2.msra.mxu0 %v1310_v1  ;;  %v954_v22 = vrot.slane %v953_v38, 1  ;;  %v993_v23 = vsel %vm752_vm3, %v517_v2, 0.0  ;;  %v318_v25 = vmax.f32 %v66_v47, 0.0  ;;  %v426_v28 = vmax.f32 %v174_v46, 0.0  ;;  %v246_v51 = vld [vmem:[%s4293_s0 + $0x740] sm:$0xff]  ;;  %v1264_v54 = vld [vmem:[%s4292_s1 + $0x718] sm:$0xff] }
  0xc5   :  { %2293 = vmatprep.subr.mxu1 %v1284_v60  ;;  %v754_v16 = vadd.f32 %v753_v3, %v751_v7  ;;  %v990_v17 = vadd.f32 %v989_v4, %v988_v8  ;;  %2016 = vmatprep.subr.mxu0 %v2313_v27  ;;  %v102_v27 = vld [vmem:[%s4293_s0 + $0x2c0] sm:$0xff]  ;;  %v444_v33 = vmax.f32 %v192_v12, 0.0  ;;  %v713_v34 = vadd.f32 %v712_v9, %v711_v56  ;;  %v1279_v59 = vld [vmem:[%s4292_s1 + $0x790] sm:$0xff]  ;;  %v1278_v2 = vld [vmem:[%s4292_s1 + $0x788] sm:$0xff] }
  0xc6   :  { %2294 = vmatpush3.msra.mxu1 %v1268_v0  ;;  %2017 = vmatpush2.msra.mxu0 %v1309_v10  ;;  %v336_v36 = vmax.f32 %v84_v18, 0.0  ;;  %v727_v39 = vadd.f32 %v300_v14, %v282_v13  ;;  %v462_v44 = vmax.f32 %v210_v24, 0.0  ;;  %v969_v48 = vadd.f32 %v426_v28, %v408_v20  ;;  %v1263_v63 = vld [vmem:[%s4292_s1 + $0x710] sm:$0xff]  ;;  %v1277_v9 = vld [vmem:[%s4292_s1 + $0x780] sm:$0xff] }
  0xc7   :  { %2295 = vmatprep.subr.mxu1 %v1283_v6  ;;  %v755_v30 = vrot.slane %v754_v16, 4  ;;  %v992_v31 = vadd.f32 %v991_v11, %v990_v17  ;;  %v955_v50 = vadd.f32 %v954_v22, %v953_v38  ;;  %v354_v52 = vmax.f32 %v102_v27, 0.0  ;;  %v1262_v6 = vld [vmem:[%s4292_s1 + $0x708] sm:$0xff]  ;;  %v1261_v12 = vld [vmem:[%s4292_s1 + $0x700] sm:$0xff] }
  0xc8   :  { %2296 = vmatpush3.msra.mxu1 %v1267_v15  ;;  %v390_v37 = vmax.f32 %v138_v32, 0.0  ;;  %v728_v53 = vadd.f32 %v727_v39, %v318_v25  ;;  %v480_v57 = vmax.f32 %v228_v35, 0.0  ;;  %v970_v58 = vadd.f32 %v969_v48, %v444_v33 }
  0xc9   :  { %2297 = vmatprep.subr.mxu1 %v1282_v21  ;;  %v756_v26 = vadd.f32 %v755_v30, %v754_v16  ;;  %v994_v41 = vadd.f32 %v993_v23, %v992_v31  ;;  %v372_v60 = vmax.f32 %v120_v42, 0.0  ;;  %v516_v61 = vmax.f32 %v264_v43, 0.0 }
  0xca   :  { %2298 = vmatpush3.msra.mxu1 %v1266_v29  ;;  %v729_v62 = vadd.f32 %v728_v53, %v336_v36  ;;  %v498_v38 = vmax.f32 %v246_v51, 0.0  ;;  %v971_v1 = vadd.f32 %v970_v58, %v462_v44  ;;  %v1015_v3 = vmul.f32 0.020408163, %v713_v34 }
  0xcb   :  { %2299 = vmatprep.subr.mxu1 %v1281_v19  ;;  %v757_v55 = vrot.slane %v756_v26, 2  ;;  %v995_v56 = vrot.slane %v994_v41, 4  ;;  %v1033_v4 = vmul.f32 0.020408163, %v955_v50  ;;  %v732_v47 = vsel %vm523_vm0, %v390_v37, 0.0 }
  0xcc   :  { %2300 = vmatpush3.msra.mxu1 %v1265_v40  ;;  %v730_v5 = vadd.f32 %v729_v62, %v354_v52  ;;  %v972_v46 = vadd.f32 %v971_v1, %v480_v57  ;;  %v974_v11 = vsel %vm523_vm0, %v516_v61, 0.0 }
  0xcd   :  { %2301 = vmatprep.subr.mxu1 %v1280_v49  ;;  %v758_v45 = vadd.f32 %v757_v55, %v756_v26  ;;  %v996_v0 = vadd.f32 %v995_v56, %v994_v41  ;;  %v1371_v16 = vsel %vm1356_vm1, %v1033_v4, %v1015_v3  ;;  %v2030_v49 = vld [vmem:[%s4294_s2] ss:$0 sm:$0xff] }
  0xce   :  { %2302 = vmatpush3.msra.mxu1 %v1264_v54  ;;  %v731_v10 = vadd.f32 %v730_v5, %v372_v60  ;;  %v973_v15 = vadd.f32 %v972_v46, %v498_v38 }
  0xcf   :  { %2303 = vmatprep.subr.mxu1 %v1279_v59  ;;  %v759_v7 = vrot.slane %v758_v45, 1  ;;  %v997_v8 = vrot.slane %v996_v0, 2 }
  0xd0   :  { %2304 = vmatpush3.msra.mxu1 %v1263_v63  ;;  %v733_v17 = vadd.f32 %v732_v47, %v731_v10  ;;  %v975_v20 = vadd.f32 %v974_v11, %v973_v15 }
  0xd1   :  { %2305 = vmatprep.subr.mxu1 %v1278_v2  ;;  %v760_v13 = vadd.f32 %v759_v7, %v758_v45  ;;  %v998_v14 = vadd.f32 %v997_v8, %v996_v0 }
  0xd2   :  { %2306 = vmatpush3.msra.mxu1 %v1262_v6  ;;  %v734_v21 = vrot.slane %v733_v17, 4  ;;  %v976_v24 = vrot.slane %v975_v20, 4 }
  0xd3   :  { %2307 = vmatprep.subr.mxu1 %v1277_v9  ;;  %v999_v18 = vrot.slane %v998_v14, 1  ;;  %v1018_v23 = vmul.f32 0.020408163, %v760_v13 }
  0xd4   :  { %2308 = vmatpush3.msra.mxu1 %v1261_v12  ;;  %v735_v25 = vadd.f32 %v734_v21, %v733_v17  ;;  %v977_v29 = vadd.f32 %v976_v24, %v975_v20 }
  0xd5   :  { %1949 = vmatmul.mubr.f32.vlgmr.msra.gmra.mxu1 %v1371_v16  ;;  %v1000_v22 = vadd.f32 %v999_v18, %v998_v14 }
  0xd6   :  { %v736_v30 = vrot.slane %v735_v25, 2  ;;  %v978_v27 = vrot.slane %v977_v29, 2 }
  0xd7   :  { %v1036_v28 = vmul.f32 0.020408163, %v1000_v22 }
  0xd8   :  { %v737_v32 = vadd.f32 %v736_v30, %v735_v25  ;;  %v979_v33 = vadd.f32 %v978_v27, %v977_v29 }
  0xd9   :  { %v1374_v31 = vsel %vm1356_vm1, %v1036_v28, %v1018_v23 }
  0xda   :  { %2031 = vmatprep.mubr.msk.f32.mxu0 %vm740_vm2, %v1374_v31  ;;  %v738_v19 = vrot.slane %v737_v32, 1  ;;  %v980_v34 = vrot.slane %v979_v33, 1 }
  0xdc   :  { %v739_v35 = vadd.f32 %v738_v19, %v737_v32  ;;  %v981_v36 = vadd.f32 %v980_v34, %v979_v33 }
  0xde   :  { %v1017_v39 = vmul.f32 0.020408163, %v739_v35  ;;  %v1035_v40 = vmul.f32 0.020408163, %v981_v36 }
  0xe0   :  { %v1373_v26 = vsel %vm1356_vm1, %v1035_v40, %v1017_v39 }
  0xe1   :  { %2019 = vmatmul.mubr.f32.vlgmr.msra.gmra.mxu0 %v1373_v26 }
  0xef   :  { %v2064_v41 = vpop.f32.mrf.mxu1 }
  0xf1   :  { %v2065_v42 = vpop.f32.mrf.mxu1 }
  0xf2   :  { %v2066_v48 = vadd.f32 %v2065_v42, %v2064_v41 }
  0xf4   :  { %v1461_v37 = vadd.f32 %v2066_v48, %v2030_v49 }
 0x109   :  { %v2134_v50 = vpop.f32.mrf.mxu0 }
 0x10b   :  { %v2135_v53 = vpop.f32.mrf.mxu0 }
 0x10c   :  { %v2136_v58 = vadd.f32 %v2135_v53, %v2134_v50 }
 0x11f   :  { %v2099_v43 = vpop.f32.mrf.mxu1 }
 0x121   :  { %v2100_v44 = vpop.f32.mrf.mxu1 }
 0x122   :  { %v2101_v52 = vadd.f32 %v2100_v44, %v2099_v43 }
 0x124   :  { %v1531_v55 = vadd.f32 %v2101_v52, %v1461_v37 }
 0x126   :  { %v1601_v60 = vadd.f32 %v2136_v58, %v1531_v55 }
 0x134   :  { %v2204_v56 = vpop.f32.mrf.mxu0 }
 0x136   :  { %v2205_v61 = vpop.f32.mrf.mxu0 }
 0x137   :  { %v2206_v38 = vadd.f32 %v2205_v61, %v2204_v56 }
 0x149   :  { %v2169_v51 = vpop.f32.mrf.mxu1 }
 0x14b   :  { %v2170_v54 = vpop.f32.mrf.mxu1 }
 0x14c   :  { %v2171_v59 = vadd.f32 %v2170_v54, %v2169_v51 }
 0x14e   :  { %v1671_v63 = vadd.f32 %v2171_v59, %v1601_v60 }
 0x150   :  { %v1741_v2 = vadd.f32 %v2206_v38, %v1671_v63 }
 0x15e   :  { %v2274_v45 = vpop.f32.mrf.mxu0 }
 0x160   :  { %v2275_v3 = vpop.f32.mrf.mxu0 }
 0x161   :  { %v2276_v6 = vadd.f32 %v2275_v3, %v2274_v45 }
 0x175   :  { %v2239_v57 = vpop.f32.mrf.mxu1 }
 0x177   :  { %v2240_v62 = vpop.f32.mrf.mxu1 }
 0x178   :  { %v2241_v1 = vadd.f32 %v2240_v62, %v2239_v57 }
 0x17a   :  { %v1811_v5 = vadd.f32 %v2241_v1, %v1741_v2 }
 0x17c   :  { %v1881_v8 = vadd.f32 %v2276_v6, %v1811_v5 }
 0x195   :  { %v2309_v0 = vpop.f32.mrf.mxu1 }
 0x197   :  { %v2310_v4 = vpop.f32.mrf.mxu1 }
 0x198   :  { %v2311_v7 = vadd.f32 %v2310_v4, %v2309_v0 }
 0x19a   :  { %v1951_v47 = vadd.f32 %v2311_v7, %v1881_v8 }
 0x1a1   :  { %v2020_v46 = vpop.f32.mrf.mxu0 }
 0x1a2   :  { %v2021_v9 = vadd.f32 %v2020_v46, %v1951_v47 }
 0x1a3   :  { %v2022_v10 = vpop.f32.mrf.mxu0 }
 0x1a4   :  { %2025 = vst.msk [vmem:[%s4295_s3] sm:$0x3] %vm2024_vm4, %v2021_v9 }

// kernel: forward.3
= control target key start
LH: loop header
LB: loop body
LE: loop exit
PB: predicated region body
PF: predicated region fallthrough
CT: control target
= control target key end

     0   :  { %s7854_s25 = smov 0   ;;  %s10186_s0 = inlined_call_operand.vmem [shape: f32[3,2,13,13,108], index: 0, kind: input, shape index: {}]   ;;  %s10187_s1 = inlined_call_operand.vmem [shape: f32[3,108,16], index: 1, kind: input, shape index: {}]   ;;  %s10188_s2 = inlined_call_operand.vmem [shape: f32[3,1,16], index: 2, kind: input, shape index: {}]   ;;  %s10189_s3 = inlined_call_operand.vmem [shape: f32[3,1,16], index: 3, kind: input, shape index: {}]   ;;  %s10190_s4 = inlined_call_operand.vmem [shape: f32[3,144,16], index: 4, kind: input, shape index: {}]   ;;  %s10191_s5 = inlined_call_operand.vmem [shape: f32[3,1,16], index: 5, kind: input, shape index: {}]   ;;  %s10192_s6 = inlined_call_operand.vmem [shape: f32[3,1,16], index: 6, kind: input, shape index: {}]   ;;  %s10193_s7 = inlined_call_operand.vmem [shape: f32[3,9,16,128], index: 7, kind: input, shape index: {}]   ;;  %s10194_s8 = inlined_call_operand.vmem [shape: f32[3,1,128], index: 8, kind: input, shape index: {}]   ;;  %s10195_s9 = inlined_call_operand.vmem [shape: f32[3,1,128], index: 9, kind: input, shape index: {}]   ;;  %s10196_s10 = inlined_call_operand.vmem [shape: f32[3,128,136], index: 10, kind: input, shape index: {}]   ;;  %s10197_s11 = inlined_call_operand.vmem [shape: f32[3,1,136], index: 11, kind: input, shape index: {}]   ;;  %s10198_s12 = inlined_call_operand.vmem [shape: f32[3,136,2], index: 12, kind: input, shape index: {}]   ;;  %s10199_s13 = inlined_call_operand.vmem [shape: f32[3,2,2], index: 13, kind: output, shape index: {}]  }
   0x1 LB: > { %s6184_s26 = sadd.s32 4294967295, %s7772_s25   ;;  %p6188_p0 = scmp.ge.s32.totalorder %s7772_s25, 1  ;;  %s7772_s25 = sphi %s7854_s25, %s23_s25  }
   0x2   : > { %p494_p1 = scmp.lt.s32.totalorder %s7772_s25, 4 }
   0x4   : > { %p495_p2 = pnand %p6188_p0, %p494_p1 }
   0x5   : > { %p584_p3 = scmp.lt.s32.totalorder (!%p495_p2), %s6184_s26, 2  ;;  %s7775_s24 = smov (!%p495_p2), 16  }
   0x6   : > { %498 = sbr.rel (%p495_p2) target bundleno = 1609 (0x649), region = 72  ;;  %s7778_s28 = smov (!%p495_p2), 48  }
   0x7   : > { %s7779_s29 = smov (!%p495_p2), 80   ;;  %s7781_s15 = smov (!%p495_p2), 96  }
   0x8   : > { %s7782_s16 = smov (!%p495_p2), 112  }
   0xb   : > { %s10201_s26 = smov (!%p584_p3, %s6184_s26), 2  ;;  %vm723_vm0 = vcmask 1043456   ;;  %vm716_vm1 = vcmask 883712   ;;  %vm642_vm2 = vcmask 128000   ;;  %v7774_v26 = vmov -inf  }
   0xc   : > { %s7684_s27 = smul.u32 112, %s10201_s26  ;;  %643 = vst.msk [vmem:[#allocation2 + $0x8] sm:$0x3f] %vm642_vm2, %v7774_v26  ;;  %645 = vst.msk [vmem:[#allocation2 + $0x18] sm:$0x3f] %vm642_vm2, %v7774_v26  ;;  %vm640_vm3 = vcmask 130048   ;;  %s8540_s20 = scalar_lea.vmem %s10188_s2, %s10201_s26 }
   0xd   : > { %s7683_s14 = smul.u32 416, %s10201_s26  ;;  %647 = vst.msk [vmem:[#allocation2 + $0x28] sm:$0x3f] %vm642_vm2, %v7774_v26  ;;  %649 = vst.msk [vmem:[#allocation2 + $0x38] sm:$0x3f] %vm642_vm2, %v7774_v26  ;;  %s8553_s23 = scalar_lea.vmem %s10189_s3, %s10201_s26  ;;  %vm821_vm4 = vcmask 126976  }
   0xe   : > { %s7868_s30 = scalar_lea.vmem %s10187_s1, %s7684_s27  ;;  %651 = vst.msk [vmem:[#allocation2 + $0x48] sm:$0x3f] %vm642_vm2, %v7774_v26  ;;  %653 = vst.msk [vmem:[#allocation2 + $0x58] sm:$0x3f] %vm642_vm2, %v7774_v26  ;;  %v8558_v48 = vld [vmem:[%s8540_s20] ss:$0 sm:$0xff]  ;;  %s607_s22 = scalar_lea.vmem %s10191_s5, %s10201_s26 }
   0xf   : > { %v7871_v0 = vld [vmem:[%s7868_s30 + $0x68] sm:$0xf]  ;;  %v7874_v1 = vld [vmem:[%s7868_s30 + $0x60] sm:$0xff]  ;;  %v7885_v2 = vld [vmem:[%s7868_s30 + $0x58] sm:$0xff]  ;;  %s7961_s17 = scalar_lea.vmem %s10186_s0, %s7683_s14  ;;  %655 = vst.msk [vmem:[#allocation2 + $0x68] sm:$0x3f] %vm642_vm2, %v7774_v26 }
  0x10   : > { %6814 = vmatprep.subr.msk.mxu0 %vm723_vm0, %v7871_v0  ;;  %6845 = vmatprep.subr.msk.mxu1 %vm723_vm0, %v7871_v0  ;;  %v7892_v3 = vld [vmem:[%s7868_s30 + $0x50] sm:$0xff]  ;;  %v7899_v4 = vld [vmem:[%s7868_s30 + $0x48] sm:$0xff]  ;;  %v7906_v5 = vld [vmem:[%s7868_s30 + $0x40] sm:$0xff]  ;;  %657 = vst.msk [vmem:[#allocation2 + $0x78] sm:$0x3f] %vm642_vm2, %v7774_v26  ;;  %vm3309_vm5 = vcmask 122880  }
  0x11   : > { %6815 = vmatpush3.msk.msra.mxu0 %vm723_vm0, %v7871_v0  ;;  %6846 = vmatpush3.msk.msra.mxu1 %vm723_vm0, %v7871_v0  ;;  %v7913_v6 = vld [vmem:[%s7868_s30 + $0x38] sm:$0xff]  ;;  %v7920_v7 = vld [vmem:[%s7868_s30 + $0x30] sm:$0xff]  ;;  %v7927_v8 = vld [vmem:[%s7868_s30 + $0x28] sm:$0xff]  ;;  %659 = vst.msk [vmem:[#allocation2 + $0x88] sm:$0x3f] %vm642_vm2, %v7774_v26  ;;  %s7776_s27 = smov 32  }
  0x12   : > { %6816 = vmatprep.subr.mxu0 %v7874_v1  ;;  %6847 = vmatprep.subr.mxu1 %v7874_v1  ;;  %v7934_v9 = vld [vmem:[%s7868_s30 + $0x20] sm:$0xff]  ;;  %v7941_v10 = vld [vmem:[%s7868_s30 + $0x18] sm:$0xff]  ;;  %v7949_v11 = vld [vmem:[%s7868_s30 + $0x10] sm:$0xff]  ;;  %661 = vst.msk [vmem:[#allocation2 + $0x98] sm:$0x3f] %vm642_vm2, %v7774_v26  ;;  %s7780_s14 = smov 64  }
  0x13   : > { %6817 = vmatpush3.msra.mxu0 %v7874_v1  ;;  %6848 = vmatpush3.msra.mxu1 %v7874_v1  ;;  %v7956_v12 = vld [vmem:[%s7868_s30 + $0x8] sm:$0xff]  ;;  %v7968_v13 = vld [vmem:[%s7868_s30] sm:$0xff]  ;;  %v6203_v15 = vld [vmem:[%s7961_s17 + $0x10] sm:$0xff]  ;;  %663 = vst.msk [vmem:[#allocation2 + $0xa8] sm:$0x3f] %vm642_vm2, %v7774_v26  ;;  %vm3730_vm6 = vcmask 258176  }
  0x14   : > { %6818 = vmatprep.subr.mxu0 %v7885_v2  ;;  %6849 = vmatprep.subr.mxu1 %v7885_v2  ;;  %v714_v14 = vld [vmem:[%s7961_s17] sm:$0xff]  ;;  %v715_v16 = vld [vmem:[%s7961_s17 + $0x8] sm:$0x1f]  ;;  %v6204_v17 = vld [vmem:[%s7961_s17 + $0x18] sm:$0x1f]  ;;  %641 = vst.msk [vmem:[#allocation2] sm:$0xff] %vm640_vm3, %v7774_v26 }
  0x15   : > { %6819 = vmatpush3.msra.mxu0 %v7885_v2  ;;  %6850 = vmatpush3.msra.mxu1 %v7885_v2  ;;  %v6208_v18 = vld [vmem:[%s7961_s17 + $0x20] sm:$0xff]  ;;  %v6213_v19 = vld [vmem:[%s7961_s17 + $0x30] sm:$0xff]  ;;  %v6209_v20 = vld [vmem:[%s7961_s17 + $0x28] sm:$0x1f]  ;;  %665 = vst.msk [vmem:[#allocation2 + $0xb8] sm:$0x3f] %vm642_vm2, %v7774_v26 }
  0x16   : > { %6820 = vmatprep.subr.mxu0 %v7892_v3  ;;  %6851 = vmatprep.subr.mxu1 %v7892_v3  ;;  %v6214_v21 = vld [vmem:[%s7961_s17 + $0x38] sm:$0x1f]  ;;  %v6218_v22 = vld [vmem:[%s7961_s17 + $0x40] sm:$0xff]  ;;  %v6223_v23 = vld [vmem:[%s7961_s17 + $0x50] sm:$0xff]  ;;  %667 = vst.msk [vmem:[#allocation2 + $0xc8] sm:$0x3f] %vm642_vm2, %v7774_v26 }
  0x17   : > { %6821 = vmatpush3.msra.mxu0 %v7892_v3  ;;  %6852 = vmatpush3.msra.mxu1 %v7892_v3  ;;  %v6219_v24 = vld [vmem:[%s7961_s17 + $0x48] sm:$0x1f]  ;;  %v6224_v25 = vld [vmem:[%s7961_s17 + $0x58] sm:$0x1f]  ;;  %669 = vst.msk [vmem:[#allocation2 + $0xd8] sm:$0x3f] %vm642_vm2, %v7774_v26 }
  0x18   : > { %6822 = vmatprep.subr.mxu0 %v7899_v4  ;;  %6853 = vmatprep.subr.mxu1 %v7899_v4  ;;  %671 = vst.msk [vmem:[#allocation2 + $0xe8] sm:$0x3f] %vm642_vm2, %v7774_v26  ;;  %673 = vst.msk [vmem:[#allocation2 + $0xf8] sm:$0x3f] %vm642_vm2, %v7774_v26  ;;  %v6228_v27 = vld [vmem:[%s7961_s17 + $0x60] sm:$0xff]  ;;  %v6233_v28 = vld [vmem:[%s7961_s17 + $0x70] sm:$0xff] }
  0x19   : > { %6823 = vmatpush3.msra.mxu0 %v7899_v4  ;;  %6854 = vmatpush3.msra.mxu1 %v7899_v4  ;;  %675 = vst.msk [vmem:[#allocation2 + $0x108] sm:$0x3f] %vm642_vm2, %v7774_v26  ;;  %677 = vst.msk [vmem:[#allocation2 + $0x118] sm:$0x3f] %vm642_vm2, %v7774_v26  ;;  %v6229_v29 = vld [vmem:[%s7961_s17 + $0x68] sm:$0x1f] }
  0x1a   : > { %6824 = vmatprep.subr.mxu0 %v7906_v5  ;;  %6855 = vmatprep.subr.mxu1 %v7906_v5  ;;  %679 = vst.msk [vmem:[#allocation2 + $0x128] sm:$0x3f] %vm642_vm2, %v7774_v26  ;;  %681 = vst.msk [vmem:[#allocation2 + $0x138] sm:$0x3f] %vm642_vm2, %v7774_v26  ;;  %v6234_v30 = vld [vmem:[%s7961_s17 + $0x78] sm:$0x1f] }
  0x1b   : > { %6825 = vmatpush3.msra.mxu0 %v7906_v5  ;;  %6856 = vmatpush3.msra.mxu1 %v7906_v5  ;;  %683 = vst.msk [vmem:[#allocation2 + $0x148] sm:$0x3f] %vm642_vm2, %v7774_v26  ;;  %685 = vst.msk [vmem:[#allocation2 + $0x158] sm:$0x3f] %vm642_vm2, %v7774_v26  ;;  %v6238_v31 = vld [vmem:[%s7961_s17 + $0x80] sm:$0xff]  ;;  %v6243_v32 = vld [vmem:[%s7961_s17 + $0x90] sm:$0xff] }
  0x1c   : > { %6826 = vmatprep.subr.mxu0 %v7913_v6  ;;  %6857 = vmatprep.subr.mxu1 %v7913_v6  ;;  %687 = vst.msk [vmem:[#allocation2 + $0x168] sm:$0x3f] %vm642_vm2, %v7774_v26  ;;  %689 = vst.msk [vmem:[#allocation2 + $0x178] sm:$0x3f] %vm642_vm2, %v7774_v26  ;;  %v6239_v33 = vld [vmem:[%s7961_s17 + $0x88] sm:$0x1f] }
  0x1d   : > { %6827 = vmatpush3.msra.mxu0 %v7913_v6  ;;  %6858 = vmatpush3.msra.mxu1 %v7913_v6  ;;  %691 = vst.msk [vmem:[#allocation2 + $0x188] sm:$0x3f] %vm642_vm2, %v7774_v26  ;;  %693 = vst.msk [vmem:[#allocation2 + $0x198] sm:$0x3f] %vm642_vm2, %v7774_v26  ;;  %v6244_v34 = vld [vmem:[%s7961_s17 + $0x98] sm:$0x1f] }
  0x1e   : > { %6828 = vmatprep.subr.mxu0 %v7920_v7  ;;  %6859 = vmatprep.subr.mxu1 %v7920_v7  ;;  %695 = vst.msk [vmem:[#allocation2 + $0x1a8] sm:$0x3f] %vm642_vm2, %v7774_v26  ;;  %697 = vst.msk [vmem:[#allocation2 + $0x1b8] sm:$0x3f] %vm642_vm2, %v7774_v26  ;;  %v6248_v35 = vld [vmem:[%s7961_s17 + $0xa0] sm:$0xff]  ;;  %v6253_v36 = vld [vmem:[%s7961_s17 + $0xb0] sm:$0xff] }
  0x1f   : > { %6829 = vmatpush3.msra.mxu0 %v7920_v7  ;;  %6860 = vmatpush3.msra.mxu1 %v7920_v7  ;;  %644 = vst.msk [vmem:[#allocation2 + $0x10] sm:$0xff] %vm640_vm3, %v7774_v26  ;;  %646 = vst.msk [vmem:[#allocation2 + $0x20] sm:$0xff] %vm640_vm3, %v7774_v26  ;;  %v6249_v37 = vld [vmem:[%s7961_s17 + $0xa8] sm:$0x1f]  ;;  %v6254_v38 = vld [vmem:[%s7961_s17 + $0xb8] sm:$0x1f] }
  0x20   : > { %6830 = vmatprep.subr.mxu0 %v7927_v8  ;;  %6861 = vmatprep.subr.mxu1 %v7927_v8  ;;  %648 = vst.msk [vmem:[#allocation2 + $0x30] sm:$0xff] %vm640_vm3, %v7774_v26  ;;  %650 = vst.msk [vmem:[#allocation2 + $0x40] sm:$0xff] %vm640_vm3, %v7774_v26  ;;  %v6258_v39 = vld [vmem:[%s7961_s17 + $0xc0] sm:$0xff]  ;;  %v6259_v40 = vld [vmem:[%s7961_s17 + $0xc8] sm:$0x1f]  ;;  %vm3791_vm7 = vcmask 389376  }
  0x21   : > { %6831 = vmatpush3.msra.mxu0 %v7927_v8  ;;  %6862 = vmatpush3.msra.mxu1 %v7927_v8  ;;  %652 = vst.msk [vmem:[#allocation2 + $0x50] sm:$0xff] %vm640_vm3, %v7774_v26  ;;  %654 = vst.msk [vmem:[#allocation2 + $0x60] sm:$0xff] %vm640_vm3, %v7774_v26  ;;  %v6263_v41 = vld [vmem:[%s7961_s17 + $0xd0] sm:$0xff]  ;;  %v6264_v42 = vld [vmem:[%s7961_s17 + $0xd8] sm:$0x1f]  ;;  %vm3853_vm8 = vcmask 520576  }
  0x22   : > { %6832 = vmatprep.subr.mxu0 %v7934_v9  ;;  %6863 = vmatprep.subr.mxu1 %v7934_v9  ;;  %656 = vst.msk [vmem:[#allocation2 + $0x70] sm:$0xff] %vm640_vm3, %v7774_v26  ;;  %658 = vst.msk [vmem:[#allocation2 + $0x80] sm:$0xff] %vm640_vm3, %v7774_v26  ;;  %v8506_v43 = vld [vmem:[%s7868_s30 + $0x68] sm:$0xf]  ;;  %v8518_v44 = vld [vmem:[%s7868_s30 + $0x60] sm:$0xff]  ;;  %vm3914_vm9 = vcmask 651776  }
  0x23   : > { %6833 = vmatpush3.msra.mxu0 %v7934_v9  ;;  %6864 = vmatpush3.msra.mxu1 %v7934_v9  ;;  %660 = vst.msk [vmem:[#allocation2 + $0x90] sm:$0xff] %vm640_vm3, %v7774_v26  ;;  %662 = vst.msk [vmem:[#allocation2 + $0xa0] sm:$0xff] %vm640_vm3, %v7774_v26  ;;  %v8525_v45 = vld [vmem:[%s7868_s30 + $0x58] sm:$0xff]  ;;  %v8532_v46 = vld [vmem:[%s7868_s30 + $0x50] sm:$0xff]  ;;  %vm3975_vm10 = vcmask 782976   ;;  %vm4037_vm11 = vcmask 914176  }
  0x24   : > { %6834 = vmatprep.subr.mxu0 %v7941_v10  ;;  %6865 = vmatprep.subr.mxu1 %v7941_v10  ;;  %664 = vst.msk [vmem:[#allocation2 + $0xb0] sm:$0xff] %vm640_vm3, %v7774_v26  ;;  %666 = vst.msk [vmem:[#allocation2 + $0xc0] sm:$0xff] %vm640_vm3, %v7774_v26  ;;  %v8545_v47 = vld [vmem:[%s7868_s30 + $0x48] sm:$0xff]  ;;  %v8561_v49 = vld [vmem:[%s7868_s30 + $0x40] sm:$0xff]  ;;  %vm4098_vm12 = vcmask 1045376   ;;  %vm7783_vm13 = vmmov 0  }
  0x25   : > { %6835 = vmatpush3.msra.mxu0 %v7941_v10  ;;  %6866 = vmatpush3.msra.mxu1 %v7941_v10  ;;  %668 = vst.msk [vmem:[#allocation2 + $0xd0] sm:$0xff] %vm640_vm3, %v7774_v26  ;;  %670 = vst.msk [vmem:[#allocation2 + $0xe0] sm:$0xff] %vm640_vm3, %v7774_v26  ;;  %v8568_v50 = vld [vmem:[%s8553_s23] ss:$0 sm:$0xff]  ;;  %v8571_v53 = vld [vmem:[%s7868_s30 + $0x38] sm:$0xff]  ;;  %vm5028_vm14 = vcmask 1041409  }
  0x26   : > { %6836 = vmatprep.subr.mxu0 %v7949_v11  ;;  %6867 = vmatprep.subr.mxu1 %v7949_v11  ;;  %672 = vst.msk [vmem:[#allocation2 + $0xf0] sm:$0xff] %vm640_vm3, %v7774_v26  ;;  %674 = vst.msk [vmem:[#allocation2 + $0x100] sm:$0xff] %vm640_vm3, %v7774_v26  ;;  %v8580_v58 = vld [vmem:[%s7868_s30 + $0x30] sm:$0xff]  ;;  %v8591_v63 = vld [vmem:[%s7868_s30 + $0x28] sm:$0xff]  ;;  %s7686_s19 = smul.u32 136, %s10201_s26  ;;  %vm5929_vm15 = vcmask 64512  }
  0x27   : > { %6837 = vmatpush3.msra.mxu0 %v7949_v11  ;;  %6868 = vmatpush3.msra.mxu1 %v7949_v11  ;;  %676 = vst.msk [vmem:[#allocation2 + $0x110] sm:$0xff] %vm640_vm3, %v7774_v26  ;;  %678 = vst.msk [vmem:[#allocation2 + $0x120] sm:$0xff] %vm640_vm3, %v7774_v26 }
  0x28   : > { %6838 = vmatprep.subr.mxu0 %v7956_v12  ;;  %6869 = vmatprep.subr.mxu1 %v7956_v12  ;;  %680 = vst.msk [vmem:[#allocation2 + $0x130] sm:$0xff] %vm640_vm3, %v7774_v26  ;;  %682 = vst.msk [vmem:[#allocation2 + $0x140] sm:$0xff] %vm640_vm3, %v7774_v26 }
  0x29   : > { %6839 = vmatpush3.msra.mxu0 %v7956_v12  ;;  %6870 = vmatpush3.msra.mxu1 %v7956_v12  ;;  %684 = vst.msk [vmem:[#allocation2 + $0x150] sm:$0xff] %vm640_vm3, %v7774_v26  ;;  %686 = vst.msk [vmem:[#allocation2 + $0x160] sm:$0xff] %vm640_vm3, %v7774_v26 }
  0x2a   : > { %6840 = vmatprep.subr.mxu0 %v7968_v13  ;;  %6871 = vmatprep.subr.mxu1 %v7968_v13  ;;  %688 = vst.msk [vmem:[#allocation2 + $0x170] sm:$0xff] %vm640_vm3, %v7774_v26  ;;  %690 = vst.msk [vmem:[#allocation2 + $0x180] sm:$0xff] %vm640_vm3, %v7774_v26 }
  0x2b   : > { %6841 = vmatpush3.msra.mxu0 %v7968_v13  ;;  %6842 = vmatprep.mubr.msk.f32.mxu0 %vm716_vm1, %v714_v14  ;;  %692 = vst.msk [vmem:[#allocation2 + $0x190] sm:$0xff] %vm640_vm3, %v7774_v26  ;;  %694 = vst.msk [vmem:[#allocation2 + $0x1a0] sm:$0xff] %vm640_vm3, %v7774_v26 }
  0x2c   : > { %6872 = vmatpush3.msra.mxu1 %v7968_v13  ;;  %6873 = vmatprep.mubr.msk.f32.mxu1 %vm716_vm1, %v6203_v15  ;;  %696 = vst.msk [vmem:[#allocation2 + $0x1b0] sm:$0xff] %vm640_vm3, %v7774_v26  ;;  %v8634_v15 = vld [vmem:[%s7868_s30] sm:$0xff] }
  0x2d   : > { %6843 = vmatmul.mubr.msk.f32.vlgmr.msra.gmra.mxu0 %vm716_vm1, %v715_v16  ;;  %6874 = vmatmul.mubr.msk.f32.vlgmr.msra.gmra.mxu1 %vm716_vm1, %v6204_v17  ;;  %v6273_v16 = vld [vmem:[%s7961_s17 + $0xf0] sm:$0xff] }
  0x2e   : > { %6876 = vmatprep.subr.msk.mxu0 %vm723_vm0, %v7871_v0  ;;  %6907 = vmatprep.subr.msk.mxu1 %vm723_vm0, %v7871_v0 }
  0x2f   : > { %6877 = vmatpush3.msk.msra.mxu0 %vm723_vm0, %v7871_v0  ;;  %6908 = vmatpush3.msk.msra.mxu1 %vm723_vm0, %v7871_v0 }
  0x30   : > { %6878 = vmatprep.subr.mxu0 %v7874_v1  ;;  %6909 = vmatprep.subr.mxu1 %v7874_v1 }
  0x31   : > { %6879 = vmatpush3.msra.mxu0 %v7874_v1  ;;  %6910 = vmatpush3.msra.mxu1 %v7874_v1 }
  0x32   : > { %6880 = vmatprep.subr.mxu0 %v7885_v2  ;;  %6911 = vmatprep.subr.mxu1 %v7885_v2 }
  0x33   : > { %6881 = vmatpush3.msra.mxu0 %v7885_v2  ;;  %6912 = vmatpush3.msra.mxu1 %v7885_v2 }
  0x34   : > { %6882 = vmatprep.subr.mxu0 %v7892_v3  ;;  %6913 = vmatprep.subr.mxu1 %v7892_v3 }
  0x35   : > { %6883 = vmatpush3.msra.mxu0 %v7892_v3  ;;  %6914 = vmatpush3.msra.mxu1 %v7892_v3 }
  0x36   : > { %6884 = vmatprep.subr.mxu0 %v7899_v4  ;;  %6915 = vmatprep.subr.mxu1 %v7899_v4 }
  0x37   : > { %6885 = vmatpush3.msra.mxu0 %v7899_v4  ;;  %6916 = vmatpush3.msra.mxu1 %v7899_v4 }
  0x38   : > { %6886 = vmatprep.subr.mxu0 %v7906_v5  ;;  %6917 = vmatprep.subr.mxu1 %v7906_v5 }
  0x39   : > { %6887 = vmatpush3.msra.mxu0 %v7906_v5  ;;  %6918 = vmatpush3.msra.mxu1 %v7906_v5 }
  0x3a   : > { %6888 = vmatprep.subr.mxu0 %v7913_v6  ;;  %6919 = vmatprep.subr.mxu1 %v7913_v6 }
  0x3b   : > { %6889 = vmatpush3.msra.mxu0 %v7913_v6  ;;  %6920 = vmatpush3.msra.mxu1 %v7913_v6 }
  0x3c   : > { %6890 = vmatprep.subr.mxu0 %v7920_v7  ;;  %6921 = vmatprep.subr.mxu1 %v7920_v7 }
  0x3d   : > { %6891 = vmatpush3.msra.mxu0 %v7920_v7  ;;  %6922 = vmatpush3.msra.mxu1 %v7920_v7 }
  0x3e   : > { %6892 = vmatprep.subr.mxu0 %v7927_v8  ;;  %6923 = vmatprep.subr.mxu1 %v7927_v8 }
  0x3f   : > { %6893 = vmatpush3.msra.mxu0 %v7927_v8  ;;  %6924 = vmatpush3.msra.mxu1 %v7927_v8 }
  0x40   : > { %6894 = vmatprep.subr.mxu0 %v7934_v9  ;;  %6925 = vmatprep.subr.mxu1 %v7934_v9 }
  0x41   : > { %6895 = vmatpush3.msra.mxu0 %v7934_v9  ;;  %6926 = vmatpush3.msra.mxu1 %v7934_v9 }
  0x42   : > { %6896 = vmatprep.subr.mxu0 %v7941_v10  ;;  %6927 = vmatprep.subr.mxu1 %v7941_v10 }
  0x43   : > { %6897 = vmatpush3.msra.mxu0 %v7941_v10  ;;  %6928 = vmatpush3.msra.mxu1 %v7941_v10 }
  0x44   : > { %6898 = vmatprep.subr.mxu0 %v7949_v11  ;;  %6929 = vmatprep.subr.mxu1 %v7949_v11 }
  0x45   : > { %6899 = vmatpush3.msra.mxu0 %v7949_v11  ;;  %6930 = vmatpush3.msra.mxu1 %v7949_v11 }
  0x46   : > { %6900 = vmatprep.subr.mxu0 %v7956_v12  ;;  %6931 = vmatprep.subr.mxu1 %v7956_v12 }
  0x47   : > { %6901 = vmatpush3.msra.mxu0 %v7956_v12  ;;  %6932 = vmatpush3.msra.mxu1 %v7956_v12 }
  0x48   : > { %6902 = vmatprep.subr.mxu0 %v7968_v13  ;;  %6933 = vmatprep.subr.mxu1 %v7968_v13 }
  0x49   : > { %6903 = vmatpush3.msra.mxu0 %v7968_v13  ;;  %6904 = vmatprep.mubr.msk.f32.mxu0 %vm716_vm1, %v6208_v18  ;;  %v6274_v18 = vld [vmem:[%s7961_s17 + $0xf8] sm:$0x1f] }
  0x4a   : > { %6934 = vmatpush3.msra.mxu1 %v7968_v13  ;;  %6935 = vmatprep.mubr.msk.f32.mxu1 %vm716_vm1, %v6213_v19 }
  0x4b   : > { %6905 = vmatmul.mubr.msk.f32.vlgmr.msra.gmra.mxu0 %vm716_vm1, %v6209_v20  ;;  %6936 = vmatmul.mubr.msk.f32.vlgmr.msra.gmra.mxu1 %vm716_vm1, %v6214_v21 }
  0x4c   : > { %6938 = vmatprep.subr.msk.mxu0 %vm723_vm0, %v7871_v0  ;;  %6969 = vmatprep.subr.msk.mxu1 %vm723_vm0, %v7871_v0 }
  0x4d   : > { %6939 = vmatpush3.msk.msra.mxu0 %vm723_vm0, %v7871_v0  ;;  %6970 = vmatpush3.msk.msra.mxu1 %vm723_vm0, %v7871_v0 }
  0x4e   : > { %6940 = vmatprep.subr.mxu0 %v7874_v1  ;;  %6971 = vmatprep.subr.mxu1 %v7874_v1 }
  0x4f   : > { %6941 = vmatpush3.msra.mxu0 %v7874_v1  ;;  %6972 = vmatpush3.msra.mxu1 %v7874_v1 }
  0x50   : > { %6942 = vmatprep.subr.mxu0 %v7885_v2  ;;  %6973 = vmatprep.subr.mxu1 %v7885_v2 }
  0x51   : > { %6943 = vmatpush3.msra.mxu0 %v7885_v2  ;;  %6974 = vmatpush3.msra.mxu1 %v7885_v2 }
  0x52   : > { %6944 = vmatprep.subr.mxu0 %v7892_v3  ;;  %6975 = vmatprep.subr.mxu1 %v7892_v3 }
  0x53   : > { %6945 = vmatpush3.msra.mxu0 %v7892_v3  ;;  %6976 = vmatpush3.msra.mxu1 %v7892_v3 }
  0x54   : > { %6946 = vmatprep.subr.mxu0 %v7899_v4  ;;  %6977 = vmatprep.subr.mxu1 %v7899_v4 }
  0x55   : > { %6947 = vmatpush3.msra.mxu0 %v7899_v4  ;;  %6978 = vmatpush3.msra.mxu1 %v7899_v4 }
  0x56   : > { %6948 = vmatprep.subr.mxu0 %v7906_v5  ;;  %6979 = vmatprep.subr.mxu1 %v7906_v5 }
  0x57   : > { %6949 = vmatpush3.msra.mxu0 %v7906_v5  ;;  %6980 = vmatpush3.msra.mxu1 %v7906_v5 }
  0x58   : > { %6950 = vmatprep.subr.mxu0 %v7913_v6  ;;  %6981 = vmatprep.subr.mxu1 %v7913_v6 }
  0x59   : > { %6951 = vmatpush3.msra.mxu0 %v7913_v6  ;;  %6982 = vmatpush3.msra.mxu1 %v7913_v6 }
  0x5a   : > { %6952 = vmatprep.subr.mxu0 %v7920_v7  ;;  %6983 = vmatprep.subr.mxu1 %v7920_v7 }
  0x5b   : > { %6953 = vmatpush3.msra.mxu0 %v7920_v7  ;;  %6984 = vmatpush3.msra.mxu1 %v7920_v7 }
  0x5c   : > { %6954 = vmatprep.subr.mxu0 %v7927_v8  ;;  %6985 = vmatprep.subr.mxu1 %v7927_v8 }
  0x5d   : > { %6955 = vmatpush3.msra.mxu0 %v7927_v8  ;;  %6986 = vmatpush3.msra.mxu1 %v7927_v8 }
  0x5e   : > { %6956 = vmatprep.subr.mxu0 %v7934_v9  ;;  %6987 = vmatprep.subr.mxu1 %v7934_v9 }
  0x5f   : > { %6957 = vmatpush3.msra.mxu0 %v7934_v9  ;;  %6988 = vmatpush3.msra.mxu1 %v7934_v9 }
  0x60   : > { %6958 = vmatprep.subr.mxu0 %v7941_v10  ;;  %6989 = vmatprep.subr.mxu1 %v7941_v10 }
  0x61   : > { %6959 = vmatpush3.msra.mxu0 %v7941_v10  ;;  %6990 = vmatpush3.msra.mxu1 %v7941_v10 }
  0x62   : > { %6960 = vmatprep.subr.mxu0 %v7949_v11  ;;  %6991 = vmatprep.subr.mxu1 %v7949_v11 }
  0x63   : > { %6961 = vmatpush3.msra.mxu0 %v7949_v11  ;;  %6992 = vmatpush3.msra.mxu1 %v7949_v11 }
  0x64   : > { %6962 = vmatprep.subr.mxu0 %v7956_v12  ;;  %6993 = vmatprep.subr.mxu1 %v7956_v12 }
  0x65   : > { %6963 = vmatpush3.msra.mxu0 %v7956_v12  ;;  %6994 = vmatpush3.msra.mxu1 %v7956_v12 }
  0x66   : > { %6964 = vmatprep.subr.mxu0 %v7968_v13  ;;  %6995 = vmatprep.subr.mxu1 %v7968_v13 }
  0x67   : > { %6965 = vmatpush3.msra.mxu0 %v7968_v13  ;;  %6966 = vmatprep.mubr.msk.f32.mxu0 %vm716_vm1, %v6218_v22 }
  0x68   : > { %6996 = vmatpush3.msra.mxu1 %v7968_v13  ;;  %6997 = vmatprep.mubr.msk.f32.mxu1 %vm716_vm1, %v6223_v23 }
  0x69   : > { %6967 = vmatmul.mubr.msk.f32.vlgmr.msra.gmra.mxu0 %vm716_vm1, %v6219_v24  ;;  %6998 = vmatmul.mubr.msk.f32.vlgmr.msra.gmra.mxu1 %vm716_vm1, %v6224_v25 }
  0x6a   : > { %7000 = vmatprep.subr.msk.mxu0 %vm723_vm0, %v7871_v0  ;;  %7031 = vmatprep.subr.msk.mxu1 %vm723_vm0, %v7871_v0 }
  0x6b   : > { %7001 = vmatpush3.msk.msra.mxu0 %vm723_vm0, %v7871_v0  ;;  %7032 = vmatpush3.msk.msra.mxu1 %vm723_vm0, %v7871_v0 }
  0x6c   : > { %7002 = vmatprep.subr.mxu0 %v7874_v1  ;;  %7033 = vmatprep.subr.mxu1 %v7874_v1 }
  0x6d   : > { %7003 = vmatpush3.msra.mxu0 %v7874_v1  ;;  %7034 = vmatpush3.msra.mxu1 %v7874_v1 }
  0x6e   : > { %7004 = vmatprep.subr.mxu0 %v7885_v2  ;;  %7035 = vmatprep.subr.mxu1 %v7885_v2 }
  0x6f   : > { %7005 = vmatpush3.msra.mxu0 %v7885_v2  ;;  %7036 = vmatpush3.msra.mxu1 %v7885_v2 }
  0x70   : > { %7006 = vmatprep.subr.mxu0 %v7892_v3  ;;  %7037 = vmatprep.subr.mxu1 %v7892_v3 }
  0x71   : > { %7007 = vmatpush3.msra.mxu0 %v7892_v3  ;;  %7038 = vmatpush3.msra.mxu1 %v7892_v3 }
  0x72   : > { %7008 = vmatprep.subr.mxu0 %v7899_v4  ;;  %7039 = vmatprep.subr.mxu1 %v7899_v4 }
  0x73   : > { %7009 = vmatpush3.msra.mxu0 %v7899_v4  ;;  %7040 = vmatpush3.msra.mxu1 %v7899_v4 }
  0x74   : > { %7010 = vmatprep.subr.mxu0 %v7906_v5  ;;  %7041 = vmatprep.subr.mxu1 %v7906_v5 }
  0x75   : > { %7011 = vmatpush3.msra.mxu0 %v7906_v5  ;;  %7042 = vmatpush3.msra.mxu1 %v7906_v5 }
  0x76   : > { %7012 = vmatprep.subr.mxu0 %v7913_v6  ;;  %7043 = vmatprep.subr.mxu1 %v7913_v6 }
  0x77   : > { %7013 = vmatpush3.msra.mxu0 %v7913_v6  ;;  %7044 = vmatpush3.msra.mxu1 %v7913_v6 }
  0x78   : > { %7014 = vmatprep.subr.mxu0 %v7920_v7  ;;  %7045 = vmatprep.subr.mxu1 %v7920_v7 }
  0x79   : > { %7015 = vmatpush3.msra.mxu0 %v7920_v7  ;;  %7046 = vmatpush3.msra.mxu1 %v7920_v7 }
  0x7a   : > { %7016 = vmatprep.subr.mxu0 %v7927_v8  ;;  %7047 = vmatprep.subr.mxu1 %v7927_v8 }
  0x7b   : > { %7017 = vmatpush3.msra.mxu0 %v7927_v8  ;;  %7048 = vmatpush3.msra.mxu1 %v7927_v8 }
  0x7c   : > { %7018 = vmatprep.subr.mxu0 %v7934_v9  ;;  %7049 = vmatprep.subr.mxu1 %v7934_v9 }
  0x7d   : > { %7019 = vmatpush3.msra.mxu0 %v7934_v9  ;;  %7050 = vmatpush3.msra.mxu1 %v7934_v9 }
  0x7e   : > { %7020 = vmatprep.subr.mxu0 %v7941_v10  ;;  %7051 = vmatprep.subr.mxu1 %v7941_v10 }
  0x7f   : > { %7021 = vmatpush3.msra.mxu0 %v7941_v10  ;;  %7052 = vmatpush3.msra.mxu1 %v7941_v10 }
  0x80   : > { %7022 = vmatprep.subr.mxu0 %v7949_v11  ;;  %7053 = vmatprep.subr.mxu1 %v7949_v11 }
  0x81   : > { %7023 = vmatpush3.msra.mxu0 %v7949_v11  ;;  %7054 = vmatpush3.msra.mxu1 %v7949_v11 }
  0x82   : > { %7024 = vmatprep.subr.mxu0 %v7956_v12  ;;  %7055 = vmatprep.subr.mxu1 %v7956_v12 }
  0x83   : > { %7025 = vmatpush3.msra.mxu0 %v7956_v12  ;;  %7056 = vmatpush3.msra.mxu1 %v7956_v12 }
  0x84   : > { %7026 = vmatprep.subr.mxu0 %v7968_v13  ;;  %7057 = vmatprep.subr.mxu1 %v7968_v13 }
  0x85   : > { %7027 = vmatpush3.msra.mxu0 %v7968_v13  ;;  %7028 = vmatprep.mubr.msk.f32.mxu0 %vm716_vm1, %v6228_v27 }
  0x86   : > { %7058 = vmatpush3.msra.mxu1 %v7968_v13  ;;  %7059 = vmatprep.mubr.msk.f32.mxu1 %vm716_vm1, %v6233_v28 }
  0x87   : > { %7029 = vmatmul.mubr.msk.f32.vlgmr.msra.gmra.mxu0 %vm716_vm1, %v6229_v29  ;;  %7060 = vmatmul.mubr.msk.f32.vlgmr.msra.gmra.mxu1 %vm716_vm1, %v6234_v30 }
  0x88   : > { %7062 = vmatprep.subr.msk.mxu0 %vm723_vm0, %v7871_v0  ;;  %7093 = vmatprep.subr.msk.mxu1 %vm723_vm0, %v7871_v0 }
  0x89   : > { %7063 = vmatpush3.msk.msra.mxu0 %vm723_vm0, %v7871_v0  ;;  %7094 = vmatpush3.msk.msra.mxu1 %vm723_vm0, %v7871_v0 }
  0x8a   : > { %7064 = vmatprep.subr.mxu0 %v7874_v1  ;;  %7095 = vmatprep.subr.mxu1 %v7874_v1 }
  0x8b   : > { %7065 = vmatpush3.msra.mxu0 %v7874_v1  ;;  %7096 = vmatpush3.msra.mxu1 %v7874_v1 }
  0x8c   : > { %7066 = vmatprep.subr.mxu0 %v7885_v2  ;;  %7097 = vmatprep.subr.mxu1 %v7885_v2 }
  0x8d   : > { %7067 = vmatpush3.msra.mxu0 %v7885_v2  ;;  %7098 = vmatpush3.msra.mxu1 %v7885_v2 }
  0x8e   : > { %7068 = vmatprep.subr.mxu0 %v7892_v3  ;;  %7099 = vmatprep.subr.mxu1 %v7892_v3 }
  0x8f   : > { %7069 = vmatpush3.msra.mxu0 %v7892_v3  ;;  %7100 = vmatpush3.msra.mxu1 %v7892_v3 }
  0x90   : > { %7070 = vmatprep.subr.mxu0 %v7899_v4  ;;  %7101 = vmatprep.subr.mxu1 %v7899_v4 }
  0x91   : > { %7071 = vmatpush3.msra.mxu0 %v7899_v4  ;;  %7102 = vmatpush3.msra.mxu1 %v7899_v4 }
  0x92   : > { %7072 = vmatprep.subr.mxu0 %v7906_v5  ;;  %7103 = vmatprep.subr.mxu1 %v7906_v5 }
  0x93   : > { %7073 = vmatpush3.msra.mxu0 %v7906_v5  ;;  %7104 = vmatpush3.msra.mxu1 %v7906_v5 }
  0x94   : > { %7074 = vmatprep.subr.mxu0 %v7913_v6  ;;  %7105 = vmatprep.subr.mxu1 %v7913_v6 }
  0x95   : > { %7075 = vmatpush3.msra.mxu0 %v7913_v6  ;;  %7106 = vmatpush3.msra.mxu1 %v7913_v6 }
  0x96   : > { %7076 = vmatprep.subr.mxu0 %v7920_v7  ;;  %7107 = vmatprep.subr.mxu1 %v7920_v7 }
  0x97   : > { %7077 = vmatpush3.msra.mxu0 %v7920_v7  ;;  %7108 = vmatpush3.msra.mxu1 %v7920_v7 }
  0x98   : > { %7078 = vmatprep.subr.mxu0 %v7927_v8  ;;  %7109 = vmatprep.subr.mxu1 %v7927_v8 }
  0x99   : > { %7079 = vmatpush3.msra.mxu0 %v7927_v8  ;;  %7110 = vmatpush3.msra.mxu1 %v7927_v8 }
  0x9a   : > { %7080 = vmatprep.subr.mxu0 %v7934_v9  ;;  %7111 = vmatprep.subr.mxu1 %v7934_v9 }
  0x9b   : > { %7081 = vmatpush3.msra.mxu0 %v7934_v9  ;;  %7112 = vmatpush3.msra.mxu1 %v7934_v9 }
  0x9c   : > { %7082 = vmatprep.subr.mxu0 %v7941_v10  ;;  %7113 = vmatprep.subr.mxu1 %v7941_v10 }
  0x9d   : > { %7083 = vmatpush3.msra.mxu0 %v7941_v10  ;;  %7114 = vmatpush3.msra.mxu1 %v7941_v10 }
  0x9e   : > { %7084 = vmatprep.subr.mxu0 %v7949_v11  ;;  %7115 = vmatprep.subr.mxu1 %v7949_v11 }
  0x9f   : > { %7085 = vmatpush3.msra.mxu0 %v7949_v11  ;;  %7116 = vmatpush3.msra.mxu1 %v7949_v11 }
  0xa0   : > { %7086 = vmatprep.subr.mxu0 %v7956_v12  ;;  %7117 = vmatprep.subr.mxu1 %v7956_v12 }
  0xa1   : > { %7087 = vmatpush3.msra.mxu0 %v7956_v12  ;;  %7118 = vmatpush3.msra.mxu1 %v7956_v12 }
  0xa2   : > { %7088 = vmatprep.subr.mxu0 %v7968_v13  ;;  %7119 = vmatprep.subr.mxu1 %v7968_v13 }
  0xa3   : > { %7089 = vmatpush3.msra.mxu0 %v7968_v13  ;;  %7090 = vmatprep.mubr.msk.f32.mxu0 %vm716_vm1, %v6238_v31 }
  0xa4   : > { %7120 = vmatpush3.msra.mxu1 %v7968_v13  ;;  %7121 = vmatprep.mubr.msk.f32.mxu1 %vm716_vm1, %v6243_v32 }
  0xa5   : > { %7091 = vmatmul.mubr.msk.f32.vlgmr.msra.gmra.mxu0 %vm716_vm1, %v6239_v33  ;;  %7122 = vmatmul.mubr.msk.f32.vlgmr.msra.gmra.mxu1 %vm716_vm1, %v6244_v34 }
  0xa6   : > { %7124 = vmatprep.subr.msk.mxu0 %vm723_vm0, %v7871_v0  ;;  %7155 = vmatprep.subr.msk.mxu1 %vm723_vm0, %v7871_v0 }
  0xa7   : > { %7125 = vmatpush3.msk.msra.mxu0 %vm723_vm0, %v7871_v0  ;;  %7156 = vmatpush3.msk.msra.mxu1 %vm723_vm0, %v7871_v0 }
  0xa8   : > { %7126 = vmatprep.subr.mxu0 %v7874_v1  ;;  %7157 = vmatprep.subr.mxu1 %v7874_v1 }
  0xa9   : > { %7127 = vmatpush3.msra.mxu0 %v7874_v1  ;;  %7158 = vmatpush3.msra.mxu1 %v7874_v1 }
  0xaa   : > { %7128 = vmatprep.subr.mxu0 %v7885_v2  ;;  %7159 = vmatprep.subr.mxu1 %v7885_v2 }
  0xab   : > { %7129 = vmatpush3.msra.mxu0 %v7885_v2  ;;  %7160 = vmatpush3.msra.mxu1 %v7885_v2 }
  0xac   : > { %7130 = vmatprep.subr.mxu0 %v7892_v3  ;;  %7161 = vmatprep.subr.mxu1 %v7892_v3 }
  0xad   : > { %7131 = vmatpush3.msra.mxu0 %v7892_v3  ;;  %7162 = vmatpush3.msra.mxu1 %v7892_v3 }
  0xae   : > { %7132 = vmatprep.subr.mxu0 %v7899_v4  ;;  %7163 = vmatprep.subr.mxu1 %v7899_v4 }
  0xaf   : > { %7133 = vmatpush3.msra.mxu0 %v7899_v4  ;;  %7164 = vmatpush3.msra.mxu1 %v7899_v4 }
  0xb0   : > { %7134 = vmatprep.subr.mxu0 %v7906_v5  ;;  %7165 = vmatprep.subr.mxu1 %v7906_v5 }
  0xb1   : > { %7135 = vmatpush3.msra.mxu0 %v7906_v5  ;;  %7166 = vmatpush3.msra.mxu1 %v7906_v5 }
  0xb2   : > { %7136 = vmatprep.subr.mxu0 %v7913_v6  ;;  %7167 = vmatprep.subr.mxu1 %v7913_v6 }
  0xb3   : > { %7137 = vmatpush3.msra.mxu0 %v7913_v6  ;;  %7168 = vmatpush3.msra.mxu1 %v7913_v6 }
  0xb4   : > { %7138 = vmatprep.subr.mxu0 %v7920_v7  ;;  %7169 = vmatprep.subr.mxu1 %v7920_v7 }
  0xb5   : > { %7139 = vmatpush3.msra.mxu0 %v7920_v7  ;;  %7170 = vmatpush3.msra.mxu1 %v7920_v7 }
  0xb6   : > { %7140 = vmatprep.subr.mxu0 %v7927_v8  ;;  %7171 = vmatprep.subr.mxu1 %v7927_v8 }
  0xb7   : > { %7141 = vmatpush3.msra.mxu0 %v7927_v8  ;;  %7172 = vmatpush3.msra.mxu1 %v7927_v8 }
  0xb8   : > { %7142 = vmatprep.subr.mxu0 %v7934_v9  ;;  %7173 = vmatprep.subr.mxu1 %v7934_v9 }
  0xb9   : > { %7143 = vmatpush3.msra.mxu0 %v7934_v9  ;;  %7174 = vmatpush3.msra.mxu1 %v7934_v9 }
  0xba   : > { %7144 = vmatprep.subr.mxu0 %v7941_v10  ;;  %7175 = vmatprep.subr.mxu1 %v7941_v10 }
  0xbb   : > { %7145 = vmatpush3.msra.mxu0 %v7941_v10  ;;  %7176 = vmatpush3.msra.mxu1 %v7941_v10 }
  0xbc   : > { %7146 = vmatprep.subr.mxu0 %v7949_v11  ;;  %7177 = vmatprep.subr.mxu1 %v7949_v11 }
  0xbd   : > { %7147 = vmatpush3.msra.mxu0 %v7949_v11  ;;  %7178 = vmatpush3.msra.mxu1 %v7949_v11 }
  0xbe   : > { %7148 = vmatprep.subr.mxu0 %v7956_v12  ;;  %7179 = vmatprep.subr.mxu1 %v7956_v12 }
  0xbf   : > { %7149 = vmatpush3.msra.mxu0 %v7956_v12  ;;  %7180 = vmatpush3.msra.mxu1 %v7956_v12 }
  0xc0   : > { %7150 = vmatprep.subr.mxu0 %v7968_v13  ;;  %7181 = vmatprep.subr.mxu1 %v7968_v13 }
  0xc1   : > { %7151 = vmatpush3.msra.mxu0 %v7968_v13  ;;  %7152 = vmatprep.mubr.msk.f32.mxu0 %vm716_vm1, %v6248_v35 }
  0xc2   : > { %7182 = vmatpush3.msra.mxu1 %v7968_v13  ;;  %7183 = vmatprep.mubr.msk.f32.mxu1 %vm716_vm1, %v6253_v36 }
  0xc3   : > { %7153 = vmatmul.mubr.msk.f32.vlgmr.msra.gmra.mxu0 %vm716_vm1, %v6249_v37  ;;  %7184 = vmatmul.mubr.msk.f32.vlgmr.msra.gmra.mxu1 %vm716_vm1, %v6254_v38 }
  0xc4   : > { %7186 = vmatprep.subr.msk.mxu0 %vm723_vm0, %v7871_v0  ;;  %7217 = vmatprep.subr.msk.mxu1 %vm723_vm0, %v7871_v0 }
  0xc5   : > { %7187 = vmatpush3.msk.msra.mxu0 %vm723_vm0, %v7871_v0  ;;  %7218 = vmatpush3.msk.msra.mxu1 %vm723_vm0, %v7871_v0 }
  0xc6   : > { %7188 = vmatprep.subr.mxu0 %v7874_v1  ;;  %7219 = vmatprep.subr.mxu1 %v7874_v1 }
  0xc7   : > { %7189 = vmatpush3.msra.mxu0 %v7874_v1  ;;  %7220 = vmatpush3.msra.mxu1 %v7874_v1 }
  0xc8   : > { %7190 = vmatprep.subr.mxu0 %v7885_v2  ;;  %7221 = vmatprep.subr.mxu1 %v7885_v2 }
  0xc9   : > { %7191 = vmatpush3.msra.mxu0 %v7885_v2  ;;  %7222 = vmatpush3.msra.mxu1 %v7885_v2 }
  0xca   : > { %7192 = vmatprep.subr.mxu0 %v7892_v3  ;;  %7223 = vmatprep.subr.mxu1 %v7892_v3 }
  0xcb   : > { %7193 = vmatpush3.msra.mxu0 %v7892_v3  ;;  %7224 = vmatpush3.msra.mxu1 %v7892_v3 }
  0xcc   : > { %7194 = vmatprep.subr.mxu0 %v7899_v4  ;;  %7225 = vmatprep.subr.mxu1 %v7899_v4 }
  0xcd   : > { %7195 = vmatpush3.msra.mxu0 %v7899_v4  ;;  %7226 = vmatpush3.msra.mxu1 %v7899_v4  ;;  %v8600_v4 = vld [vmem:[%s7868_s30 + $0x20] sm:$0xff] }
  0xce   : > { %7196 = vmatprep.subr.mxu0 %v7906_v5  ;;  %7227 = vmatprep.subr.mxu1 %v7906_v5 }
  0xcf   : > { %7197 = vmatpush3.msra.mxu0 %v7906_v5  ;;  %7228 = vmatpush3.msra.mxu1 %v7906_v5 }
  0xd0   : > { %7198 = vmatprep.subr.mxu0 %v7913_v6  ;;  %7229 = vmatprep.subr.mxu1 %v7913_v6 }
  0xd1   : > { %7199 = vmatpush3.msra.mxu0 %v7913_v6  ;;  %7230 = vmatpush3.msra.mxu1 %v7913_v6 }
  0xd2   : > { %7200 = vmatprep.subr.mxu0 %v7920_v7  ;;  %7231 = vmatprep.subr.mxu1 %v7920_v7 }
  0xd3   : > { %7201 = vmatpush3.msra.mxu0 %v7920_v7  ;;  %7232 = vmatpush3.msra.mxu1 %v7920_v7  ;;  %v8609_v7 = vld [vmem:[%s7868_s30 + $0x18] sm:$0xff] }
  0xd4   : > { %7202 = vmatprep.subr.mxu0 %v7927_v8  ;;  %7233 = vmatprep.subr.mxu1 %v7927_v8 }
  0xd5   : > { %7203 = vmatpush3.msra.mxu0 %v7927_v8  ;;  %7234 = vmatpush3.msra.mxu1 %v7927_v8  ;;  %v8618_v8 = vld [vmem:[%s7868_s30 + $0x10] sm:$0xff] }
  0xd6   : > { %7204 = vmatprep.subr.mxu0 %v7934_v9  ;;  %7235 = vmatprep.subr.mxu1 %v7934_v9 }
  0xd7   : > { %7205 = vmatpush3.msra.mxu0 %v7934_v9  ;;  %7236 = vmatpush3.msra.mxu1 %v7934_v9  ;;  %v8625_v9 = vld [vmem:[%s7868_s30 + $0x8] sm:$0xff] }
  0xd8   : > { %7206 = vmatprep.subr.mxu0 %v7941_v10  ;;  %7237 = vmatprep.subr.mxu1 %v7941_v10 }
  0xd9   : > { %7207 = vmatpush3.msra.mxu0 %v7941_v10  ;;  %7238 = vmatpush3.msra.mxu1 %v7941_v10  ;;  %v6268_v10 = vld [vmem:[%s7961_s17 + $0xe0] sm:$0xff] }
  0xda   : > { %7208 = vmatprep.subr.mxu0 %v7949_v11  ;;  %7239 = vmatprep.subr.mxu1 %v7949_v11 }
  0xdb   : > { %7209 = vmatpush3.msra.mxu0 %v7949_v11  ;;  %7240 = vmatpush3.msra.mxu1 %v7949_v11 }
  0xdc   : > { %7210 = vmatprep.subr.mxu0 %v7956_v12  ;;  %7241 = vmatprep.subr.mxu1 %v7956_v12 }
  0xdd   : > { %7211 = vmatpush3.msra.mxu0 %v7956_v12  ;;  %7242 = vmatpush3.msra.mxu1 %v7956_v12 }
  0xde   : > { %7212 = vmatprep.subr.mxu0 %v7968_v13  ;;  %7243 = vmatprep.subr.mxu1 %v7968_v13 }
  0xdf   : > { %7213 = vmatpush3.msra.mxu0 %v7968_v13  ;;  %7214 = vmatprep.mubr.msk.f32.mxu0 %vm716_vm1, %v6258_v39 }
  0xe0   : > { %7244 = vmatpush3.msra.mxu1 %v7968_v13  ;;  %7215 = vmatmul.mubr.msk.f32.vlgmr.msra.gmra.mxu0 %vm716_vm1, %v6259_v40  ;;  %v6269_v13 = vld [vmem:[%s7961_s17 + $0xe8] sm:$0x1f] }
  0xe1   : > { %7245 = vmatprep.mubr.msk.f32.mxu1 %vm716_vm1, %v6263_v41  ;;  %7248 = vmatprep.subr.msk.mxu0 %vm723_vm0, %v8506_v43 }
  0xe2   : > { %7279 = vmatprep.subr.msk.mxu1 %vm723_vm0, %v8506_v43  ;;  %7246 = vmatmul.mubr.msk.f32.vlgmr.msra.gmra.mxu1 %vm716_vm1, %v6264_v42 }
  0xe3   : > { %7249 = vmatpush3.msk.msra.mxu0 %vm723_vm0, %v8506_v43  ;;  %7280 = vmatpush3.msk.msra.mxu1 %vm723_vm0, %v8506_v43 }
  0xe4   : > { %7250 = vmatprep.subr.mxu0 %v8518_v44  ;;  %7281 = vmatprep.subr.mxu1 %v8518_v44 }
  0xe5   : > { %7251 = vmatpush3.msra.mxu0 %v8518_v44  ;;  %7282 = vmatpush3.msra.mxu1 %v8518_v44 }
  0xe6   : > { %7252 = vmatprep.subr.mxu0 %v8525_v45  ;;  %7283 = vmatprep.subr.mxu1 %v8525_v45 }
  0xe7   : > { %7253 = vmatpush3.msra.mxu0 %v8525_v45  ;;  %7284 = vmatpush3.msra.mxu1 %v8525_v45 }
  0xe8   : > { %7254 = vmatprep.subr.mxu0 %v8532_v46  ;;  %7285 = vmatprep.subr.mxu1 %v8532_v46 }
  0xe9   : > { %7255 = vmatpush3.msra.mxu0 %v8532_v46  ;;  %7286 = vmatpush3.msra.mxu1 %v8532_v46 }
  0xea   : > { %7256 = vmatprep.subr.mxu0 %v8545_v47  ;;  %7287 = vmatprep.subr.mxu1 %v8545_v47 }
  0xeb   : > { %7257 = vmatpush3.msra.mxu0 %v8545_v47  ;;  %7288 = vmatpush3.msra.mxu1 %v8545_v47 }
  0xec   : > { %7258 = vmatprep.subr.mxu0 %v8561_v49  ;;  %7289 = vmatprep.subr.mxu1 %v8561_v49 }
  0xed   : > { %7259 = vmatpush3.msra.mxu0 %v8561_v49  ;;  %7290 = vmatpush3.msra.mxu1 %v8561_v49  ;;  %v6844_v51 = vpop.f32.mrf.mxu0  ;;  %v6875_v52 = vpop.f32.mrf.mxu1 }
  0xee   : > { %7260 = vmatprep.subr.mxu0 %v8571_v53  ;;  %7291 = vmatprep.subr.mxu1 %v8571_v53  ;;  %v809_v54 = vmul.f32 %v6844_v51, %v8558_v48  ;;  %v908_v55 = vmul.f32 %v6875_v52, %v8558_v48 }
  0xef   : > { %7261 = vmatpush3.msra.mxu0 %v8571_v53  ;;  %7292 = vmatpush3.msra.mxu1 %v8571_v53  ;;  %v793_v56 = vpop.f32.mrf.mxu0  ;;  %v898_v57 = vpop.f32.mrf.mxu1 }
  0xf0   : > { %7262 = vmatprep.subr.mxu0 %v8580_v58  ;;  %7293 = vmatprep.subr.mxu1 %v8580_v58  ;;  %v817_v59 = vadd.f32 %v8568_v50, %v809_v54  ;;  %v910_v60 = vadd.f32 %v8568_v50, %v908_v55  ;;  %v808_v61 = vmul.f32 %v8558_v48, %v793_v56 }
  0xf1   : > { %7263 = vmatpush3.msra.mxu0 %v8580_v58  ;;  %7294 = vmatpush3.msra.mxu1 %v8580_v58  ;;  %v907_v62 = vmul.f32 %v8558_v48, %v898_v57 }
  0xf2   : > { %7264 = vmatprep.subr.mxu0 %v8591_v63  ;;  %7295 = vmatprep.subr.mxu1 %v8591_v63  ;;  %v819_v0 = vmax.f32 %v817_v59, 0.0  ;;  %v912_v1 = vmax.f32 %v910_v60, 0.0  ;;  %v816_v2 = vadd.f32 %v8568_v50, %v808_v61 }
  0xf3   : > { %7265 = vmatpush3.msra.mxu0 %v8591_v63  ;;  %7296 = vmatpush3.msra.mxu1 %v8591_v63  ;;  %v909_v3 = vadd.f32 %v8568_v50, %v907_v62 }
  0xf4   : > { %7266 = vmatprep.subr.mxu0 %v8600_v4  ;;  %7297 = vmatprep.subr.mxu1 %v8600_v4  ;;  %822 = vst.msk [vmem:[#allocation2 + $0x8] sm:$0x1f] %vm821_vm4, %v819_v0  ;;  %915 = vst.msk [vmem:[#allocation2 + $0x18] sm:$0x1f] %vm821_vm4, %v912_v1  ;;  %v818_v5 = vmax.f32 %v816_v2, 0.0 }
  0xf5   : > { %7267 = vmatpush3.msra.mxu0 %v8600_v4  ;;  %7298 = vmatpush3.msra.mxu1 %v8600_v4  ;;  %v911_v6 = vmax.f32 %v909_v3, 0.0 }
  0xf6   : > { %7268 = vmatprep.subr.mxu0 %v8609_v7  ;;  %7299 = vmatprep.subr.mxu1 %v8609_v7  ;;  %820 = vst.msk [vmem:[#allocation2] sm:$0xff] %vm640_vm3, %v818_v5 }
  0xf7   : > { %7269 = vmatpush3.msra.mxu0 %v8609_v7  ;;  %7300 = vmatpush3.msra.mxu1 %v8609_v7  ;;  %914 = vst.msk [vmem:[#allocation2 + $0x10] sm:$0xff] %vm640_vm3, %v911_v6 }
  0xf8   : > { %7270 = vmatprep.subr.mxu0 %v8618_v8  ;;  %7301 = vmatprep.subr.mxu1 %v8618_v8 }
  0xf9   : > { %7271 = vmatpush3.msra.mxu0 %v8618_v8  ;;  %7302 = vmatpush3.msra.mxu1 %v8618_v8 }
  0xfa   : > { %7272 = vmatprep.subr.mxu0 %v8625_v9  ;;  %7303 = vmatprep.subr.mxu1 %v8625_v9 }
  0xfb   : > { %v3149_v11 = vld [vmem:[#allocation2 + $0x8] sm:$0x3f]  ;;  %v3153_v12 = vld [vmem:[#allocation2 + $0x18] sm:$0x3f]  ;;  %7273 = vmatpush3.msra.mxu0 %v8625_v9  ;;  %7304 = vmatpush3.msra.mxu1 %v8625_v9 }
  0xfc   : > { %v3157_v14 = vmax.f32 %v3149_v11, %v3153_v12  ;;  %7274 = vmatprep.subr.mxu0 %v8634_v15  ;;  %7305 = vmatprep.subr.mxu1 %v8634_v15 }
  0xfd   : > { %v3148_v17 = vld [vmem:[#allocation2] sm:$0xff]  ;;  %7275 = vmatpush3.msra.mxu0 %v8634_v15  ;;  %7276 = vmatprep.mubr.msk.f32.mxu0 %vm716_vm1, %v6268_v10 }
  0xfe   : > { %3161 = vst.msk [vmem:[#allocation3 + $0x8] sm:$0x3f] %vm642_vm2, %v3157_v14  ;;  %v3152_v19 = vld [vmem:[#allocation2 + $0x10] sm:$0xff]  ;;  %7306 = vmatpush3.msra.mxu1 %v8634_v15  ;;  %7277 = vmatmul.mubr.msk.f32.vlgmr.msra.gmra.mxu0 %vm716_vm1, %v6269_v13  ;;  %v6278_v10 = vld [vmem:[%s7961_s17 + $0x100] sm:$0xff]  ;;  %v6279_v13 = vld [vmem:[%s7961_s17 + $0x108] sm:$0x1f] }
  0xff   : > { %v3156_v20 = vmax.f32 %v3148_v17, %v3152_v19  ;;  %7307 = vmatprep.mubr.msk.f32.mxu1 %vm716_vm1, %v6273_v16  ;;  %7310 = vmatprep.subr.msk.mxu0 %vm723_vm0, %v8506_v43  ;;  %v6283_v16 = vld [vmem:[%s7961_s17 + $0x110] sm:$0xff] }
 0x100   : > { %7341 = vmatprep.subr.msk.mxu1 %vm723_vm0, %v8506_v43  ;;  %7308 = vmatmul.mubr.msk.f32.vlgmr.msra.gmra.mxu1 %vm716_vm1, %v6274_v18  ;;  %v6284_v18 = vld [vmem:[%s7961_s17 + $0x118] sm:$0x1f] }
 0x101   : > { %3160 = vst.msk [vmem:[#allocation3] sm:$0xff] %vm640_vm3, %v3156_v20  ;;  %7311 = vmatpush3.msk.msra.mxu0 %vm723_vm0, %v8506_v43  ;;  %7342 = vmatpush3.msk.msra.mxu1 %vm723_vm0, %v8506_v43 }
 0x102   : > { %7312 = vmatprep.subr.mxu0 %v8518_v44  ;;  %7343 = vmatprep.subr.mxu1 %v8518_v44 }
 0x103   : > { %7313 = vmatpush3.msra.mxu0 %v8518_v44  ;;  %7344 = vmatpush3.msra.mxu1 %v8518_v44 }
 0x104   : > { %7314 = vmatprep.subr.mxu0 %v8525_v45  ;;  %7345 = vmatprep.subr.mxu1 %v8525_v45 }
 0x105   : > { %7315 = vmatpush3.msra.mxu0 %v8525_v45  ;;  %7346 = vmatpush3.msra.mxu1 %v8525_v45  ;;  %v3492_v21 = vld [vmem:[#allocation3 + $0x8] sm:$0x1]  ;;  %v3506_v22 = vld [vmem:[#allocation3 + $0x9] sm:$0x1]  ;;  %v3548_v23 = vld [vmem:[#allocation3 + $0xa] sm:$0x1] }
 0x106   : > { %7316 = vmatprep.subr.mxu0 %v8532_v46  ;;  %7347 = vmatprep.subr.mxu1 %v8532_v46  ;;  %v3520_v24 = vmax.f32 %v3492_v21, %v3506_v22  ;;  %v3562_v25 = vld [vmem:[#allocation3 + $0xb] sm:$0x1]  ;;  %v3604_v26 = vld [vmem:[#allocation3 + $0xc] sm:$0x1]  ;;  %v3618_v27 = vld [vmem:[#allocation3 + $0xd] sm:$0x1] }
 0x107   : > { %7317 = vmatpush3.msra.mxu0 %v8532_v46  ;;  %7348 = vmatpush3.msra.mxu1 %v8532_v46  ;;  %v3576_v28 = vmax.f32 %v3548_v23, %v3562_v25  ;;  %v3632_v29 = vmax.f32 %v3604_v26, %v3618_v27 }
 0x108   : > { %7318 = vmatprep.subr.mxu0 %v8545_v47  ;;  %7349 = vmatprep.subr.mxu1 %v8545_v47  ;;  %v3324_v30 = vld [vmem:[#allocation3 + $0x2] sm:$0x1]  ;;  %v3338_v31 = vld [vmem:[#allocation3 + $0x3] sm:$0x1]  ;;  %v3380_v32 = vld [vmem:[#allocation3 + $0x4] sm:$0x1] }
 0x109   : > { %3534 = vst.msk [vmem:[#allocation4 + $0x4] sm:$0x1] %vm3309_vm5, %v3520_v24  ;;  %7319 = vmatpush3.msra.mxu0 %v8545_v47  ;;  %7350 = vmatpush3.msra.mxu1 %v8545_v47  ;;  %v3352_v33 = vmax.f32 %v3324_v30, %v3338_v31  ;;  %v3394_v34 = vld [vmem:[#allocation3 + $0x5] sm:$0x1]  ;;  %v3436_v35 = vld [vmem:[#allocation3 + $0x6] sm:$0x1] }
 0x10a   : > { %v3450_v36 = vld [vmem:[#allocation3 + $0x7] sm:$0x1]  ;;  %3590 = vst.msk [vmem:[#allocation4 + $0x5] sm:$0x1] %vm3309_vm5, %v3576_v28  ;;  %3646 = vst.msk [vmem:[#allocation4 + $0x6] sm:$0x1] %vm3309_vm5, %v3632_v29  ;;  %7320 = vmatprep.subr.mxu0 %v8561_v49  ;;  %7351 = vmatprep.subr.mxu1 %v8561_v49  ;;  %v3408_v37 = vmax.f32 %v3380_v32, %v3394_v34 }
 0x10b   : > { %v3464_v38 = vmax.f32 %v3436_v35, %v3450_v36  ;;  %v3267_v39 = vld [vmem:[#allocation3] sm:$0x1]  ;;  %v3281_v40 = vld [vmem:[#allocation3 + $0x1] sm:$0x1]  ;;  %7321 = vmatpush3.msra.mxu0 %v8561_v49  ;;  %7352 = vmatpush3.msra.mxu1 %v8561_v49  ;;  %v6906_v41 = vpop.f32.mrf.mxu0  ;;  %v6937_v42 = vpop.f32.mrf.mxu1  ;;  %3366 = vst.msk [vmem:[#allocation4 + $0x1] sm:$0x1] %vm3309_vm5, %v3352_v33 }
 0x10c   : > { %v3295_v51 = vmax.f32 %v3267_v39, %v3281_v40  ;;  %7322 = vmatprep.subr.mxu0 %v8571_v53  ;;  %7353 = vmatprep.subr.mxu1 %v8571_v53  ;;  %v1001_v52 = vmul.f32 %v6906_v41, %v8558_v48  ;;  %v1094_v54 = vmul.f32 %v6937_v42, %v8558_v48 }
 0x10d   : > { %3422 = vst.msk [vmem:[#allocation4 + $0x2] sm:$0x1] %vm3309_vm5, %v3408_v37  ;;  %3478 = vst.msk [vmem:[#allocation4 + $0x3] sm:$0x1] %vm3309_vm5, %v3464_v38  ;;  %7323 = vmatpush3.msra.mxu0 %v8571_v53  ;;  %7354 = vmatpush3.msra.mxu1 %v8571_v53  ;;  %v991_v55 = vpop.f32.mrf.mxu0  ;;  %v1084_v56 = vpop.f32.mrf.mxu1 }
 0x10e   : > { %3310 = vst.msk [vmem:[#allocation4] sm:$0x1] %vm3309_vm5, %v3295_v51  ;;  %7324 = vmatprep.subr.mxu0 %v8580_v58  ;;  %7355 = vmatprep.subr.mxu1 %v8580_v58  ;;  %v1003_v57 = vadd.f32 %v8568_v50, %v1001_v52  ;;  %v1096_v59 = vadd.f32 %v8568_v50, %v1094_v54 }
 0x10f   : > { %v1000_v60 = vmul.f32 %v8558_v48, %v991_v55  ;;  %7325 = vmatpush3.msra.mxu0 %v8580_v58  ;;  %7356 = vmatpush3.msra.mxu1 %v8580_v58  ;;  %v1093_v61 = vmul.f32 %v8558_v48, %v1084_v56 }
 0x110   : > { %7326 = vmatprep.subr.mxu0 %v8591_v63  ;;  %7357 = vmatprep.subr.mxu1 %v8591_v63  ;;  %v1005_v62 = vmax.f32 %v1003_v57, 0.0  ;;  %v1098_v0 = vmax.f32 %v1096_v59, 0.0 }
 0x111   : > { %v1002_v1 = vadd.f32 %v8568_v50, %v1000_v60  ;;  %7327 = vmatpush3.msra.mxu0 %v8591_v63  ;;  %7358 = vmatpush3.msra.mxu1 %v8591_v63  ;;  %v1095_v2 = vadd.f32 %v8568_v50, %v1093_v61 }
 0x112   : > { %7328 = vmatprep.subr.mxu0 %v8600_v4  ;;  %7359 = vmatprep.subr.mxu1 %v8600_v4  ;;  %1008 = vst.msk [vmem:[#allocation2 + $0x28] sm:$0x1f] %vm821_vm4, %v1005_v62  ;;  %1101 = vst.msk [vmem:[#allocation2 + $0x38] sm:$0x1f] %vm821_vm4, %v1098_v0 }
 0x113   : > { %v1004_v3 = vmax.f32 %v1002_v1, 0.0  ;;  %7329 = vmatpush3.msra.mxu0 %v8600_v4  ;;  %7360 = vmatpush3.msra.mxu1 %v8600_v4  ;;  %v1097_v5 = vmax.f32 %v1095_v2, 0.0 }
 0x114   : > { %7330 = vmatprep.subr.mxu0 %v8609_v7  ;;  %7361 = vmatprep.subr.mxu1 %v8609_v7  ;;  %v3680_v21 = vld [vmem:[#allocation4 + $0x1] sm:$0x1f] }
 0x115   : > { %1007 = vst.msk [vmem:[#allocation2 + $0x20] sm:$0xff] %vm640_vm3, %v1004_v3  ;;  %v3660_v6 = vld [vmem:[#allocation4] sm:$0x1f]  ;;  %7331 = vmatpush3.msra.mxu0 %v8609_v7  ;;  %7362 = vmatpush3.msra.mxu1 %v8609_v7  ;;  %1100 = vst.msk [vmem:[#allocation2 + $0x30] sm:$0xff] %vm640_vm3, %v1097_v5 }
 0x116   : > { %3670 = vst.msk [vmem:[#allocation5] sm:$0x1f] %vm821_vm4, %v3660_v6  ;;  %7332 = vmatprep.subr.mxu0 %v8618_v8  ;;  %7363 = vmatprep.subr.mxu1 %v8618_v8  ;;  %v3741_v29 = vld [vmem:[#allocation4 + $0x2] sm:$0x1f] }
 0x117   : > { %7333 = vmatpush3.msra.mxu0 %v8618_v8  ;;  %7364 = vmatpush3.msra.mxu1 %v8618_v8 }
 0x118   : > { %7334 = vmatprep.subr.mxu0 %v8625_v9  ;;  %7365 = vmatprep.subr.mxu1 %v8625_v9 }
 0x119   : > { %v3165_v11 = vld [vmem:[#allocation2 + $0x28] sm:$0x3f]  ;;  %v3169_v12 = vld [vmem:[#allocation2 + $0x38] sm:$0x3f]  ;;  %7335 = vmatpush3.msra.mxu0 %v8625_v9  ;;  %7366 = vmatpush3.msra.mxu1 %v8625_v9 }
 0x11a   : > { %v3173_v14 = vmax.f32 %v3165_v11, %v3169_v12  ;;  %7336 = vmatprep.subr.mxu0 %v8634_v15  ;;  %7367 = vmatprep.subr.mxu1 %v8634_v15 }
 0x11b   : > { %7337 = vmatpush3.msra.mxu0 %v8634_v15  ;;  %7338 = vmatprep.mubr.msk.f32.mxu0 %vm716_vm1, %v6278_v10 }
 0x11c   : > { %v3164_v17 = vld [vmem:[#allocation2 + $0x20] sm:$0xff]  ;;  %3178 = vst.msk [vmem:[#allocation3 + $0x18] sm:$0x3f] %vm642_vm2, %v3173_v14  ;;  %v3168_v19 = vld [vmem:[#allocation2 + $0x30] sm:$0xff]  ;;  %7368 = vmatpush3.msra.mxu1 %v8634_v15  ;;  %7339 = vmatmul.mubr.msk.f32.vlgmr.msra.gmra.mxu0 %vm716_vm1, %v6279_v13 }
 0x11d   : > { %v3172_v20 = vmax.f32 %v3164_v17, %v3168_v19  ;;  %7369 = vmatprep.mubr.msk.f32.mxu1 %vm716_vm1, %v6283_v16  ;;  %7372 = vmatprep.subr.msk.mxu0 %vm723_vm0, %v8506_v43  ;;  %v6288_v14 = vld [vmem:[%s7961_s17 + $0x120] sm:$0xff]  ;;  %v6289_v17 = vld [vmem:[%s7961_s17 + $0x128] sm:$0x1f]  ;;  %v6293_v19 = vld [vmem:[%s7961_s17 + $0x130] sm:$0xff] }
 0x11e   : > { %7403 = vmatprep.subr.msk.mxu1 %vm723_vm0, %v8506_v43  ;;  %7370 = vmatmul.mubr.msk.f32.vlgmr.msra.gmra.mxu1 %vm716_vm1, %v6284_v18 }
 0x11f   : > { %3177 = vst.msk [vmem:[#allocation3 + $0x10] sm:$0xff] %vm640_vm3, %v3172_v20  ;;  %7373 = vmatpush3.msk.msra.mxu0 %vm723_vm0, %v8506_v43  ;;  %7404 = vmatpush3.msk.msra.mxu1 %vm723_vm0, %v8506_v43 }
 0x120   : > { %7374 = vmatprep.subr.mxu0 %v8518_v44  ;;  %7405 = vmatprep.subr.mxu1 %v8518_v44 }
 0x121   : > { %7375 = vmatpush3.msra.mxu0 %v8518_v44  ;;  %7406 = vmatpush3.msra.mxu1 %v8518_v44 }
 0x122   : > { %7376 = vmatprep.subr.mxu0 %v8525_v45  ;;  %7407 = vmatprep.subr.mxu1 %v8525_v45 }
 0x123   : > { %7377 = vmatpush3.msra.mxu0 %v8525_v45  ;;  %7408 = vmatpush3.msra.mxu1 %v8525_v45  ;;  %v3493_v22 = vld [vmem:[#allocation3 + $0x18] sm:$0x1]  ;;  %v3507_v23 = vld [vmem:[#allocation3 + $0x19] sm:$0x1]  ;;  %v3549_v24 = vld [vmem:[#allocation3 + $0x1a] sm:$0x1] }
 0x124   : > { %3700 = vrot.lane.b32.xlu0 %v3680_v21, %s7775_s24  ;;  %7378 = vmatprep.subr.mxu0 %v8532_v46  ;;  %v3521_v25 = vmax.f32 %v3493_v22, %v3507_v23  ;;  %v3563_v26 = vld [vmem:[#allocation3 + $0x1b] sm:$0x1]  ;;  %v3605_v27 = vld [vmem:[#allocation3 + $0x1c] sm:$0x1]  ;;  %v3619_v28 = vld [vmem:[#allocation3 + $0x1d] sm:$0x1] }
 0x125   : > { %7409 = vmatprep.subr.mxu1 %v8532_v46  ;;  %7379 = vmatpush3.msra.mxu0 %v8532_v46  ;;  %v3577_v30 = vmax.f32 %v3549_v24, %v3563_v26  ;;  %v3633_v31 = vmax.f32 %v3605_v27, %v3619_v28  ;;  %v6294_v21 = vld [vmem:[%s7961_s17 + $0x138] sm:$0x1f]  ;;  %v7777_v23 = vmov 0.0  }
 0x126   : > { %7410 = vmatpush3.msra.mxu1 %v8532_v46  ;;  %7380 = vmatprep.subr.mxu0 %v8545_v47  ;;  %v3268_v32 = vld [vmem:[#allocation3 + $0x10] sm:$0x1]  ;;  %v3282_v33 = vld [vmem:[#allocation3 + $0x11] sm:$0x1]  ;;  %v3325_v34 = vld [vmem:[#allocation3 + $0x12] sm:$0x1] }
 0x127   : > { %3535 = vst.msk [vmem:[#allocation4 + $0xc] sm:$0x1] %vm3309_vm5, %v3521_v25  ;;  %7411 = vmatprep.subr.mxu1 %v8545_v47  ;;  %7381 = vmatpush3.msra.mxu0 %v8545_v47  ;;  %v3296_v35 = vmax.f32 %v3268_v32, %v3282_v33  ;;  %v3339_v36 = vld [vmem:[#allocation3 + $0x13] sm:$0x1]  ;;  %v3381_v37 = vld [vmem:[#allocation3 + $0x14] sm:$0x1] }
 0x128   : > { %v3395_v38 = vld [vmem:[#allocation3 + $0x15] sm:$0x1]  ;;  %3591 = vst.msk [vmem:[#allocation4 + $0xd] sm:$0x1] %vm3309_vm5, %v3577_v30  ;;  %3647 = vst.msk [vmem:[#allocation4 + $0xe] sm:$0x1] %vm3309_vm5, %v3633_v31  ;;  %7412 = vmatpush3.msra.mxu1 %v8545_v47  ;;  %3761 = vrot.lane.b32.xlu0 %v3741_v29, %s7776_s27  ;;  %v3353_v39 = vmax.f32 %v3325_v34, %v3339_v36 }
 0x129   : > { %v3409_v40 = vmax.f32 %v3381_v37, %v3395_v38  ;;  %v3437_v41 = vld [vmem:[#allocation3 + $0x16] sm:$0x1]  ;;  %v3451_v42 = vld [vmem:[#allocation3 + $0x17] sm:$0x1]  ;;  %7382 = vmatprep.subr.mxu0 %v8561_v49  ;;  %7413 = vmatprep.subr.mxu1 %v8561_v49  ;;  %v6968_v51 = vpop.f32.mrf.mxu0  ;;  %v6999_v52 = vpop.f32.mrf.mxu1  ;;  %3311 = vst.msk [vmem:[#allocation4 + $0x8] sm:$0x1] %vm3309_vm5, %v3296_v35 }
 0x12a   : > { %v3465_v54 = vmax.f32 %v3437_v41, %v3451_v42  ;;  %7383 = vmatpush3.msra.mxu0 %v8561_v49  ;;  %7414 = vmatpush3.msra.mxu1 %v8561_v49  ;;  %v1187_v55 = vmul.f32 %v6968_v51, %v8558_v48  ;;  %v1280_v56 = vmul.f32 %v6999_v52, %v8558_v48 }
 0x12b   : > { %3367 = vst.msk [vmem:[#allocation4 + $0x9] sm:$0x1] %vm3309_vm5, %v3353_v39  ;;  %3423 = vst.msk [vmem:[#allocation4 + $0xa] sm:$0x1] %vm3309_vm5, %v3409_v40  ;;  %7384 = vmatprep.subr.mxu0 %v8571_v53  ;;  %7415 = vmatprep.subr.mxu1 %v8571_v53  ;;  %v1177_v57 = vpop.f32.mrf.mxu0  ;;  %v1270_v59 = vpop.f32.mrf.mxu1 }
 0x12c   : > { %3479 = vst.msk [vmem:[#allocation4 + $0xb] sm:$0x1] %vm3309_vm5, %v3465_v54  ;;  %7385 = vmatpush3.msra.mxu0 %v8571_v53  ;;  %7416 = vmatpush3.msra.mxu1 %v8571_v53  ;;  %v1189_v60 = vadd.f32 %v8568_v50, %v1187_v55  ;;  %v1282_v61 = vadd.f32 %v8568_v50, %v1280_v56 }
 0x12d   : > { %v1186_v62 = vmul.f32 %v8558_v48, %v1177_v57  ;;  %7386 = vmatprep.subr.mxu0 %v8580_v58  ;;  %7417 = vmatprep.subr.mxu1 %v8580_v58  ;;  %v1279_v0 = vmul.f32 %v8558_v48, %v1270_v59  ;;  %4129 = vst.msk [vmem:[#allocation6] sm:$0x3f] %vm642_vm2, %v7777_v23  ;;  %4130 = vst.msk [vmem:[#allocation6 + $0x8] sm:$0x3f] %vm642_vm2, %v7777_v23 }
 0x12e   : > { %7387 = vmatpush3.msra.mxu0 %v8580_v58  ;;  %7418 = vmatpush3.msra.mxu1 %v8580_v58  ;;  %v1191_v1 = vmax.f32 %v1189_v60, 0.0  ;;  %v1284_v2 = vmax.f32 %v1282_v61, 0.0  ;;  %4131 = vst.msk [vmem:[#allocation6 + $0x10] sm:$0x3f] %vm642_vm2, %v7777_v23  ;;  %4132 = vst.msk [vmem:[#allocation6 + $0x18] sm:$0x3f] %vm642_vm2, %v7777_v23 }
 0x12f   : > { %v1188_v3 = vadd.f32 %v8568_v50, %v1186_v62  ;;  %7388 = vmatprep.subr.mxu0 %v8591_v63  ;;  %7419 = vmatprep.subr.mxu1 %v8591_v63  ;;  %v1281_v5 = vadd.f32 %v8568_v50, %v1279_v0  ;;  %4133 = vst.msk [vmem:[#allocation6 + $0x20] sm:$0x3f] %vm642_vm2, %v7777_v23  ;;  %4134 = vst.msk [vmem:[#allocation6 + $0x28] sm:$0x3f] %vm642_vm2, %v7777_v23 }
 0x130   : > { %7389 = vmatpush3.msra.mxu0 %v8591_v63  ;;  %7420 = vmatpush3.msra.mxu1 %v8591_v63  ;;  %1194 = vst.msk [vmem:[#allocation2 + $0x48] sm:$0x1f] %vm821_vm4, %v1191_v1  ;;  %1287 = vst.msk [vmem:[#allocation2 + $0x58] sm:$0x1f] %vm821_vm4, %v1284_v2 }
 0x131   : > { %v1190_v6 = vmax.f32 %v1188_v3, 0.0  ;;  %7390 = vmatprep.subr.mxu0 %v8600_v4  ;;  %7421 = vmatprep.subr.mxu1 %v8600_v4  ;;  %v1283_v10 = vmax.f32 %v1281_v5, 0.0  ;;  %4135 = vst.msk [vmem:[#allocation6 + $0x30] sm:$0x3f] %vm642_vm2, %v7777_v23  ;;  %4136 = vst.msk [vmem:[#allocation6 + $0x38] sm:$0x3f] %vm642_vm2, %v7777_v23 }
 0x132   : > { %7391 = vmatpush3.msra.mxu0 %v8600_v4  ;;  %7422 = vmatpush3.msra.mxu1 %v8600_v4  ;;  %4137 = vst.msk [vmem:[#allocation6 + $0x40] sm:$0x3f] %vm642_vm2, %v7777_v23  ;;  %4138 = vst.msk [vmem:[#allocation6 + $0x48] sm:$0x3f] %vm642_vm2, %v7777_v23 }
 0x133   : > { %1193 = vst.msk [vmem:[#allocation2 + $0x40] sm:$0xff] %vm640_vm3, %v1190_v6  ;;  %7392 = vmatprep.subr.mxu0 %v8609_v7  ;;  %7423 = vmatprep.subr.mxu1 %v8609_v7  ;;  %1286 = vst.msk [vmem:[#allocation2 + $0x50] sm:$0xff] %vm640_vm3, %v1283_v10  ;;  %v3661_v11 = vld [vmem:[#allocation4 + $0x8] sm:$0x1f] }
 0x134   : > { %7393 = vmatpush3.msra.mxu0 %v8609_v7  ;;  %7424 = vmatpush3.msra.mxu1 %v8609_v7  ;;  %3671 = vst.msk [vmem:[#allocation5 + $0x10] sm:$0x1f] %vm821_vm4, %v3661_v11  ;;  %v3803_v24 = vld [vmem:[#allocation4 + $0x8] sm:$0x1f] }
 0x135   : > { %7394 = vmatprep.subr.mxu0 %v8618_v8  ;;  %7425 = vmatprep.subr.mxu1 %v8618_v8  ;;  %4139 = vst.msk [vmem:[#allocation6 + $0x50] sm:$0x3f] %vm642_vm2, %v7777_v23  ;;  %4140 = vst.msk [vmem:[#allocation6 + $0x58] sm:$0x3f] %vm642_vm2, %v7777_v23  ;;  %v3925_v25 = vld [vmem:[#allocation4 + $0xa] sm:$0x1f] }
 0x136   : > { %7395 = vmatpush3.msra.mxu0 %v8618_v8  ;;  %7426 = vmatpush3.msra.mxu1 %v8618_v8  ;;  %v3681_v55 = vld [vmem:[#allocation4 + $0x9] sm:$0x1f] }
 0x137   : > { %v3182_v12 = vld [vmem:[#allocation2 + $0x48] sm:$0x3f]  ;;  %v3186_v13 = vld [vmem:[#allocation2 + $0x58] sm:$0x3f]  ;;  %7396 = vmatprep.subr.mxu0 %v8625_v9  ;;  %7427 = vmatprep.subr.mxu1 %v8625_v9 }
 0x138   : > { %v3190_v16 = vmax.f32 %v3182_v12, %v3186_v13  ;;  %7397 = vmatpush3.msra.mxu0 %v8625_v9  ;;  %7428 = vmatpush3.msra.mxu1 %v8625_v9  ;;  %v3742_v5 = vld [vmem:[#allocation4 + $0xa] sm:$0x1f] }
 0x139   : > { %7398 = vmatprep.subr.mxu0 %v8634_v15  ;;  %7429 = vmatprep.subr.mxu1 %v8634_v15 }
 0x13a   : > { %v3181_v18 = vld [vmem:[#allocation2 + $0x40] sm:$0xff]  ;;  %3195 = vst.msk [vmem:[#allocation3 + $0x28] sm:$0x3f] %vm642_vm2, %v3190_v16  ;;  %v3185_v20 = vld [vmem:[#allocation2 + $0x50] sm:$0xff]  ;;  %7399 = vmatpush3.msra.mxu0 %v8634_v15  ;;  %7400 = vmatprep.mubr.msk.f32.mxu0 %vm716_vm1, %v6288_v14 }
 0x13b   : > { %v3189_v22 = vmax.f32 %v3181_v18, %v3185_v20  ;;  %7430 = vmatpush3.msra.mxu1 %v8634_v15  ;;  %7401 = vmatmul.mubr.msk.f32.vlgmr.msra.gmra.mxu0 %vm716_vm1, %v6289_v17  ;;  %v6298_v14 = vld [vmem:[%s7961_s17 + $0x140] sm:$0xff]  ;;  %v6299_v17 = vld [vmem:[%s7961_s17 + $0x148] sm:$0x1f]  ;;  %v6303_v18 = vld [vmem:[%s7961_s17 + $0x150] sm:$0xff] }
 0x13c   : > { %7431 = vmatprep.mubr.msk.f32.mxu1 %vm716_vm1, %v6293_v19  ;;  %7434 = vmatprep.subr.msk.mxu0 %vm723_vm0, %v8506_v43 }
 0x13d   : > { %3194 = vst.msk [vmem:[#allocation3 + $0x20] sm:$0xff] %vm640_vm3, %v3189_v22  ;;  %7465 = vmatprep.subr.msk.mxu1 %vm723_vm0, %v8506_v43  ;;  %7432 = vmatmul.mubr.msk.f32.vlgmr.msra.gmra.mxu1 %vm716_vm1, %v6294_v21 }
 0x13e   : > { %7435 = vmatpush3.msk.msra.mxu0 %vm723_vm0, %v8506_v43  ;;  %7466 = vmatpush3.msk.msra.mxu1 %vm723_vm0, %v8506_v43 }
 0x13f   : > { %7436 = vmatprep.subr.mxu0 %v8518_v44  ;;  %7467 = vmatprep.subr.mxu1 %v8518_v44 }
 0x140   : > { %7437 = vmatpush3.msra.mxu0 %v8518_v44  ;;  %7468 = vmatpush3.msra.mxu1 %v8518_v44 }
 0x141   : > { %7438 = vmatprep.subr.mxu0 %v8525_v45  ;;  %7469 = vmatprep.subr.mxu1 %v8525_v45  ;;  %v3494_v26 = vld [vmem:[#allocation3 + $0x28] sm:$0x1]  ;;  %v3508_v27 = vld [vmem:[#allocation3 + $0x29] sm:$0x1]  ;;  %v3550_v28 = vld [vmem:[#allocation3 + $0x2a] sm:$0x1] }
 0x142   : > { %7439 = vmatpush3.msra.mxu0 %v8525_v45  ;;  %7470 = vmatpush3.msra.mxu1 %v8525_v45  ;;  %v3522_v29 = vmax.f32 %v3494_v26, %v3508_v27  ;;  %v3564_v30 = vld [vmem:[#allocation3 + $0x2b] sm:$0x1]  ;;  %v3606_v31 = vld [vmem:[#allocation3 + $0x2c] sm:$0x1]  ;;  %v3620_v32 = vld [vmem:[#allocation3 + $0x2d] sm:$0x1] }
 0x143   : > { %3823 = vrot.lane.b32.xlu1 %v3803_v24, %s7778_s28  ;;  %3945 = vrot.lane.b32.xlu0 %v3925_v25, %s7779_s29  ;;  %v3578_v33 = vmax.f32 %v3550_v28, %v3564_v30  ;;  %v3634_v34 = vmax.f32 %v3606_v31, %v3620_v32  ;;  %v8965_v28 = vld [vmem:[%s7868_s30 + $0x58] sm:$0xff] }
 0x144   : > { %7440 = vmatprep.subr.mxu0 %v8532_v46  ;;  %7471 = vmatprep.subr.mxu1 %v8532_v46  ;;  %v3269_v35 = vld [vmem:[#allocation3 + $0x20] sm:$0x1]  ;;  %v3283_v36 = vld [vmem:[#allocation3 + $0x21] sm:$0x1]  ;;  %v3326_v37 = vld [vmem:[#allocation3 + $0x22] sm:$0x1] }
 0x145   : > { %3536 = vst.msk [vmem:[#allocation4 + $0x14] sm:$0x1] %vm3309_vm5, %v3522_v29  ;;  %7441 = vmatpush3.msra.mxu0 %v8532_v46  ;;  %7472 = vmatpush3.msra.mxu1 %v8532_v46  ;;  %v3297_v38 = vmax.f32 %v3269_v35, %v3283_v36  ;;  %v3340_v39 = vld [vmem:[#allocation3 + $0x23] sm:$0x1]  ;;  %v3382_v40 = vld [vmem:[#allocation3 + $0x24] sm:$0x1] }
 0x146   : > { %v3396_v41 = vld [vmem:[#allocation3 + $0x25] sm:$0x1]  ;;  %3592 = vst.msk [vmem:[#allocation4 + $0x15] sm:$0x1] %vm3309_vm5, %v3578_v33  ;;  %3648 = vst.msk [vmem:[#allocation4 + $0x16] sm:$0x1] %vm3309_vm5, %v3634_v34  ;;  %7442 = vmatprep.subr.mxu0 %v8545_v47  ;;  %7473 = vmatprep.subr.mxu1 %v8545_v47  ;;  %v3354_v42 = vmax.f32 %v3326_v37, %v3340_v39 }
 0x147   : > { %v3410_v51 = vmax.f32 %v3382_v40, %v3396_v41  ;;  %v3438_v52 = vld [vmem:[#allocation3 + $0x26] sm:$0x1]  ;;  %v3452_v54 = vld [vmem:[#allocation3 + $0x27] sm:$0x1]  ;;  %7443 = vmatpush3.msra.mxu0 %v8545_v47  ;;  %7474 = vmatpush3.msra.mxu1 %v8545_v47  ;;  %v3864_v46 = vld [vmem:[#allocation4 + $0x9] sm:$0x1f]  ;;  %v7030_v56 = vpop.f32.mrf.mxu0  ;;  %v7061_v57 = vpop.f32.mrf.mxu1 }
 0x148   : > { %3312 = vst.msk [vmem:[#allocation4 + $0x10] sm:$0x1] %vm3309_vm5, %v3297_v38  ;;  %v3466_v59 = vmax.f32 %v3438_v52, %v3452_v54  ;;  %3884 = vrot.lane.b32.xlu1 %v3864_v46, %s7780_s14  ;;  %3702 = vrot.lane.b32.xlu0 %v3681_v55, %s7775_s24  ;;  %v1373_v60 = vmul.f32 %v7030_v56, %v8558_v48  ;;  %3368 = vst.msk [vmem:[#allocation4 + $0x11] sm:$0x1] %vm3309_vm5, %v3354_v42  ;;  %v8983_v42 = vld [vmem:[%s7868_s30 + $0x48] sm:$0xff] }
 0x149   : > { %v1466_v61 = vmul.f32 %v7061_v57, %v8558_v48  ;;  %3424 = vst.msk [vmem:[#allocation4 + $0x12] sm:$0x1] %vm3309_vm5, %v3410_v51  ;;  %7444 = vmatprep.subr.mxu0 %v8561_v49  ;;  %7475 = vmatprep.subr.mxu1 %v8561_v49  ;;  %v1363_v47 = vpop.f32.mrf.mxu0  ;;  %v1456_v62 = vpop.f32.mrf.mxu1  ;;  %v8987_v51 = vld [vmem:[%s8540_s20] ss:$0 sm:$0xff] }
 0x14a   : > { %3480 = vst.msk [vmem:[#allocation4 + $0x13] sm:$0x1] %vm3309_vm5, %v3466_v59  ;;  %7445 = vmatpush3.msra.mxu0 %v8561_v49  ;;  %7476 = vmatpush3.msra.mxu1 %v8561_v49  ;;  %v1375_v0 = vadd.f32 %v8568_v50, %v1373_v60  ;;  %v1372_v2 = vmul.f32 %v8558_v48, %v1363_v47  ;;  %v8999_v57 = vld [vmem:[%s8553_s23] ss:$0 sm:$0xff] }
 0x14b   : > { %v1468_v1 = vadd.f32 %v8568_v50, %v1466_v61  ;;  %7446 = vmatprep.subr.mxu0 %v8571_v53  ;;  %7477 = vmatprep.subr.mxu1 %v8571_v53  ;;  %v1465_v3 = vmul.f32 %v8558_v48, %v1456_v62  ;;  %v9005_v47 = vld [vmem:[%s7868_s30 + $0x40] sm:$0xff] }
 0x14c   : > { %7447 = vmatpush3.msra.mxu0 %v8571_v53  ;;  %7478 = vmatpush3.msra.mxu1 %v8571_v53  ;;  %v1377_v6 = vmax.f32 %v1375_v0, 0.0  ;;  %v1374_v49 = vadd.f32 %v8568_v50, %v1372_v2 }
 0x14d   : > { %v1470_v10 = vmax.f32 %v1468_v1, 0.0  ;;  %3763 = vrot.lane.b32.xlu0 %v3742_v5, %s7776_s27  ;;  %7448 = vmatprep.subr.mxu0 %v8580_v58  ;;  %v1467_v11 = vadd.f32 %v8568_v50, %v1465_v3  ;;  %v9014_v3 = vld [vmem:[%s7868_s30 + $0x38] sm:$0xff] }
 0x14e   : > { %7479 = vmatprep.subr.mxu1 %v8580_v58  ;;  %7449 = vmatpush3.msra.mxu0 %v8580_v58  ;;  %1380 = vst.msk [vmem:[#allocation2 + $0x68] sm:$0x1f] %vm821_vm4, %v1377_v6  ;;  %v1376_v48 = vmax.f32 %v1374_v49, 0.0  ;;  %v9025_v49 = vld [vmem:[%s7868_s30 + $0x30] sm:$0xff] }
 0x14f   : > { %1473 = vst.msk [vmem:[#allocation2 + $0x78] sm:$0x1f] %vm821_vm4, %v1470_v10  ;;  %7480 = vmatpush3.msra.mxu1 %v8580_v58  ;;  %7450 = vmatprep.subr.mxu0 %v8591_v63  ;;  %v1469_v53 = vmax.f32 %v1467_v11, 0.0 }
 0x150   : > { %7481 = vmatprep.subr.mxu1 %v8591_v63  ;;  %7451 = vmatpush3.msra.mxu0 %v8591_v63  ;;  %1379 = vst.msk [vmem:[#allocation2 + $0x60] sm:$0xff] %vm640_vm3, %v1376_v48  ;;  %v9033_v48 = vld [vmem:[%s7868_s30 + $0x28] sm:$0xff] }
 0x151   : > { %7482 = vmatpush3.msra.mxu1 %v8591_v63  ;;  %7452 = vmatprep.subr.mxu0 %v8600_v4  ;;  %1472 = vst.msk [vmem:[#allocation2 + $0x70] sm:$0xff] %vm640_vm3, %v1469_v53  ;;  %v4109_v50 = vld [vmem:[#allocation4 + $0x12] sm:$0x1f] }
 0x152   : > { %7483 = vmatprep.subr.mxu1 %v8600_v4  ;;  %7453 = vmatpush3.msra.mxu0 %v8600_v4  ;;  %4119 = vst.msk [vmem:[#allocation5 + $0x8] sm:$0x1f] %vm821_vm4, %v4109_v50  ;;  %v3662_v58 = vld [vmem:[#allocation4 + $0x10] sm:$0x1f] }
 0x153   : > { %7484 = vmatpush3.msra.mxu1 %v8600_v4  ;;  %7454 = vmatprep.subr.mxu0 %v8609_v7  ;;  %3672 = vst.msk [vmem:[#allocation5 + $0x20] sm:$0x1f] %vm821_vm4, %v3662_v58  ;;  %v3865_v26 = vld [vmem:[#allocation4 + $0x11] sm:$0x1f] }
 0x154   : > { %7485 = vmatprep.subr.mxu1 %v8609_v7  ;;  %7455 = vmatpush3.msra.mxu0 %v8609_v7  ;;  %v4048_v46 = vld [vmem:[#allocation4 + $0x11] sm:$0x1f] }
 0x155   : > { %7486 = vmatpush3.msra.mxu1 %v8609_v7  ;;  %7456 = vmatprep.subr.mxu0 %v8618_v8  ;;  %v3199_v63 = vld [vmem:[#allocation2 + $0x68] sm:$0x3f]  ;;  %v3804_v6 = vld [vmem:[#allocation4 + $0x10] sm:$0x1f] }
 0x156   : > { %v3203_v12 = vld [vmem:[#allocation2 + $0x78] sm:$0x3f]  ;;  %7487 = vmatprep.subr.mxu1 %v8618_v8  ;;  %7457 = vmatpush3.msra.mxu0 %v8618_v8  ;;  %v3926_v50 = vld [vmem:[#allocation4 + $0x12] sm:$0x1f] }
 0x157   : > { %v3207_v4 = vmax.f32 %v3199_v63, %v3203_v12  ;;  %7488 = vmatpush3.msra.mxu1 %v8618_v8  ;;  %7458 = vmatprep.subr.mxu0 %v8625_v9  ;;  %v3198_v13 = vld [vmem:[#allocation2 + $0x60] sm:$0xff]  ;;  %v6304_v8 = vld [vmem:[%s7961_s17 + $0x158] sm:$0x1f] }
 0x158   : > { %7489 = vmatprep.subr.mxu1 %v8625_v9  ;;  %7459 = vmatpush3.msra.mxu0 %v8625_v9  ;;  %v3202_v7 = vld [vmem:[#allocation2 + $0x70] sm:$0xff]  ;;  %v9044_v63 = vld [vmem:[%s7868_s30 + $0x20] sm:$0xff] }
 0x159   : > { %3212 = vst.msk [vmem:[#allocation3 + $0x38] sm:$0x3f] %vm642_vm2, %v3207_v4  ;;  %7490 = vmatpush3.msra.mxu1 %v8625_v9  ;;  %v3206_v16 = vmax.f32 %v3198_v13, %v3202_v7  ;;  %7460 = vmatprep.subr.mxu0 %v8634_v15  ;;  %v3987_v9 = vld [vmem:[#allocation4 + $0x10] sm:$0x1f]  ;;  %v9051_v13 = vld [vmem:[%s7868_s30 + $0x18] sm:$0xff] }
 0x15a   : > { %7491 = vmatprep.subr.mxu1 %v8634_v15  ;;  %7461 = vmatpush3.msra.mxu0 %v8634_v15 }
 0x15b   : > { %3211 = vst.msk [vmem:[#allocation3 + $0x30] sm:$0xff] %vm640_vm3, %v3206_v16  ;;  %7462 = vmatprep.mubr.msk.f32.mxu0 %vm716_vm1, %v6298_v14  ;;  %7492 = vmatpush3.msra.mxu1 %v8634_v15  ;;  %v9058_v16 = vld [vmem:[%s7868_s30 + $0x10] sm:$0xff] }
 0x15c   : > { %7463 = vmatmul.mubr.msk.f32.vlgmr.msra.gmra.mxu0 %vm716_vm1, %v6299_v17  ;;  %7493 = vmatprep.mubr.msk.f32.mxu1 %vm716_vm1, %v6303_v18 }
 0x15d   : > { %7496 = vmatprep.subr.msk.mxu0 %vm723_vm0, %v8506_v43  ;;  %7527 = vmatprep.subr.msk.mxu1 %vm723_vm0, %v8506_v43 }
 0x15e   : > { %7494 = vmatmul.mubr.msk.f32.vlgmr.msra.gmra.mxu1 %vm716_vm1, %v6304_v8  ;;  %7497 = vmatpush3.msk.msra.mxu0 %vm723_vm0, %v8506_v43  ;;  %v9066_v8 = vld [vmem:[%s7868_s30 + $0x8] sm:$0xff] }
 0x15f   : > { %7528 = vmatpush3.msk.msra.mxu1 %vm723_vm0, %v8506_v43  ;;  %7498 = vmatprep.subr.mxu0 %v8518_v44 }
 0x160   : > { %v3495_v15 = vld [vmem:[#allocation3 + $0x38] sm:$0x1]  ;;  %v3509_v19 = vld [vmem:[#allocation3 + $0x39] sm:$0x1]  ;;  %v3551_v20 = vld [vmem:[#allocation3 + $0x3a] sm:$0x1]  ;;  %7529 = vmatprep.subr.mxu1 %v8518_v44  ;;  %7499 = vmatpush3.msra.mxu0 %v8518_v44 }
 0x161   : > { %v3523_v21 = vmax.f32 %v3495_v15, %v3509_v19  ;;  %v3565_v22 = vld [vmem:[#allocation3 + $0x3b] sm:$0x1]  ;;  %v3607_v24 = vld [vmem:[#allocation3 + $0x3c] sm:$0x1]  ;;  %v3621_v25 = vld [vmem:[#allocation3 + $0x3d] sm:$0x1]  ;;  %7530 = vmatpush3.msra.mxu1 %v8518_v44  ;;  %7500 = vmatprep.subr.mxu0 %v8525_v45 }
 0x162   : > { %v3579_v43 = vmax.f32 %v3551_v20, %v3565_v22  ;;  %v3635_v27 = vmax.f32 %v3607_v24, %v3621_v25  ;;  %7531 = vmatprep.subr.mxu1 %v8525_v45  ;;  %7501 = vmatpush3.msra.mxu0 %v8965_v28  ;;  %v3327_v29 = vld [vmem:[#allocation3 + $0x32] sm:$0x1]  ;;  %v3341_v30 = vld [vmem:[#allocation3 + $0x33] sm:$0x1]  ;;  %v3383_v31 = vld [vmem:[#allocation3 + $0x34] sm:$0x1] }
 0x163   : > { %3537 = vst.msk [vmem:[#allocation4 + $0x1c] sm:$0x1] %vm3309_vm5, %v3523_v21  ;;  %7532 = vmatpush3.msra.mxu1 %v8965_v28  ;;  %4007 = vrot.lane.b32.xlu1 %v3987_v9, %s7781_s15  ;;  %v3355_v44 = vmax.f32 %v3327_v29, %v3341_v30  ;;  %v3397_v32 = vld [vmem:[#allocation3 + $0x35] sm:$0x1]  ;;  %v3439_v33 = vld [vmem:[#allocation3 + $0x36] sm:$0x1] }
 0x164   : > { %v3453_v34 = vld [vmem:[#allocation3 + $0x37] sm:$0x1]  ;;  %3593 = vst.msk [vmem:[#allocation4 + $0x1d] sm:$0x1] %vm3309_vm5, %v3579_v43  ;;  %3649 = vst.msk [vmem:[#allocation4 + $0x1e] sm:$0x1] %vm3309_vm5, %v3635_v27  ;;  %3886 = vrot.lane.b32.xlu0 %v3865_v26, %s7780_s14  ;;  %v3411_v35 = vmax.f32 %v3383_v31, %v3397_v32 }
 0x165   : > { %v8975_v45 = vld [vmem:[%s7868_s30 + $0x50] sm:$0xff]  ;;  %v3467_v36 = vmax.f32 %v3439_v33, %v3453_v34  ;;  %v7092_v39 = vpop.f32.mrf.mxu0  ;;  %v7123_v40 = vpop.f32.mrf.mxu1  ;;  %3369 = vst.msk [vmem:[#allocation4 + $0x19] sm:$0x1] %vm3309_vm5, %v3355_v44  ;;  %v6308_v9 = vld [vmem:[%s7961_s17 + $0x160] sm:$0xff]  ;;  %v6309_v15 = vld [vmem:[%s7961_s17 + $0x168] sm:$0x1f] }
 0x166   : > { %7502 = vmatprep.subr.mxu0 %v8975_v45  ;;  %v3270_v37 = vld [vmem:[#allocation3 + $0x30] sm:$0x1]  ;;  %v3284_v38 = vld [vmem:[#allocation3 + $0x31] sm:$0x1]  ;;  %7533 = vmatprep.subr.mxu1 %v8975_v45  ;;  %v1559_v52 = vmul.f32 %v8987_v51, %v7092_v39  ;;  %v1652_v54 = vmul.f32 %v8987_v51, %v7123_v40  ;;  %3425 = vst.msk [vmem:[#allocation4 + $0x1a] sm:$0x1] %vm3309_vm5, %v3411_v35 }
 0x167   : > { %7503 = vmatpush3.msra.mxu0 %v8975_v45  ;;  %v3298_v41 = vmax.f32 %v3270_v37, %v3284_v38  ;;  %7534 = vmatpush3.msra.mxu1 %v8975_v45  ;;  %3481 = vst.msk [vmem:[#allocation4 + $0x1b] sm:$0x1] %vm3309_vm5, %v3467_v36  ;;  %v1549_v55 = vpop.f32.mrf.mxu0  ;;  %v1642_v56 = vpop.f32.mrf.mxu1  ;;  %v9076_v19 = vld [vmem:[%s7868_s30] sm:$0xff]  ;;  %v6313_v20 = vld [vmem:[%s7961_s17 + $0x170] sm:$0xff]  ;;  %v6314_v21 = vld [vmem:[%s7961_s17 + $0x178] sm:$0x1f] }
 0x168   : > { %7504 = vmatprep.subr.mxu0 %v8983_v42  ;;  %7535 = vmatprep.subr.mxu1 %v8983_v42  ;;  %v1561_v59 = vadd.f32 %v8999_v57, %v1559_v52  ;;  %v1654_v60 = vadd.f32 %v8999_v57, %v1652_v54  ;;  %v1558_v61 = vmul.f32 %v8987_v51, %v1549_v55  ;;  %v7733_v22 = vld [vmem:[%s7868_s30 + $0x68] sm:$0xf]  ;;  %v7734_v34 = vld [vmem:[%s7868_s30 + $0x60] sm:$0xff]  ;;  %s7685_s30 = smul.u32 144, %s10201_s26 }
 0x169   : > { %7505 = vmatpush3.msra.mxu0 %v8983_v42  ;;  %3313 = vst.msk [vmem:[#allocation4 + $0x18] sm:$0x1] %vm3309_vm5, %v3298_v41  ;;  %7536 = vmatpush3.msra.mxu1 %v8983_v42  ;;  %v1651_v62 = vmul.f32 %v8987_v51, %v1642_v56 }
 0x16a   : > { %4068 = vrot.lane.b32.xlu1 %v4048_v46, %s7782_s16  ;;  %7506 = vmatprep.subr.mxu0 %v9005_v47  ;;  %v1563_v0 = vmax.f32 %v1561_v59, 0.0  ;;  %v1656_v1 = vmax.f32 %v1654_v60, 0.0  ;;  %v1560_v2 = vadd.f32 %v8999_v57, %v1558_v61  ;;  %s9181_s21 = scalar_lea.vmem %s10190_s4, %s7685_s30 }
 0x16b   : > { %7537 = vmatprep.subr.mxu1 %v9005_v47  ;;  %7507 = vmatpush3.msra.mxu0 %v9005_v47  ;;  %v1653_v5 = vadd.f32 %v8999_v57, %v1651_v62 }
 0x16c   : > { %7538 = vmatpush3.msra.mxu1 %v9005_v47  ;;  %7508 = vmatprep.subr.mxu0 %v9014_v3  ;;  %1566 = vst.msk [vmem:[#allocation2 + $0x88] sm:$0x1f] %vm821_vm4, %v1563_v0  ;;  %1659 = vst.msk [vmem:[#allocation2 + $0x98] sm:$0x1f] %vm821_vm4, %v1656_v1  ;;  %v1562_v10 = vmax.f32 %v1560_v2, 0.0 }
 0x16d   : > { %7539 = vmatprep.subr.mxu1 %v9014_v3  ;;  %7509 = vmatpush3.msra.mxu0 %v9014_v3  ;;  %v1655_v11 = vmax.f32 %v1653_v5, 0.0 }
 0x16e   : > { %7540 = vmatpush3.msra.mxu1 %v9014_v3  ;;  %3825 = vrot.lane.b32.xlu1 %v3804_v6, %s7778_s28  ;;  %1565 = vst.msk [vmem:[#allocation2 + $0x80] sm:$0xff] %vm640_vm3, %v1562_v10  ;;  %v4110_v53 = vld [vmem:[#allocation4 + $0x1a] sm:$0x1f]  ;;  %v3743_v10 = vld [vmem:[#allocation4 + $0x12] sm:$0x1f] }
 0x16f   : > { %7510 = vmatprep.subr.mxu0 %v9025_v49  ;;  %7541 = vmatprep.subr.mxu1 %v9025_v49  ;;  %1658 = vst.msk [vmem:[#allocation2 + $0x90] sm:$0xff] %vm640_vm3, %v1655_v11  ;;  %v4049_v31 = vld [vmem:[#allocation4 + $0x19] sm:$0x1f]  ;;  %v3682_v11 = vld [vmem:[#allocation4 + $0x11] sm:$0x1f] }
 0x170   : > { %7511 = vmatpush3.msra.mxu0 %v9025_v49  ;;  %7542 = vmatpush3.msra.mxu1 %v9025_v49  ;;  %4120 = vst.msk [vmem:[#allocation5 + $0x18] sm:$0x1f] %vm821_vm4, %v4110_v53  ;;  %v3663_v58 = vld [vmem:[#allocation4 + $0x18] sm:$0x1f] }
 0x171   : > { %7512 = vmatprep.subr.mxu0 %v9033_v48  ;;  %7543 = vmatprep.subr.mxu1 %v9033_v48  ;;  %3673 = vst.msk [vmem:[#allocation5 + $0x30] sm:$0x1f] %vm821_vm4, %v3663_v58  ;;  %v3988_v44 = vld [vmem:[#allocation4 + $0x18] sm:$0x1f] }
 0x172   : > { %7513 = vmatpush3.msra.mxu0 %v9033_v48  ;;  %7544 = vmatpush3.msra.mxu1 %v9033_v48 }
 0x173   : > { %3947 = vrot.lane.b32.xlu1 %v3926_v50, %s7779_s29  ;;  %7514 = vmatprep.subr.mxu0 %v9044_v63  ;;  %v3216_v12 = vld [vmem:[#allocation2 + $0x88] sm:$0x3f]  ;;  %v3220_v4 = vld [vmem:[#allocation2 + $0x98] sm:$0x3f] }
 0x174   : > { %7545 = vmatprep.subr.mxu1 %v9044_v63  ;;  %7515 = vmatpush3.msra.mxu0 %v9044_v63  ;;  %v3224_v7 = vmax.f32 %v3216_v12, %v3220_v4  ;;  %v3866_v4 = vld [vmem:[#allocation4 + $0x19] sm:$0x1f] }
 0x175   : > { %7546 = vmatpush3.msra.mxu1 %v9044_v63  ;;  %7516 = vmatprep.subr.mxu0 %v9051_v13  ;;  %v3215_v14 = vld [vmem:[#allocation2 + $0x80] sm:$0xff] }
 0x176   : > { %7547 = vmatprep.subr.mxu1 %v9051_v13  ;;  %7517 = vmatpush3.msra.mxu0 %v9051_v13  ;;  %3229 = vst.msk [vmem:[#allocation3 + $0x48] sm:$0x3f] %vm642_vm2, %v3224_v7  ;;  %v3219_v17 = vld [vmem:[#allocation2 + $0x90] sm:$0xff]  ;;  %v3805_v7 = vld [vmem:[#allocation4 + $0x18] sm:$0x1f] }
 0x177   : > { %7548 = vmatpush3.msra.mxu1 %v9051_v13  ;;  %7518 = vmatprep.subr.mxu0 %v9058_v16  ;;  %v3223_v18 = vmax.f32 %v3215_v14, %v3219_v17 }
 0x178   : > { %7549 = vmatprep.subr.mxu1 %v9058_v16  ;;  %7519 = vmatpush3.msra.mxu0 %v9058_v16 }
 0x179   : > { %7550 = vmatpush3.msra.mxu1 %v9058_v16  ;;  %7520 = vmatprep.subr.mxu0 %v9066_v8  ;;  %3228 = vst.msk [vmem:[#allocation3 + $0x40] sm:$0xff] %vm640_vm3, %v3223_v18  ;;  %v3927_v18 = vld [vmem:[#allocation4 + $0x1a] sm:$0x1f] }
 0x17a   : > { %7551 = vmatprep.subr.mxu1 %v9066_v8  ;;  %7521 = vmatpush3.msra.mxu0 %v9066_v8 }
 0x17b   : > { %7552 = vmatpush3.msra.mxu1 %v9066_v8  ;;  %7522 = vmatprep.subr.mxu0 %v9076_v19 }
 0x17c   : > { %7553 = vmatprep.subr.mxu1 %v9076_v19  ;;  %7523 = vmatpush3.msra.mxu0 %v9076_v19 }
 0x17d   : > { %7524 = vmatprep.mubr.msk.f32.mxu0 %vm716_vm1, %v6308_v9  ;;  %7554 = vmatpush3.msra.mxu1 %v9076_v19  ;;  %v3496_v24 = vld [vmem:[#allocation3 + $0x48] sm:$0x1]  ;;  %v3510_v25 = vld [vmem:[#allocation3 + $0x49] sm:$0x1]  ;;  %v3552_v26 = vld [vmem:[#allocation3 + $0x4a] sm:$0x1] }
 0x17e   : > { %7525 = vmatmul.mubr.msk.f32.vlgmr.msra.gmra.mxu0 %vm716_vm1, %v6309_v15  ;;  %7555 = vmatprep.mubr.msk.f32.mxu1 %vm716_vm1, %v6313_v20  ;;  %v3524_v43 = vmax.f32 %v3496_v24, %v3510_v25  ;;  %v3566_v27 = vld [vmem:[#allocation3 + $0x4b] sm:$0x1]  ;;  %v3608_v29 = vld [vmem:[#allocation3 + $0x4c] sm:$0x1]  ;;  %v3622_v30 = vld [vmem:[#allocation3 + $0x4d] sm:$0x1] }
 0x17f   : > { %7558 = vmatprep.subr.msk.mxu0 %vm723_vm0, %v7733_v22  ;;  %7589 = vmatprep.subr.msk.mxu1 %vm723_vm0, %v7733_v22  ;;  %v3580_v32 = vmax.f32 %v3552_v26, %v3566_v27  ;;  %v3636_v33 = vmax.f32 %v3608_v29, %v3622_v30  ;;  %v3683_v20 = vld [vmem:[#allocation4 + $0x19] sm:$0x1f]  ;;  %v6319_v24 = vld [vmem:[%s7961_s17 + $0x188] sm:$0x1f] }
 0x180   : > { %7556 = vmatmul.mubr.msk.f32.vlgmr.msra.gmra.mxu1 %vm716_vm1, %v6314_v21  ;;  %7559 = vmatpush3.msk.msra.mxu0 %vm723_vm0, %v7733_v22  ;;  %v3271_v35 = vld [vmem:[#allocation3 + $0x40] sm:$0x1]  ;;  %v3285_v36 = vld [vmem:[#allocation3 + $0x41] sm:$0x1]  ;;  %v3328_v37 = vld [vmem:[#allocation3 + $0x42] sm:$0x1] }
 0x181   : > { %7590 = vmatpush3.msk.msra.mxu1 %vm723_vm0, %v7733_v22  ;;  %7560 = vmatprep.subr.mxu0 %v7734_v34  ;;  %3538 = vst.msk [vmem:[#allocation4 + $0x24] sm:$0x1] %vm3309_vm5, %v3524_v43  ;;  %v3299_v38 = vmax.f32 %v3271_v35, %v3285_v36  ;;  %v3342_v39 = vld [vmem:[#allocation3 + $0x43] sm:$0x1]  ;;  %v3384_v40 = vld [vmem:[#allocation3 + $0x44] sm:$0x1] }
 0x182   : > { %7591 = vmatprep.subr.mxu1 %v7734_v34  ;;  %7561 = vmatpush3.msra.mxu0 %v7734_v34  ;;  %v3398_v41 = vld [vmem:[#allocation3 + $0x45] sm:$0x1]  ;;  %3594 = vst.msk [vmem:[#allocation4 + $0x25] sm:$0x1] %vm3309_vm5, %v3580_v32  ;;  %3650 = vst.msk [vmem:[#allocation4 + $0x26] sm:$0x1] %vm3309_vm5, %v3636_v33  ;;  %v3356_v52 = vmax.f32 %v3328_v37, %v3342_v39 }
 0x183   : > { %7592 = vmatpush3.msra.mxu1 %v7734_v34  ;;  %7562 = vmatprep.subr.mxu0 %v8965_v28  ;;  %v3412_v54 = vmax.f32 %v3384_v40, %v3398_v41  ;;  %v3440_v46 = vld [vmem:[#allocation3 + $0x46] sm:$0x1]  ;;  %v3454_v55 = vld [vmem:[#allocation3 + $0x47] sm:$0x1]  ;;  %v7154_v56 = vpop.f32.mrf.mxu0  ;;  %v7185_v59 = vpop.f32.mrf.mxu1  ;;  %3314 = vst.msk [vmem:[#allocation4 + $0x20] sm:$0x1] %vm3309_vm5, %v3299_v38 }
 0x184   : > { %7593 = vmatprep.subr.mxu1 %v8965_v28  ;;  %7563 = vmatpush3.msra.mxu0 %v8965_v28  ;;  %v3468_v60 = vmax.f32 %v3440_v46, %v3454_v55  ;;  %v1745_v61 = vmul.f32 %v8987_v51, %v7154_v56  ;;  %v1838_v62 = vmul.f32 %v8987_v51, %v7185_v59  ;;  %v6323_v22 = vld [vmem:[%s7961_s17 + $0x190] sm:$0xff]  ;;  %v6324_v26 = vld [vmem:[%s7961_s17 + $0x198] sm:$0x1f]  ;;  %vm6003_vm0 = vcmask 9216  }
 0x185   : > { %7594 = vmatpush3.msra.mxu1 %v8965_v28  ;;  %4070 = vrot.lane.b32.xlu1 %v4049_v31, %s7782_s16  ;;  %3370 = vst.msk [vmem:[#allocation4 + $0x21] sm:$0x1] %vm3309_vm5, %v3356_v52  ;;  %3426 = vst.msk [vmem:[#allocation4 + $0x22] sm:$0x1] %vm3309_vm5, %v3412_v54  ;;  %v1735_v28 = vpop.f32.mrf.mxu0  ;;  %v1828_v0 = vpop.f32.mrf.mxu1  ;;  %v9191_v39 = vld [vmem:[%s9181_s21 + $0x78] sm:$0xff] }
 0x186   : > { %4009 = vrot.lane.b32.xlu0 %v3988_v44, %s7781_s15  ;;  %7564 = vmatprep.subr.mxu0 %v8975_v45  ;;  %3482 = vst.msk [vmem:[#allocation4 + $0x23] sm:$0x1] %vm3309_vm5, %v3468_v60  ;;  %v1747_v1 = vadd.f32 %v8999_v57, %v1745_v61  ;;  %v1840_v2 = vadd.f32 %v8999_v57, %v1838_v62  ;;  %v4162_v44 = vld [vmem:[#allocation5 + $0x8] sm:$0x1f] }
 0x187   : > { %7595 = vmatprep.subr.mxu1 %v8975_v45  ;;  %7565 = vmatpush3.msra.mxu0 %v8975_v45  ;;  %v1744_v5 = vmul.f32 %v8987_v51, %v1735_v28  ;;  %v1837_v6 = vmul.f32 %v8987_v51, %v1828_v0 }
 0x188   : > { %7596 = vmatpush3.msra.mxu1 %v8975_v45  ;;  %7566 = vmatprep.subr.mxu0 %v8983_v42  ;;  %v1749_v53 = vmax.f32 %v1747_v1, 0.0  ;;  %v1842_v45 = vmax.f32 %v1840_v2, 0.0  ;;  %v9208_v1 = vld [vmem:[%s9181_s21 + $0x70] sm:$0xff] }
 0x189   : > { %7597 = vmatprep.subr.mxu1 %v8983_v42  ;;  %7567 = vmatpush3.msra.mxu0 %v8983_v42  ;;  %v1746_v50 = vadd.f32 %v8999_v57, %v1744_v5  ;;  %v1839_v58 = vadd.f32 %v8999_v57, %v1837_v6 }
 0x18a   : > { %7598 = vmatpush3.msra.mxu1 %v8983_v42  ;;  %3765 = vrot.lane.b32.xlu1 %v3743_v10, %s7776_s27  ;;  %1752 = vst.msk [vmem:[#allocation2 + $0xa8] sm:$0x1f] %vm821_vm4, %v1749_v53  ;;  %1845 = vst.msk [vmem:[#allocation2 + $0xb8] sm:$0x1f] %vm821_vm4, %v1842_v45  ;;  %v9218_v53 = vld [vmem:[%s9181_s21 + $0x68] sm:$0xff] }
 0x18b   : > { %3704 = vrot.lane.b32.xlu0 %v3682_v11, %s7775_s24  ;;  %7568 = vmatprep.subr.mxu0 %v9005_v47  ;;  %v1748_v42 = vmax.f32 %v1746_v50, 0.0  ;;  %v1841_v12 = vmax.f32 %v1839_v58, 0.0 }
 0x18c   : > { %7599 = vmatprep.subr.mxu1 %v9005_v47  ;;  %7569 = vmatpush3.msra.mxu0 %v9005_v47 }
 0x18d   : > { %7600 = vmatpush3.msra.mxu1 %v9005_v47  ;;  %7570 = vmatprep.subr.mxu0 %v9014_v3  ;;  %1751 = vst.msk [vmem:[#allocation2 + $0xa0] sm:$0xff] %vm640_vm3, %v1748_v42  ;;  %1844 = vst.msk [vmem:[#allocation2 + $0xb0] sm:$0xff] %vm640_vm3, %v1841_v12  ;;  %v4111_v47 = vld [vmem:[#allocation4 + $0x22] sm:$0x1f] }
 0x18e   : > { %7601 = vmatprep.subr.mxu1 %v9014_v3  ;;  %7571 = vmatpush3.msra.mxu0 %v9014_v3  ;;  %v3664_v14 = vld [vmem:[#allocation4 + $0x20] sm:$0x1f]  ;;  %4121 = vst.msk [vmem:[#allocation5 + $0x28] sm:$0x1f] %vm821_vm4, %v4111_v47 }
 0x18f   : > { %7602 = vmatpush3.msra.mxu1 %v9014_v3  ;;  %3888 = vrot.lane.b32.xlu1 %v3866_v4, %s7780_s14  ;;  %3674 = vst.msk [vmem:[#allocation5 + $0x40] sm:$0x1f] %vm821_vm4, %v3664_v14  ;;  %v3989_v32 = vld [vmem:[#allocation4 + $0x20] sm:$0x1f] }
 0x190   : > { %3827 = vrot.lane.b32.xlu0 %v3805_v7, %s7778_s28  ;;  %7572 = vmatprep.subr.mxu0 %v9025_v49  ;;  %v3867_v33 = vld [vmem:[#allocation4 + $0x21] sm:$0x1f] }
 0x191   : > { %7603 = vmatprep.subr.mxu1 %v9025_v49  ;;  %7573 = vmatpush3.msra.mxu0 %v9025_v49  ;;  %v3233_v3 = vld [vmem:[#allocation2 + $0xa8] sm:$0x3f]  ;;  %v3237_v17 = vld [vmem:[#allocation2 + $0xb8] sm:$0x3f]  ;;  %v4050_v10 = vld [vmem:[#allocation4 + $0x21] sm:$0x1f] }
 0x192   : > { %7604 = vmatpush3.msra.mxu1 %v9025_v49  ;;  %7574 = vmatprep.subr.mxu0 %v9033_v48  ;;  %v3241_v9 = vmax.f32 %v3233_v3, %v3237_v17  ;;  %v9228_v12 = vld [vmem:[%s9181_s21 + $0x60] sm:$0xff]  ;;  %v9237_v3 = vld [vmem:[%s9181_s21 + $0x58] sm:$0xff] }
 0x193   : > { %7605 = vmatprep.subr.mxu1 %v9033_v48  ;;  %7575 = vmatpush3.msra.mxu0 %v9033_v48  ;;  %v3806_v14 = vld [vmem:[#allocation4 + $0x20] sm:$0x1f] }
 0x194   : > { %7606 = vmatpush3.msra.mxu1 %v9033_v48  ;;  %3949 = vrot.lane.b32.xlu0 %v3927_v18, %s7779_s29  ;;  %v3232_v15 = vld [vmem:[#allocation2 + $0xa0] sm:$0xff]  ;;  %3246 = vst.msk [vmem:[#allocation3 + $0x58] sm:$0x3f] %vm642_vm2, %v3241_v9  ;;  %v3236_v49 = vld [vmem:[#allocation2 + $0xb0] sm:$0xff] }
 0x195   : > { %7576 = vmatprep.subr.mxu0 %v9044_v63  ;;  %7607 = vmatprep.subr.mxu1 %v9044_v63  ;;  %v3240_v48 = vmax.f32 %v3232_v15, %v3236_v49  ;;  %v9246_v9 = vld [vmem:[%s9181_s21 + $0x50] sm:$0xff]  ;;  %v3928_v49 = vld [vmem:[#allocation4 + $0x22] sm:$0x1f] }
 0x196   : > { %7577 = vmatpush3.msra.mxu0 %v9044_v63  ;;  %7608 = vmatpush3.msra.mxu1 %v9044_v63  ;;  %v3701_v21 = vpop.permute.xlu0 %3700  ;;  %v6318_v63 = vld [vmem:[%s7961_s17 + $0x180] sm:$0xff] }
 0x197   : > { %7578 = vmatprep.subr.mxu0 %v9051_v13  ;;  %7609 = vmatprep.subr.mxu1 %v9051_v13  ;;  %3245 = vst.msk [vmem:[#allocation3 + $0x50] sm:$0xff] %vm640_vm3, %v3240_v48  ;;  %v3255_v48 = vld [vmem:[#allocation2 + $0xd8] sm:$0x3f] }
 0x198   : > { %7579 = vmatpush3.msra.mxu0 %v9051_v13  ;;  %7610 = vmatpush3.msra.mxu1 %v9051_v13  ;;  %3731 = vst.msk [vmem:[#allocation5] sm:$0x1f] %vm3730_vm6, %v3701_v21  ;;  %v3744_v13 = vld [vmem:[#allocation4 + $0x1a] sm:$0x1f]  ;;  %v3254_v21 = vld [vmem:[#allocation2 + $0xd0] sm:$0xff] }
 0x199   : > { %3706 = vrot.lane.b32.xlu0 %v3683_v20, %s7775_s24  ;;  %7580 = vmatprep.subr.mxu0 %v9058_v16  ;;  %v9254_v20 = vld [vmem:[%s9181_s21 + $0x48] sm:$0xff] }
 0x19a   : > { %7611 = vmatprep.subr.mxu1 %v9058_v16  ;;  %7581 = vmatpush3.msra.mxu0 %v9058_v16  ;;  %v3762_v25 = vpop.permute.xlu0 %3761 }
 0x19b   : > { %7612 = vmatpush3.msra.mxu1 %v9058_v16  ;;  %7582 = vmatprep.subr.mxu0 %v9066_v8  ;;  %3792 = vst.msk [vmem:[#allocation5] sm:$0x1f] %vm3791_vm7, %v3762_v25  ;;  %v3497_v43 = vld [vmem:[#allocation3 + $0x58] sm:$0x1]  ;;  %v3511_v27 = vld [vmem:[#allocation3 + $0x59] sm:$0x1] }
 0x19c   : > { %7613 = vmatprep.subr.mxu1 %v9066_v8  ;;  %7583 = vmatpush3.msra.mxu0 %v9066_v8  ;;  %v3553_v29 = vld [vmem:[#allocation3 + $0x5a] sm:$0x1]  ;;  %v3525_v16 = vmax.f32 %v3497_v43, %v3511_v27  ;;  %v3567_v30 = vld [vmem:[#allocation3 + $0x5b] sm:$0x1]  ;;  %v3623_v31 = vld [vmem:[#allocation3 + $0x5d] sm:$0x1] }
 0x19d   : > { %7614 = vmatpush3.msra.mxu1 %v9066_v8  ;;  %3767 = vrot.lane.b32.xlu0 %v3744_v13, %s7776_s27  ;;  %v3609_v8 = vld [vmem:[#allocation3 + $0x5c] sm:$0x1]  ;;  %v3581_v34 = vmax.f32 %v3553_v29, %v3567_v30  ;;  %v3745_v30 = vld [vmem:[#allocation4 + $0x22] sm:$0x1f] }
 0x19e   : > { %7584 = vmatprep.subr.mxu0 %v9076_v19  ;;  %7615 = vmatprep.subr.mxu1 %v9076_v19  ;;  %v3637_v35 = vmax.f32 %v3609_v8, %v3623_v31  ;;  %v3329_v36 = vld [vmem:[#allocation3 + $0x52] sm:$0x1]  ;;  %v3343_v37 = vld [vmem:[#allocation3 + $0x53] sm:$0x1]  ;;  %v3385_v38 = vld [vmem:[#allocation3 + $0x54] sm:$0x1] }
 0x19f   : > { %7585 = vmatpush3.msra.mxu0 %v9076_v19  ;;  %7586 = vmatprep.mubr.msk.f32.mxu0 %vm716_vm1, %v6318_v63  ;;  %3539 = vst.msk [vmem:[#allocation4 + $0x2c] sm:$0x1] %vm3309_vm5, %v3525_v16  ;;  %v3357_v40 = vmax.f32 %v3329_v36, %v3343_v37  ;;  %v3399_v41 = vld [vmem:[#allocation3 + $0x55] sm:$0x1]  ;;  %v3441_v52 = vld [vmem:[#allocation3 + $0x56] sm:$0x1] }
 0x1a0   : > { %7616 = vmatpush3.msra.mxu1 %v9076_v19  ;;  %7617 = vmatprep.mubr.msk.f32.mxu1 %vm716_vm1, %v6323_v22  ;;  %v3455_v54 = vld [vmem:[#allocation3 + $0x57] sm:$0x1]  ;;  %3595 = vst.msk [vmem:[#allocation4 + $0x2d] sm:$0x1] %vm3309_vm5, %v3581_v34  ;;  %3651 = vst.msk [vmem:[#allocation4 + $0x2e] sm:$0x1] %vm3309_vm5, %v3637_v35  ;;  %v7216_v46 = vpop.f32.mrf.mxu0  ;;  %v3413_v55 = vmax.f32 %v3385_v38, %v3399_v41 }
 0x1a1   : > { %7587 = vmatmul.mubr.msk.f32.vlgmr.msra.gmra.mxu0 %vm716_vm1, %v6319_v24  ;;  %7618 = vmatmul.mubr.msk.f32.vlgmr.msra.gmra.mxu1 %vm716_vm1, %v6324_v26  ;;  %v4254_v19 = vld [vmem:[#allocation5 + $0x18] sm:$0x1f]  ;;  %v3469_v56 = vmax.f32 %v3441_v52, %v3455_v54  ;;  %v3272_v59 = vld [vmem:[#allocation3 + $0x50] sm:$0x1]  ;;  %v3286_v60 = vld [vmem:[#allocation3 + $0x51] sm:$0x1]  ;;  %v1931_v61 = vmul.f32 %v8987_v51, %v7216_v46 }
 0x1a2   : > { %6328 = vmatprep.mubr.msk.f32.mxu0 %vm640_vm3, %v4162_v44  ;;  %6331 = vmatprep.mubr.msk.f32.mxu1 %vm640_vm3, %v4254_v19  ;;  %3371 = vst.msk [vmem:[#allocation4 + $0x29] sm:$0x1] %vm3309_vm5, %v3357_v40  ;;  %v3300_v62 = vmax.f32 %v3272_v59, %v3286_v60  ;;  %v1921_v28 = vpop.f32.mrf.mxu0  ;;  %3427 = vst.msk [vmem:[#allocation4 + $0x2a] sm:$0x1] %vm3309_vm5, %v3413_v55  ;;  %v7247_v0 = vpop.f32.mrf.mxu1  ;;  %v9261_v63 = vld [vmem:[%s9181_s21 + $0x40] sm:$0xff]  ;;  %v9269_v43 = vld [vmem:[%s9181_s21 + $0x38] sm:$0xff] }
 0x1a3   : > { %4011 = vrot.lane.b32.xlu1 %v3989_v32, %s7781_s15  ;;  %3890 = vrot.lane.b32.xlu0 %v3867_v33, %s7780_s14  ;;  %3483 = vst.msk [vmem:[#allocation4 + $0x2b] sm:$0x1] %vm3309_vm5, %v3469_v56  ;;  %v1933_v2 = vadd.f32 %v8999_v57, %v1931_v61  ;;  %v1930_v5 = vmul.f32 %v8987_v51, %v1921_v28  ;;  %v3684_v24 = vld [vmem:[#allocation4 + $0x21] sm:$0x1f]  ;;  %v9277_v16 = vld [vmem:[%s9181_s21 + $0x30] sm:$0xff]  ;;  %v9285_v8 = vld [vmem:[%s9181_s21 + $0x28] sm:$0xff] }
 0x1a4   : > { %4166 = vmatprep.subr.mxu0 %v7777_v23  ;;  %3315 = vst.msk [vmem:[#allocation4 + $0x28] sm:$0x1] %vm3309_vm5, %v3300_v62  ;;  %v2024_v6 = vmul.f32 %v8987_v51, %v7247_v0  ;;  %4258 = vmatprep.subr.mxu1 %v7777_v23  ;;  %v2014_v11 = vpop.f32.mrf.mxu1  ;;  %v9293_v33 = vld [vmem:[%s9181_s21 + $0x20] sm:$0xff]  ;;  %v9299_v35 = vld [vmem:[%s9181_s21 + $0x18] sm:$0xff]  ;;  %v9303_v40 = vld [vmem:[%s9181_s21 + $0x10] sm:$0xff] }
 0x1a5   : > { %4167 = vmatpush1.msra.mxu0 %v9191_v39  ;;  %4259 = vmatpush1.msra.mxu1 %v9191_v39  ;;  %v1935_v45 = vmax.f32 %v1933_v2, 0.0  ;;  %v1932_v50 = vadd.f32 %v8999_v57, %v1930_v5  ;;  %v2023_v42 = vmul.f32 %v8987_v51, %v2014_v11 }
 0x1a6   : > { %4168 = vmatprep.subr.mxu0 %v7777_v23  ;;  %v2026_v58 = vadd.f32 %v8999_v57, %v2024_v6  ;;  %4260 = vmatprep.subr.mxu1 %v7777_v23 }
 0x1a7   : > { %4072 = vrot.lane.b32.xlu1 %v4050_v10, %s7782_s16  ;;  %4169 = vmatpush1.msra.mxu0 %v9208_v1  ;;  %1938 = vst.msk [vmem:[#allocation2 + $0xc8] sm:$0x1f] %vm821_vm4, %v1935_v45  ;;  %v1934_v4 = vmax.f32 %v1932_v50, 0.0  ;;  %v2025_v47 = vadd.f32 %v8999_v57, %v2023_v42  ;;  %v9319_v50 = vld [vmem:[%s9181_s21 + $0x8] sm:$0xff] }
 0x1a8   : > { %4170 = vmatprep.subr.mxu0 %v7777_v23  ;;  %v2028_v7 = vmax.f32 %v2026_v58, 0.0  ;;  %4261 = vmatpush1.msra.mxu1 %v9208_v1 }
 0x1a9   : > { %4171 = vmatpush1.msra.mxu0 %v9218_v53  ;;  %4262 = vmatprep.subr.mxu1 %v7777_v23  ;;  %1937 = vst.msk [vmem:[#allocation2 + $0xc0] sm:$0xff] %vm640_vm3, %v1934_v4  ;;  %v2027_v17 = vmax.f32 %v2025_v47, 0.0  ;;  %v9330_v4 = vld [vmem:[%s9181_s21] sm:$0xff] }
 0x1aa   : > { %4172 = vmatprep.subr.mxu0 %v7777_v23  ;;  %2031 = vst.msk [vmem:[#allocation2 + $0xe8] sm:$0x1f] %vm821_vm4, %v2028_v7  ;;  %4263 = vmatpush1.msra.mxu1 %v9218_v53  ;;  %v4112_v15 = vld [vmem:[#allocation4 + $0x2a] sm:$0x1f] }
 0x1ab   : > { %3829 = vrot.lane.b32.xlu1 %v3806_v14, %s7778_s28  ;;  %4173 = vmatpush1.msra.mxu0 %v9228_v12  ;;  %v3990_v18 = vld [vmem:[#allocation4 + $0x28] sm:$0x1f]  ;;  %2030 = vst.msk [vmem:[#allocation2 + $0xe0] sm:$0xff] %vm640_vm3, %v2027_v17 }
 0x1ac   : > { %4174 = vmatprep.subr.mxu0 %v7777_v23  ;;  %4013 = vrot.lane.b32.xlu0 %v3990_v18, %s7781_s15  ;;  %4122 = vst.msk [vmem:[#allocation5 + $0x38] sm:$0x1f] %vm821_vm4, %v4112_v15  ;;  %v4051_v22 = vld [vmem:[#allocation4 + $0x29] sm:$0x1f] }
 0x1ad   : > { %4175 = vmatpush1.msra.mxu0 %v9237_v3  ;;  %4264 = vmatprep.subr.mxu1 %v7777_v23  ;;  %v3807_v29 = vld [vmem:[#allocation4 + $0x28] sm:$0x1f] }
 0x1ae   : > { %4176 = vmatprep.subr.mxu0 %v7777_v23  ;;  %v3250_v13 = vld [vmem:[#allocation2 + $0xc8] sm:$0x3f]  ;;  %4265 = vmatpush1.msra.mxu1 %v9228_v12 }
 0x1af   : > { %3951 = vrot.lane.b32.xlu1 %v3928_v49, %s7779_s29  ;;  %4177 = vmatpush1.msra.mxu0 %v9246_v9  ;;  %v3259_v25 = vmax.f32 %v3250_v13, %v3255_v48  ;;  %v3929_v32 = vld [vmem:[#allocation4 + $0x2a] sm:$0x1f]  ;;  %v9350_v13 = vld [vmem:[%s9181_s21 + $0x80] sm:$0xff] }
 0x1b0   : > { %4178 = vmatprep.subr.mxu0 %v7777_v23  ;;  %3708 = vrot.lane.b32.xlu0 %v3684_v24, %s7775_s24  ;;  %v3249_v26 = vld [vmem:[#allocation2 + $0xc0] sm:$0xff]  ;;  %v3868_v34 = vld [vmem:[#allocation4 + $0x29] sm:$0x1f] }
 0x1b1   : > { %4179 = vmatpush1.msra.mxu0 %v9254_v20  ;;  %4266 = vmatprep.subr.mxu1 %v7777_v23  ;;  %3264 = vst.msk [vmem:[#allocation3 + $0x68] sm:$0x3f] %vm642_vm2, %v3259_v25  ;;  %v3258_v27 = vmax.f32 %v3249_v26, %v3254_v21  ;;  %v9340_v18 = vld [vmem:[%s9181_s21 + $0x88] sm:$0xff] }
 0x1b2   : > { %4180 = vmatprep.subr.mxu0 %v7777_v23  ;;  %4267 = vmatpush1.msra.mxu1 %v9237_v3 }
 0x1b3   : > { %4074 = vrot.lane.b32.xlu1 %v4051_v22, %s7782_s16  ;;  %4181 = vmatpush1.msra.mxu0 %v9261_v63  ;;  %3263 = vst.msk [vmem:[#allocation3 + $0x60] sm:$0xff] %vm640_vm3, %v3258_v27 }
 0x1b4   : > { %4182 = vmatprep.subr.mxu0 %v7777_v23  ;;  %3831 = vrot.lane.b32.xlu0 %v3807_v29, %s7778_s28 }
 0x1b5   : > { %4183 = vmatpush1.msra.mxu0 %v9269_v43  ;;  %4268 = vmatprep.subr.mxu1 %v7777_v23  ;;  %v3824_v31 = vpop.permute.xlu1 %3823  ;;  %v3946_v44 = vpop.permute.xlu0 %3945 }
 0x1b6   : > { %4184 = vmatprep.subr.mxu0 %v7777_v23  ;;  %3854 = vst.msk [vmem:[#allocation5] sm:$0x1f] %vm3853_vm8, %v3824_v31  ;;  %4269 = vmatpush1.msra.mxu1 %v9246_v9 }
 0x1b7   : > { %3769 = vrot.lane.b32.xlu1 %v3745_v30, %s7776_s27  ;;  %4185 = vmatpush1.msra.mxu0 %v9277_v16 }
 0x1b8   : > { %4186 = vmatprep.subr.mxu0 %v7777_v23  ;;  %3953 = vrot.lane.b32.xlu0 %v3929_v32, %s7779_s29  ;;  %v3498_v36 = vld [vmem:[#allocation3 + $0x68] sm:$0x1]  ;;  %v3512_v37 = vld [vmem:[#allocation3 + $0x69] sm:$0x1]  ;;  %v3554_v38 = vld [vmem:[#allocation3 + $0x6a] sm:$0x1] }
 0x1b9   : > { %4187 = vmatpush1.msra.mxu0 %v9285_v8  ;;  %4270 = vmatprep.subr.mxu1 %v7777_v23  ;;  %v3526_v41 = vmax.f32 %v3498_v36, %v3512_v37  ;;  %v3568_v52 = vld [vmem:[#allocation3 + $0x6b] sm:$0x1]  ;;  %v3610_v54 = vld [vmem:[#allocation3 + $0x6c] sm:$0x1]  ;;  %v3624_v19 = vld [vmem:[#allocation3 + $0x6d] sm:$0x1] }
 0x1ba   : > { %4188 = vmatprep.subr.mxu0 %v7777_v23  ;;  %v3885_v46 = vpop.permute.xlu1 %3884  ;;  %v3703_v55 = vpop.permute.xlu0 %3702  ;;  %v3273_v56 = vld [vmem:[#allocation3 + $0x60] sm:$0x1]  ;;  %v3287_v59 = vld [vmem:[#allocation3 + $0x61] sm:$0x1]  ;;  %v3330_v60 = vld [vmem:[#allocation3 + $0x62] sm:$0x1]  ;;  %v3582_v61 = vmax.f32 %v3554_v38, %v3568_v52  ;;  %4271 = vmatpush1.msra.mxu1 %v9254_v20  ;;  %v3638_v62 = vmax.f32 %v3610_v54, %v3624_v19 }
 0x1bb   : > { %3892 = vrot.lane.b32.xlu1 %v3868_v34, %s7780_s14  ;;  %4189 = vmatpush1.msra.mxu0 %v9293_v33  ;;  %3915 = vst.msk [vmem:[#allocation5] sm:$0x1f] %vm3914_vm9, %v3885_v46  ;;  %v3301_v28 = vmax.f32 %v3273_v56, %v3287_v59  ;;  %v3344_v0 = vld [vmem:[#allocation3 + $0x63] sm:$0x1]  ;;  %v3386_v2 = vld [vmem:[#allocation3 + $0x64] sm:$0x1] }
 0x1bc   : > { %4190 = vmatprep.subr.mxu0 %v7777_v23  ;;  %3732 = vst.msk [vmem:[#allocation5 + $0x10] sm:$0x1f] %vm3730_vm6, %v3703_v55  ;;  %v3400_v5 = vld [vmem:[#allocation3 + $0x65] sm:$0x1]  ;;  %4272 = vmatprep.subr.mxu1 %v7777_v23  ;;  %v3358_v6 = vmax.f32 %v3330_v60, %v3344_v0  ;;  %v3442_v11 = vld [vmem:[#allocation3 + $0x66] sm:$0x1] }
 0x1bd   : > { %3540 = vst.msk [vmem:[#allocation4 + $0x34] sm:$0x1] %vm3309_vm5, %v3526_v41  ;;  %4191 = vmatpush1.msra.mxu0 %v9299_v35  ;;  %v3414_v10 = vmax.f32 %v3386_v2, %v3400_v5  ;;  %v3456_v45 = vld [vmem:[#allocation3 + $0x67] sm:$0x1]  ;;  %3596 = vst.msk [vmem:[#allocation4 + $0x35] sm:$0x1] %vm3309_vm5, %v3582_v61  ;;  %4273 = vmatpush1.msra.mxu1 %v9261_v63 }
 0x1be   : > { %3976 = vst.msk [vmem:[#allocation5] sm:$0x1f] %vm3975_vm10, %v3946_v44  ;;  %4192 = vmatprep.subr.mxu0 %v7777_v23  ;;  %v3470_v58 = vmax.f32 %v3442_v11, %v3456_v45  ;;  %4274 = vmatprep.subr.mxu1 %v7777_v23  ;;  %v7278_v42 = vpop.f32.mrf.mxu0  ;;  %v3151_v32 = vld [vmem:[#allocation2 + $0xe8] sm:$0x3f]  ;;  %v3150_v37 = vld [vmem:[#allocation2 + $0xe0] sm:$0xff] }
 0x1bf   : > { %3652 = vst.msk [vmem:[#allocation4 + $0x36] sm:$0x1] %vm3309_vm5, %v3638_v62  ;;  %3316 = vst.msk [vmem:[#allocation4 + $0x30] sm:$0x1] %vm3309_vm5, %v3301_v28  ;;  %4193 = vmatpush1.msra.mxu0 %v9303_v40  ;;  %4275 = vmatpush1.msra.mxu1 %v9269_v43  ;;  %v3764_v7 = vpop.permute.xlu0 %3763  ;;  %v2117_v47 = vmul.f32 %v8987_v51, %v7278_v42 }
 0x1c0   : > { %3372 = vst.msk [vmem:[#allocation4 + $0x31] sm:$0x1] %vm3309_vm5, %v3358_v6  ;;  %3428 = vst.msk [vmem:[#allocation4 + $0x32] sm:$0x1] %vm3309_vm5, %v3414_v10  ;;  %4194 = vmatprep.subr.mxu0 %v7777_v23  ;;  %4276 = vmatprep.subr.mxu1 %v7777_v23  ;;  %v2107_v14 = vpop.f32.mrf.mxu0  ;;  %v7309_v17 = vpop.f32.mrf.mxu1 }
 0x1c1   : > { %3484 = vst.msk [vmem:[#allocation4 + $0x33] sm:$0x1] %vm3309_vm5, %v3470_v58  ;;  %4195 = vmatpush1.msra.mxu0 %v9319_v50  ;;  %4277 = vmatpush1.msra.mxu1 %v9277_v16  ;;  %v2119_v15 = vadd.f32 %v8999_v57, %v2117_v47  ;;  %v2116_v49 = vmul.f32 %v8987_v51, %v2107_v14 }
 0x1c2   : > { %3793 = vst.msk [vmem:[#allocation5 + $0x10] sm:$0x1f] %vm3791_vm7, %v3764_v7  ;;  %4196 = vmatprep.subr.mxu0 %v7777_v23  ;;  %v2210_v48 = vmul.f32 %v8987_v51, %v7309_v17  ;;  %4278 = vmatprep.subr.mxu1 %v7777_v23  ;;  %v2200_v21 = vpop.f32.mrf.mxu1 }
 0x1c3   : > { %4197 = vmatpush1.msra.mxu0 %v9330_v4  ;;  %4279 = vmatpush1.msra.mxu1 %v9285_v8  ;;  %v2121_v22 = vmax.f32 %v2119_v15, 0.0  ;;  %v2118_v24 = vadd.f32 %v8999_v57, %v2116_v49  ;;  %v2209_v26 = vmul.f32 %v8987_v51, %v2200_v21  ;;  %v9394_v15 = vld [vmem:[%s8540_s20] ss:$0 sm:$0xff] }
 0x1c4   : > { %4226 = vmatprep.subr.mxu0 %v7777_v23  ;;  %v2212_v25 = vadd.f32 %v8999_v57, %v2210_v48  ;;  %4280 = vmatprep.subr.mxu1 %v7777_v23 }
 0x1c5   : > { %4227 = vmatpush2.msra.mxu0 %v9340_v18  ;;  %4281 = vmatpush1.msra.mxu1 %v9293_v33  ;;  %2124 = vst.msk [vmem:[#allocation2 + $0xf8] sm:$0x1f] %vm821_vm4, %v2121_v22  ;;  %v2120_v27 = vmax.f32 %v2118_v24, 0.0  ;;  %v2211_v30 = vadd.f32 %v8999_v57, %v2209_v26  ;;  %v9399_v24 = vld [vmem:[%s8553_s23] ss:$0 sm:$0xff] }
 0x1c6   : > { %4228 = vmatprep.subr.mxu0 %v7777_v23  ;;  %v2214_v29 = vmax.f32 %v2212_v25, 0.0  ;;  %4282 = vmatprep.subr.mxu1 %v7777_v23 }
 0x1c7   : > { %4229 = vmatpush2.msra.mxu0 %v9350_v13  ;;  %4283 = vmatpush1.msra.mxu1 %v9299_v35  ;;  %2123 = vst.msk [vmem:[#allocation2 + $0xf0] sm:$0xff] %vm640_vm3, %v2120_v27  ;;  %v2213_v44 = vmax.f32 %v2211_v30, 0.0 }
 0x1c8   : > { %v3991_v31 = vld [vmem:[#allocation4 + $0x30] sm:$0x1f]  ;;  %4339 = vmatprep.subr.mxu0 %v7777_v23  ;;  %2217 = vst.msk [vmem:[#allocation2 + $0x108] sm:$0x1f] %vm821_vm4, %v2214_v29  ;;  %4284 = vmatprep.subr.mxu1 %v7777_v23 }
 0x1c9   : > { %v4113_v51 = vld [vmem:[#allocation4 + $0x32] sm:$0x1f]  ;;  %4015 = vrot.lane.b32.xlu1 %v3991_v31, %s7781_s15  ;;  %4285 = vmatpush1.msra.mxu1 %v9303_v40  ;;  %2216 = vst.msk [vmem:[#allocation2 + $0x100] sm:$0xff] %vm640_vm3, %v2213_v44 }
 0x1ca   : > { %4123 = vst.msk [vmem:[#allocation5 + $0x48] sm:$0x1f] %vm821_vm4, %v4113_v51  ;;  %4286 = vmatprep.subr.mxu1 %v7777_v23  ;;  %v4052_v57 = vld [vmem:[#allocation4 + $0x31] sm:$0x1f] }
 0x1cb   : > { %4287 = vmatpush1.msra.mxu1 %v9319_v50 }
 0x1cc   : > { %4288 = vmatprep.subr.mxu1 %v7777_v23  ;;  %v3155_v34 = vld [vmem:[#allocation2 + $0xf8] sm:$0x3f] }
 0x1cd   : > { %4076 = vrot.lane.b32.xlu1 %v4052_v57, %s7782_s16  ;;  %4289 = vmatpush1.msra.mxu1 %v9330_v4  ;;  %v3159_v36 = vmax.f32 %v3151_v32, %v3155_v34 }
 0x1ce   : > { %4318 = vmatprep.subr.mxu1 %v7777_v23  ;;  %v3154_v38 = vld [vmem:[#allocation2 + $0xf0] sm:$0xff] }
 0x1cf   : > { %4319 = vmatpush2.msra.mxu1 %v9340_v18  ;;  %3163 = vst.msk [vmem:[#allocation3 + $0x78] sm:$0x3f] %vm642_vm2, %v3159_v36  ;;  %v3158_v41 = vmax.f32 %v3150_v37, %v3154_v38  ;;  %v4335_v36 = vld [vmem:[#allocation5 + $0x28] sm:$0x1f] }
 0x1d0   : > { %4320 = vmatprep.subr.mxu1 %v7777_v23 }
 0x1d1   : > { %4321 = vmatpush2.msra.mxu1 %v9350_v13  ;;  %3162 = vst.msk [vmem:[#allocation3 + $0x70] sm:$0xff] %vm640_vm3, %v3158_v41 }
 0x1d2   : > { %4420 = vmatprep.subr.mxu1 %v7777_v23 }
 0x1d5   : > { %v4008_v52 = vpop.permute.xlu1 %4007 }
 0x1d6   : > { %4038 = vst.msk [vmem:[#allocation5] sm:$0x1f] %vm4037_vm11, %v4008_v52  ;;  %v3499_v54 = vld [vmem:[#allocation3 + $0x78] sm:$0x1]  ;;  %v3513_v19 = vld [vmem:[#allocation3 + $0x79] sm:$0x1]  ;;  %v3887_v29 = vpop.permute.xlu0 %3886 }
 0x1d7   : > { %v3555_v46 = vld [vmem:[#allocation3 + $0x7a] sm:$0x1]  ;;  %v3527_v55 = vmax.f32 %v3499_v54, %v3513_v19  ;;  %v3569_v56 = vld [vmem:[#allocation3 + $0x7b] sm:$0x1]  ;;  %v3611_v59 = vld [vmem:[#allocation3 + $0x7c] sm:$0x1] }
 0x1d8   : > { %v3625_v60 = vld [vmem:[#allocation3 + $0x7d] sm:$0x1]  ;;  %v3331_v61 = vld [vmem:[#allocation3 + $0x72] sm:$0x1]  ;;  %v3345_v62 = vld [vmem:[#allocation3 + $0x73] sm:$0x1]  ;;  %v3583_v0 = vmax.f32 %v3555_v46, %v3569_v56 }
 0x1d9   : > { %v3387_v28 = vld [vmem:[#allocation3 + $0x74] sm:$0x1]  ;;  %v3639_v2 = vmax.f32 %v3611_v59, %v3625_v60  ;;  %v3359_v5 = vmax.f32 %v3331_v61, %v3345_v62  ;;  %v3401_v6 = vld [vmem:[#allocation3 + $0x75] sm:$0x1]  ;;  %v3443_v10 = vld [vmem:[#allocation3 + $0x76] sm:$0x1] }
 0x1da   : > { %v3457_v11 = vld [vmem:[#allocation3 + $0x77] sm:$0x1]  ;;  %3541 = vst.msk [vmem:[#allocation4 + $0x3c] sm:$0x1] %vm3309_vm5, %v3527_v55  ;;  %v3415_v58 = vmax.f32 %v3387_v28, %v3401_v6  ;;  %3597 = vst.msk [vmem:[#allocation4 + $0x3d] sm:$0x1] %vm3309_vm5, %v3583_v0 }
 0x1db   : > { %v3471_v42 = vmax.f32 %v3443_v10, %v3457_v11  ;;  %3653 = vst.msk [vmem:[#allocation4 + $0x3e] sm:$0x1] %vm3309_vm5, %v3639_v2  ;;  %v3274_v7 = vld [vmem:[#allocation3 + $0x70] sm:$0x1]  ;;  %v3288_v47 = vld [vmem:[#allocation3 + $0x71] sm:$0x1] }
 0x1dc   : > { %v4069_v45 = vpop.permute.xlu1 %4068  ;;  %3373 = vst.msk [vmem:[#allocation4 + $0x39] sm:$0x1] %vm3309_vm5, %v3359_v5  ;;  %v3302_v14 = vmax.f32 %v3274_v7, %v3288_v47  ;;  %v7340_v17 = vpop.f32.mrf.mxu0  ;;  %3429 = vst.msk [vmem:[#allocation4 + $0x3a] sm:$0x1] %vm3309_vm5, %v3415_v58  ;;  %v3167_v55 = vld [vmem:[#allocation2 + $0x108] sm:$0x3f] }
 0x1dd   : > { %4099 = vst.msk [vmem:[#allocation5] sm:$0x1f] %vm4098_vm12, %v4069_v45  ;;  %v2303_v49 = vmul.f32 %v9394_v15, %v7340_v17  ;;  %v3166_v60 = vld [vmem:[#allocation2 + $0x100] sm:$0xff] }
 0x1de   : > { %3485 = vst.msk [vmem:[#allocation4 + $0x3b] sm:$0x1] %vm3309_vm5, %v3471_v42  ;;  %3317 = vst.msk [vmem:[#allocation4 + $0x38] sm:$0x1] %vm3309_vm5, %v3302_v14  ;;  %v2293_v48 = vpop.f32.mrf.mxu0  ;;  %v7371_v21 = vpop.f32.mrf.mxu1 }
 0x1df   : > { %v2305_v25 = vadd.f32 %v9399_v24, %v2303_v49  ;;  %v2302_v26 = vmul.f32 %v9394_v15, %v2293_v48  ;;  %v2396_v27 = vmul.f32 %v9394_v15, %v7371_v21 }
 0x1e0   : > { %v3826_v22 = vpop.permute.xlu1 %3825  ;;  %v2386_v30 = vpop.f32.mrf.mxu1 }
 0x1e1   : > { %3855 = vst.msk [vmem:[#allocation5 + $0x10] sm:$0x1f] %vm3853_vm8, %v3826_v22  ;;  %v2307_v31 = vmax.f32 %v2305_v25, 0.0  ;;  %v2304_v51 = vadd.f32 %v9399_v24, %v2302_v26  ;;  %v2398_v44 = vadd.f32 %v9399_v24, %v2396_v27  ;;  %v2395_v57 = vmul.f32 %v9394_v15, %v2386_v30 }
 0x1e2   : > { %3916 = vst.msk [vmem:[#allocation5 + $0x10] sm:$0x1f] %vm3914_vm9, %v3887_v29 }
 0x1e3   : > { %2310 = vst.msk [vmem:[#allocation2 + $0x118] sm:$0x1f] %vm821_vm4, %v2307_v31  ;;  %v2306_v37 = vmax.f32 %v2304_v51, 0.0  ;;  %v2400_v41 = vmax.f32 %v2398_v44, 0.0  ;;  %v2397_v52 = vadd.f32 %v9399_v24, %v2395_v57 }
 0x1e4   : > { %v4161_v32 = vld [vmem:[#allocation5] sm:$0x1f] }
 0x1e5   : > { %v3948_v34 = vpop.permute.xlu1 %3947  ;;  %4231 = vmatmul.mubr.f32.vlgmr.msra.gmra.mxu0 %v4161_v32  ;;  %v3685_v38 = vld [vmem:[#allocation4 + $0x39] sm:$0x1f]  ;;  %2309 = vst.msk [vmem:[#allocation2 + $0x110] sm:$0xff] %vm640_vm3, %v2306_v37  ;;  %v2399_v19 = vmax.f32 %v2397_v52, 0.0 }
 0x1e6   : > { %3977 = vst.msk [vmem:[#allocation5 + $0x10] sm:$0x1f] %vm3975_vm10, %v3948_v34  ;;  %6332 = vmatprep.mubr.msk.f32.mxu0 %vm640_vm3, %v4335_v36  ;;  %3710 = vrot.lane.b32.xlu0 %v3685_v38, %s7775_s24  ;;  %v3665_v54 = vld [vmem:[#allocation4 + $0x38] sm:$0x1f] }
 0x1e7   : > { %2403 = vst.msk [vmem:[#allocation2 + $0x128] sm:$0x1f] %vm821_vm4, %v2400_v41  ;;  %4340 = vmatpush1.msra.mxu0 %v9191_v39  ;;  %3675 = vst.msk [vmem:[#allocation5 + $0x50] sm:$0x1f] %vm821_vm4, %v3665_v54  ;;  %v3746_v46 = vld [vmem:[#allocation4 + $0x3a] sm:$0x1f] }
 0x1e8   : > { %4341 = vmatprep.subr.mxu0 %v7777_v23  ;;  %2402 = vst.msk [vmem:[#allocation2 + $0x120] sm:$0xff] %vm640_vm3, %v2399_v19 }
 0x1e9   : > { %4342 = vmatpush1.msra.mxu0 %v9208_v1 }
 0x1ea   : > { %3771 = vrot.lane.b32.xlu0 %v3746_v46, %s7776_s27  ;;  %4343 = vmatprep.subr.mxu0 %v7777_v23  ;;  %v3171_v56 = vld [vmem:[#allocation2 + $0x118] sm:$0x3f]  ;;  %v4416_v46 = vld [vmem:[#allocation5 + $0x38] sm:$0x1f] }
 0x1eb   : > { %4344 = vmatpush1.msra.mxu0 %v9218_v53  ;;  %v3175_v59 = vmax.f32 %v3167_v55, %v3171_v56 }
 0x1ec   : > { %4345 = vmatprep.subr.mxu0 %v7777_v23  ;;  %v3170_v61 = vld [vmem:[#allocation2 + $0x110] sm:$0xff] }
 0x1ed   : > { %4346 = vmatpush1.msra.mxu0 %v9228_v12  ;;  %3180 = vst.msk [vmem:[#allocation3 + $0x88] sm:$0x3f] %vm642_vm2, %v3175_v59  ;;  %v3174_v62 = vmax.f32 %v3166_v60, %v3170_v61 }
 0x1ee   : > { %4347 = vmatprep.subr.mxu0 %v7777_v23 }
 0x1ef   : > { %4348 = vmatpush1.msra.mxu0 %v9237_v3  ;;  %3179 = vst.msk [vmem:[#allocation3 + $0x80] sm:$0xff] %vm640_vm3, %v3174_v62 }
 0x1f0   : > { %4349 = vmatprep.subr.mxu0 %v7777_v23 }
 0x1f1   : > { %4350 = vmatpush1.msra.mxu0 %v9246_v9 }
 0x1f2   : > { %4351 = vmatprep.subr.mxu0 %v7777_v23 }
 0x1f3   : > { %4352 = vmatpush1.msra.mxu0 %v9254_v20 }
 0x1f4   : > { %4353 = vmatprep.subr.mxu0 %v7777_v23  ;;  %v3500_v28 = vld [vmem:[#allocation3 + $0x88] sm:$0x1]  ;;  %v3514_v0 = vld [vmem:[#allocation3 + $0x89] sm:$0x1]  ;;  %v3556_v2 = vld [vmem:[#allocation3 + $0x8a] sm:$0x1] }
 0x1f5   : > { %4354 = vmatpush1.msra.mxu0 %v9261_v63  ;;  %v3528_v5 = vmax.f32 %v3500_v28, %v3514_v0  ;;  %v3570_v6 = vld [vmem:[#allocation3 + $0x8b] sm:$0x1]  ;;  %v3612_v10 = vld [vmem:[#allocation3 + $0x8c] sm:$0x1]  ;;  %v3626_v11 = vld [vmem:[#allocation3 + $0x8d] sm:$0x1] }
 0x1f6   : > { %4355 = vmatprep.subr.mxu0 %v7777_v23  ;;  %v3275_v42 = vld [vmem:[#allocation3 + $0x80] sm:$0x1]  ;;  %v3289_v7 = vld [vmem:[#allocation3 + $0x81] sm:$0x1]  ;;  %v3332_v47 = vld [vmem:[#allocation3 + $0x82] sm:$0x1]  ;;  %v3584_v14 = vmax.f32 %v3556_v2, %v3570_v6  ;;  %v3640_v17 = vmax.f32 %v3612_v10, %v3626_v11 }
 0x1f7   : > { %4356 = vmatpush1.msra.mxu0 %v9269_v43  ;;  %v4071_v45 = vpop.permute.xlu1 %4070  ;;  %v3303_v49 = vmax.f32 %v3275_v42, %v3289_v7  ;;  %v3346_v48 = vld [vmem:[#allocation3 + $0x83] sm:$0x1]  ;;  %v3388_v21 = vld [vmem:[#allocation3 + $0x84] sm:$0x1]  ;;  %v3402_v22 = vld [vmem:[#allocation3 + $0x85] sm:$0x1] }
 0x1f8   : > { %v4010_v58 = vpop.permute.xlu0 %4009  ;;  %4357 = vmatprep.subr.mxu0 %v7777_v23  ;;  %3542 = vst.msk [vmem:[#allocation4 + $0x44] sm:$0x1] %vm3309_vm5, %v3528_v5  ;;  %v3360_v25 = vmax.f32 %v3332_v47, %v3346_v48  ;;  %v3416_v26 = vmax.f32 %v3388_v21, %v3402_v22  ;;  %v3444_v27 = vld [vmem:[#allocation3 + $0x86] sm:$0x1]  ;;  %v3458_v29 = vld [vmem:[#allocation3 + $0x87] sm:$0x1] }
 0x1f9   : > { %4039 = vst.msk [vmem:[#allocation5 + $0x10] sm:$0x1f] %vm4037_vm11, %v4010_v58  ;;  %4358 = vmatpush1.msra.mxu0 %v9277_v16  ;;  %v3472_v30 = vmax.f32 %v3444_v27, %v3458_v29  ;;  %v3184_v11 = vld [vmem:[#allocation2 + $0x128] sm:$0x3f] }
 0x1fa   : > { %4100 = vst.msk [vmem:[#allocation5 + $0x10] sm:$0x1f] %vm4098_vm12, %v4071_v45  ;;  %4359 = vmatprep.subr.mxu0 %v7777_v23 }
 0x1fb   : > { %3598 = vst.msk [vmem:[#allocation4 + $0x45] sm:$0x1] %vm3309_vm5, %v3584_v14  ;;  %3654 = vst.msk [vmem:[#allocation4 + $0x46] sm:$0x1] %vm3309_vm5, %v3640_v17  ;;  %4360 = vmatpush1.msra.mxu0 %v9285_v8  ;;  %v7402_v44 = vpop.f32.mrf.mxu0 }
 0x1fc   : > { %3318 = vst.msk [vmem:[#allocation4 + $0x40] sm:$0x1] %vm3309_vm5, %v3303_v49  ;;  %3374 = vst.msk [vmem:[#allocation4 + $0x41] sm:$0x1] %vm3309_vm5, %v3360_v25  ;;  %4361 = vmatprep.subr.mxu0 %v7777_v23  ;;  %v3766_v31 = vpop.permute.xlu1 %3765  ;;  %v2489_v57 = vmul.f32 %v9394_v15, %v7402_v44 }
 0x1fd   : > { %3430 = vst.msk [vmem:[#allocation4 + $0x42] sm:$0x1] %vm3309_vm5, %v3416_v26  ;;  %v3705_v51 = vpop.permute.xlu0 %3704  ;;  %3486 = vst.msk [vmem:[#allocation4 + $0x43] sm:$0x1] %vm3309_vm5, %v3472_v30  ;;  %4362 = vmatpush1.msra.mxu0 %v9293_v33  ;;  %v7433_v32 = vpop.f32.mrf.mxu1 }
 0x1fe   : > { %3733 = vst.msk [vmem:[#allocation5 + $0x20] sm:$0x1f] %vm3730_vm6, %v3705_v51  ;;  %4363 = vmatprep.subr.mxu0 %v7777_v23  ;;  %v2479_v34 = vpop.f32.mrf.mxu0  ;;  %v2582_v36 = vmul.f32 %v9394_v15, %v7433_v32  ;;  %v2491_v38 = vadd.f32 %v9399_v24, %v2489_v57 }
 0x1ff   : > { %3794 = vst.msk [vmem:[#allocation5 + $0x20] sm:$0x1f] %vm3791_vm7, %v3766_v31  ;;  %4364 = vmatpush1.msra.mxu0 %v9299_v35  ;;  %v2488_v41 = vmul.f32 %v9394_v15, %v2479_v34  ;;  %v2572_v52 = vpop.f32.mrf.mxu1 }
 0x200   : > { %4365 = vmatprep.subr.mxu0 %v7777_v23  ;;  %v2584_v55 = vadd.f32 %v9399_v24, %v2582_v36  ;;  %v2581_v56 = vmul.f32 %v9394_v15, %v2572_v52  ;;  %v2493_v59 = vmax.f32 %v2491_v38, 0.0 }
 0x201   : > { %v4253_v37 = vld [vmem:[#allocation5 + $0x10] sm:$0x1f]  ;;  %4366 = vmatpush1.msra.mxu0 %v9303_v40  ;;  %v3889_v54 = vpop.permute.xlu1 %3888  ;;  %v2490_v60 = vadd.f32 %v9399_v24, %v2488_v41 }
 0x202   : > { %v3828_v19 = vpop.permute.xlu0 %3827  ;;  %4323 = vmatmul.mubr.f32.vlgmr.msra.gmra.mxu1 %v4253_v37  ;;  %4367 = vmatprep.subr.mxu0 %v7777_v23  ;;  %v2583_v28 = vadd.f32 %v9399_v24, %v2581_v56  ;;  %2496 = vst.msk [vmem:[#allocation2 + $0x138] sm:$0x1f] %vm821_vm4, %v2493_v59  ;;  %v2586_v2 = vmax.f32 %v2584_v55, 0.0 }
 0x203   : > { %3856 = vst.msk [vmem:[#allocation5 + $0x20] sm:$0x1f] %vm3853_vm8, %v3828_v19  ;;  %6333 = vmatprep.mubr.msk.f32.mxu1 %vm640_vm3, %v4416_v46  ;;  %4421 = vmatpush1.msra.mxu1 %v9191_v39  ;;  %v2492_v0 = vmax.f32 %v2490_v60, 0.0 }
 0x204   : > { %3917 = vst.msk [vmem:[#allocation5 + $0x20] sm:$0x1f] %vm3914_vm9, %v3889_v54  ;;  %v3808_v61 = vld [vmem:[#allocation4 + $0x40] sm:$0x1f]  ;;  %4422 = vmatprep.subr.mxu1 %v7777_v23  ;;  %4368 = vmatpush1.msra.mxu0 %v9319_v50  ;;  %v2585_v5 = vmax.f32 %v2583_v28, 0.0 }
 0x205   : > { %v3869_v62 = vld [vmem:[#allocation4 + $0x41] sm:$0x1f]  ;;  %3833 = vrot.lane.b32.xlu1 %v3808_v61, %s7778_s28  ;;  %4423 = vmatpush1.msra.mxu1 %v9208_v1  ;;  %2495 = vst.msk [vmem:[#allocation2 + $0x130] sm:$0xff] %vm640_vm3, %v2492_v0 }
 0x206   : > { %3894 = vrot.lane.b32.xlu0 %v3869_v62, %s7780_s14  ;;  %4369 = vmatprep.subr.mxu0 %v7777_v23  ;;  %v3666_v39 = vld [vmem:[#allocation4 + $0x40] sm:$0x1f]  ;;  %v3950_v6 = vpop.permute.xlu0 %3949  ;;  %2589 = vst.msk [vmem:[#allocation2 + $0x148] sm:$0x1f] %vm821_vm4, %v2586_v2 }
 0x207   : > { %4424 = vmatprep.subr.mxu1 %v7777_v23  ;;  %4370 = vmatpush1.msra.mxu0 %v9330_v4  ;;  %3676 = vst.msk [vmem:[#allocation5 + $0x60] sm:$0x1f] %vm821_vm4, %v3666_v39  ;;  %v3930_v10 = vld [vmem:[#allocation4 + $0x42] sm:$0x1f] }
 0x208   : > { %3978 = vst.msk [vmem:[#allocation5 + $0x20] sm:$0x1f] %vm3975_vm10, %v3950_v6  ;;  %4425 = vmatpush1.msra.mxu1 %v9218_v53  ;;  %4399 = vmatprep.subr.mxu0 %v7777_v23 }
 0x209   : > { %2588 = vst.msk [vmem:[#allocation2 + $0x140] sm:$0xff] %vm640_vm3, %v2585_v5  ;;  %3955 = vrot.lane.b32.xlu1 %v3930_v10, %s7779_s29  ;;  %4426 = vmatprep.subr.mxu1 %v7777_v23  ;;  %v3188_v45 = vld [vmem:[#allocation2 + $0x138] sm:$0x3f] }
 0x20a   : > { %4427 = vmatpush1.msra.mxu1 %v9228_v12  ;;  %4400 = vmatpush2.msra.mxu0 %v9340_v18  ;;  %v3192_v53 = vmax.f32 %v3184_v11, %v3188_v45  ;;  %v3183_v12 = vld [vmem:[#allocation2 + $0x120] sm:$0xff]  ;;  %v9548_v5 = vld [vmem:[%s9181_s21 + $0x78] sm:$0xff] }
 0x20b   : > { %v3707_v1 = vpop.permute.xlu0 %3706  ;;  %4428 = vmatprep.subr.mxu1 %v7777_v23  ;;  %4401 = vmatprep.subr.mxu0 %v7777_v23 }
 0x20c   : > { %3734 = vst.msk [vmem:[#allocation5 + $0x30] sm:$0x1f] %vm3730_vm6, %v3707_v1  ;;  %4429 = vmatpush1.msra.mxu1 %v9237_v3  ;;  %4402 = vmatpush2.msra.mxu0 %v9350_v13  ;;  %v3187_v58 = vld [vmem:[#allocation2 + $0x130] sm:$0xff] }
 0x20d   : > { %4430 = vmatprep.subr.mxu1 %v7777_v23  ;;  %4501 = vmatprep.subr.mxu0 %v7777_v23  ;;  %3197 = vst.msk [vmem:[#allocation3 + $0x98] sm:$0x3f] %vm642_vm2, %v3192_v53  ;;  %v3191_v42 = vmax.f32 %v3183_v12, %v3187_v58  ;;  %v3747_v53 = vld [vmem:[#allocation4 + $0x42] sm:$0x1f] }
 0x20e   : > { %4431 = vmatpush1.msra.mxu1 %v9246_v9 }
 0x20f   : > { %4432 = vmatprep.subr.mxu1 %v7777_v23  ;;  %v3768_v7 = vpop.permute.xlu0 %3767  ;;  %3196 = vst.msk [vmem:[#allocation3 + $0x90] sm:$0xff] %vm640_vm3, %v3191_v42  ;;  %v9562_v42 = vld [vmem:[%s9181_s21 + $0x70] sm:$0xff] }
 0x210   : > { %4433 = vmatpush1.msra.mxu1 %v9254_v20  ;;  %3795 = vst.msk [vmem:[#allocation5 + $0x30] sm:$0x1f] %vm3791_vm7, %v3768_v7  ;;  %v3686_v7 = vld [vmem:[#allocation4 + $0x41] sm:$0x1f] }
 0x211   : > { %4434 = vmatprep.subr.mxu1 %v7777_v23 }
 0x212   : > { %4435 = vmatpush1.msra.mxu1 %v9261_v63 }
 0x213   : > { %4436 = vmatprep.subr.mxu1 %v7777_v23 }
 0x214   : > { %4437 = vmatpush1.msra.mxu1 %v9269_v43  ;;  %v3501_v9 = vld [vmem:[#allocation3 + $0x98] sm:$0x1]  ;;  %v3515_v20 = vld [vmem:[#allocation3 + $0x99] sm:$0x1]  ;;  %v3557_v47 = vld [vmem:[#allocation3 + $0x9a] sm:$0x1] }
 0x215   : > { %v4012_v3 = vpop.permute.xlu1 %4011  ;;  %4438 = vmatprep.subr.mxu1 %v7777_v23  ;;  %v3529_v14 = vmax.f32 %v3501_v9, %v3515_v20  ;;  %v3571_v17 = vld [vmem:[#allocation3 + $0x9b] sm:$0x1]  ;;  %v3613_v49 = vld [vmem:[#allocation3 + $0x9c] sm:$0x1]  ;;  %v3627_v63 = vld [vmem:[#allocation3 + $0x9d] sm:$0x1]  ;;  %v3891_v32 = vpop.permute.xlu0 %3890 }
 0x216   : > { %4040 = vst.msk [vmem:[#allocation5 + $0x20] sm:$0x1f] %vm4037_vm11, %v4012_v3  ;;  %4439 = vmatpush1.msra.mxu1 %v9277_v16  ;;  %v3333_v48 = vld [vmem:[#allocation3 + $0x92] sm:$0x1]  ;;  %v3347_v43 = vld [vmem:[#allocation3 + $0x93] sm:$0x1]  ;;  %v3585_v22 = vmax.f32 %v3557_v47, %v3571_v17  ;;  %v3641_v25 = vmax.f32 %v3613_v49, %v3627_v63 }
 0x217   : > { %4440 = vmatprep.subr.mxu1 %v7777_v23  ;;  %v3389_v21 = vld [vmem:[#allocation3 + $0x94] sm:$0x1]  ;;  %v3361_v27 = vmax.f32 %v3333_v48, %v3347_v43  ;;  %v3403_v29 = vld [vmem:[#allocation3 + $0x95] sm:$0x1]  ;;  %v3445_v30 = vld [vmem:[#allocation3 + $0x96] sm:$0x1] }
 0x218   : > { %4441 = vmatpush1.msra.mxu1 %v9285_v8  ;;  %v3459_v31 = vld [vmem:[#allocation3 + $0x97] sm:$0x1]  ;;  %3543 = vst.msk [vmem:[#allocation4 + $0x4c] sm:$0x1] %vm3309_vm5, %v3529_v14  ;;  %v3417_v51 = vmax.f32 %v3389_v21, %v3403_v29  ;;  %3599 = vst.msk [vmem:[#allocation4 + $0x4d] sm:$0x1] %vm3309_vm5, %v3585_v22 }
 0x219   : > { %v4073_v26 = vpop.permute.xlu1 %4072  ;;  %4442 = vmatprep.subr.mxu1 %v7777_v23  ;;  %v3473_v8 = vmax.f32 %v3445_v30, %v3459_v31  ;;  %v3276_v44 = vld [vmem:[#allocation3 + $0x90] sm:$0x1]  ;;  %v3290_v57 = vld [vmem:[#allocation3 + $0x91] sm:$0x1]  ;;  %3655 = vst.msk [vmem:[#allocation4 + $0x4e] sm:$0x1] %vm3309_vm5, %v3641_v25 }
 0x21a   : > { %4101 = vst.msk [vmem:[#allocation5 + $0x20] sm:$0x1f] %vm4098_vm12, %v4073_v26  ;;  %4443 = vmatpush1.msra.mxu1 %v9293_v33  ;;  %v3304_v34 = vmax.f32 %v3276_v44, %v3290_v57  ;;  %v9572_v9 = vld [vmem:[%s9181_s21 + $0x68] sm:$0xff]  ;;  %v9580_v47 = vld [vmem:[%s9181_s21 + $0x60] sm:$0xff]  ;;  %v9587_v22 = vld [vmem:[%s9181_s21 + $0x58] sm:$0xff] }
 0x21b   : > { %3375 = vst.msk [vmem:[#allocation4 + $0x49] sm:$0x1] %vm3309_vm5, %v3361_v27  ;;  %4444 = vmatprep.subr.mxu1 %v7777_v23  ;;  %3431 = vst.msk [vmem:[#allocation4 + $0x4a] sm:$0x1] %vm3309_vm5, %v3417_v51  ;;  %v3201_v14 = vld [vmem:[#allocation2 + $0x148] sm:$0x3f] }
 0x21c   : > { %3487 = vst.msk [vmem:[#allocation4 + $0x4b] sm:$0x1] %vm3309_vm5, %v3473_v8  ;;  %4445 = vmatpush1.msra.mxu1 %v9299_v35  ;;  %3319 = vst.msk [vmem:[#allocation4 + $0x48] sm:$0x1] %vm3309_vm5, %v3304_v34  ;;  %v7464_v36 = vpop.f32.mrf.mxu0  ;;  %v3200_v25 = vld [vmem:[#allocation2 + $0x140] sm:$0xff]  ;;  %v9596_v30 = vld [vmem:[%s9181_s21 + $0x50] sm:$0xff] }
 0x21d   : > { %v3830_v33 = vpop.permute.xlu1 %3829  ;;  %4446 = vmatprep.subr.mxu1 %v7777_v23  ;;  %v2675_v37 = vmul.f32 %v9394_v15, %v7464_v36  ;;  %v9604_v51 = vld [vmem:[%s9181_s21 + $0x48] sm:$0xff]  ;;  %v9610_v8 = vld [vmem:[%s9181_s21 + $0x40] sm:$0xff]  ;;  %v9618_v57 = vld [vmem:[%s9181_s21 + $0x38] sm:$0xff] }
 0x21e   : > { %3857 = vst.msk [vmem:[#allocation5 + $0x30] sm:$0x1f] %vm3853_vm8, %v3830_v33  ;;  %4447 = vmatpush1.msra.mxu1 %v9303_v40  ;;  %v4014_v38 = vpop.permute.xlu0 %4013  ;;  %v2665_v41 = vpop.f32.mrf.mxu0  ;;  %v4497_v40 = vld [vmem:[#allocation5 + $0x48] sm:$0x1f] }
 0x21f   : > { %3918 = vst.msk [vmem:[#allocation5 + $0x30] sm:$0x1f] %vm3914_vm9, %v3891_v32  ;;  %4448 = vmatprep.subr.mxu1 %v7777_v23  ;;  %v7495_v52 = vpop.f32.mrf.mxu1  ;;  %v2677_v19 = vadd.f32 %v9399_v24, %v2675_v37  ;;  %v2674_v46 = vmul.f32 %v9394_v15, %v2665_v41 }
 0x220   : > { %4449 = vmatpush1.msra.mxu1 %v9319_v50  ;;  %v2768_v55 = vmul.f32 %v9394_v15, %v7495_v52 }
 0x221   : > { %v3952_v35 = vpop.permute.xlu1 %3951  ;;  %v4334_v54 = vld [vmem:[#allocation5 + $0x20] sm:$0x1f]  ;;  %4450 = vmatprep.subr.mxu1 %v7777_v23  ;;  %v2758_v56 = vpop.f32.mrf.mxu1  ;;  %v2679_v59 = vmax.f32 %v2677_v19, 0.0  ;;  %v2676_v60 = vadd.f32 %v9399_v24, %v2674_v46 }
 0x222   : > { %3979 = vst.msk [vmem:[#allocation5 + $0x30] sm:$0x1f] %vm3975_vm10, %v3952_v35  ;;  %4404 = vmatmul.mubr.f32.vlgmr.msra.gmra.mxu0 %v4334_v54  ;;  %4451 = vmatpush1.msra.mxu1 %v9330_v4  ;;  %v2770_v62 = vadd.f32 %v9399_v24, %v2768_v55  ;;  %v3709_v28 = vpop.permute.xlu0 %3708  ;;  %v2767_v0 = vmul.f32 %v9394_v15, %v2758_v56 }
 0x223   : > { %6334 = vmatprep.mubr.msk.f32.mxu0 %vm640_vm3, %v4497_v40  ;;  %v4053_v61 = vld [vmem:[#allocation4 + $0x49] sm:$0x1f]  ;;  %4041 = vst.msk [vmem:[#allocation5 + $0x30] sm:$0x1f] %vm4037_vm11, %v4014_v38  ;;  %4480 = vmatprep.subr.mxu1 %v7777_v23  ;;  %v2678_v39 = vmax.f32 %v2676_v60, 0.0 }
 0x224   : > { %4078 = vrot.lane.b32.xlu1 %v4053_v61, %s7782_s16  ;;  %v3992_v2 = vld [vmem:[#allocation4 + $0x48] sm:$0x1f]  ;;  %3735 = vst.msk [vmem:[#allocation5 + $0x40] sm:$0x1f] %vm3730_vm6, %v3709_v28  ;;  %4502 = vmatpush1.msra.mxu0 %v9548_v5  ;;  %v2772_v10 = vmax.f32 %v2770_v62, 0.0  ;;  %v2769_v1 = vadd.f32 %v9399_v24, %v2767_v0 }
 0x225   : > { %2682 = vst.msk [vmem:[#allocation2 + $0x158] sm:$0x1f] %vm821_vm4, %v2679_v59  ;;  %4017 = vrot.lane.b32.xlu0 %v3992_v2, %s7781_s15  ;;  %v4075_v6 = vpop.permute.xlu1 %4074  ;;  %4481 = vmatpush2.msra.mxu1 %v9340_v18  ;;  %v4114_v11 = vld [vmem:[#allocation4 + $0x4a] sm:$0x1f] }
 0x226   : > { %4102 = vst.msk [vmem:[#allocation5 + $0x30] sm:$0x1f] %vm4098_vm12, %v4075_v6  ;;  %4503 = vmatprep.subr.mxu0 %v7777_v23  ;;  %4482 = vmatprep.subr.mxu1 %v7777_v23  ;;  %v3667_v45 = vld [vmem:[#allocation4 + $0x48] sm:$0x1f]  ;;  %v2771_v12 = vmax.f32 %v2769_v1, 0.0  ;;  %v3832_v58 = vpop.permute.xlu0 %3831  ;;  %v9639_v6 = vld [vmem:[%s9181_s21 + $0x20] sm:$0xff] }
 0x227   : > { %4124 = vst.msk [vmem:[#allocation5 + $0x58] sm:$0x1f] %vm821_vm4, %v4114_v11  ;;  %2775 = vst.msk [vmem:[#allocation2 + $0x168] sm:$0x1f] %vm821_vm4, %v2772_v10  ;;  %4504 = vmatpush1.msra.mxu0 %v9562_v42  ;;  %4483 = vmatpush2.msra.mxu1 %v9350_v13  ;;  %v3870_v20 = vld [vmem:[#allocation4 + $0x49] sm:$0x1f] }
 0x228   : > { %2681 = vst.msk [vmem:[#allocation2 + $0x150] sm:$0xff] %vm640_vm3, %v2678_v39  ;;  %3773 = vrot.lane.b32.xlu1 %v3747_v53, %s7776_s27  ;;  %4505 = vmatprep.subr.mxu0 %v7777_v23  ;;  %2774 = vst.msk [vmem:[#allocation2 + $0x160] sm:$0xff] %vm640_vm3, %v2771_v12  ;;  %v3809_v49 = vld [vmem:[#allocation4 + $0x48] sm:$0x1f]  ;;  %v9650_v10 = vld [vmem:[%s9181_s21 + $0x18] sm:$0xff] }
 0x229   : > { %3677 = vst.msk [vmem:[#allocation5 + $0x70] sm:$0x1f] %vm821_vm4, %v3667_v45  ;;  %3712 = vrot.lane.b32.xlu0 %v3686_v7, %s7775_s24  ;;  %v3770_v3 = vpop.permute.xlu1 %3769  ;;  %4506 = vmatpush1.msra.mxu0 %v9572_v9  ;;  %v3931_v31 = vld [vmem:[#allocation4 + $0x4a] sm:$0x1f]  ;;  %v9658_v53 = vld [vmem:[%s9181_s21 + $0x10] sm:$0xff] }
 0x22a   : > { %3796 = vst.msk [vmem:[#allocation5 + $0x40] sm:$0x1f] %vm3791_vm7, %v3770_v3  ;;  %4507 = vmatprep.subr.mxu0 %v7777_v23  ;;  %4582 = vmatprep.subr.mxu1 %v7777_v23  ;;  %v3954_v63 = vpop.permute.xlu0 %3953  ;;  %v3687_v44 = vld [vmem:[#allocation4 + $0x49] sm:$0x1f] }
 0x22b   : > { %3858 = vst.msk [vmem:[#allocation5 + $0x40] sm:$0x1f] %vm3853_vm8, %v3832_v58  ;;  %4508 = vmatpush1.msra.mxu0 %v9580_v47  ;;  %v3748_v32 = vld [vmem:[#allocation4 + $0x4a] sm:$0x1f] }
 0x22c   : > { %v3205_v17 = vld [vmem:[#allocation2 + $0x158] sm:$0x3f]  ;;  %3896 = vrot.lane.b32.xlu1 %v3870_v20, %s7780_s14  ;;  %4509 = vmatprep.subr.mxu0 %v7777_v23  ;;  %v9630_v60 = vld [vmem:[%s9181_s21 + $0x28] sm:$0xff] }
 0x22d   : > { %v3209_v48 = vmax.f32 %v3201_v14, %v3205_v17  ;;  %3835 = vrot.lane.b32.xlu0 %v3809_v49, %s7778_s28  ;;  %v3893_v43 = vpop.permute.xlu1 %3892  ;;  %v4415_v21 = vld [vmem:[#allocation5 + $0x30] sm:$0x1f]  ;;  %4510 = vmatpush1.msra.mxu0 %v9587_v22 }
 0x22e   : > { %3919 = vst.msk [vmem:[#allocation5 + $0x40] sm:$0x1f] %vm3914_vm9, %v3893_v43  ;;  %4485 = vmatmul.mubr.f32.vlgmr.msra.gmra.mxu1 %v4415_v21  ;;  %v4578_v27 = vld [vmem:[#allocation5 + $0x58] sm:$0x1f]  ;;  %4511 = vmatprep.subr.mxu0 %v7777_v23 }
 0x22f   : > { %v3204_v26 = vld [vmem:[#allocation2 + $0x150] sm:$0xff]  ;;  %3214 = vst.msk [vmem:[#allocation3 + $0xa8] sm:$0x3f] %vm642_vm2, %v3209_v48  ;;  %6335 = vmatprep.mubr.msk.f32.mxu1 %vm640_vm3, %v4578_v27  ;;  %4512 = vmatpush1.msra.mxu0 %v9596_v30 }
 0x230   : > { %v3208_v29 = vmax.f32 %v3200_v25, %v3204_v26  ;;  %3980 = vst.msk [vmem:[#allocation5 + $0x40] sm:$0x1f] %vm3975_vm10, %v3954_v63  ;;  %4513 = vmatprep.subr.mxu0 %v7777_v23  ;;  %4583 = vmatpush1.msra.mxu1 %v9548_v5  ;;  %v9685_v26 = vld [vmem:[%s9181_s21 + $0x30] sm:$0xff] }
 0x231   : > { %3957 = vrot.lane.b32.xlu0 %v3931_v31, %s7779_s29  ;;  %4514 = vmatpush1.msra.mxu0 %v9604_v51 }
 0x232   : > { %3213 = vst.msk [vmem:[#allocation3 + $0xa0] sm:$0xff] %vm640_vm3, %v3208_v29  ;;  %4515 = vmatprep.subr.mxu0 %v7777_v23  ;;  %4584 = vmatprep.subr.mxu1 %v7777_v23 }
 0x233   : > { %4516 = vmatpush1.msra.mxu0 %v9610_v8  ;;  %4585 = vmatpush1.msra.mxu1 %v9562_v42 }
 0x234   : > { %4517 = vmatprep.subr.mxu0 %v7777_v23  ;;  %4586 = vmatprep.subr.mxu1 %v7777_v23 }
 0x235   : > { %3714 = vrot.lane.b32.xlu0 %v3687_v44, %s7775_s24  ;;  %4518 = vmatpush1.msra.mxu0 %v9618_v57 }
 0x236   : > { %4519 = vmatprep.subr.mxu0 %v7777_v23  ;;  %v3502_v34 = vld [vmem:[#allocation3 + $0xa8] sm:$0x1]  ;;  %v3516_v33 = vld [vmem:[#allocation3 + $0xa9] sm:$0x1]  ;;  %v3558_v36 = vld [vmem:[#allocation3 + $0xaa] sm:$0x1]  ;;  %4587 = vmatpush1.msra.mxu1 %v9572_v9 }
 0x237   : > { %4520 = vmatpush1.msra.mxu0 %v9277_v16  ;;  %v3530_v37 = vmax.f32 %v3502_v34, %v3516_v33  ;;  %v3572_v38 = vld [vmem:[#allocation3 + $0xab] sm:$0x1]  ;;  %v3614_v41 = vld [vmem:[#allocation3 + $0xac] sm:$0x1]  ;;  %v3628_v52 = vld [vmem:[#allocation3 + $0xad] sm:$0x1]  ;;  %4588 = vmatprep.subr.mxu1 %v7777_v23 }
 0x238   : > { %4521 = vmatprep.subr.mxu0 %v7777_v23  ;;  %v3586_v46 = vmax.f32 %v3558_v36, %v3572_v38  ;;  %v3642_v55 = vmax.f32 %v3614_v41, %v3628_v52  ;;  %4589 = vmatpush1.msra.mxu1 %v9580_v47  ;;  %v3217_v34 = vld [vmem:[#allocation2 + $0x160] sm:$0xff]  ;;  %v9716_v41 = vld [vmem:[%s9181_s21 + $0x8] sm:$0xff] }
 0x239   : > { %v3277_v35 = vld [vmem:[#allocation3 + $0xa0] sm:$0x1]  ;;  %v3291_v54 = vld [vmem:[#allocation3 + $0xa1] sm:$0x1]  ;;  %v3334_v19 = vld [vmem:[#allocation3 + $0xa2] sm:$0x1]  ;;  %3775 = vrot.lane.b32.xlu0 %v3748_v32, %s7776_s27  ;;  %4522 = vmatpush1.msra.mxu0 %v9630_v60 }
 0x23a   : > { %v3305_v40 = vmax.f32 %v3277_v35, %v3291_v54  ;;  %v3348_v16 = vld [vmem:[#allocation3 + $0xa3] sm:$0x1]  ;;  %v3390_v56 = vld [vmem:[#allocation3 + $0xa4] sm:$0x1]  ;;  %v3404_v59 = vld [vmem:[#allocation3 + $0xa5] sm:$0x1]  ;;  %4523 = vmatprep.subr.mxu0 %v7777_v23  ;;  %4590 = vmatprep.subr.mxu1 %v7777_v23 }
 0x23b   : > { %3544 = vst.msk [vmem:[#allocation4 + $0x54] sm:$0x1] %vm3309_vm5, %v3530_v37  ;;  %v3362_v61 = vmax.f32 %v3334_v19, %v3348_v16  ;;  %v3418_v62 = vmax.f32 %v3390_v56, %v3404_v59  ;;  %v3446_v28 = vld [vmem:[#allocation3 + $0xa6] sm:$0x1]  ;;  %v3460_v0 = vld [vmem:[#allocation3 + $0xa7] sm:$0x1]  ;;  %v4016_v39 = vpop.permute.xlu1 %4015  ;;  %4524 = vmatpush1.msra.mxu0 %v9639_v6  ;;  %4591 = vmatpush1.msra.mxu1 %v9587_v22 }
 0x23c   : > { %3600 = vst.msk [vmem:[#allocation4 + $0x55] sm:$0x1] %vm3309_vm5, %v3586_v46  ;;  %3656 = vst.msk [vmem:[#allocation4 + $0x56] sm:$0x1] %vm3309_vm5, %v3642_v55  ;;  %v3474_v2 = vmax.f32 %v3446_v28, %v3460_v0  ;;  %4525 = vmatprep.subr.mxu0 %v7777_v23  ;;  %4592 = vmatprep.subr.mxu1 %v7777_v23  ;;  %v9722_v52 = vld [vmem:[%s9181_s21] sm:$0xff]  ;;  %v9729_v35 = vld [vmem:[%s9181_s21 + $0x88] sm:$0xff] }
 0x23d   : > { %3320 = vst.msk [vmem:[#allocation4 + $0x50] sm:$0x1] %vm3309_vm5, %v3305_v40  ;;  %3376 = vst.msk [vmem:[#allocation4 + $0x51] sm:$0x1] %vm3309_vm5, %v3362_v61  ;;  %4526 = vmatpush1.msra.mxu0 %v9650_v10  ;;  %4593 = vmatpush1.msra.mxu1 %v9596_v30  ;;  %v9736_v59 = vld [vmem:[%s9181_s21 + $0x80] sm:$0xff] }
 0x23e   : > { %3432 = vst.msk [vmem:[#allocation4 + $0x52] sm:$0x1] %vm3309_vm5, %v3418_v62  ;;  %3488 = vst.msk [vmem:[#allocation4 + $0x53] sm:$0x1] %vm3309_vm5, %v3474_v2  ;;  %v7526_v1 = vpop.f32.mrf.mxu0  ;;  %4527 = vmatprep.subr.mxu0 %v7777_v23  ;;  %4594 = vmatprep.subr.mxu1 %v7777_v23 }
 0x23f   : > { %4042 = vst.msk [vmem:[#allocation5 + $0x40] sm:$0x1f] %vm4037_vm11, %v4016_v39  ;;  %v2861_v11 = vmul.f32 %v9394_v15, %v7526_v1  ;;  %v4077_v45 = vpop.permute.xlu1 %4076  ;;  %4528 = vmatpush1.msra.mxu0 %v9658_v53  ;;  %4595 = vmatpush1.msra.mxu1 %v9604_v51 }
 0x240   : > { %v2851_v12 = vpop.f32.mrf.mxu0  ;;  %v7557_v58 = vpop.f32.mrf.mxu1  ;;  %4103 = vst.msk [vmem:[#allocation5 + $0x40] sm:$0x1f] %vm4098_vm12, %v4077_v45  ;;  %4529 = vmatprep.subr.mxu0 %v7777_v23  ;;  %4596 = vmatprep.subr.mxu1 %v7777_v23 }
 0x241   : > { %v2863_v7 = vadd.f32 %v9399_v24, %v2861_v11  ;;  %v2860_v3 = vmul.f32 %v9394_v15, %v2851_v12  ;;  %v2954_v20 = vmul.f32 %v9394_v15, %v7557_v58  ;;  %4530 = vmatpush1.msra.mxu0 %v9319_v50  ;;  %4597 = vmatpush1.msra.mxu1 %v9610_v8 }
 0x242   : > { %v2944_v14 = vpop.f32.mrf.mxu1  ;;  %4531 = vmatprep.subr.mxu0 %v7777_v23  ;;  %4598 = vmatprep.subr.mxu1 %v7777_v23 }
 0x243   : > { %v2865_v17 = vmax.f32 %v2863_v7, 0.0  ;;  %v2862_v49 = vadd.f32 %v9399_v24, %v2860_v3  ;;  %v2956_v63 = vadd.f32 %v9399_v24, %v2954_v20  ;;  %v2953_v48 = vmul.f32 %v9394_v15, %v2944_v14  ;;  %4532 = vmatpush1.msra.mxu0 %v9330_v4  ;;  %4599 = vmatpush1.msra.mxu1 %v9618_v57 }
 0x244   : > { %4561 = vmatprep.subr.mxu0 %v7777_v23  ;;  %4600 = vmatprep.subr.mxu1 %v7777_v23 }
 0x245   : > { %v3993_v50 = vld [vmem:[#allocation4 + $0x50] sm:$0x1f]  ;;  %2868 = vst.msk [vmem:[#allocation2 + $0x178] sm:$0x1f] %vm821_vm4, %v2865_v17  ;;  %v2864_v21 = vmax.f32 %v2862_v49, 0.0  ;;  %v2958_v25 = vmax.f32 %v2956_v63, 0.0  ;;  %v2955_v15 = vadd.f32 %v9399_v24, %v2953_v48  ;;  %4562 = vmatpush2.msra.mxu0 %v9340_v18  ;;  %4601 = vmatpush1.msra.mxu1 %v9685_v26 }
 0x246   : > { %v3871_v43 = vld [vmem:[#allocation4 + $0x51] sm:$0x1f]  ;;  %4019 = vrot.lane.b32.xlu1 %v3993_v50, %s7781_s15  ;;  %4563 = vmatprep.subr.mxu0 %v7777_v23  ;;  %v3218_v18 = vld [vmem:[#allocation2 + $0x168] sm:$0x3f]  ;;  %v7755_v63 = vld [vmem:[%s8540_s20] ss:$0 sm:$0xff]  ;;  %s10133_s20 = scalar_lea.vmem %s10198_s12, %s7686_s19 }
 0x247   : > { %3898 = vrot.lane.b32.xlu0 %v3871_v43, %s7780_s14  ;;  %v4115_v4 = vld [vmem:[#allocation4 + $0x52] sm:$0x1f]  ;;  %2867 = vst.msk [vmem:[#allocation2 + $0x170] sm:$0xff] %vm640_vm3, %v2864_v21  ;;  %v2957_v27 = vmax.f32 %v2955_v15, 0.0  ;;  %4602 = vmatprep.subr.mxu1 %v7777_v23  ;;  %v7756_v15 = vld [vmem:[%s8553_s23] ss:$0 sm:$0xff] }
 0x248   : > { %2961 = vst.msk [vmem:[#allocation2 + $0x188] sm:$0x1f] %vm821_vm4, %v2958_v25  ;;  %v4496_v29 = vld [vmem:[#allocation5 + $0x40] sm:$0x1f]  ;;  %4125 = vst.msk [vmem:[#allocation5 + $0x68] sm:$0x1f] %vm821_vm4, %v4115_v4  ;;  %4564 = vmatpush2.msra.mxu0 %v9350_v13  ;;  %4603 = vmatpush1.msra.mxu1 %v9630_v60 }
 0x249   : > { %v3668_v24 = vld [vmem:[#allocation4 + $0x50] sm:$0x1f]  ;;  %2960 = vst.msk [vmem:[#allocation2 + $0x180] sm:$0xff] %vm640_vm3, %v2957_v27  ;;  %4566 = vmatmul.mubr.f32.vlgmr.msra.gmra.mxu0 %v4496_v29  ;;  %4604 = vmatprep.subr.mxu1 %v7777_v23 }
 0x24a   : > { %v4054_v31 = vld [vmem:[#allocation4 + $0x51] sm:$0x1f]  ;;  %3678 = vst.msk [vmem:[#allocation5 + $0x80] sm:$0x1f] %vm821_vm4, %v3668_v24  ;;  %4663 = vmatprep.subr.mxu0 %v7777_v23  ;;  %4605 = vmatpush1.msra.mxu1 %v9639_v6 }
 0x24b   : > { %4080 = vrot.lane.b32.xlu1 %v4054_v31, %s7782_s16  ;;  %4664 = vmatpush1.msra.mxu0 %v9548_v5  ;;  %v3810_v13 = vld [vmem:[#allocation4 + $0x50] sm:$0x1f] }
 0x24c   : > { %v3222_v44 = vld [vmem:[#allocation2 + $0x178] sm:$0x3f]  ;;  %4606 = vmatprep.subr.mxu1 %v7777_v23  ;;  %4665 = vmatprep.subr.mxu0 %v7777_v23  ;;  %v3932_v38 = vld [vmem:[#allocation4 + $0x52] sm:$0x1f] }
 0x24d   : > { %v3226_v32 = vmax.f32 %v3218_v18, %v3222_v44  ;;  %4607 = vmatpush1.msra.mxu1 %v9650_v10  ;;  %4666 = vmatpush1.msra.mxu0 %v9562_v42 }
 0x24e   : > { %v3221_v33 = vld [vmem:[#allocation2 + $0x170] sm:$0xff]  ;;  %4608 = vmatprep.subr.mxu1 %v7777_v23  ;;  %4667 = vmatprep.subr.mxu0 %v7777_v23 }
 0x24f   : > { %3837 = vrot.lane.b32.xlu1 %v3810_v13, %s7778_s28  ;;  %v4659_v36 = vld [vmem:[#allocation5 + $0x68] sm:$0x1f]  ;;  %3231 = vst.msk [vmem:[#allocation3 + $0xb8] sm:$0x3f] %vm642_vm2, %v3226_v32  ;;  %v3225_v37 = vmax.f32 %v3217_v34, %v3221_v33  ;;  %4609 = vmatpush1.msra.mxu1 %v9658_v53 }
 0x250   : > { %6336 = vmatprep.mubr.msk.f32.mxu0 %vm640_vm3, %v4659_v36  ;;  %4610 = vmatprep.subr.mxu1 %v7777_v23  ;;  %v3749_v36 = vld [vmem:[#allocation4 + $0x52] sm:$0x1f] }
 0x251   : > { %3230 = vst.msk [vmem:[#allocation3 + $0xb0] sm:$0xff] %vm640_vm3, %v3225_v37  ;;  %4611 = vmatpush1.msra.mxu1 %v9716_v41  ;;  %4668 = vmatpush1.msra.mxu0 %v9572_v9 }
 0x252   : > { %4612 = vmatprep.subr.mxu1 %v7777_v23  ;;  %4669 = vmatprep.subr.mxu0 %v7777_v23 }
 0x253   : > { %3959 = vrot.lane.b32.xlu1 %v3932_v38, %s7779_s29  ;;  %4613 = vmatpush1.msra.mxu1 %v9722_v52 }
 0x254   : > { %4642 = vmatprep.subr.mxu1 %v7777_v23  ;;  %4670 = vmatpush1.msra.mxu0 %v9580_v47 }
 0x255   : > { %4643 = vmatpush2.msra.mxu1 %v9729_v35  ;;  %4671 = vmatprep.subr.mxu0 %v7777_v23 }
 0x256   : > { %v3503_v54 = vld [vmem:[#allocation3 + $0xb8] sm:$0x1]  ;;  %v3517_v19 = vld [vmem:[#allocation3 + $0xb9] sm:$0x1]  ;;  %v3559_v46 = vld [vmem:[#allocation3 + $0xba] sm:$0x1]  ;;  %4644 = vmatprep.subr.mxu1 %v7777_v23  ;;  %4672 = vmatpush1.msra.mxu0 %v9587_v22 }
 0x257   : > { %v3531_v55 = vmax.f32 %v3503_v54, %v3517_v19  ;;  %v3573_v40 = vld [vmem:[#allocation3 + $0xbb] sm:$0x1]  ;;  %v3615_v16 = vld [vmem:[#allocation3 + $0xbc] sm:$0x1]  ;;  %v3629_v56 = vld [vmem:[#allocation3 + $0xbd] sm:$0x1]  ;;  %4645 = vmatpush2.msra.mxu1 %v9736_v59  ;;  %4673 = vmatprep.subr.mxu0 %v7777_v23 }
 0x258   : > { %v3335_v61 = vld [vmem:[#allocation3 + $0xb2] sm:$0x1]  ;;  %v3349_v62 = vld [vmem:[#allocation3 + $0xb3] sm:$0x1]  ;;  %v3391_v28 = vld [vmem:[#allocation3 + $0xb4] sm:$0x1]  ;;  %v3587_v0 = vmax.f32 %v3559_v46, %v3573_v40  ;;  %v3711_v2 = vpop.permute.xlu0 %3710  ;;  %v3643_v39 = vmax.f32 %v3615_v16, %v3629_v56  ;;  %4674 = vmatpush1.msra.mxu0 %v9596_v30  ;;  %4744 = vmatprep.subr.mxu1 %v7777_v23 }
 0x259   : > { %v3363_v1 = vmax.f32 %v3335_v61, %v3349_v62  ;;  %v3405_v11 = vld [vmem:[#allocation3 + $0xb5] sm:$0x1]  ;;  %v3447_v45 = vld [vmem:[#allocation3 + $0xb6] sm:$0x1]  ;;  %v3461_v12 = vld [vmem:[#allocation3 + $0xb7] sm:$0x1]  ;;  %4675 = vmatprep.subr.mxu0 %v7777_v23 }
 0x25a   : > { %3545 = vst.msk [vmem:[#allocation4 + $0x5c] sm:$0x1] %vm3309_vm5, %v3531_v55  ;;  %v3419_v58 = vmax.f32 %v3391_v28, %v3405_v11  ;;  %v3475_v7 = vmax.f32 %v3447_v45, %v3461_v12  ;;  %3601 = vst.msk [vmem:[#allocation4 + $0x5d] sm:$0x1] %vm3309_vm5, %v3587_v0  ;;  %v3278_v3 = vld [vmem:[#allocation3 + $0xb0] sm:$0x1]  ;;  %4676 = vmatpush1.msra.mxu0 %v9604_v51 }
 0x25b   : > { %3736 = vst.msk [vmem:[#allocation5 + $0x50] sm:$0x1f] %vm3730_vm6, %v3711_v2  ;;  %v3292_v20 = vld [vmem:[#allocation3 + $0xb1] sm:$0x1]  ;;  %4677 = vmatprep.subr.mxu0 %v7777_v23  ;;  %v3257_v40 = vld [vmem:[#allocation2 + $0x1b8] sm:$0x3f] }
 0x25c   : > { %3657 = vst.msk [vmem:[#allocation4 + $0x5e] sm:$0x1] %vm3309_vm5, %v3643_v39  ;;  %3377 = vst.msk [vmem:[#allocation4 + $0x59] sm:$0x1] %vm3309_vm5, %v3363_v1  ;;  %v3306_v14 = vmax.f32 %v3278_v3, %v3292_v20  ;;  %v3772_v17 = vpop.permute.xlu0 %3771  ;;  %4678 = vmatpush1.msra.mxu0 %v9610_v8  ;;  %v3688_v54 = vld [vmem:[#allocation4 + $0x51] sm:$0x1f] }
 0x25d   : > { %3433 = vst.msk [vmem:[#allocation4 + $0x5a] sm:$0x1] %vm3309_vm5, %v3419_v58  ;;  %3489 = vst.msk [vmem:[#allocation4 + $0x5b] sm:$0x1] %vm3309_vm5, %v3475_v7  ;;  %4679 = vmatprep.subr.mxu0 %v7777_v23  ;;  %v3235_v16 = vld [vmem:[#allocation2 + $0x188] sm:$0x3f] }
 0x25e   : > { %3321 = vst.msk [vmem:[#allocation4 + $0x58] sm:$0x1] %vm3309_vm5, %v3306_v14  ;;  %4680 = vmatpush1.msra.mxu0 %v9618_v57  ;;  %v3256_v28 = vld [vmem:[#allocation2 + $0x1b0] sm:$0xff]  ;;  %v3234_v2 = vld [vmem:[#allocation2 + $0x180] sm:$0xff] }
 0x25f   : > { %3797 = vst.msk [vmem:[#allocation5 + $0x50] sm:$0x1f] %vm3791_vm7, %v3772_v17  ;;  %4681 = vmatprep.subr.mxu0 %v7777_v23 }
 0x260   : > { %4682 = vmatpush1.msra.mxu0 %v9685_v26 }
 0x261   : > { %v7588_v49 = vpop.f32.mrf.mxu0  ;;  %4683 = vmatprep.subr.mxu0 %v7777_v23  ;;  %v7619_v50 = vpop.f32.mrf.mxu1 }
 0x262   : > { %v3047_v48 = vmul.f32 %v7755_v63, %v7588_v49  ;;  %4684 = vmatpush1.msra.mxu0 %v9630_v60  ;;  %v3140_v25 = vmul.f32 %v7755_v63, %v7619_v50 }
 0x263   : > { %v3037_v43 = vpop.f32.mrf.mxu0  ;;  %4685 = vmatprep.subr.mxu0 %v7777_v23  ;;  %v3130_v24 = vpop.f32.mrf.mxu1 }
 0x264   : > { %v4055_v21 = vld [vmem:[#allocation4 + $0x59] sm:$0x1f]  ;;  %v3049_v4 = vadd.f32 %v7756_v15, %v3047_v48  ;;  %v3046_v27 = vmul.f32 %v7755_v63, %v3037_v43  ;;  %4686 = vmatpush1.msra.mxu0 %v9639_v6  ;;  %v3142_v31 = vadd.f32 %v7756_v15, %v3140_v25  ;;  %v3139_v18 = vmul.f32 %v7755_v63, %v3130_v24 }
 0x265   : > { %4082 = vrot.lane.b32.xlu1 %v4055_v21, %s7782_s16  ;;  %v3994_v29 = vld [vmem:[#allocation4 + $0x58] sm:$0x1f]  ;;  %4687 = vmatprep.subr.mxu0 %v7777_v23 }
 0x266   : > { %4021 = vrot.lane.b32.xlu0 %v3994_v29, %s7781_s15  ;;  %v4116_v44 = vld [vmem:[#allocation4 + $0x5a] sm:$0x1f]  ;;  %v3051_v32 = vmax.f32 %v3049_v4, 0.0  ;;  %v3048_v34 = vadd.f32 %v7756_v15, %v3046_v27  ;;  %4688 = vmatpush1.msra.mxu0 %v9650_v10  ;;  %v3144_v33 = vmax.f32 %v3142_v31, 0.0  ;;  %v3141_v37 = vadd.f32 %v7756_v15, %v3139_v18 }
 0x267   : > { %v3669_v13 = vld [vmem:[#allocation4 + $0x58] sm:$0x1f]  ;;  %4126 = vst.msk [vmem:[#allocation5 + $0x78] sm:$0x1f] %vm821_vm4, %v4116_v44  ;;  %4689 = vmatprep.subr.mxu0 %v7777_v23 }
 0x268   : > { %3679 = vst.msk [vmem:[#allocation5 + $0x90] sm:$0x1f] %vm821_vm4, %v3669_v13  ;;  %3054 = vst.msk [vmem:[#allocation2 + $0x198] sm:$0x1f] %vm821_vm4, %v3051_v32  ;;  %v3050_v38 = vmax.f32 %v3048_v34, 0.0  ;;  %4690 = vmatpush1.msra.mxu0 %v9658_v53  ;;  %v3143_v19 = vmax.f32 %v3141_v37, 0.0 }
 0x269   : > { %3777 = vrot.lane.b32.xlu1 %v3749_v36, %s7776_s27  ;;  %3147 = vst.msk [vmem:[#allocation2 + $0x1a8] sm:$0x1f] %vm821_vm4, %v3144_v33  ;;  %4691 = vmatprep.subr.mxu0 %v7777_v23  ;;  %v3872_v46 = vld [vmem:[#allocation4 + $0x59] sm:$0x1f] }
 0x26a   : > { %3716 = vrot.lane.b32.xlu0 %v3688_v54, %s7775_s24  ;;  %3053 = vst.msk [vmem:[#allocation2 + $0x190] sm:$0xff] %vm640_vm3, %v3050_v38  ;;  %4692 = vmatpush1.msra.mxu0 %v9716_v41  ;;  %3146 = vst.msk [vmem:[#allocation2 + $0x1a0] sm:$0xff] %vm640_vm3, %v3143_v19  ;;  %v3811_v55 = vld [vmem:[#allocation4 + $0x58] sm:$0x1f] }
 0x26b   : > { %4693 = vmatprep.subr.mxu0 %v7777_v23  ;;  %v3933_v0 = vld [vmem:[#allocation4 + $0x5a] sm:$0x1f] }
 0x26c   : > { %4694 = vmatpush1.msra.mxu0 %v9722_v52  ;;  %v3689_v58 = vld [vmem:[#allocation4 + $0x59] sm:$0x1f] }
 0x26d   : > { %3900 = vrot.lane.b32.xlu1 %v3872_v46, %s7780_s14  ;;  %4723 = vmatprep.subr.mxu0 %v7777_v23  ;;  %v3750_v20 = vld [vmem:[#allocation4 + $0x5a] sm:$0x1f] }
 0x26e   : > { %3839 = vrot.lane.b32.xlu0 %v3811_v55, %s7778_s28  ;;  %4724 = vmatpush2.msra.mxu0 %v9729_v35 }
 0x26f   : > { %v3239_v56 = vld [vmem:[#allocation2 + $0x198] sm:$0x3f]  ;;  %4725 = vmatprep.subr.mxu0 %v7777_v23 }
 0x270   : > { %v3243_v61 = vmax.f32 %v3235_v16, %v3239_v56  ;;  %v3252_v62 = vld [vmem:[#allocation2 + $0x1a8] sm:$0x3f]  ;;  %4726 = vmatpush2.msra.mxu0 %v9736_v59 }
 0x271   : > { %v3238_v39 = vld [vmem:[#allocation2 + $0x190] sm:$0xff]  ;;  %v3261_v1 = vmax.f32 %v3252_v62, %v3257_v40  ;;  %4825 = vmatprep.subr.mxu0 %v7777_v23  ;;  %v3251_v45 = vld [vmem:[#allocation2 + $0x1a0] sm:$0xff] }
 0x272   : > { %3961 = vrot.lane.b32.xlu0 %v3933_v0, %s7779_s29  ;;  %3248 = vst.msk [vmem:[#allocation3 + $0xc8] sm:$0x3f] %vm642_vm2, %v3243_v61  ;;  %v3242_v11 = vmax.f32 %v3234_v2, %v3238_v39  ;;  %v3260_v12 = vmax.f32 %v3251_v45, %v3256_v28 }
 0x273   : > { %3266 = vst.msk [vmem:[#allocation3 + $0xd8] sm:$0x3f] %vm642_vm2, %v3261_v1 }
 0x274   : > { %3247 = vst.msk [vmem:[#allocation3 + $0xc0] sm:$0xff] %vm640_vm3, %v3242_v11  ;;  %3265 = vst.msk [vmem:[#allocation3 + $0xd0] sm:$0xff] %vm640_vm3, %v3260_v12 }
 0x276   : > { %3718 = vrot.lane.b32.xlu0 %v3689_v58, %s7775_s24  ;;  %s618_s24 = scalar_lea.vmem %s10194_s8, %s10201_s26 }
 0x277   : > { %v3834_v7 = vpop.permute.xlu1 %3833 }
 0x278   : > { %v3895_v3 = vpop.permute.xlu0 %3894  ;;  %3859 = vst.msk [vmem:[#allocation5 + $0x50] sm:$0x1f] %vm3853_vm8, %v3834_v7 }
 0x279   : > { %v3504_v14 = vld [vmem:[#allocation3 + $0xc8] sm:$0x1]  ;;  %v3518_v17 = vld [vmem:[#allocation3 + $0xc9] sm:$0x1]  ;;  %v3560_v49 = vld [vmem:[#allocation3 + $0xca] sm:$0x1] }
 0x27a   : > { %3779 = vrot.lane.b32.xlu0 %v3750_v20, %s7776_s27  ;;  %3920 = vst.msk [vmem:[#allocation5 + $0x50] sm:$0x1f] %vm3914_vm9, %v3895_v3  ;;  %v3532_v63 = vmax.f32 %v3504_v14, %v3518_v17  ;;  %v3574_v48 = vld [vmem:[#allocation3 + $0xcb] sm:$0x1]  ;;  %v3616_v50 = vld [vmem:[#allocation3 + $0xcc] sm:$0x1]  ;;  %s610_s27 = scalar_lea.vmem %s10192_s6, %s10201_s26 }
 0x27b   : > { %v3630_v43 = vld [vmem:[#allocation3 + $0xcd] sm:$0x1]  ;;  %v3279_v21 = vld [vmem:[#allocation3 + $0xc0] sm:$0x1]  ;;  %v3293_v25 = vld [vmem:[#allocation3 + $0xc1] sm:$0x1]  ;;  %v3588_v4 = vmax.f32 %v3560_v49, %v3574_v48  ;;  %v3956_v27 = vpop.permute.xlu1 %3955 }
 0x27c   : > { %v3336_v15 = vld [vmem:[#allocation3 + $0xc2] sm:$0x1]  ;;  %v3644_v29 = vmax.f32 %v3616_v50, %v3630_v43  ;;  %v3307_v24 = vmax.f32 %v3279_v21, %v3293_v25  ;;  %v3350_v31 = vld [vmem:[#allocation3 + $0xc3] sm:$0x1]  ;;  %v3392_v18 = vld [vmem:[#allocation3 + $0xc4] sm:$0x1] }
 0x27d   : > { %v3406_v44 = vld [vmem:[#allocation3 + $0xc5] sm:$0x1]  ;;  %3546 = vst.msk [vmem:[#allocation4 + $0x64] sm:$0x1] %vm3309_vm5, %v3532_v63  ;;  %v3364_v13 = vmax.f32 %v3336_v15, %v3350_v31  ;;  %v3448_v34 = vld [vmem:[#allocation3 + $0xc6] sm:$0x1] }
 0x27e   : > { %3981 = vst.msk [vmem:[#allocation5 + $0x50] sm:$0x1f] %vm3975_vm10, %v3956_v27  ;;  %v3420_v32 = vmax.f32 %v3392_v18, %v3406_v44  ;;  %v3462_v33 = vld [vmem:[#allocation3 + $0xc7] sm:$0x1]  ;;  %v3280_v36 = vld [vmem:[#allocation3 + $0xd0] sm:$0x1] }
 0x27f   : > { %3602 = vst.msk [vmem:[#allocation4 + $0x65] sm:$0x1] %vm3309_vm5, %v3588_v4  ;;  %3658 = vst.msk [vmem:[#allocation4 + $0x66] sm:$0x1] %vm3309_vm5, %v3644_v29  ;;  %v3476_v37 = vmax.f32 %v3448_v34, %v3462_v33  ;;  %v3294_v38 = vld [vmem:[#allocation3 + $0xd1] sm:$0x1] }
 0x280   : > { %3322 = vst.msk [vmem:[#allocation4 + $0x60] sm:$0x1] %vm3309_vm5, %v3307_v24  ;;  %v3337_v54 = vld [vmem:[#allocation3 + $0xd2] sm:$0x1]  ;;  %v3351_v19 = vld [vmem:[#allocation3 + $0xd3] sm:$0x1]  ;;  %v3308_v46 = vmax.f32 %v3280_v36, %v3294_v38 }
 0x281   : > { %3378 = vst.msk [vmem:[#allocation4 + $0x61] sm:$0x1] %vm3309_vm5, %v3364_v13  ;;  %3434 = vst.msk [vmem:[#allocation4 + $0x62] sm:$0x1] %vm3309_vm5, %v3420_v32  ;;  %v3365_v55 = vmax.f32 %v3337_v54, %v3351_v19  ;;  %v3393_v40 = vld [vmem:[#allocation3 + $0xd4] sm:$0x1] }
 0x282   : > { %v3407_v16 = vld [vmem:[#allocation3 + $0xd5] sm:$0x1]  ;;  %v3449_v56 = vld [vmem:[#allocation3 + $0xd6] sm:$0x1]  ;;  %3490 = vst.msk [vmem:[#allocation4 + $0x63] sm:$0x1] %vm3309_vm5, %v3476_v37 }
 0x283   : > { %v3421_v61 = vmax.f32 %v3393_v40, %v3407_v16  ;;  %v3463_v62 = vld [vmem:[#allocation3 + $0xd7] sm:$0x1]  ;;  %v3505_v28 = vld [vmem:[#allocation3 + $0xd8] sm:$0x1]  ;;  %v3519_v0 = vld [vmem:[#allocation3 + $0xd9] sm:$0x1] }
 0x284   : > { %3323 = vst.msk [vmem:[#allocation4 + $0x68] sm:$0x1] %vm3309_vm5, %v3308_v46  ;;  %3379 = vst.msk [vmem:[#allocation4 + $0x69] sm:$0x1] %vm3309_vm5, %v3365_v55  ;;  %v3477_v2 = vmax.f32 %v3449_v56, %v3463_v62  ;;  %v3533_v39 = vmax.f32 %v3505_v28, %v3519_v0  ;;  %v3561_v1 = vld [vmem:[#allocation3 + $0xda] sm:$0x1] }
 0x285   : > { %v3575_v11 = vld [vmem:[#allocation3 + $0xdb] sm:$0x1]  ;;  %v3617_v45 = vld [vmem:[#allocation3 + $0xdc] sm:$0x1]  ;;  %3435 = vst.msk [vmem:[#allocation4 + $0x6a] sm:$0x1] %vm3309_vm5, %v3421_v61 }
 0x286   : > { %v3589_v12 = vmax.f32 %v3561_v1, %v3575_v11  ;;  %v3631_v58 = vld [vmem:[#allocation3 + $0xdd] sm:$0x1]  ;;  %3491 = vst.msk [vmem:[#allocation4 + $0x6b] sm:$0x1] %vm3309_vm5, %v3477_v2  ;;  %3547 = vst.msk [vmem:[#allocation4 + $0x6c] sm:$0x1] %vm3309_vm5, %v3533_v39 }
 0x287   : > { %v3645_v7 = vmax.f32 %v3617_v45, %v3631_v58  ;;  %v4740_v31 = vld [vmem:[#allocation5 + $0x78] sm:$0x1f]  ;;  %v9839_v18 = vld [vmem:[%s607_s22] ss:$0 sm:$0xff] }
 0x288   : > { %3603 = vst.msk [vmem:[#allocation4 + $0x6d] sm:$0x1] %vm3309_vm5, %v3589_v12  ;;  %v9844_v13 = vld [vmem:[%s610_s27] ss:$0 sm:$0xff]  ;;  %v7757_v12 = vld [vmem:[%s9181_s21 + $0x78] sm:$0xff] }
 0x289   : > { %3659 = vst.msk [vmem:[#allocation4 + $0x6e] sm:$0x1] %vm3309_vm5, %v3645_v7  ;;  %v3995_v3 = vld [vmem:[#allocation4 + $0x60] sm:$0x1f] }
 0x28a   : > { %v3873_v20 = vld [vmem:[#allocation4 + $0x61] sm:$0x1f]  ;;  %4023 = vrot.lane.b32.xlu1 %v3995_v3, %s7781_s15 }
 0x28b   : > { %3902 = vrot.lane.b32.xlu0 %v3873_v20, %s7780_s14  ;;  %v4117_v14 = vld [vmem:[#allocation4 + $0x62] sm:$0x1f]  ;;  %v7758_v20 = vld [vmem:[%s9181_s21 + $0x70] sm:$0xff]  ;;  %s9999_s14 = scalar_lea.vmem %s10193_s7, %s7685_s30 }
 0x28c   : > { %4127 = vst.msk [vmem:[#allocation5 + $0x88] sm:$0x1f] %vm821_vm4, %v4117_v14  ;;  %v4056_v49 = vld [vmem:[#allocation4 + $0x61] sm:$0x1f] }
 0x28d   : > { %v3996_v17 = vld [vmem:[#allocation4 + $0x68] sm:$0x1f]  ;;  %v3812_v48 = vld [vmem:[#allocation4 + $0x60] sm:$0x1f] }
 0x28e   : > { %4084 = vrot.lane.b32.xlu1 %v4056_v49, %s7782_s16  ;;  %v3934_v50 = vld [vmem:[#allocation4 + $0x62] sm:$0x1f] }
 0x28f   : > { %4025 = vrot.lane.b32.xlu0 %v3996_v17, %s7781_s15  ;;  %v4057_v21 = vld [vmem:[#allocation4 + $0x69] sm:$0x1f]  ;;  %s6370_s15 = sshll.u32 %s10201_s26, 8 }
 0x290   : > { %v4118_v63 = vld [vmem:[#allocation4 + $0x6a] sm:$0x1f]  ;;  %s10075_s18 = scalar_lea.vmem %s10196_s10, %s6370_s15 }
 0x291   : > { %4128 = vst.msk [vmem:[#allocation5 + $0x98] sm:$0x1f] %vm821_vm4, %v4118_v63  ;;  %v7759_v17 = vld [vmem:[%s9181_s21 + $0x68] sm:$0xff] }
 0x292   : > { %3841 = vrot.lane.b32.xlu1 %v3812_v48, %s7778_s28  ;;  %v7760_v48 = vld [vmem:[%s9181_s21 + $0x60] sm:$0xff] }
 0x293   : > { %v4821_v0 = vld [vmem:[#allocation5 + $0x88] sm:$0x1f] }
 0x296   : > { %3963 = vrot.lane.b32.xlu1 %v3934_v50, %s7779_s29  ;;  %v4079_v43 = vpop.permute.xlu1 %4078  ;;  %v7761_v50 = vld [vmem:[%s9181_s21 + $0x58] sm:$0xff]  ;;  %s621_s29 = scalar_lea.vmem %s10195_s9, %s10201_s26 }
 0x297   : > { %v4018_v25 = vpop.permute.xlu0 %4017 }
 0x298   : > { %4043 = vst.msk [vmem:[#allocation5 + $0x50] sm:$0x1f] %vm4037_vm11, %v4018_v25  ;;  %v4902_v11 = vld [vmem:[#allocation5 + $0x98] sm:$0x1f] }
 0x299   : > { %4104 = vst.msk [vmem:[#allocation5 + $0x50] sm:$0x1f] %vm4098_vm12, %v4079_v43  ;;  %v7763_v25 = vld [vmem:[%s9181_s21 + $0x48] sm:$0xff] }
 0x29a   : > { %4086 = vrot.lane.b32.xlu1 %v4057_v21, %s7782_s16  ;;  %v3774_v15 = vpop.permute.xlu1 %3773  ;;  %v7762_v21 = vld [vmem:[%s9181_s21 + $0x50] sm:$0xff] }
 0x29b   : > { %v3713_v4 = vpop.permute.xlu0 %3712 }
 0x29c   : > { %3737 = vst.msk [vmem:[#allocation5 + $0x60] sm:$0x1f] %vm3730_vm6, %v3713_v4 }
 0x29d   : > { %3798 = vst.msk [vmem:[#allocation5 + $0x60] sm:$0x1f] %vm3791_vm7, %v3774_v15 }
 0x29e   : > { %v3897_v27 = vpop.permute.xlu1 %3896 }
 0x29f   : > { %v3836_v29 = vpop.permute.xlu0 %3835 }
 0x2a0   : > { %3860 = vst.msk [vmem:[#allocation5 + $0x60] sm:$0x1f] %vm3853_vm8, %v3836_v29  ;;  %v4577_v24 = vld [vmem:[#allocation5 + $0x50] sm:$0x1f] }
 0x2a1   : > { %3921 = vst.msk [vmem:[#allocation5 + $0x60] sm:$0x1f] %vm3914_vm9, %v3897_v27  ;;  %4647 = vmatmul.mubr.f32.vlgmr.msra.gmra.mxu1 %v4577_v24  ;;  %v7764_v27 = vld [vmem:[%s9181_s21 + $0x40] sm:$0xff] }
 0x2a2   : > { %6337 = vmatprep.mubr.msk.f32.mxu1 %vm640_vm3, %v4740_v31  ;;  %4745 = vmatpush1.msra.mxu1 %v9548_v5  ;;  %v7765_v31 = vld [vmem:[%s9181_s21 + $0x38] sm:$0xff] }
 0x2a3   : > { %v3958_v44 = vpop.permute.xlu0 %3957  ;;  %4746 = vmatprep.subr.mxu1 %v7777_v23 }
 0x2a4   : > { %3982 = vst.msk [vmem:[#allocation5 + $0x60] sm:$0x1f] %vm3975_vm10, %v3958_v44  ;;  %4747 = vmatpush1.msra.mxu1 %v9562_v42 }
 0x2a5   : > { %v4232_v32 = vpop.f32.mrf.mxu0  ;;  %4748 = vmatprep.subr.mxu1 %v7777_v23 }
 0x2a6   : > { %v4242_v34 = vmul.f32 %v9839_v18, %v4232_v32  ;;  %4749 = vmatpush1.msra.mxu1 %v9572_v9 }
 0x2a7   : > { %v4234_v33 = vpop.f32.mrf.mxu0  ;;  %v3715_v36 = vpop.permute.xlu0 %3714  ;;  %4750 = vmatprep.subr.mxu1 %v7777_v23 }
 0x2a8   : > { %v4249_v37 = vadd.f32 %v9844_v13, %v4242_v34  ;;  %3738 = vst.msk [vmem:[#allocation5 + $0x70] sm:$0x1f] %vm3730_vm6, %v3715_v36  ;;  %4751 = vmatpush1.msra.mxu1 %v9580_v47 }
 0x2a9   : > { %4752 = vmatprep.subr.mxu1 %v7777_v23 }
 0x2aa   : > { %v4250_v38 = vmax.f32 %v4249_v37, 0.0  ;;  %4753 = vmatpush1.msra.mxu1 %v9587_v22 }
 0x2ab   : > { %v3776_v54 = vpop.permute.xlu0 %3775  ;;  %4754 = vmatprep.subr.mxu1 %v7777_v23 }
 0x2ac   : > { %4251 = vst.msk [vmem:[#allocation6] sm:$0x1f] %vm821_vm4, %v4250_v38  ;;  %4755 = vmatpush1.msra.mxu1 %v9596_v30 }
 0x2ad   : > { %3799 = vst.msk [vmem:[#allocation5 + $0x70] sm:$0x1f] %vm3791_vm7, %v3776_v54  ;;  %4756 = vmatprep.subr.mxu1 %v7777_v23 }
 0x2ae   : > { %4757 = vmatpush1.msra.mxu1 %v9604_v51 }
 0x2af   : > { %4758 = vmatprep.subr.mxu1 %v7777_v23 }
 0x2b0   : > { %4759 = vmatpush1.msra.mxu1 %v9610_v8 }
 0x2b1   : > { %4760 = vmatprep.subr.mxu1 %v7777_v23 }
 0x2b2   : > { %4761 = vmatpush1.msra.mxu1 %v9618_v57 }
 0x2b3   : > { %4762 = vmatprep.subr.mxu1 %v7777_v23 }
 0x2b4   : > { %4763 = vmatpush1.msra.mxu1 %v9685_v26 }
 0x2b5   : > { %4764 = vmatprep.subr.mxu1 %v7777_v23 }
 0x2b6   : > { %4765 = vmatpush1.msra.mxu1 %v9630_v60 }
 0x2b7   : > { %4766 = vmatprep.subr.mxu1 %v7777_v23 }
 0x2b8   : > { %v4020_v19 = vpop.permute.xlu1 %4019  ;;  %4767 = vmatpush1.msra.mxu1 %v9639_v6 }
 0x2b9   : > { %4044 = vst.msk [vmem:[#allocation5 + $0x60] sm:$0x1f] %vm4037_vm11, %v4020_v19  ;;  %4768 = vmatprep.subr.mxu1 %v7777_v23  ;;  %v3899_v40 = vpop.permute.xlu0 %3898 }
 0x2ba   : > { %4769 = vmatpush1.msra.mxu1 %v9650_v10 }
 0x2bb   : > { %4770 = vmatprep.subr.mxu1 %v7777_v23 }
 0x2bc   : > { %4771 = vmatpush1.msra.mxu1 %v9658_v53 }
 0x2bd   : > { %v4081_v46 = vpop.permute.xlu1 %4080  ;;  %4772 = vmatprep.subr.mxu1 %v7777_v23 }
 0x2be   : > { %4105 = vst.msk [vmem:[#allocation5 + $0x60] sm:$0x1f] %vm4098_vm12, %v4081_v46  ;;  %4773 = vmatpush1.msra.mxu1 %v9716_v41  ;;  %v5001_v46 = vld [vmem:[#allocation6 + $0x28] sm:$0x3f] }
 0x2bf   : > { %4774 = vmatprep.subr.mxu1 %v7777_v23 }
 0x2c0   : > { %4775 = vmatpush1.msra.mxu1 %v9722_v52 }
 0x2c1   : > { %v3838_v55 = vpop.permute.xlu1 %3837  ;;  %4804 = vmatprep.subr.mxu1 %v7777_v23 }
 0x2c2   : > { %3861 = vst.msk [vmem:[#allocation5 + $0x70] sm:$0x1f] %vm3853_vm8, %v3838_v55  ;;  %v4324_v16 = vpop.f32.mrf.mxu1  ;;  %4805 = vmatpush2.msra.mxu1 %v9729_v35 }
 0x2c3   : > { %3922 = vst.msk [vmem:[#allocation5 + $0x70] sm:$0x1f] %vm3914_vm9, %v3899_v40  ;;  %v4328_v56 = vmul.f32 %v9839_v18, %v4324_v16  ;;  %4806 = vmatprep.subr.mxu1 %v7777_v23  ;;  %v6341_v16 = vld [vmem:[%s9999_s14 + $0x18] sm:$0xff] }
 0x2c4   : > { %v4326_v28 = vpop.f32.mrf.mxu1  ;;  %4807 = vmatpush2.msra.mxu1 %v9736_v59 }
 0x2c5   : > { %v3960_v61 = vpop.permute.xlu1 %3959  ;;  %v4658_v62 = vld [vmem:[#allocation5 + $0x60] sm:$0x1f]  ;;  %v4329_v2 = vadd.f32 %v9844_v13, %v4328_v56  ;;  %4906 = vmatprep.subr.mxu1 %v7777_v23  ;;  %v6345_v56 = vld [vmem:[%s9999_s14 + $0x28] sm:$0xff] }
 0x2c6   : > { %3983 = vst.msk [vmem:[#allocation5 + $0x70] sm:$0x1f] %vm3975_vm10, %v3960_v61  ;;  %4728 = vmatmul.mubr.f32.vlgmr.msra.gmra.mxu0 %v4658_v62  ;;  %v6340_v61 = vld [vmem:[%s9999_s14 + $0x10] sm:$0xff]  ;;  %v6344_v62 = vld [vmem:[%s9999_s14 + $0x20] sm:$0xff] }
 0x2c7   : > { %6338 = vmatprep.mubr.msk.f32.mxu0 %vm640_vm3, %v4821_v0  ;;  %4826 = vmatpush1.msra.mxu0 %v9548_v5  ;;  %v4330_v39 = vmax.f32 %v4329_v2, 0.0  ;;  %v4981_v5 = vld [vmem:[#allocation6] sm:$0x3f] }
 0x2c8   : > { %4827 = vmatprep.subr.mxu0 %v7777_v23 }
 0x2c9   : > { %4828 = vmatpush1.msra.mxu0 %v9562_v42  ;;  %4332 = vst.msk [vmem:[#allocation6 + $0x8] sm:$0x1f] %vm821_vm4, %v4330_v39 }
 0x2ca   : > { %4829 = vmatprep.subr.mxu0 %v7777_v23 }
 0x2cb   : > { %4830 = vmatpush1.msra.mxu0 %v9572_v9 }
 0x2cc   : > { %4831 = vmatprep.subr.mxu0 %v7777_v23 }
 0x2cd   : > { %4832 = vmatpush1.msra.mxu0 %v9580_v47 }
 0x2ce   : > { %4833 = vmatprep.subr.mxu0 %v7777_v23 }
 0x2cf   : > { %4834 = vmatpush1.msra.mxu0 %v9587_v22 }
 0x2d0   : > { %4835 = vmatprep.subr.mxu0 %v7777_v23  ;;  %v4983_v42 = vld [vmem:[#allocation6 + $0x8] sm:$0x3f] }
 0x2d1   : > { %4836 = vmatpush1.msra.mxu0 %v9596_v30  ;;  %v4985_v1 = vadd.f32 %v4983_v42, %v4981_v5 }
 0x2d2   : > { %4837 = vmatprep.subr.mxu0 %v7777_v23 }
 0x2d3   : > { %4838 = vmatpush1.msra.mxu0 %v9604_v51  ;;  %4987 = vst.msk [vmem:[#allocation7] sm:$0x3f] %vm642_vm2, %v4985_v1 }
 0x2d4   : > { %4839 = vmatprep.subr.mxu0 %v7777_v23 }
 0x2d5   : > { %4840 = vmatpush1.msra.mxu0 %v9610_v8 }
 0x2d6   : > { %4841 = vmatprep.subr.mxu0 %v7777_v23 }
 0x2d7   : > { %4842 = vmatpush1.msra.mxu0 %v9618_v57  ;;  %v4083_v9 = vpop.permute.xlu1 %4082 }
 0x2d8   : > { %4843 = vmatprep.subr.mxu0 %v7777_v23  ;;  %v4022_v47 = vpop.permute.xlu0 %4021 }
 0x2d9   : > { %4844 = vmatpush1.msra.mxu0 %v9685_v26  ;;  %4045 = vst.msk [vmem:[#allocation5 + $0x70] sm:$0x1f] %vm4037_vm11, %v4022_v47 }
 0x2da   : > { %4845 = vmatprep.subr.mxu0 %v7777_v23  ;;  %4106 = vst.msk [vmem:[#allocation5 + $0x70] sm:$0x1f] %vm4098_vm12, %v4083_v9 }
 0x2db   : > { %4846 = vmatpush1.msra.mxu0 %v9630_v60  ;;  %v3778_v22 = vpop.permute.xlu1 %3777 }
 0x2dc   : > { %4847 = vmatprep.subr.mxu0 %v7777_v23  ;;  %v3717_v30 = vpop.permute.xlu0 %3716 }
 0x2dd   : > { %4848 = vmatpush1.msra.mxu0 %v9639_v6  ;;  %3739 = vst.msk [vmem:[#allocation5 + $0x80] sm:$0x1f] %vm3730_vm6, %v3717_v30 }
 0x2de   : > { %4849 = vmatprep.subr.mxu0 %v7777_v23  ;;  %3800 = vst.msk [vmem:[#allocation5 + $0x80] sm:$0x1f] %vm3791_vm7, %v3778_v22 }
 0x2df   : > { %4850 = vmatpush1.msra.mxu0 %v9650_v10  ;;  %v3901_v51 = vpop.permute.xlu1 %3900 }
 0x2e0   : > { %4851 = vmatprep.subr.mxu0 %v7777_v23  ;;  %v3840_v8 = vpop.permute.xlu0 %3839 }
 0x2e1   : > { %4852 = vmatpush1.msra.mxu0 %v9658_v53  ;;  %3862 = vst.msk [vmem:[#allocation5 + $0x80] sm:$0x1f] %vm3853_vm8, %v3840_v8  ;;  %v4739_v57 = vld [vmem:[#allocation5 + $0x70] sm:$0x1f] }
 0x2e2   : > { %4853 = vmatprep.subr.mxu0 %v7777_v23  ;;  %3923 = vst.msk [vmem:[#allocation5 + $0x80] sm:$0x1f] %vm3914_vm9, %v3901_v51  ;;  %4809 = vmatmul.mubr.f32.vlgmr.msra.gmra.mxu1 %v4739_v57  ;;  %v4405_v45 = vpop.f32.mrf.mxu0  ;;  %v5016_v57 = vld [vmem:[#allocation7 + $0x2] sm:$0x1] }
 0x2e3   : > { %4854 = vmatpush1.msra.mxu0 %v9716_v41  ;;  %6339 = vmatprep.mubr.msk.f32.mxu1 %vm640_vm3, %v4902_v11  ;;  %v4409_v58 = vmul.f32 %v9839_v18, %v4405_v45  ;;  %v5018_v11 = vld [vmem:[#allocation7 + $0x3] sm:$0x1]  ;;  %v5178_v45 = vld [vmem:[#allocation7 + $0x4] sm:$0x1] }
 0x2e4   : > { %4907 = vmatpush1.msra.mxu1 %v7757_v12  ;;  %v3962_v7 = vpop.permute.xlu0 %3961  ;;  %4855 = vmatprep.subr.mxu0 %v7777_v23  ;;  %v4407_v3 = vpop.f32.mrf.mxu0  ;;  %v5180_v12 = vld [vmem:[#allocation7 + $0x5] sm:$0x1] }
 0x2e5   : > { %4908 = vmatprep.subr.mxu1 %v7777_v23  ;;  %3984 = vst.msk [vmem:[#allocation5 + $0x80] sm:$0x1f] %vm3975_vm10, %v3962_v7  ;;  %4856 = vmatpush1.msra.mxu0 %v9722_v52  ;;  %v4410_v14 = vadd.f32 %v9844_v13, %v4409_v58 }
 0x2e6   : > { %4909 = vmatpush1.msra.mxu1 %v7758_v20  ;;  %4885 = vmatprep.subr.mxu0 %v7777_v23 }
 0x2e7   : > { %4910 = vmatprep.subr.mxu1 %v7777_v23  ;;  %4886 = vmatpush2.msra.mxu0 %v9729_v35  ;;  %v4411_v49 = vmax.f32 %v4410_v14, 0.0 }
 0x2e8   : > { %4911 = vmatpush1.msra.mxu1 %v7759_v17  ;;  %v3719_v63 = vpop.permute.xlu0 %3718  ;;  %4887 = vmatprep.subr.mxu0 %v7777_v23 }
 0x2e9   : > { %4912 = vmatprep.subr.mxu1 %v7777_v23  ;;  %3740 = vst.msk [vmem:[#allocation5 + $0x90] sm:$0x1f] %vm3730_vm6, %v3719_v63  ;;  %4888 = vmatpush2.msra.mxu0 %v9736_v59 }
 0x2ea   : > { %4913 = vmatpush1.msra.mxu1 %v7760_v48  ;;  %4413 = vst.msk [vmem:[#allocation6 + $0x10] sm:$0x1f] %vm821_vm4, %v4411_v49  ;;  %7634 = vmatprep.subr.mxu0 %v7777_v23 }
 0x2eb   : > { %4914 = vmatprep.subr.mxu1 %v7777_v23 }
 0x2ec   : > { %4915 = vmatpush1.msra.mxu1 %v7761_v50  ;;  %v3780_v43 = vpop.permute.xlu0 %3779  ;;  %v5020_v50 = vadd.f32 %v5018_v11, %v5016_v57 }
 0x2ed   : > { %4916 = vmatprep.subr.mxu1 %v7777_v23  ;;  %3801 = vst.msk [vmem:[#allocation5 + $0x90] sm:$0x1f] %vm3791_vm7, %v3780_v43 }
 0x2ee   : > { %4917 = vmatpush1.msra.mxu1 %v7762_v21  ;;  %v4486_v15 = vpop.f32.mrf.mxu1  ;;  %v5182_v21 = vadd.f32 %v5180_v12, %v5178_v45 }
 0x2ef   : > { %4918 = vmatprep.subr.mxu1 %v7777_v23  ;;  %v4490_v4 = vmul.f32 %v9839_v18, %v4486_v15  ;;  %v5015_v15 = vld [vmem:[%s9999_s14 + $0x8] sm:$0xff] }
 0x2f0   : > { %4919 = vmatpush1.msra.mxu1 %v7763_v25  ;;  %v4488_v29 = vpop.f32.mrf.mxu1 }
 0x2f1   : > { %4920 = vmatprep.subr.mxu1 %v7777_v23  ;;  %v4491_v24 = vadd.f32 %v9844_v13, %v4490_v4  ;;  %v5008_v4 = vld [vmem:[#allocation7] sm:$0x1] }
 0x2f2   : > { %4921 = vmatpush1.msra.mxu1 %v7764_v27  ;;  %v5010_v27 = vld [vmem:[#allocation7 + $0x1] sm:$0x1] }
 0x2f3   : > { %4922 = vmatprep.subr.mxu1 %v7777_v23  ;;  %v4492_v44 = vmax.f32 %v4491_v24, 0.0 }
 0x2f4   : > { %4923 = vmatpush1.msra.mxu1 %v7765_v31 }
 0x2f5   : > { %4924 = vmatprep.subr.mxu1 %v7777_v23  ;;  %4494 = vst.msk [vmem:[#allocation6 + $0x18] sm:$0x1f] %vm821_vm4, %v4492_v44 }
 0x2f6   : > { %4925 = vmatpush1.msra.mxu1 %v9685_v26  ;;  %v4989_v26 = vld [vmem:[#allocation6 + $0x10] sm:$0x3f] }
 0x2f7   : > { %4926 = vmatprep.subr.mxu1 %v7777_v23 }
 0x2f8   : > { %4927 = vmatpush1.msra.mxu1 %v9630_v60 }
 0x2f9   : > { %4928 = vmatprep.subr.mxu1 %v7777_v23 }
 0x2fa   : > { %4929 = vmatpush1.msra.mxu1 %v9639_v6 }
 0x2fb   : > { %4930 = vmatprep.subr.mxu1 %v7777_v23 }
 0x2fc   : > { %v4024_v32 = vpop.permute.xlu1 %4023  ;;  %4931 = vmatpush1.msra.mxu1 %v9650_v10  ;;  %v4991_v34 = vld [vmem:[#allocation6 + $0x18] sm:$0x3f] }
 0x2fd   : > { %4046 = vst.msk [vmem:[#allocation5 + $0x80] sm:$0x1f] %vm4037_vm11, %v4024_v32  ;;  %4932 = vmatprep.subr.mxu1 %v7777_v23  ;;  %v4993_v33 = vadd.f32 %v4991_v34, %v4989_v26  ;;  %v3903_v6 = vpop.permute.xlu0 %3902  ;;  %v5014_v26 = vld [vmem:[%s9999_s14] sm:$0xff]  ;;  %v6351_v34 = vld [vmem:[%s9999_s14 + $0x48] sm:$0xff] }
 0x2fe   : > { %4933 = vmatpush1.msra.mxu1 %v9658_v53 }
 0x2ff   : > { %4934 = vmatprep.subr.mxu1 %v7777_v23  ;;  %4996 = vst.msk [vmem:[#allocation7 + $0x8] sm:$0x3f] %vm642_vm2, %v4993_v33 }
 0x300   : > { %v4085_v60 = vpop.permute.xlu1 %4084  ;;  %4935 = vmatpush1.msra.mxu1 %v9716_v41 }
 0x301   : > { %4107 = vst.msk [vmem:[#allocation5 + $0x80] sm:$0x1f] %vm4098_vm12, %v4085_v60  ;;  %4936 = vmatprep.subr.mxu1 %v7777_v23  ;;  %v4026_v53 = vpop.permute.xlu0 %4025  ;;  %v5012_v60 = vadd.f32 %v5010_v27, %v5008_v4 }
 0x302   : > { %4937 = vmatpush1.msra.mxu1 %v9722_v52 }
 0x303   : > { %4966 = vmatprep.subr.mxu1 %v7777_v23 }
 0x304   : > { %v3842_v10 = vpop.permute.xlu1 %3841  ;;  %4967 = vmatpush2.msra.mxu1 %v9729_v35 }
 0x305   : > { %3863 = vst.msk [vmem:[#allocation5 + $0x90] sm:$0x1f] %vm3853_vm8, %v3842_v10  ;;  %4968 = vmatprep.subr.mxu1 %v7777_v23  ;;  %v6348_v10 = vld [vmem:[%s9999_s14 + $0x38] sm:$0xff] }
 0x306   : > { %3924 = vst.msk [vmem:[#allocation5 + $0x90] sm:$0x1f] %vm3914_vm9, %v3903_v6  ;;  %4969 = vmatpush2.msra.mxu1 %v9736_v59 }
 0x307   : > { %7620 = vmatprep.subr.mxu1 %v7777_v23 }
 0x308   : > { %v3964_v41 = vpop.permute.xlu1 %3963  ;;  %v4820_v36 = vld [vmem:[#allocation5 + $0x80] sm:$0x1f] }
 0x309   : > { %3985 = vst.msk [vmem:[#allocation5 + $0x90] sm:$0x1f] %vm3975_vm10, %v3964_v41  ;;  %4890 = vmatmul.mubr.f32.vlgmr.msra.gmra.mxu0 %v4820_v36  ;;  %v4567_v52 = vpop.f32.mrf.mxu0  ;;  %v6347_v36 = vld [vmem:[%s9999_s14 + $0x30] sm:$0xff] }
 0x30a   : > { %4047 = vst.msk [vmem:[#allocation5 + $0x90] sm:$0x1f] %vm4037_vm11, %v4026_v53  ;;  %v4571_v37 = vmul.f32 %v9839_v18, %v4567_v52  ;;  %7635 = vmatpush3.msra.mxu0 %v6345_v56  ;;  %7638 = vmatprep.mubr.msk.f32.mxu0 %vm7783_vm13, %v7777_v23  ;;  %v6350_v52 = vld [vmem:[%s9999_s14 + $0x40] sm:$0xff] }
 0x30b   : > { %v4569_v38 = vpop.f32.mrf.mxu0  ;;  %7636 = vmatprep.subr.mxu0 %v7777_v23 }
 0x30c   : > { %v4087_v35 = vpop.permute.xlu1 %4086  ;;  %v4572_v59 = vadd.f32 %v9844_v13, %v4571_v37  ;;  %7637 = vmatpush3.msra.mxu0 %v6344_v62 }
 0x30d   : > { %4108 = vst.msk [vmem:[#allocation5 + $0x90] sm:$0x1f] %vm4098_vm12, %v4087_v35  ;;  %7648 = vmatprep.subr.mxu0 %v7777_v23 }
 0x30e   : > { %v4573_v54 = vmax.f32 %v4572_v59, 0.0 }
 0x310   : > { %4575 = vst.msk [vmem:[#allocation6 + $0x20] sm:$0x1f] %vm821_vm4, %v4573_v54 }
 0x314   : > { %v4901_v19 = vld [vmem:[#allocation5 + $0x90] sm:$0x1f] }
 0x315   : > { %4971 = vmatmul.mubr.f32.vlgmr.msra.gmra.mxu1 %v4901_v19 }
 0x316   : > { %7621 = vmatpush3.msra.mxu1 %v6341_v16  ;;  %7624 = vmatprep.mubr.msk.f32.mxu1 %vm7783_vm13, %v7777_v23 }
 0x317   : > { %v4998_v55 = vld [vmem:[#allocation6 + $0x20] sm:$0x3f]  ;;  %7622 = vmatprep.subr.mxu1 %v7777_v23 }
 0x318   : > { %v5003_v40 = vadd.f32 %v5001_v46, %v4998_v55  ;;  %7623 = vmatpush3.msra.mxu1 %v6340_v61 }
 0x319   : > { %7627 = vmatprep.subr.mxu1 %v7777_v23 }
 0x31a   : > { %5006 = vst.msk [vmem:[#allocation7 + $0x10] sm:$0x3f] %vm642_vm2, %v5003_v40 }
 0x321   : > { %v5522_v4 = vld [vmem:[#allocation7 + $0x10] sm:$0x1]  ;;  %v5524_v27 = vld [vmem:[#allocation7 + $0x11] sm:$0x1] }
 0x361   : > { %v4648_v28 = vpop.f32.mrf.mxu1 }
 0x362   : > { %v4652_v0 = vmul.f32 %v9839_v18, %v4648_v28  ;;  %v5264_v28 = vld [vmem:[#allocation7 + $0x8] sm:$0x1] }
 0x363   : > { %v4650_v2 = vpop.f32.mrf.mxu1 }
 0x364   : > { %v4653_v39 = vadd.f32 %v9844_v13, %v4652_v0  ;;  %v5266_v0 = vld [vmem:[#allocation7 + $0x9] sm:$0x1]  ;;  %v5002_v2 = vld [vmem:[#allocation6 + $0x58] sm:$0x3f] }
 0x365   : > { %v5268_v11 = vadd.f32 %v5266_v0, %v5264_v28  ;;  %v5824_v28 = vld [vmem:[%s10075_s18 + $0xd8] sm:$0xff]  ;;  %v5823_v0 = vld [vmem:[%s10075_s18 + $0xd0] sm:$0xff] }
 0x366   : > { %v4654_v5 = vmax.f32 %v4653_v39, 0.0  ;;  %v5350_v39 = vld [vmem:[#allocation7 + $0xa] sm:$0x1] }
 0x368   : > { %4656 = vst.msk [vmem:[#allocation6 + $0x30] sm:$0x1f] %vm821_vm4, %v4654_v5  ;;  %v5352_v5 = vld [vmem:[#allocation7 + $0xb] sm:$0x1] }
 0x369   : > { %v5354_v12 = vadd.f32 %v5352_v5, %v5350_v39  ;;  %v5821_v39 = vld [vmem:[%s10075_s18 + $0xc0] sm:$0xff]  ;;  %v5820_v5 = vld [vmem:[%s10075_s18 + $0xb8] sm:$0xff] }
 0x36f   : > { %v4982_v30 = vld [vmem:[#allocation6 + $0x30] sm:$0x3f] }
 0x386   : > { %v4729_v42 = vpop.f32.mrf.mxu0 }
 0x387   : > { %v4733_v1 = vmul.f32 %v9839_v18, %v4729_v42 }
 0x388   : > { %v4731_v9 = vpop.f32.mrf.mxu0 }
 0x389   : > { %v4734_v47 = vadd.f32 %v9844_v13, %v4733_v1 }
 0x38b   : > { %v4735_v22 = vmax.f32 %v4734_v47, 0.0 }
 0x38d   : > { %4737 = vst.msk [vmem:[#allocation6 + $0x38] sm:$0x1f] %vm821_vm4, %v4735_v22 }
 0x394   : > { %v4984_v51 = vld [vmem:[#allocation6 + $0x38] sm:$0x3f] }
 0x395   : > { %v4986_v8 = vadd.f32 %v4984_v51, %v4982_v30 }
 0x397   : > { %4988 = vst.msk [vmem:[#allocation7 + $0x18] sm:$0x3f] %vm642_vm2, %v4986_v8 }
 0x39e   : > { %v5017_v58 = vld [vmem:[#allocation7 + $0x1a] sm:$0x1]  ;;  %v5019_v7 = vld [vmem:[#allocation7 + $0x1b] sm:$0x1]  ;;  %v5179_v3 = vld [vmem:[#allocation7 + $0x1c] sm:$0x1] }
 0x39f   : > { %v5021_v20 = vadd.f32 %v5019_v7, %v5017_v58  ;;  %v5181_v14 = vld [vmem:[#allocation7 + $0x1d] sm:$0x1]  ;;  %v5009_v17 = vld [vmem:[#allocation7 + $0x18] sm:$0x1]  ;;  %v5011_v49 = vld [vmem:[#allocation7 + $0x19] sm:$0x1] }
 0x3a0   : > { %v5183_v63 = vadd.f32 %v5181_v14, %v5179_v3  ;;  %v5013_v48 = vadd.f32 %v5011_v49, %v5009_v17  ;;  %v6354_v7 = vld [vmem:[%s9999_s14 + $0x58] sm:$0xff] }
 0x3a1   : > { %v5027_v43 = vrot.slane %v5021_v20, 7  ;;  %v5436_v3 = vld [vmem:[#allocation7 + $0xc] sm:$0x1]  ;;  %v5438_v20 = vld [vmem:[#allocation7 + $0xd] sm:$0x1] }
 0x3a2   : > { %v5189_v25 = vrot.slane %v5183_v63, 7  ;;  %v4810_v29 = vpop.f32.mrf.mxu1  ;;  %v5104_v31 = vrot.slane %v5013_v48, 7  ;;  %v6353_v63 = vld [vmem:[%s9999_s14 + $0x50] sm:$0xff]  ;;  %v6357_v48 = vld [vmem:[%s9999_s14 + $0x68] sm:$0xff] }
 0x3a3   : > { %v5029_v24 = vsel %vm5028_vm14, %v5027_v43, %v5020_v50  ;;  %v4814_v44 = vmul.f32 %v9839_v18, %v4810_v29  ;;  %v5440_v50 = vadd.f32 %v5438_v20, %v5436_v3  ;;  %v6360_v43 = vld [vmem:[%s9999_s14 + $0x78] sm:$0xff]  ;;  %v5608_v29 = vld [vmem:[#allocation7 + $0x12] sm:$0x1]  ;;  %v5803_v3 = vld [vmem:[%s10075_s18 + $0x30] sm:$0xff] }
 0x3a4   : > { %7625 = vmatmul.mubr.msk.f32.vlgmr.msra.gmra.mxu1 %vm640_vm3, %v5029_v24  ;;  %v5190_v32 = vsel %vm5028_vm14, %v5189_v25, %v5182_v21  ;;  %v4812_v33 = vpop.f32.mrf.mxu1  ;;  %v5105_v53 = vsel %vm5028_vm14, %v5104_v31, %v5012_v60  ;;  %v6356_v25 = vld [vmem:[%s9999_s14 + $0x60] sm:$0xff]  ;;  %v5828_v31 = vld [vmem:[%s10075_s18 + $0xf8] sm:$0xff]  ;;  %v5802_v20 = vld [vmem:[%s10075_s18 + $0x28] sm:$0xff] }
 0x3a5   : > { %7639 = vmatmul.mubr.msk.f32.vlgmr.msra.gmra.mxu0 %vm640_vm3, %v5190_v32  ;;  %7628 = vmatpush3.msra.mxu1 %v5015_v15  ;;  %v4815_v6 = vadd.f32 %v9844_v13, %v4814_v44  ;;  %v6359_v15 = vld [vmem:[%s9999_s14 + $0x70] sm:$0xff]  ;;  %v5610_v24 = vld [vmem:[#allocation7 + $0x13] sm:$0x1] }
 0x3a6   : > { %7629 = vmatprep.subr.mxu1 %v7777_v23  ;;  %7631 = vmatprep.mubr.msk.f32.mxu1 %vm7783_vm13, %v7777_v23 }
 0x3a7   : > { %7630 = vmatpush3.msra.mxu1 %v5014_v26  ;;  %7649 = vmatpush3.msra.mxu0 %v6351_v34  ;;  %v4816_v41 = vmax.f32 %v4815_v6, 0.0 }
 0x3a8   : > { %7632 = vmatmul.mubr.msk.f32.vlgmr.msra.gmra.mxu1 %vm640_vm3, %v5105_v53  ;;  %7641 = vmatprep.subr.mxu1 %v7777_v23 }
 0x3a9   : > { %7642 = vmatpush3.msra.mxu1 %v6348_v10  ;;  %7650 = vmatprep.subr.mxu0 %v7777_v23  ;;  %4818 = vst.msk [vmem:[#allocation6 + $0x40] sm:$0x1f] %vm821_vm4, %v4816_v41  ;;  %v5526_v41 = vadd.f32 %v5524_v27, %v5522_v4  ;;  %v5922_v4 = vld [vmem:[%s10133_s20 + $0x50] sm:$0xff]  ;;  %v5921_v27 = vld [vmem:[%s10133_s20 + $0x48] sm:$0xff] }
 0x3aa   : > { %7643 = vmatprep.subr.mxu1 %v7777_v23  ;;  %7645 = vmatprep.mubr.msk.f32.mxu1 %vm7783_vm13, %v7777_v23 }
 0x3ab   : > { %7644 = vmatpush3.msra.mxu1 %v6347_v36  ;;  %7651 = vmatpush3.msra.mxu0 %v6350_v52  ;;  %v5612_v52 = vadd.f32 %v5610_v24, %v5608_v29  ;;  %v5920_v29 = vld [vmem:[%s10133_s20 + $0x40] sm:$0xff]  ;;  %v5919_v24 = vld [vmem:[%s10133_s20 + $0x38] sm:$0xff] }
 0x3ac   : > { %7652 = vmatprep.mubr.msk.f32.mxu0 %vm7783_vm13, %v7777_v23  ;;  %7655 = vmatprep.subr.mxu1 %v7777_v23 }
 0x3ad   : > { %7662 = vmatprep.subr.mxu0 %v7777_v23 }
 0x3b0   : > { %v4990_v55 = vld [vmem:[#allocation6 + $0x40] sm:$0x3f] }
 0x3c9   : > { %v4891_v35 = vpop.f32.mrf.mxu0 }
 0x3ca   : > { %v4895_v37 = vmul.f32 %v9839_v18, %v4891_v35 }
 0x3cb   : > { %v4893_v38 = vpop.f32.mrf.mxu0 }
 0x3cc   : > { %v4896_v59 = vadd.f32 %v9844_v13, %v4895_v37  ;;  %v6363_v37 = vld [vmem:[%s9999_s14 + $0x88] sm:$0xff]  ;;  %v5694_v38 = vld [vmem:[#allocation7 + $0x14] sm:$0x1] }
 0x3ce   : > { %v4897_v54 = vmax.f32 %v4896_v59, 0.0  ;;  %v5696_v59 = vld [vmem:[#allocation7 + $0x15] sm:$0x1] }
 0x3d0   : > { %4899 = vst.msk [vmem:[#allocation6 + $0x48] sm:$0x1f] %vm821_vm4, %v4897_v54 }
 0x3d5   : > { %v4972_v19 = vpop.f32.mrf.mxu1 }
 0x3d6   : > { %v4976_v46 = vmul.f32 %v9839_v18, %v4972_v19 }
 0x3d7   : > { %v4992_v40 = vld [vmem:[#allocation6 + $0x48] sm:$0x3f]  ;;  %v4974_v16 = vpop.f32.mrf.mxu1 }
 0x3d8   : > { %v4994_v56 = vadd.f32 %v4992_v40, %v4990_v55  ;;  %v4977_v61 = vadd.f32 %v9844_v13, %v4976_v46  ;;  %v6362_v55 = vld [vmem:[%s9999_s14 + $0x80] sm:$0xff]  ;;  %v5827_v40 = vld [vmem:[%s10075_s18 + $0xf0] sm:$0xff]  ;;  %v5698_v16 = vadd.f32 %v5696_v59, %v5694_v38  ;;  %s6195_s14 = sshll.u32 %s10201_s26, 1 }
 0x3d9   : > { %s630_s30 = scalar_lea.vmem %s10197_s11, %s6195_s14  ;;  %s639_s26 = scalar_lea.vmem %s10199_s13, %s6195_s14 }
 0x3da   : > { %4997 = vst.msk [vmem:[#allocation7 + $0x20] sm:$0x3f] %vm642_vm2, %v4994_v56  ;;  %v4978_v62 = vmax.f32 %v4977_v61, 0.0  ;;  %v5826_v56 = vld [vmem:[%s10075_s18 + $0xe8] sm:$0xff]  ;;  %v5825_v61 = vld [vmem:[%s10075_s18 + $0xe0] sm:$0xff] }
 0x3dc   : > { %4980 = vst.msk [vmem:[#allocation6 + $0x50] sm:$0x1f] %vm821_vm4, %v4978_v62 }
 0x3e1   : > { %v5265_v42 = vld [vmem:[#allocation7 + $0x20] sm:$0x1]  ;;  %v5267_v1 = vld [vmem:[#allocation7 + $0x21] sm:$0x1]  ;;  %v5351_v18 = vld [vmem:[#allocation7 + $0x22] sm:$0x1] }
 0x3e2   : > { %v5269_v9 = vadd.f32 %v5267_v1, %v5265_v42  ;;  %v5353_v47 = vld [vmem:[#allocation7 + $0x23] sm:$0x1]  ;;  %v5437_v22 = vld [vmem:[#allocation7 + $0x24] sm:$0x1]  ;;  %v5439_v30 = vld [vmem:[#allocation7 + $0x25] sm:$0x1] }
 0x3e3   : > { %v4999_v51 = vld [vmem:[#allocation6 + $0x50] sm:$0x3f]  ;;  %v5355_v13 = vadd.f32 %v5353_v47, %v5351_v18  ;;  %v5441_v8 = vadd.f32 %v5439_v30, %v5437_v22  ;;  %v5819_v42 = vld [vmem:[%s10075_s18 + $0xb0] sm:$0xff]  ;;  %v5818_v1 = vld [vmem:[%s10075_s18 + $0xa8] sm:$0xff] }
 0x3e4   : > { %v5004_v57 = vadd.f32 %v5002_v2, %v4999_v51  ;;  %v5275_v45 = vrot.slane %v5269_v9, 7  ;;  %v5822_v2 = vld [vmem:[%s10075_s18 + $0xc8] sm:$0xff]  ;;  %v5817_v18 = vld [vmem:[%s10075_s18 + $0xa0] sm:$0xff]  ;;  %v5816_v9 = vld [vmem:[%s10075_s18 + $0x98] sm:$0xff] }
 0x3e5   : > { %v5361_v58 = vrot.slane %v5355_v13, 7  ;;  %v5447_v17 = vrot.slane %v5441_v8, 7  ;;  %v5815_v47 = vld [vmem:[%s10075_s18 + $0x90] sm:$0xff]  ;;  %v5814_v22 = vld [vmem:[%s10075_s18 + $0x88] sm:$0xff]  ;;  %v5813_v30 = vld [vmem:[%s10075_s18 + $0x80] sm:$0xff] }
 0x3e6   : > { %5007 = vst.msk [vmem:[#allocation7 + $0x28] sm:$0x3f] %vm642_vm2, %v5004_v57  ;;  %v5276_v14 = vsel %vm5028_vm14, %v5275_v45, %v5268_v11  ;;  %v5812_v51 = vld [vmem:[%s10075_s18 + $0x78] sm:$0xff]  ;;  %v5811_v13 = vld [vmem:[%s10075_s18 + $0x70] sm:$0xff]  ;;  %v5810_v8 = vld [vmem:[%s10075_s18 + $0x68] sm:$0xff] }
 0x3e7   : > { %7646 = vmatmul.mubr.msk.f32.vlgmr.msra.gmra.mxu1 %vm640_vm3, %v5276_v14  ;;  %v5362_v49 = vsel %vm5028_vm14, %v5361_v58, %v5354_v12  ;;  %v5448_v21 = vsel %vm5028_vm14, %v5447_v17, %v5440_v50  ;;  %v5809_v57 = vld [vmem:[%s10075_s18 + $0x60] sm:$0xff]  ;;  %v5808_v11 = vld [vmem:[%s10075_s18 + $0x58] sm:$0xff]  ;;  %v5807_v45 = vld [vmem:[%s10075_s18 + $0x50] sm:$0xff] }
 0x3e8   : > { %7653 = vmatmul.mubr.msk.f32.vlgmr.msra.gmra.mxu0 %vm640_vm3, %v5362_v49  ;;  %7656 = vmatpush3.msra.mxu1 %v6354_v7  ;;  %v5806_v12 = vld [vmem:[%s10075_s18 + $0x48] sm:$0xff]  ;;  %v5805_v58 = vld [vmem:[%s10075_s18 + $0x40] sm:$0xff]  ;;  %v5804_v7 = vld [vmem:[%s10075_s18 + $0x38] sm:$0xff] }
 0x3e9   : > { %7657 = vmatprep.subr.mxu1 %v7777_v23  ;;  %7659 = vmatprep.mubr.msk.f32.mxu1 %vm7783_vm13, %v7777_v23  ;;  %v5801_v14 = vld [vmem:[%s10075_s18 + $0x20] sm:$0xff]  ;;  %v5800_v17 = vld [vmem:[%s10075_s18 + $0x18] sm:$0xff]  ;;  %v5799_v49 = vld [vmem:[%s10075_s18 + $0x10] sm:$0xff] }
 0x3ea   : > { %7658 = vmatpush3.msra.mxu1 %v6353_v63  ;;  %7663 = vmatpush3.msra.mxu0 %v6357_v48  ;;  %v5798_v63 = vld [vmem:[%s10075_s18 + $0x8] sm:$0xff]  ;;  %v5797_v48 = vld [vmem:[%s10075_s18] sm:$0xff]  ;;  %v5927_v50 = vld [vmem:[%s10133_s20 + $0x78] sm:$0xff] }
 0x3eb   : > { %7660 = vmatmul.mubr.msk.f32.vlgmr.msra.gmra.mxu1 %vm640_vm3, %v5448_v21  ;;  %7669 = vmatprep.subr.mxu1 %v7777_v23  ;;  %v5925_v21 = vld [vmem:[%s10133_s20 + $0x68] sm:$0xff] }
 0x3ec   : > { %7664 = vmatprep.subr.mxu0 %v7777_v23  ;;  %7670 = vmatpush3.msra.mxu1 %v6360_v43  ;;  %v5926_v43 = vld [vmem:[%s10133_s20 + $0x70] sm:$0xff] }
 0x3ed   : > { %7665 = vmatpush3.msra.mxu0 %v6356_v25  ;;  %7671 = vmatprep.subr.mxu1 %v7777_v23  ;;  %v5523_v44 = vld [vmem:[#allocation7 + $0x28] sm:$0x1]  ;;  %v5525_v32 = vld [vmem:[#allocation7 + $0x29] sm:$0x1]  ;;  %v5609_v26 = vld [vmem:[#allocation7 + $0x2a] sm:$0x1] }
 0x3ee   : > { %7666 = vmatprep.mubr.msk.f32.mxu0 %vm7783_vm13, %v7777_v23  ;;  %7672 = vmatpush3.msra.mxu1 %v6359_v15  ;;  %v5527_v34 = vadd.f32 %v5525_v32, %v5523_v44  ;;  %v5611_v33 = vld [vmem:[#allocation7 + $0x2b] sm:$0x1]  ;;  %v5695_v60 = vld [vmem:[#allocation7 + $0x2c] sm:$0x1]  ;;  %v5697_v6 = vld [vmem:[#allocation7 + $0x2d] sm:$0x1] }
 0x3ef   : > { %7673 = vmatprep.mubr.msk.f32.mxu1 %vm7783_vm13, %v7777_v23  ;;  %7676 = vmatprep.subr.mxu0 %v7777_v23  ;;  %v5613_v10 = vadd.f32 %v5611_v33, %v5609_v26  ;;  %v5699_v53 = vadd.f32 %v5697_v6, %v5695_v60  ;;  %v5924_v25 = vld [vmem:[%s10133_s20 + $0x60] sm:$0xff]  ;;  %v5923_v15 = vld [vmem:[%s10133_s20 + $0x58] sm:$0xff]  ;;  %v5917_v44 = vld [vmem:[%s10133_s20 + $0x28] sm:$0xff] }
 0x3f0   : > { %v5533_v36 = vrot.slane %v5527_v34, 7  ;;  %5841 = vmatprep.subr.mxu1 %v5828_v31  ;;  %v5918_v31 = vld [vmem:[%s10133_s20 + $0x30] sm:$0xff]  ;;  %v5916_v32 = vld [vmem:[%s10133_s20 + $0x20] sm:$0xff]  ;;  %v5915_v26 = vld [vmem:[%s10133_s20 + $0x18] sm:$0xff] }
 0x3f1   : > { %v5619_v35 = vrot.slane %v5613_v10, 7  ;;  %v5705_v19 = vrot.slane %v5699_v53, 7  ;;  %v5914_v34 = vld [vmem:[%s10133_s20 + $0x10] sm:$0xff] }
 0x3f2   : > { %v5534_v54 = vsel %vm5028_vm14, %v5533_v36, %v5526_v41 }
 0x3f3   : > { %7667 = vmatmul.mubr.msk.f32.vlgmr.msra.gmra.mxu0 %vm640_vm3, %v5534_v54  ;;  %v5620_v46 = vsel %vm5028_vm14, %v5619_v35, %v5612_v52  ;;  %v5706_v62 = vsel %vm5028_vm14, %v5705_v19, %v5698_v16 }
 0x3f4   : > { %7674 = vmatmul.mubr.msk.f32.vlgmr.msra.gmra.mxu1 %vm640_vm3, %v5620_v46  ;;  %7677 = vmatpush3.msra.mxu0 %v6363_v37 }
 0x3f5   : > { %7678 = vmatprep.subr.mxu0 %v7777_v23  ;;  %7680 = vmatprep.mubr.msk.f32.mxu0 %vm7783_vm13, %v7777_v23 }
 0x3f6   : > { %7679 = vmatpush3.msra.mxu0 %v6362_v55  ;;  %5842 = vmatpush1.msra.mxu1 %v5827_v40 }
 0x3f7   : > { %7681 = vmatmul.mubr.msk.f32.vlgmr.msra.gmra.mxu0 %vm640_vm3, %v5706_v62  ;;  %5843 = vmatprep.subr.mxu1 %v5826_v56 }
 0x3f8   : > { %5844 = vmatpush1.msra.mxu1 %v5825_v61  ;;  %5905 = vmatprep.mubr.f32.mxu1 %v7777_v23 }
 0x3f9   : > { %5845 = vmatprep.subr.mxu1 %v5824_v28  ;;  %5933 = vmatprep.subr.mxu0 %v7777_v23 }
 0x3fa   : > { %5846 = vmatpush1.msra.mxu1 %v5823_v0  ;;  %5934 = vmatpush1.msra.mxu0 %v5927_v50 }
 0x3fb   : > { %5847 = vmatprep.subr.mxu1 %v5822_v2  ;;  %5935 = vmatprep.subr.mxu0 %v7777_v23 }
 0x3fc   : > { %5848 = vmatpush1.msra.mxu1 %v5821_v39  ;;  %5936 = vmatpush1.msra.mxu0 %v5926_v43  ;;  %v6365_v39 = vld [vmem:[%s618_s24] ss:$0 sm:$0xff] }
 0x3fd   : > { %5849 = vmatprep.subr.mxu1 %v5820_v5  ;;  %5937 = vmatprep.subr.mxu0 %v7777_v23 }
 0x3fe   : > { %5850 = vmatpush1.msra.mxu1 %v5819_v42  ;;  %5938 = vmatpush1.msra.mxu0 %v5925_v21  ;;  %v6366_v42 = vld [vmem:[%s621_s29] ss:$0 sm:$0xff] }
 0x3ff   : > { %5851 = vmatprep.subr.mxu1 %v5818_v1  ;;  %5939 = vmatprep.subr.mxu0 %v7777_v23 }
 0x400   : > { %5852 = vmatpush1.msra.mxu1 %v5817_v18  ;;  %5940 = vmatpush1.msra.mxu0 %v5924_v25 }
 0x401   : > { %5853 = vmatprep.subr.mxu1 %v5816_v9  ;;  %5941 = vmatprep.subr.mxu0 %v7777_v23 }
 0x402   : > { %5854 = vmatpush1.msra.mxu1 %v5815_v47  ;;  %5942 = vmatpush1.msra.mxu0 %v5923_v15 }
 0x403   : > { %5855 = vmatprep.subr.mxu1 %v5814_v22  ;;  %5943 = vmatprep.subr.mxu0 %v7777_v23  ;;  %v5913_v22 = vld [vmem:[%s10133_s20 + $0x8] sm:$0xff] }
 0x404   : > { %5856 = vmatpush1.msra.mxu1 %v5813_v30  ;;  %5944 = vmatpush1.msra.mxu0 %v5922_v4  ;;  %v5912_v30 = vld [vmem:[%s10133_s20] sm:$0xff] }
 0x405   : > { %5857 = vmatprep.subr.mxu1 %v5812_v51  ;;  %5945 = vmatprep.subr.mxu0 %v7777_v23  ;;  %v5928_v51 = vld [vmem:[%s10133_s20 + $0x80] sm:$0xff] }
 0x406   : > { %5858 = vmatpush1.msra.mxu1 %v5811_v13  ;;  %5946 = vmatpush1.msra.mxu0 %v5921_v27  ;;  %v5831_v13 = vlaneseq }
 0x407   : > { %5859 = vmatprep.subr.mxu1 %v5810_v8  ;;  %5947 = vmatprep.subr.mxu0 %v7777_v23 }
 0x408   : > { %5860 = vmatpush1.msra.mxu1 %v5809_v57  ;;  %5948 = vmatpush1.msra.mxu0 %v5920_v29  ;;  %v5832_v8 = vshrl.u32 %v5831_v13, 7 }
 0x409   : > { %5861 = vmatprep.subr.mxu1 %v5808_v11  ;;  %5949 = vmatprep.subr.mxu0 %v7777_v23 }
 0x40a   : > { %5862 = vmatpush1.msra.mxu1 %v5807_v45  ;;  %5950 = vmatpush1.msra.mxu0 %v5919_v24  ;;  %v5837_v57 = vsub.s32 1, %v5832_v8  ;;  %v5833_v11 = vsub.s32 0, %v5832_v8  ;;  %v5829_v45 = vld [vmem:[%s630_s30] sm:$0x3] }
 0x40b   : > { %5863 = vmatprep.subr.mxu1 %v5806_v12  ;;  %5951 = vmatprep.subr.mxu0 %v7777_v23 }
 0x40c   : > { %5864 = vmatpush1.msra.mxu1 %v5805_v58  ;;  %5952 = vmatpush1.msra.mxu0 %v5918_v31  ;;  %v5838_v12 = vrot.slane %v5829_v45, %v5837_v57  ;;  %v5834_v58 = vrot.slane %v5829_v45, %v5833_v11 }
 0x40d   : > { %5865 = vmatprep.subr.mxu1 %v5804_v7  ;;  %5953 = vmatprep.subr.mxu0 %v7777_v23 }
 0x40e   : > { %5866 = vmatpush1.msra.mxu1 %v5803_v3  ;;  %5954 = vmatpush1.msra.mxu0 %v5917_v44 }
 0x40f   : > { %5867 = vmatprep.subr.mxu1 %v5802_v20  ;;  %5955 = vmatprep.subr.mxu0 %v7777_v23 }
 0x410   : > { %5868 = vmatpush1.msra.mxu1 %v5801_v14  ;;  %5956 = vmatpush1.msra.mxu0 %v5916_v32 }
 0x411   : > { %5869 = vmatprep.subr.mxu1 %v5800_v17  ;;  %5957 = vmatprep.subr.mxu0 %v7777_v23 }
 0x412   : > { %5870 = vmatpush1.msra.mxu1 %v5799_v49  ;;  %5958 = vmatpush1.msra.mxu0 %v5915_v26 }
 0x413   : > { %5871 = vmatprep.subr.mxu1 %v5798_v63  ;;  %5959 = vmatprep.subr.mxu0 %v7777_v23 }
 0x414   : > { %5872 = vmatpush1.msra.mxu1 %v5797_v48  ;;  %5960 = vmatpush1.msra.mxu0 %v5914_v34 }
 0x415   : > { %5961 = vmatprep.subr.mxu0 %v7777_v23 }
 0x416   : > { %5962 = vmatpush1.msra.mxu0 %v5913_v22 }
 0x417   : > { %5963 = vmatprep.subr.mxu0 %v7777_v23 }
 0x418   : > { %5964 = vmatpush1.msra.mxu0 %v5912_v30 }
 0x419   : > { %5995 = vmatprep.subr.mxu0 %v7777_v23 }
 0x41a   : > { %5996 = vmatpush2.msra.mxu0 %v5928_v51 }
 0x464   : > { %v5098_v33 = vpop.f32.mrf.mxu1 }
 0x465   : > { %v5259_v60 = vpop.f32.mrf.mxu0 }
 0x466   : > { %v7626_v6 = vpop.f32.mrf.mxu1 }
 0x467   : > { %v7640_v10 = vpop.f32.mrf.mxu0 }
 0x468   : > { %v5174_v53 = vpop.f32.mrf.mxu1 }
 0x469   : > { %v5175_v41 = vadd.f32 %v5174_v53, %v5098_v33 }
 0x46a   : > { %v7633_v36 = vpop.f32.mrf.mxu1 }
 0x46b   : > { %v5263_v52 = vadd.f32 %v5259_v60, %v5175_v41 }
 0x4a7   : > { %v5345_v35 = vpop.f32.mrf.mxu1 }
 0x4a8   : > { %v5431_v37 = vpop.f32.mrf.mxu0  ;;  %v5349_v59 = vadd.f32 %v5345_v35, %v5263_v52 }
 0x4a9   : > { %v7647_v38 = vpop.f32.mrf.mxu1 }
 0x4aa   : > { %v7654_v54 = vpop.f32.mrf.mxu0  ;;  %v5435_v55 = vadd.f32 %v5431_v37, %v5349_v59 }
 0x4ab   : > { %v5517_v19 = vpop.f32.mrf.mxu1 }
 0x4ac   : > { %v5521_v40 = vadd.f32 %v5517_v19, %v5435_v55 }
 0x4ad   : > { %v7661_v46 = vpop.f32.mrf.mxu1 }
 0x4b3   : > { %v5603_v16 = vpop.f32.mrf.mxu0 }
 0x4b4   : > { %v5607_v56 = vadd.f32 %v5603_v16, %v5521_v40  ;;  %v5689_v61 = vpop.f32.mrf.mxu1 }
 0x4b5   : > { %v7668_v62 = vpop.f32.mrf.mxu0 }
 0x4b6   : > { %v5693_v28 = vadd.f32 %v5689_v61, %v5607_v56  ;;  %v7675_v0 = vpop.f32.mrf.mxu1 }
 0x4b7   : > { %v5775_v2 = vpop.f32.mrf.mxu0 }
 0x4b8   : > { %v5779_v5 = vadd.f32 %v5775_v2, %v5693_v28 }
 0x4b9   : > { %v7682_v1 = vpop.f32.mrf.mxu0 }
 0x4ba   : > { %v5787_v18 = vmul.f32 %v6365_v39, %v5779_v5 }
 0x4bc   : > { %v5795_v9 = vadd.f32 %v6366_v42, %v5787_v18 }
 0x4be   : > { %v5796_v47 = vmax.f32 %v5795_v9, 0.0 }
 0x4c0   : > { %5906 = vmatmul.mubr.f32.vlgmr.msra.gmra.mxu1 %v5796_v47 }
 0x580   : > { %v5907_v7 = vpop.f32.mrf.mxu1 }
 0x581   : > { %v5908_v14 = vadd.f32 %v5907_v7, %v5834_v58 }
 0x582   : > { %v5909_v3 = vpop.f32.mrf.mxu1 }
 0x583   : > { %v5910_v20 = vadd.f32 %v5909_v3, %v5838_v12 }
 0x585   : > { %6367 = vmatprep.mubr.msk.f32.mxu0 %vm5929_vm15, %v5910_v20 }
 0x586   : > { %5998 = vmatmul.mubr.f32.vlgmr.msra.gmra.mxu0 %v5908_v14 }
 0x646   : > { %v5999_v23 = vpop.f32.mrf.mxu0 }
 0x647   : > { %6004 = vst.msk [vmem:[%s639_s26] sm:$0x3] %vm6003_vm0, %v5999_v23 }
 0x648   : > { %v6001_v17 = vpop.f32.mrf.mxu0 }
 0x649 PF: > { %s23_s25 = sadd.s32 1, %s7772_s25  }
 0x64a   : > { %p20_p4 = scmp.ge.s32.totalorder %s23_s25, 5  }
 0x64c   :  { %22 = sbr.rel (!%p20_p4) target bundleno = 1 (0x1), region = 226 }

</bundles_post_ra>
